<compile_context>
chip_gen: v5e
topology: v5e:2x2
jax: 0.10.0
libtpu: 0.0.40
codegen_flags: <defaults>
</compile_context>

<pallas_src>
import jax
import jax.numpy as jnp
import numpy as np
from jax.experimental import pallas as pl
from jax.experimental.pallas import tpu as pltpu


# --------------------------------------------------------------------------
# Pallas kernel: one block of images per grid step, everything lane-dense.
# --------------------------------------------------------------------------
def _make_kernel(H):
    def kernel(x_ref,          # (M, WC)      f32   M = B_blk*H image rows
               whead_ref,      # (WC, 3*WC)   bf16  fused 1x1 heads [w1|w2a|w3a]
               bhead_ref,      # (1, 3*WC)    f32
               w2b_ref,        # (WC, WC)     bf16  (1,3) conv, W-banded
               b2b_ref,        # (1, WC)      f32
               w2c_ref,        # (3*WC, WC)   bf16  (3,1) conv, K-packed per kh
               b2c_ref,        # (1, WC)      f32
               w3b_ref,        # (3*WC, WC)   bf16  3x3 conv, K-packed per kh
               b3b_ref,        # (1, WC)      f32
               wo_ref,         # (3*WC, WC)   bf16  outConv 1x1, K-packed per branch
               bo_ref,         # (1, WC)      f32
               o_ref):         # (M, WC)      f32
        M, WC = x_ref.shape
        B = M // H
        bf16 = jnp.bfloat16

        def mm(a16, w_ref):
            # bf16 x bf16 -> f32 accumulation: single MXU pass.
            return jnp.dot(a16, w_ref[...], preferred_element_type=jnp.float32)

        relu = lambda a: jnp.maximum(a, 0.0)

        def ktap_cat(flat16, pad_row16):
            # flat16: (M, WC) bf16; pad_row16: (1, WC) bf16.
            # Returns (M, 3*WC) = [row h-1 | row h | row h+1] per image, with
            # per-image H padding rows (no cross-image mixing).  One K=3*WC
            # matmul then accumulates the three H taps inside the MXU.
            mid = flat16.reshape(B, H, WC)
            padb = jnp.broadcast_to(pad_row16.reshape(1, 1, WC), (B, 1, WC))
            down = jnp.concatenate([padb, mid[:, :H - 1]], axis=1)   # kh = 0 tap
            up = jnp.concatenate([mid[:, 1:], padb], axis=1)         # kh = 2 tap
            return jnp.concatenate([down, mid, up], axis=-1).reshape(M, 3 * WC)

        xf = x_ref[...]                                    # (M, WC) f32
        x16 = xf.astype(bf16)

        # ---- fused branch heads: conv1 | conv2's 1x1 | conv3's 1x1 (one matmul)
        head = mm(x16, whead_ref) + bhead_ref[...]         # (M, 3*WC) f32
        x1 = relu(head[:, :WC])                            # Conv1x1BNRelu
        t = head[:, WC:2 * WC]                             # Conv1x1BN (no relu)
        t3 = head[:, 2 * WC:]                              # Conv1x1BN (no relu)

        # ---- branch 2: Conv(1,3) pad=1 (both dims) -> BN/ReLU -> Conv(3,1) pad=0
        #      -> BN/ReLU.  W taps + W padding are inside the banded weight; the
        #      (1,3) conv's H padding rows equal the constant row relu(b2b). ----
        v16 = relu(mm(t.astype(bf16), w2b_ref) + b2b_ref[...]).astype(bf16)
        pad2 = relu(b2b_ref[...]).astype(bf16)             # (1, WC)
        x2 = relu(mm(ktap_cat(v16, pad2), w2c_ref) + b2c_ref[...])   # (M, WC)

        # ---- branch 3: Conv3x3 pad=1 -> BN -> ReLU (H pad rows are zeros) -----
        pad3 = jnp.zeros((1, WC), bf16)
        x3 = relu(mm(ktap_cat(t3.astype(bf16), pad3), w3b_ref) + b3b_ref[...])

        # ---- outConv: 1x1 over channel-concat [x1,x2,x3] -> ReLU -> + residual
        cat_o = jnp.concatenate(
            [x1.astype(bf16), x2.astype(bf16), x3.astype(bf16)], axis=-1)
        o_ref[...] = relu(mm(cat_o, wo_ref) + bo_ref[...]) + xf      # lane-dense

    return kernel


# --------------------------------------------------------------------------
# Wrapper
# --------------------------------------------------------------------------
def link2net_block(x_nhwc, P, block_images=None):
    N, H, W, C = x_nhwc.shape
    WC = W * C
    assert WC % 128 == 0, "this layout wants W*C to be a multiple of 128 lanes"

    if block_images is None:
        divisors = [b for b in range(1, N + 1) if N % b == 0]
        # target M_blk = B_blk*H in [128, 256]; keep >=2 grid steps (v7x: 2 TCs)
        cand = [b for b in divisors if b * H <= 256 and (N // b) >= 2]
        if not cand:
            cand = [b for b in divisors if b * H <= 256] or [1]
        block_images = max(cand)
    assert N % block_images == 0
    M_blk = block_images * H
    assert M_blk % 8 == 0

    x2d = x_nhwc.reshape(N * H, WC)      # free reshape: merge (N,H) and (W,C)

    def wspec(shape):
        nd = len(shape)
        return pl.BlockSpec(shape, lambda n, nd=nd: (0,) * nd)  # resident weights

    grid_spec = pltpu.PrefetchScalarGridSpec(
        num_scalar_prefetch=0,
        grid=(N // block_images,),
        in_specs=[
            pl.BlockSpec((M_blk, WC), lambda n: (n, 0)),          # image rows
            wspec((WC, 3 * WC)), wspec((1, 3 * WC)),              # fused heads
            wspec((WC, WC)),     wspec((1, WC)),                  # (1,3) conv (banded)
            wspec((3 * WC, WC)), wspec((1, WC)),                  # (3,1) conv, K-packed
            wspec((3 * WC, WC)), wspec((1, WC)),                  # 3x3 conv,  K-packed
            wspec((3 * WC, WC)), wspec((1, WC)),                  # outConv,   K-packed
        ],
        out_specs=pl.BlockSpec((M_blk, WC), lambda n: (n, 0)),
    )

    out2d = pl.pallas_call(
        _make_kernel(H),
        out_shape=jax.ShapeDtypeStruct((N * H, WC), jnp.float32),
        grid_spec=grid_spec,
        compiler_params=pltpu.CompilerParams(
            # image blocks are independent -> let v7x shard them over its 2 TCs
            dimension_semantics=("parallel",),
            vmem_limit_bytes=32 * 1024 * 1024),
    )(x2d, P['whead'], P['bhead'], P['w2b'], P['b2b'], P['w2c'], P['b2c'],
      P['w3b'], P['b3b'], P['wo'], P['bo'])
    return out2d.reshape(N, H, W, C)


# --------------------------------------------------------------------------
# Host-side weight packing: fold Conv+BN (inference mode), quantize to bf16,
# build block-diagonal / W-banded (W*C)-sized matrices, K-pack the H taps.
# --------------------------------------------------------------------------
def _fold_conv_bn(key, cin, cout, kh, kw, eps=1e-5):
    k = jax.random.split(key, 6)
    w = jax.random.normal(k[0], (cout, cin, kh, kw), jnp.float32) / np.sqrt(cin * kh * kw)
    b = 0.1 * jax.random.normal(k[1], (cout,), jnp.float32)
    gamma = 1.0 + 0.1 * jax.random.normal(k[2], (cout,), jnp.float32)
    beta = 0.1 * jax.random.normal(k[3], (cout,), jnp.float32)
    mean = 0.1 * jax.random.normal(k[4], (cout,), jnp.float32)
    var = 1.0 + jnp.abs(jax.random.normal(k[5], (cout,), jnp.float32))
    scale = gamma * jax.lax.rsqrt(var + eps)
    w_eff = w * scale[:, None, None, None]                 # fold BN scale into weight
    b_eff = (b - mean) * scale + beta                      # fold BN shift into bias
    hwio = jnp.transpose(w_eff, (2, 3, 1, 0))              # (kh, kw, cin, cout)
    # Quantize folded weights once so kernel (bf16 MXU) and reference use
    # numerically identical parameters.
    hwio = hwio.astype(jnp.bfloat16).astype(jnp.float32)
    return hwio, b_eff


def _block_diag(wc, W):            # (Cin, Cout) -> (W*Cin, W*Cout): 1x1 conv
    return jnp.kron(jnp.eye(W, dtype=wc.dtype), wc)


def _w_banded(taps, W):            # (kw, Cin, Cout), pad=kw//2 along W -> (W*Cin, W*Cout)
    kwid = taps.shape[0]
    out = None
    for kw in range(kwid):
        d = kw - kwid // 2                              # input col = output col + d
        m = jnp.kron(jnp.eye(W, k=-d, dtype=taps.dtype), taps[kw])
        out = m if out is None else out + m             # missing blocks == zero pad
    return out


def _tile_bias(b, W):              # (C,) -> (1, W*C): lane w*C+c carries b[c]
    return jnp.tile(b, W)[None, :]


def make_params(key, W, C):
    bf16 = jnp.bfloat16
    ks = jax.random.split(key, 7)
    h1,  rb1  = _fold_conv_bn(ks[0], C, C, 1, 1)
    h2a, rb2a = _fold_conv_bn(ks[1], C, C, 1, 1)
    h2b, rb2b = _fold_conv_bn(ks[2], C, C, 1, 3)
    h2c, rb2c = _fold_conv_bn(ks[3], C, C, 3, 1)
    h3a, rb3a = _fold_conv_bn(ks[4], C, C, 1, 1)
    h3b, rb3b = _fold_conv_bn(ks[5], C, C, 3, 3)
    ho,  rbo  = _fold_conv_bn(ks[6], 3 * C, C, 1, 1)

    whead = jnp.concatenate([_block_diag(h1[0, 0], W),
                             _block_diag(h2a[0, 0], W),
                             _block_diag(h3a[0, 0], W)], axis=1).astype(bf16)
    bhead = jnp.concatenate([_tile_bias(rb1, W),
                             _tile_bias(rb2a, W),
                             _tile_bias(rb3a, W)], axis=1)

    w2b = _w_banded(h2b[0], W).astype(bf16)                                   # (1,3)
    # K-packed per-kh matrices, row-block order [kh=0; kh=1; kh=2] to match the
    # kernel's lane-concat [row h-1 | row h | row h+1].
    w2c = jnp.concatenate([_block_diag(h2c[kh, 0], W) for kh in range(3)],
                          axis=0).astype(bf16)                                # (3,1)
    w3b = jnp.concatenate([_w_banded(h3b[kh], W) for kh in range(3)],
                          axis=0).astype(bf16)                                # (3,3)
    wo = jnp.concatenate([_block_diag(ho[0, 0, b * C:(b + 1) * C, :], W)
                          for b in range(3)], axis=0).astype(bf16)            # 1x1, 3C->C

    return dict(
        whead=whead, bhead=bhead,
        w2b=w2b, b2b=_tile_bias(rb2b, W),
        w2c=w2c, b2c=_tile_bias(rb2c, W),
        w3b=w3b, b3b=_tile_bias(rb3b, W),
        wo=wo, bo=_tile_bias(rbo, W),
        # f32 HWIO weights (same bf16-rounded values) + biases for the reference
        hwio_w1=h1, hwio_w2a=h2a, hwio_w2b=h2b, hwio_w2c=h2c,
        hwio_w3a=h3a, hwio_w3b=h3b, hwio_wo=ho,
        rb1=rb1, rb2a=rb2a, rb2b=rb2b, rb2c=rb2c, rb3a=rb3a, rb3b=rb3b, rbo=rbo,
    )


# --------------------------------------------------------------------------
# Pure-JAX reference (independent conv path) for correctness checking
# --------------------------------------------------------------------------
def ref_forward(x, P):
    dn = ('NHWC', 'HWIO', 'NHWC')
    prec = jax.lax.Precision.HIGHEST

    def conv(a, w, pad):
        return jax.lax.conv_general_dilated(a, w, (1, 1), pad,
                                            dimension_numbers=dn, precision=prec)

    relu = lambda a: jnp.maximum(a, 0.0)
    xq = x.astype(jnp.bfloat16).astype(jnp.float32)   # match kernel's bf16 input rounding
    x1 = relu(conv(xq, P['hwio_w1'], [(0, 0), (0, 0)]) + P['rb1'])
    t = conv(xq, P['hwio_w2a'], [(0, 0), (0, 0)]) + P['rb2a']
    u = relu(conv(t, P['hwio_w2b'], [(1, 1), (1, 1)]) + P['rb2b'])
    x2 = relu(conv(u, P['hwio_w2c'], [(0, 0), (0, 0)]) + P['rb2c'])
    t3 = conv(xq, P['hwio_w3a'], [(0, 0), (0, 0)]) + P['rb3a']
    x3 = relu(conv(t3, P['hwio_w3b'], [(1, 1), (1, 1)]) + P['rb3b'])
    cat = jnp.concatenate([x1, x2, x3], axis=-1)
    out = relu(conv(cat, P['hwio_wo'], [(0, 0), (0, 0)]) + P['rbo'])
    return out + x


if __name__ == "__main__":
    # dim=16, spatial 16x16, batch 16 -> W*C = 256 lanes, 8 images per grid
    # step (M = 128 rows per matmul), grid length 2 (balanced on v7x's 2 TCs).
    N, H, W, C = 16, 16, 16, 16
    key = jax.random.PRNGKey(0)
    kx, kp = jax.random.split(key)
    x = jax.random.normal(kx, (N, H, W, C), jnp.float32)   # NHWC view of NCHW input
    P = make_params(kp, W, C)

    out = jax.block_until_ready(link2net_block(x, P))
    ref = jax.block_until_ready(ref_forward(x, P))
    # Kernel runs bf16 matmuls with f32 accumulation against an f32 reference
    # using identical (bf16-rounded) parameters; remaining difference is only
    # intermediate-activation rounding, comfortably below 2e-2.
    np.testing.assert_allclose(np.asarray(out), np.asarray(ref), rtol=2e-2, atol=2e-2)
    print("KERNEL_OK")
</pallas_src>

<mosaic_0001>
module attributes {stable_mosaic.version = 11 : i64} {
  func.func @kernel(%arg0: i32, %arg1: memref<128x256xf32, #tpu.memory_space<vmem>>, %arg2: memref<256x768xbf16, #tpu.memory_space<vmem>>, %arg3: memref<1x768xf32, #tpu.memory_space<vmem>>, %arg4: memref<256x256xbf16, #tpu.memory_space<vmem>>, %arg5: memref<1x256xf32, #tpu.memory_space<vmem>>, %arg6: memref<768x256xbf16, #tpu.memory_space<vmem>>, %arg7: memref<1x256xf32, #tpu.memory_space<vmem>>, %arg8: memref<768x256xbf16, #tpu.memory_space<vmem>>, %arg9: memref<1x256xf32, #tpu.memory_space<vmem>>, %arg10: memref<768x256xbf16, #tpu.memory_space<vmem>>, %arg11: memref<1x256xf32, #tpu.memory_space<vmem>>, %arg12: memref<128x256xf32, #tpu.memory_space<vmem>>) attributes {dimension_semantics = [#tpu.dimension_semantics<parallel>], iteration_bounds = array<i64: 2>, scalar_prefetch = 0 : i64, scratch_operands = 0 : i64, tpu.core_type = #tpu.core_type<tc>, window_params = [{transform_indices = @transform_0, window_bounds = array<i64: 128, 256>}, {pipeline_mode = #tpu.pipeline_mode<synchronous>, transform_indices = @transform_1, window_bounds = array<i64: 256, 768>}, {pipeline_mode = #tpu.pipeline_mode<synchronous>, transform_indices = @transform_2, window_bounds = array<i64: 1, 768>}, {pipeline_mode = #tpu.pipeline_mode<synchronous>, transform_indices = @transform_3, window_bounds = array<i64: 256, 256>}, {pipeline_mode = #tpu.pipeline_mode<synchronous>, transform_indices = @transform_4, window_bounds = array<i64: 1, 256>}, {pipeline_mode = #tpu.pipeline_mode<synchronous>, transform_indices = @transform_5, window_bounds = array<i64: 768, 256>}, {pipeline_mode = #tpu.pipeline_mode<synchronous>, transform_indices = @transform_6, window_bounds = array<i64: 1, 256>}, {pipeline_mode = #tpu.pipeline_mode<synchronous>, transform_indices = @transform_7, window_bounds = array<i64: 768, 256>}, {pipeline_mode = #tpu.pipeline_mode<synchronous>, transform_indices = @transform_8, window_bounds = array<i64: 1, 256>}, {pipeline_mode = #tpu.pipeline_mode<synchronous>, transform_indices = @transform_9, window_bounds = array<i64: 768, 256>}, {pipeline_mode = #tpu.pipeline_mode<synchronous>, transform_indices = @transform_10, window_bounds = array<i64: 1, 256>}, {transform_indices = @transform_11, window_bounds = array<i64: 128, 256>}]} {
    %c0 = arith.constant 0 : index
    %c0_0 = arith.constant 0 : index
    %0 = vector.load %arg1[%c0, %c0_0] : memref<128x256xf32, #tpu.memory_space<vmem>>, vector<128x256xf32>
    %1 = arith.truncf %0 : vector<128x256xf32> to vector<128x256xbf16>
    %c0_1 = arith.constant 0 : index
    %c0_2 = arith.constant 0 : index
    %2 = vector.load %arg2[%c0_1, %c0_2] : memref<256x768xbf16, #tpu.memory_space<vmem>>, vector<256x768xbf16>
    %cst = arith.constant dense<0.000000e+00> : vector<128x768xf32>
    %3 = tpu.matmul %1, %2, %cst {dimension_numbers = #tpu.dot_dimension_numbers<[1], [0], [0], [1], [0, 0, 1, 1], [], []>} : vector<128x256xbf16>, vector<256x768xbf16>, vector<128x768xf32> -> vector<128x768xf32>
    %c0_3 = arith.constant 0 : index
    %c0_4 = arith.constant 0 : index
    %4 = vector.load %arg3[%c0_3, %c0_4] : memref<1x768xf32, #tpu.memory_space<vmem>>, vector<1x768xf32>
    %5 = vector.broadcast %4 : vector<1x768xf32> to vector<128x768xf32>
    %6 = arith.addf %3, %5 : vector<128x768xf32>
    %7 = vector.extract_strided_slice %6 {offsets = [0, 0], sizes = [128, 256], strides = [1, 1]} : vector<128x768xf32> to vector<128x256xf32>
    %cst_5 = arith.constant 0.000000e+00 : f32
    %8 = vector.broadcast %cst_5 : f32 to vector<128x256xf32>
    %9 = arith.maximumf %7, %8 : vector<128x256xf32>
    %10 = vector.extract_strided_slice %6 {offsets = [0, 256], sizes = [128, 256], strides = [1, 1]} : vector<128x768xf32> to vector<128x256xf32>
    %11 = vector.extract_strided_slice %6 {offsets = [0, 512], sizes = [128, 256], strides = [1, 1]} : vector<128x768xf32> to vector<128x256xf32>
    %12 = arith.truncf %10 : vector<128x256xf32> to vector<128x256xbf16>
    %c0_6 = arith.constant 0 : index
    %c0_7 = arith.constant 0 : index
    %13 = vector.load %arg4[%c0_6, %c0_7] : memref<256x256xbf16, #tpu.memory_space<vmem>>, vector<256x256xbf16>
    %cst_8 = arith.constant dense<0.000000e+00> : vector<128x256xf32>
    %14 = tpu.matmul %12, %13, %cst_8 {dimension_numbers = #tpu.dot_dimension_numbers<[1], [0], [0], [1], [0, 0, 1, 1], [], []>} : vector<128x256xbf16>, vector<256x256xbf16>, vector<128x256xf32> -> vector<128x256xf32>
    %c0_9 = arith.constant 0 : index
    %c0_10 = arith.constant 0 : index
    %15 = vector.load %arg5[%c0_9, %c0_10] : memref<1x256xf32, #tpu.memory_space<vmem>>, vector<1x256xf32>
    %16 = vector.broadcast %15 : vector<1x256xf32> to vector<128x256xf32>
    %17 = arith.addf %14, %16 : vector<128x256xf32>
    %cst_11 = arith.constant 0.000000e+00 : f32
    %18 = vector.broadcast %cst_11 : f32 to vector<128x256xf32>
    %19 = arith.maximumf %17, %18 : vector<128x256xf32>
    %20 = arith.truncf %19 : vector<128x256xf32> to vector<128x256xbf16>
    %c0_12 = arith.constant 0 : index
    %c0_13 = arith.constant 0 : index
    %21 = vector.load %arg5[%c0_12, %c0_13] : memref<1x256xf32, #tpu.memory_space<vmem>>, vector<1x256xf32>
    %cst_14 = arith.constant 0.000000e+00 : f32
    %22 = vector.broadcast %cst_14 : f32 to vector<1x256xf32>
    %23 = arith.maximumf %21, %22 : vector<1x256xf32>
    %24 = arith.truncf %23 : vector<1x256xf32> to vector<1x256xbf16>
    %25 = vector.shape_cast %20 : vector<128x256xbf16> to vector<8x16x256xbf16>
    %26 = vector.shape_cast %24 : vector<1x256xbf16> to vector<1x1x256xbf16>
    %27 = vector.shape_cast %26 : vector<1x1x256xbf16> to vector<1x1x256xbf16>
    %28 = vector.broadcast %27 : vector<1x1x256xbf16> to vector<8x1x256xbf16>
    %29 = vector.extract_strided_slice %25 {offsets = [0, 0, 0], sizes = [8, 15, 256], strides = [1, 1, 1]} : vector<8x16x256xbf16> to vector<8x15x256xbf16>
    %30 = tpu.concatenate %28, %29 in 1 : vector<8x1x256xbf16>, vector<8x15x256xbf16> -> vector<8x16x256xbf16>
    %31 = vector.extract_strided_slice %25 {offsets = [0, 1, 0], sizes = [8, 15, 256], strides = [1, 1, 1]} : vector<8x16x256xbf16> to vector<8x15x256xbf16>
    %32 = tpu.concatenate %31, %28 in 1 : vector<8x15x256xbf16>, vector<8x1x256xbf16> -> vector<8x16x256xbf16>
    %33 = tpu.concatenate %30, %25, %32 in 2 : vector<8x16x256xbf16>, vector<8x16x256xbf16>, vector<8x16x256xbf16> -> vector<8x16x768xbf16>
    %34 = vector.shape_cast %33 : vector<8x16x768xbf16> to vector<128x768xbf16>
    %c0_15 = arith.constant 0 : index
    %c0_16 = arith.constant 0 : index
    %35 = vector.load %arg6[%c0_15, %c0_16] : memref<768x256xbf16, #tpu.memory_space<vmem>>, vector<768x256xbf16>
    %cst_17 = arith.constant dense<0.000000e+00> : vector<128x256xf32>
    %36 = tpu.matmul %34, %35, %cst_17 {dimension_numbers = #tpu.dot_dimension_numbers<[1], [0], [0], [1], [0, 0, 1, 1], [], []>} : vector<128x768xbf16>, vector<768x256xbf16>, vector<128x256xf32> -> vector<128x256xf32>
    %c0_18 = arith.constant 0 : index
    %c0_19 = arith.constant 0 : index
    %37 = vector.load %arg7[%c0_18, %c0_19] : memref<1x256xf32, #tpu.memory_space<vmem>>, vector<1x256xf32>
    %38 = vector.broadcast %37 : vector<1x256xf32> to vector<128x256xf32>
    %39 = arith.addf %36, %38 : vector<128x256xf32>
    %cst_20 = arith.constant 0.000000e+00 : f32
    %40 = vector.broadcast %cst_20 : f32 to vector<128x256xf32>
    %41 = arith.maximumf %39, %40 : vector<128x256xf32>
    %cst_21 = arith.constant 0.000000e+00 : bf16
    %42 = vector.broadcast %cst_21 : bf16 to vector<1x256xbf16>
    %43 = arith.truncf %11 : vector<128x256xf32> to vector<128x256xbf16>
    %44 = vector.shape_cast %43 : vector<128x256xbf16> to vector<8x16x256xbf16>
    %45 = vector.shape_cast %42 : vector<1x256xbf16> to vector<1x1x256xbf16>
    %46 = vector.shape_cast %45 : vector<1x1x256xbf16> to vector<1x1x256xbf16>
    %47 = vector.broadcast %46 : vector<1x1x256xbf16> to vector<8x1x256xbf16>
    %48 = vector.extract_strided_slice %44 {offsets = [0, 0, 0], sizes = [8, 15, 256], strides = [1, 1, 1]} : vector<8x16x256xbf16> to vector<8x15x256xbf16>
    %49 = tpu.concatenate %47, %48 in 1 : vector<8x1x256xbf16>, vector<8x15x256xbf16> -> vector<8x16x256xbf16>
    %50 = vector.extract_strided_slice %44 {offsets = [0, 1, 0], sizes = [8, 15, 256], strides = [1, 1, 1]} : vector<8x16x256xbf16> to vector<8x15x256xbf16>
    %51 = tpu.concatenate %50, %47 in 1 : vector<8x15x256xbf16>, vector<8x1x256xbf16> -> vector<8x16x256xbf16>
    %52 = tpu.concatenate %49, %44, %51 in 2 : vector<8x16x256xbf16>, vector<8x16x256xbf16>, vector<8x16x256xbf16> -> vector<8x16x768xbf16>
    %53 = vector.shape_cast %52 : vector<8x16x768xbf16> to vector<128x768xbf16>
    %c0_22 = arith.constant 0 : index
    %c0_23 = arith.constant 0 : index
    %54 = vector.load %arg8[%c0_22, %c0_23] : memref<768x256xbf16, #tpu.memory_space<vmem>>, vector<768x256xbf16>
    %cst_24 = arith.constant dense<0.000000e+00> : vector<128x256xf32>
    %55 = tpu.matmul %53, %54, %cst_24 {dimension_numbers = #tpu.dot_dimension_numbers<[1], [0], [0], [1], [0, 0, 1, 1], [], []>} : vector<128x768xbf16>, vector<768x256xbf16>, vector<128x256xf32> -> vector<128x256xf32>
    %c0_25 = arith.constant 0 : index
    %c0_26 = arith.constant 0 : index
    %56 = vector.load %arg9[%c0_25, %c0_26] : memref<1x256xf32, #tpu.memory_space<vmem>>, vector<1x256xf32>
    %57 = vector.broadcast %56 : vector<1x256xf32> to vector<128x256xf32>
    %58 = arith.addf %55, %57 : vector<128x256xf32>
    %cst_27 = arith.constant 0.000000e+00 : f32
    %59 = vector.broadcast %cst_27 : f32 to vector<128x256xf32>
    %60 = arith.maximumf %58, %59 : vector<128x256xf32>
    %61 = arith.truncf %9 : vector<128x256xf32> to vector<128x256xbf16>
    %62 = arith.truncf %41 : vector<128x256xf32> to vector<128x256xbf16>
    %63 = arith.truncf %60 : vector<128x256xf32> to vector<128x256xbf16>
    %64 = tpu.concatenate %61, %62, %63 in 1 : vector<128x256xbf16>, vector<128x256xbf16>, vector<128x256xbf16> -> vector<128x768xbf16>
    %c0_28 = arith.constant 0 : index
    %c0_29 = arith.constant 0 : index
    %65 = vector.load %arg10[%c0_28, %c0_29] : memref<768x256xbf16, #tpu.memory_space<vmem>>, vector<768x256xbf16>
    %cst_30 = arith.constant dense<0.000000e+00> : vector<128x256xf32>
    %66 = tpu.matmul %64, %65, %cst_30 {dimension_numbers = #tpu.dot_dimension_numbers<[1], [0], [0], [1], [0, 0, 1, 1], [], []>} : vector<128x768xbf16>, vector<768x256xbf16>, vector<128x256xf32> -> vector<128x256xf32>
    %c0_31 = arith.constant 0 : index
    %c0_32 = arith.constant 0 : index
    %67 = vector.load %arg11[%c0_31, %c0_32] : memref<1x256xf32, #tpu.memory_space<vmem>>, vector<1x256xf32>
    %68 = vector.broadcast %67 : vector<1x256xf32> to vector<128x256xf32>
    %69 = arith.addf %66, %68 : vector<128x256xf32>
    %cst_33 = arith.constant 0.000000e+00 : f32
    %70 = vector.broadcast %cst_33 : f32 to vector<128x256xf32>
    %71 = arith.maximumf %69, %70 : vector<128x256xf32>
    %72 = arith.addf %71, %0 : vector<128x256xf32>
    %c0_34 = arith.constant 0 : index
    %c0_35 = arith.constant 0 : index
    %73 = vector.load %arg12[%c0_34, %c0_35] : memref<128x256xf32, #tpu.memory_space<vmem>>, vector<128x256xf32>
    tpu.vector_store %arg12[%c0_34, %c0_35], %72 {strides = array<i32>} : memref<128x256xf32, #tpu.memory_space<vmem>>, vector<128x256xf32>,
    return
  }
  func.func @transform_0(%arg0: i32) -> (i32, i32) {
    %c0_i32 = arith.constant 0 : i32
    %c0_i32_0 = arith.constant 0 : i32
    return %arg0, %c0_i32 : i32, i32
  }
  func.func @transform_1(%arg0: i32) -> (i32, i32) {
    %c0_i32 = arith.constant 0 : i32
    %c0_i32_0 = arith.constant 0 : i32
    %c0_i32_1 = arith.constant 0 : i32
    return %c0_i32, %c0_i32_0 : i32, i32
  }
  func.func @transform_2(%arg0: i32) -> (i32, i32) {
    %c0_i32 = arith.constant 0 : i32
    %c0_i32_0 = arith.constant 0 : i32
    %c0_i32_1 = arith.constant 0 : i32
    return %c0_i32, %c0_i32_0 : i32, i32
  }
  func.func @transform_3(%arg0: i32) -> (i32, i32) {
    %c0_i32 = arith.constant 0 : i32
    %c0_i32_0 = arith.constant 0 : i32
    %c0_i32_1 = arith.constant 0 : i32
    return %c0_i32, %c0_i32_0 : i32, i32
  }
  func.func @transform_4(%arg0: i32) -> (i32, i32) {
    %c0_i32 = arith.constant 0 : i32
    %c0_i32_0 = arith.constant 0 : i32
    %c0_i32_1 = arith.constant 0 : i32
    return %c0_i32, %c0_i32_0 : i32, i32
  }
  func.func @transform_5(%arg0: i32) -> (i32, i32) {
    %c0_i32 = arith.constant 0 : i32
    %c0_i32_0 = arith.constant 0 : i32
    %c0_i32_1 = arith.constant 0 : i32
    return %c0_i32, %c0_i32_0 : i32, i32
  }
  func.func @transform_6(%arg0: i32) -> (i32, i32) {
    %c0_i32 = arith.constant 0 : i32
    %c0_i32_0 = arith.constant 0 : i32
    %c0_i32_1 = arith.constant 0 : i32
    return %c0_i32, %c0_i32_0 : i32, i32
  }
  func.func @transform_7(%arg0: i32) -> (i32, i32) {
    %c0_i32 = arith.constant 0 : i32
    %c0_i32_0 = arith.constant 0 : i32
    %c0_i32_1 = arith.constant 0 : i32
    return %c0_i32, %c0_i32_0 : i32, i32
  }
  func.func @transform_8(%arg0: i32) -> (i32, i32) {
    %c0_i32 = arith.constant 0 : i32
    %c0_i32_0 = arith.constant 0 : i32
    %c0_i32_1 = arith.constant 0 : i32
    return %c0_i32, %c0_i32_0 : i32, i32
  }
  func.func @transform_9(%arg0: i32) -> (i32, i32) {
    %c0_i32 = arith.constant 0 : i32
    %c0_i32_0 = arith.constant 0 : i32
    %c0_i32_1 = arith.constant 0 : i32
    return %c0_i32, %c0_i32_0 : i32, i32
  }
  func.func @transform_10(%arg0: i32) -> (i32, i32) {
    %c0_i32 = arith.constant 0 : i32
    %c0_i32_0 = arith.constant 0 : i32
    %c0_i32_1 = arith.constant 0 : i32
    return %c0_i32, %c0_i32_0 : i32, i32
  }
  func.func @transform_11(%arg0: i32) -> (i32, i32) {
    %c0_i32 = arith.constant 0 : i32
    %c0_i32_0 = arith.constant 0 : i32
    return %arg0, %c0_i32 : i32, i32
  }
}

</mosaic_0001>

<bundles_post_ra>
// kernel: tpu_custom_call.1
= control target key start
LH: loop header
LB: loop body
LE: loop exit
PB: predicated region body
PF: predicated region fallthrough
CT: control target
= control target key end

     0   :  { %s11763_s0 = inlined_call_operand.hbm [shape: f32[256,256], index: 0, kind: input, shape index: {}]   ;;  %s11764_s1 = inlined_call_operand.hbm [shape: bf16[256,768], index: 1, kind: input, shape index: {}]   ;;  %s11765_s2 = inlined_call_operand.hbm [shape: f32[1,768], index: 2, kind: input, shape index: {}]   ;;  %s11766_s3 = inlined_call_operand.hbm [shape: bf16[256,256], index: 3, kind: input, shape index: {}]   ;;  %s11767_s4 = inlined_call_operand.vmem [shape: f32[1,256], index: 4, kind: input, shape index: {}]   ;;  %s11768_s5 = inlined_call_operand.hbm [shape: bf16[768,256], index: 5, kind: input, shape index: {}]   ;;  %s11769_s6 = inlined_call_operand.vmem [shape: f32[1,256], index: 6, kind: input, shape index: {}]   ;;  %s11770_s7 = inlined_call_operand.hbm [shape: bf16[768,256], index: 7, kind: input, shape index: {}]   ;;  %s11771_s8 = inlined_call_operand.vmem [shape: f32[1,256], index: 8, kind: input, shape index: {}]   ;;  %s11772_s9 = inlined_call_operand.hbm [shape: bf16[768,256], index: 9, kind: input, shape index: {}]   ;;  %s11773_s10 = inlined_call_operand.vmem [shape: f32[1,256], index: 10, kind: input, shape index: {}]   ;;  %s11774_s11 = inlined_call_operand.hbm [shape: f32[256,256], index: 11, kind: output, shape index: {}]  }
   0x1   :  { %11885 = sst [smem:[#allocation76_spill]] %s11764_s1 }
   0x2   :  { %11886 = sst [smem:[#allocation77_spill]] %s11765_s2 }
   0x3   :  { %11887 = sst [smem:[#allocation78_spill]] %s11766_s3 }
   0x4   :  { %11888 = sst [smem:[#allocation79_spill]] %s11768_s5 }
   0x5   :  { %11889 = sst [smem:[#allocation80_spill]] %s11773_s10 }
   0x6   :  { %11890 = sst [smem:[#allocation81_spill]] %s11774_s11 }
   0x7   :  { %16 = vsyncpa [#allocation3], 0 }
   0x8   :  { %18 = vsyncpa [#allocation3 + $0x1], 0 }
   0x9   :  { %19 = vsyncpa [#allocation6], 0 }
   0xa   :  { %20 = vsyncpa [#allocation9], 0 }
   0xb   :  { %21 = vsyncpa [#allocation12], 0 }
   0xc   :  { %22 = vsyncpa [#allocation4], 0 }
   0xd   :  { %24 = vsyncpa [#allocation4 + $0x1], 0  ;;  %s9575_s17 = smov 0   ;;  %s9577_s18 = smov 0  }
   0xe   :  { %s9579_s19 = smov 0   ;;  %s9581_s20 = smov 0  }
   0xf LB: > { %s11891_s1 = sld [smem:[#allocation76_spill]]  ;;  %s9599_s24 = sadd.s32 4294967295, %s9499_s20   ;;  %s9499_s20 = sphi %s9581_s20, %s12102_s20   ;;  %s9495_s19 = sphi %s9579_s19, %s12101_s19   ;;  %s9491_s18 = sphi %s9577_s18, %s12100_s18   ;;  %s9487_s17 = sphi %s9575_s17, %s12099_s17  }
  0x10   : > { %p6952_p0 = scmp.ge.s32.totalorder %s9499_s20, 1  ;;  %p51_p1 = scmp.eq.s32.totalorder %s9599_s24, 0 }
  0x11   : > { %p297_p2 = scmp.lt.s32.totalorder %s9499_s20, 3  ;;  %s9501_s26 = smov [#allocation5]  }
  0x12   : > { %s310_s27 = sshll.u32 %s9501_s26, 4  ;;  %s11893_s3 = sld [smem:[#allocation78_spill]]  ;;  %s311_s27 = int_to_ptr.vmem [resolvable:$true] %s310_s27 }
  0x13   : > { %p9604_p3 = pnand %p6952_p0, %p297_p2  ;;  %s9502_s13 = smov [#allocation8]  }
  0x14   : > { %s336_s14 = sshll.u32 %s9502_s13, 4  ;;  %s9503_s15 = smov 384   ;;  %s337_s14 = int_to_ptr.vmem [resolvable:$true] %s336_s14 }
  0x15   : > { %s308_s23 = sshll.u32 %s11891_s1, 4  ;;  %p9091_p4 = pneg %p9604_p3  ;;  %s309_s23 = int_to_ptr.hbm [resolvable:$true] %s308_s23 }
  0x16   : > { %s9504_s16 = smov 24   ;;  %s9505_s21 = smov 128  }
  0x17   : > { %p9616_p6 = pnand %p9091_p4, %p51_p1  ;;  %s9506_s22 = smov 8  }
  0x18   : > { %s334_s30 = sshll.u32 %s11893_s3, 4  ;;  %s368_s29 = sshll.u32 %s11770_s7, 4  ;;  %s335_s30 = int_to_ptr.hbm [resolvable:$true] %s334_s30  ;;  %s369_s29 = int_to_ptr.hbm [resolvable:$true] %s368_s29 }
  0x19   : > { %9094 = dma.hbm_to_vmem [thread:$0]  (!%p9616_p6), %s309_s23, 12288, %s311_s27, [#allocation6], %s9503_s15, %s9503_s15, %s9504_s16  }
  0x1a   : > { %9100 = dma.hbm_to_vmem [thread:$0]  (!%p9616_p6), %s335_s30, 4096, %s337_s14, [#allocation9], %s9505_s21, %s9505_s21, %s9506_s22  }
  0x1b   : > { %s9507_s1 = smov [#allocation11]   ;;  %s11895_s2 = sld [smem:[#allocation77_spill]] }
  0x1c   : > { %s370_s3 = sshll.u32 %s9507_s1, 4  ;;  %s9508_s23 = smov [#allocation7]   ;;  %s371_s3 = int_to_ptr.vmem [resolvable:$true] %s370_s3 }
  0x1d   : > { %9106 = dma.hbm_to_vmem [thread:$0]  (!%p9616_p6), %s369_s29, 12288, %s371_s3, [#allocation12], %s9505_s21, %s9505_s21, %s9506_s22  }
  0x1e   : > { %s325_s27 = sshll.u32 %s9508_s23, 4  ;;  %s11896_s5 = sld [smem:[#allocation79_spill]]  ;;  %s326_s27 = int_to_ptr.vmem [resolvable:$true] %s325_s27 }
  0x1f   : > { %s385_s3 = sshll.u32 %s11772_s9, 4  ;;  %s9509_s16 = smov [#allocation10]   ;;  %s386_s3 = int_to_ptr.hbm [resolvable:$true] %s385_s3 }
  0x20   : > { %s353_s26 = sshll.u32 %s9509_s16, 4  ;;  %s9510_s28 = smov [#allocation13]   ;;  %s354_s26 = int_to_ptr.vmem [resolvable:$true] %s353_s26 }
  0x21   : > { %s323_s10 = sshll.u32 %s11895_s2, 4  ;;  %s6951_s29 = sadd.s32 4294967294, %s9499_s20   ;;  %s324_s10 = int_to_ptr.hbm [resolvable:$true] %s323_s10 }
  0x22   : > { %9097 = dma.hbm_to_vmem [thread:$0]  (!%p9616_p6), %s324_s10, 96, %s326_s27, [#allocation6]  }
  0x23   : > { %s387_s10 = sshll.u32 %s9510_s28, 4  ;;  %s9646_s13 = sadd.s32 1, %s9499_s20   ;;  %s388_s10 = int_to_ptr.vmem [resolvable:$true] %s387_s10 }
  0x24   : > { %s351_s15 = sshll.u32 %s11896_s5, 4  ;;  %s34_s23 = ssub.s32 %s9499_s20, %s9646_s13  ;;  %s352_s15 = int_to_ptr.hbm [resolvable:$true] %s351_s15 }
  0x25   : > { %9103 = dma.hbm_to_vmem [thread:$0]  (!%p9616_p6), %s352_s15, 12288, %s354_s26, [#allocation9], %s9505_s21, %s9505_s21, %s9506_s22  }
  0x26   : > { %9109 = dma.hbm_to_vmem [thread:$0]  (!%p9616_p6), %s386_s3, 12288, %s388_s10, [#allocation12], %s9505_s21, %s9505_s21, %s9506_s22  }
  0x27   : > { %s37_s27 = sadd.s32 1, %s9495_s19  ;;  %p35_p7 = scmp.eq.s32.totalorder %s34_s23, 0 }
  0x28   : > { %p44_p8 = scmp.ne.s32.totalorder %s9495_s19, %s9491_s18  ;;  %p45_p9 = scmp.eq.s32.totalorder %s9499_s20, 0 }
  0x29   : > { %p50_p10 = scmp.ne.s32.totalorder %s9491_s18, %s9487_s17  ;;  %p284_p13 = scmp.eq.s32.totalorder %s9599_s24, 1 }
  0x2a   : > { %s9657_s30 = scalar_select %p35_p7, %s9495_s19, %s37_s27  }
  0x2b   : > { %p9659_p11 = por %p45_p9, %p44_p8  ;;  %p9665_p12 = por %p51_p1, %p50_p10 }
  0x2c   : > { %p290_p0 = scmp.eq.s32.totalorder %s6951_s29, 1  ;;  %p9124_p2 = scmp.lt.s32.totalorder %s9499_s20, 2 }
  0x2d   : > { %s404_s21 = sand.u32 1, %s9495_s19   ;;  %p9672_p4 = por %p284_p13, %p44_p8 }
  0x2e   : > { %p9676_p6 = por %p290_p0, %p50_p10  ;;  %s6960_s1 = sshll.u32 %s404_s21, 8 }
  0x2f   : > { %s8644_s11 = sshll.u32 %s9499_s20, 8  ;;  %s408_s28 = scalar_lea.vmem [#allocation2], %s6960_s1 }
  0x30   : > { %s414_s26 = scalar_lea.hbm %s11763_s0, %s8644_s11  ;;  %s417_s10 = sshll.u32 %s408_s28, 4  ;;  %s418_s10 = int_to_ptr.vmem [resolvable:$true] %s417_s10 }
  0x31   : > { %s415_s23 = sshll.u32 %s414_s26, 4  ;;  %p9686_p7 = pnand %p9124_p2, %p9659_p11  ;;  %s416_s23 = int_to_ptr.hbm [resolvable:$true] %s415_s23 }
  0x32   : > { %s405_s27 = scalar_lea.sflag [#allocation3], %s404_s21  ;;  %s9391_s2 = sshra.s32 %s416_s23, 4  ;;  %s9392_s2 = int_to_ptr.hbm [resolvable:$true] %s9391_s2 }
  0x33   : > { %s9393_s5 = scalar_lea.hbm %s9392_s2, 256  ;;  %p9395_p9 = pneg %p9686_p7 }
  0x34   : > { %p9394_p8 = scmp.ne.s32.totalorder %s9392_s2, %s9393_s5  ;;  %s9398_s3 = scalar_lea.hbm %s11763_s0, 512 }
  0x35   : > { %p9399_p11 = scmp.lt.s32.totalorder %s9392_s2, %s11763_s0  ;;  %p9400_p0 = scmp.lt.s32.totalorder %s9398_s3, %s9393_s5 }
  0x36   : > { %p9396_p10 = pnand %p9395_p9, %p9394_p8 }
  0x37   : > { %p9401_p2 = por %p9400_p0, %p9399_p11 }
  0x38   : > { %p9397_p13 = pneg %p9396_p10 }
  0x3a   : > { %p9402_p5 = pnand %p9401_p2, %p9397_p13 }
  0x3c   : > { %9405 = shalt.err (!%p9402_p5)
}
  0x3d   : > { %s9511_s21 = smov 256   ;;  %s9512_s26 = smov 16  }
  0x3e   : > { %9113 = dma.hbm_to_vmem [thread:$0]  (!%p9686_p7), %s416_s23, 4096, %s418_s10, %s405_s27, %s9511_s21, %s9511_s21, %s9512_s26  }
  0x3f   : > { %429 = sbr.rel (%p9604_p3) target bundleno = 1943 (0x797), region = 64 }
  0x44   : > { %s9703_s28 = sand.u32 1, %s9491_s18  }
  0x45   : > { %s6965_s2 = sshll.u32 %s9703_s28, 8  ;;  %s432_s5 = scalar_lea.sflag [#allocation3], %s9703_s28 }
  0x46   : > { %s9709_s1 = scalar_lea.vmem [#allocation2], %s6965_s2 }
  0x47   : > { %9466 = dma.done.wait (%p9665_p12), %s432_s5, 4096  }
  0x48   : > { %9468 = vsyncadd (%p9665_p12), %s432_s5, 4294963200 }
  0x49   : > { %9470 = dma.done.wait (%p51_p1), [#allocation6], 12384  }
  0x4a   : > { %9472 = vsyncadd (%p51_p1), [#allocation6], 4294954912 }
  0x4b   : > { %9474 = dma.done.wait (%p51_p1), [#allocation9], 16384  }
  0x4c   : > { %9476 = vsyncadd (%p51_p1), [#allocation9], 4294950912 }
  0x4d   : > { %9478 = dma.done.wait (%p51_p1), [#allocation12], 24576  }
  0x4e   : > { %9480 = vsyncadd (%p51_p1), [#allocation12], 4294942720  ;;  %v7143_v0 = vld [vmem:[#allocation5 + $0x150] sm:$0xf]  ;;  %v8690_v1 = vld [vmem:[#allocation5 + $0x164] sm:$0xf0] }
  0x4f   : > { %v7335_v2 = vld [vmem:[#allocation5 + $0x2d0] sm:$0xf]  ;;  %v7144_v3 = vor.u32 %v8690_v1, %v7143_v0  ;;  %v8738_v4 = vld [vmem:[#allocation5 + $0x2e4] sm:$0xf0]  ;;  %v8687_v5 = vld [vmem:[#allocation5 + $0x154] sm:$0xf] }
  0x50   : > { %v7145_v6 = vld [vmem:[#allocation5 + $0x168] sm:$0xf0]  ;;  %v7336_v7 = vor.u32 %v8738_v4, %v7335_v2  ;;  %v8735_v9 = vld [vmem:[#allocation5 + $0x2d4] sm:$0xf]  ;;  %v7119_v11 = vld [vmem:[#allocation5 + $0x120] sm:$0xf] }
  0x51   : > { %v7148_v8 = vor.u32 %v8687_v5, %v7145_v6  ;;  %v7337_v10 = vld [vmem:[#allocation5 + $0x2e8] sm:$0xf0]  ;;  %1146 = vmatpush.bf16.msra.mxu0 %v7144_v3  ;;  %v8684_v13 = vld [vmem:[#allocation5 + $0x134] sm:$0xf0]  ;;  %v7311_v14 = vld [vmem:[#allocation5 + $0x2a0] sm:$0xf] }
  0x52   : > { %v7340_v12 = vor.u32 %v8735_v9, %v7337_v10  ;;  %v8732_v15 = vld [vmem:[#allocation5 + $0x2b4] sm:$0xf0]  ;;  %1195 = vmatpush.bf16.msra.mxu1 %v7336_v7  ;;  %v7120_v16 = vor.u32 %v8684_v13, %v7119_v11  ;;  %v8681_v18 = vld [vmem:[#allocation5 + $0x124] sm:$0xf]  ;;  %v7121_v19 = vld [vmem:[#allocation5 + $0x138] sm:$0xf0] }
  0x53   : > { %1244 = vmatpush.bf16.msra.mxu2 %v7148_v8  ;;  %v7312_v17 = vor.u32 %v8732_v15, %v7311_v14  ;;  %v8729_v20 = vld [vmem:[#allocation5 + $0x2a4] sm:$0xf]  ;;  %v7124_v21 = vor.u32 %v8681_v18, %v7121_v19  ;;  %v7313_v22 = vld [vmem:[#allocation5 + $0x2b8] sm:$0xf0]  ;;  %v7095_v23 = vld [vmem:[#allocation5 + $0xf0] sm:$0xf] }
  0x54   : > { %1293 = vmatpush.bf16.msra.mxu3 %v7340_v12  ;;  %v8678_v24 = vld [vmem:[#allocation5 + $0x104] sm:$0xf0]  ;;  %v7316_v25 = vor.u32 %v8729_v20, %v7313_v22  ;;  %v7287_v26 = vld [vmem:[#allocation5 + $0x270] sm:$0xf]  ;;  %v8675_v28 = vld [vmem:[#allocation5 + $0xf4] sm:$0xf] }
  0x55   : > { %v8726_v27 = vld [vmem:[#allocation5 + $0x284] sm:$0xf0]  ;;  %1147 = vmatpush.bf16.msra.mxu0 %v7120_v16  ;;  %v7096_v29 = vor.u32 %v8678_v24, %v7095_v23  ;;  %v7097_v30 = vld [vmem:[#allocation5 + $0x108] sm:$0xf0]  ;;  %v8723_v31 = vld [vmem:[#allocation5 + $0x274] sm:$0xf] }
  0x56   : > { %v7289_v32 = vld [vmem:[#allocation5 + $0x288] sm:$0xf0]  ;;  %1196 = vmatpush.bf16.msra.mxu1 %v7312_v17  ;;  %v7288_v33 = vor.u32 %v8726_v27, %v7287_v26  ;;  %v7100_v34 = vor.u32 %v8675_v28, %v7097_v30  ;;  %v7071_v35 = vld [vmem:[#allocation5 + $0xc0] sm:$0xf]  ;;  %v8672_v36 = vld [vmem:[#allocation5 + $0xd4] sm:$0xf0] }
  0x57   : > { %1245 = vmatpush.bf16.msra.mxu2 %v7124_v21  ;;  %v7263_v37 = vld [vmem:[#allocation5 + $0x240] sm:$0xf]  ;;  %v7292_v38 = vor.u32 %v8723_v31, %v7289_v32  ;;  %v8720_v39 = vld [vmem:[#allocation5 + $0x254] sm:$0xf0]  ;;  %v8669_v40 = vld [vmem:[#allocation5 + $0xc4] sm:$0xf]  ;;  %v7072_v44 = vor.u32 %v8672_v36, %v7071_v35 }
  0x58   : > { %1294 = vmatpush.bf16.msra.mxu3 %v7316_v25  ;;  %v7073_v41 = vld [vmem:[#allocation5 + $0xd8] sm:$0xf0]  ;;  %v8717_v42 = vld [vmem:[#allocation5 + $0x244] sm:$0xf]  ;;  %v7264_v45 = vor.u32 %v8720_v39, %v7263_v37  ;;  %v7047_v47 = vld [vmem:[#allocation5 + $0x90] sm:$0xf] }
  0x59   : > { %v7265_v43 = vld [vmem:[#allocation5 + $0x258] sm:$0xf0]  ;;  %1148 = vmatpush.bf16.msra.mxu0 %v7096_v29  ;;  %v7076_v46 = vor.u32 %v8669_v40, %v7073_v41  ;;  %v8666_v48 = vld [vmem:[#allocation5 + $0xa4] sm:$0xf0]  ;;  %v7239_v49 = vld [vmem:[#allocation5 + $0x210] sm:$0xf] }
  0x5a   : > { %1197 = vmatpush.bf16.msra.mxu1 %v7288_v33  ;;  %v7268_v50 = vor.u32 %v8717_v42, %v7265_v43  ;;  %v8714_v51 = vld [vmem:[#allocation5 + $0x224] sm:$0xf0]  ;;  %v8663_v52 = vld [vmem:[#allocation5 + $0x94] sm:$0xf]  ;;  %v7049_v53 = vld [vmem:[#allocation5 + $0xa8] sm:$0xf0]  ;;  %v7048_v56 = vor.u32 %v8666_v48, %v7047_v47 }
  0x5b   : > { %1246 = vmatpush.bf16.msra.mxu2 %v7100_v34  ;;  %v8711_v54 = vld [vmem:[#allocation5 + $0x214] sm:$0xf]  ;;  %v7241_v55 = vld [vmem:[#allocation5 + $0x228] sm:$0xf0]  ;;  %v7240_v57 = vor.u32 %v8714_v51, %v7239_v49  ;;  %v7052_v58 = vor.u32 %v8663_v52, %v7049_v53  ;;  %v7023_v59 = vld [vmem:[#allocation5 + $0x60] sm:$0xf] }
  0x5c   : > { %1295 = vmatpush.bf16.msra.mxu3 %v7292_v38  ;;  %v8660_v60 = vld [vmem:[#allocation5 + $0x74] sm:$0xf0]  ;;  %v7215_v61 = vld [vmem:[#allocation5 + $0x1e0] sm:$0xf]  ;;  %v7244_v62 = vor.u32 %v8711_v54, %v7241_v55  ;;  %v8657_v0 = vld [vmem:[#allocation5 + $0x64] sm:$0xf] }
  0x5d   : > { %1149 = vmatpush.bf16.msra.mxu0 %v7072_v44  ;;  %v8708_v63 = vld [vmem:[#allocation5 + $0x1f4] sm:$0xf0]  ;;  %v7025_v1 = vld [vmem:[#allocation5 + $0x78] sm:$0xf0]  ;;  %v8705_v2 = vld [vmem:[#allocation5 + $0x1e4] sm:$0xf]  ;;  %v7024_v4 = vor.u32 %v8660_v60, %v7023_v59 }
  0x5e   : > { %1198 = vmatpush.bf16.msra.mxu1 %v7264_v45  ;;  %v7217_v3 = vld [vmem:[#allocation5 + $0x1f8] sm:$0xf0]  ;;  %v7216_v5 = vor.u32 %v8708_v63, %v7215_v61  ;;  %v7028_v6 = vor.u32 %v8657_v0, %v7025_v1  ;;  %v6999_v7 = vld [vmem:[#allocation5 + $0x30] sm:$0xf]  ;;  %v8654_v8 = vld [vmem:[#allocation5 + $0x44] sm:$0xf0] }
  0x5f   : > { %1247 = vmatpush.bf16.msra.mxu2 %v7076_v46  ;;  %v7191_v9 = vld [vmem:[#allocation5 + $0x1b0] sm:$0xf]  ;;  %v7220_v10 = vor.u32 %v8705_v2, %v7217_v3  ;;  %v8702_v11 = vld [vmem:[#allocation5 + $0x1c4] sm:$0xf0]  ;;  %v8651_v12 = vld [vmem:[#allocation5 + $0x34] sm:$0xf]  ;;  %v7000_v16 = vor.u32 %v8654_v8, %v6999_v7 }
  0x60   : > { %1296 = vmatpush.bf16.msra.mxu3 %v7268_v50  ;;  %v7001_v13 = vld [vmem:[#allocation5 + $0x48] sm:$0xf0]  ;;  %v8699_v14 = vld [vmem:[#allocation5 + $0x1b4] sm:$0xf]  ;;  %v6975_v17 = vld [vmem:[#allocation5] sm:$0xf]  ;;  %v7192_v19 = vor.u32 %v8702_v11, %v7191_v9 }
  0x61   : > { %1150 = vmatpush.bf16.msra.mxu0 %v7048_v56  ;;  %v7193_v15 = vld [vmem:[#allocation5 + $0x1c8] sm:$0xf0]  ;;  %v8648_v18 = vld [vmem:[#allocation5 + $0x14] sm:$0xf0]  ;;  %v7004_v20 = vor.u32 %v8651_v12, %v7001_v13  ;;  %v7167_v21 = vld [vmem:[#allocation5 + $0x180] sm:$0xf] }
  0x62   : > { %1199 = vmatpush.bf16.msra.mxu1 %v7240_v57  ;;  %v8696_v22 = vld [vmem:[#allocation5 + $0x194] sm:$0xf0]  ;;  %v8645_v23 = vld [vmem:[#allocation5 + $0x4] sm:$0xf]  ;;  %v7196_v24 = vor.u32 %v8699_v14, %v7193_v15  ;;  %v6977_v25 = vld [vmem:[#allocation5 + $0x18] sm:$0xf0]  ;;  %v6976_v31 = vor.u32 %v8648_v18, %v6975_v17 }
  0x63   : > { %1248 = vmatpush.bf16.msra.mxu2 %v7052_v58  ;;  %v8693_v26 = vld [vmem:[#allocation5 + $0x184] sm:$0xf]  ;;  %v7169_v27 = vld [vmem:[#allocation5 + $0x198] sm:$0xf0]  ;;  %v7153_v30 = vld [vmem:[#allocation5 + $0x170] sm:$0xf0]  ;;  %v7168_v35 = vor.u32 %v8696_v22, %v7167_v21  ;;  %v6980_v36 = vor.u32 %v8645_v23, %v6977_v25 }
  0x64   : > { %1297 = vmatpush.bf16.msra.mxu3 %v7244_v62  ;;  %v508_v28 = vld [vmem:[%s9709_s1] sm:$0xff]  ;;  %v8688_v29 = vld [vmem:[#allocation5 + $0x15c] sm:$0xf]  ;;  %v510_v32 = vld [vmem:[%s9709_s1 + $0x10] sm:$0xff]  ;;  %v7172_v39 = vor.u32 %v8693_v26, %v7169_v27  ;;  %vm2430_vm0 = vcmask 1040384   ;;  %vm2507_vm3 = vcmask 1047552  }
  0x65   : > { %1151 = vmatpush.bf16.msra.mxu0 %v7024_v4  ;;  %v8736_v33 = vld [vmem:[#allocation5 + $0x2dc] sm:$0xf]  ;;  %v7345_v34 = vld [vmem:[#allocation5 + $0x2f0] sm:$0xf0]  ;;  %v509_v37 = vld [vmem:[%s9709_s1 + $0x8] sm:$0xff]  ;;  %v7156_v40 = vor.u32 %v8688_v29, %v7153_v30  ;;  %v9731_v44 = vpack.c.bf16 %v510_v32, %v508_v28  ;;  %s12087_s16 = sld [smem:[#allocation80_spill]] }
  0x66   : > { %1200 = vmatpush.bf16.msra.mxu1 %v7216_v5  ;;  %v511_v38 = vld [vmem:[%s9709_s1 + $0x18] sm:$0xff]  ;;  %v8691_v42 = vld [vmem:[#allocation5 + $0x16c] sm:$0xf0]  ;;  %v7348_v45 = vor.u32 %v8736_v33, %v7345_v34  ;;  %v8682_v47 = vld [vmem:[#allocation5 + $0x12c] sm:$0xf]  ;;  %s11561_s14 = scalar_lea.vmem [#allocation14], %s6965_s2 }
  0x67   : > { %1249 = vmatpush.bf16.msra.mxu2 %v7028_v6  ;;  %v7151_v41 = vld [vmem:[#allocation5 + $0x158] sm:$0xf]  ;;  %v8739_v46 = vld [vmem:[#allocation5 + $0x2ec] sm:$0xf0]  ;;  %v7129_v48 = vld [vmem:[#allocation5 + $0x140] sm:$0xf0]  ;;  %v9733_v49 = vpack.c.bf16 %v511_v38, %v509_v37 }
  0x68   : > { %1298 = vmatpush.bf16.msra.mxu3 %v7220_v10  ;;  %v7343_v43 = vld [vmem:[#allocation5 + $0x2d8] sm:$0xf]  ;;  %v8730_v50 = vld [vmem:[#allocation5 + $0x2ac] sm:$0xf]  ;;  %v7321_v51 = vld [vmem:[#allocation5 + $0x2c0] sm:$0xf0]  ;;  %v7152_v52 = vor.u32 %v8691_v42, %v7151_v41  ;;  %v7132_v54 = vor.u32 %v8682_v47, %v7129_v48 }
  0x69   : > { %1152 = vmatpush.bf16.msra.mxu0 %v7000_v16  ;;  %v7344_v53 = vor.u32 %v8739_v46, %v7343_v43  ;;  %v7127_v55 = vld [vmem:[#allocation5 + $0x128] sm:$0xf]  ;;  %v8685_v56 = vld [vmem:[#allocation5 + $0x13c] sm:$0xf0]  ;;  %v7324_v57 = vor.u32 %v8730_v50, %v7321_v51  ;;  %v8676_v61 = vld [vmem:[#allocation5 + $0xfc] sm:$0xf] }
  0x6a   : > { %1201 = vmatpush.bf16.msra.mxu1 %v7192_v19  ;;  %v7319_v58 = vld [vmem:[#allocation5 + $0x2a8] sm:$0xf]  ;;  %v8733_v59 = vld [vmem:[#allocation5 + $0x2bc] sm:$0xf0]  ;;  %v7128_v60 = vor.u32 %v8685_v56, %v7127_v55  ;;  %v7105_v62 = vld [vmem:[#allocation5 + $0x110] sm:$0xf0] }
  0x6b   : > { %1250 = vmatpush.bf16.msra.mxu2 %v7004_v20  ;;  %v8724_v63 = vld [vmem:[#allocation5 + $0x27c] sm:$0xf]  ;;  %v7320_v0 = vor.u32 %v8733_v59, %v7319_v58  ;;  %v7108_v1 = vor.u32 %v8676_v61, %v7105_v62  ;;  %v7297_v2 = vld [vmem:[#allocation5 + $0x290] sm:$0xf0]  ;;  %v7103_v3 = vld [vmem:[#allocation5 + $0xf8] sm:$0xf] }
  0x6c   : > { %1299 = vmatpush.bf16.msra.mxu3 %v7196_v24  ;;  %v8679_v4 = vld [vmem:[#allocation5 + $0x10c] sm:$0xf0]  ;;  %v7300_v5 = vor.u32 %v8724_v63, %v7297_v2  ;;  %v7295_v6 = vld [vmem:[#allocation5 + $0x278] sm:$0xf]  ;;  %v512_v10 = vld [vmem:[%s9709_s1 + $0x20] sm:$0xff]  ;;  %s9062_s21 = sshll.u32 %s9599_s24, 8 }
  0x6d   : > { %1153 = vmatpush.bf16.msra.mxu0 %v6976_v31  ;;  %v8727_v7 = vld [vmem:[#allocation5 + $0x28c] sm:$0xf0]  ;;  %v7104_v8 = vor.u32 %v8679_v4, %v7103_v3  ;;  %v513_v12 = vld [vmem:[%s9709_s1 + $0x28] sm:$0xff]  ;;  %v515_v13 = vld [vmem:[%s9709_s1 + $0x38] sm:$0xff]  ;;  %vm2431_vm1 = vsmask.f32 256 }
  0x6e   : > { %1202 = vmatpush.bf16.msra.mxu1 %v7168_v35  ;;  %v7296_v9 = vor.u32 %v8727_v7, %v7295_v6  ;;  %v514_v11 = vld [vmem:[%s9709_s1 + $0x30] sm:$0xff]  ;;  %v9745_v15 = vpack.c.bf16 %v515_v13, %v513_v12  ;;  %v8670_v16 = vld [vmem:[#allocation5 + $0xcc] sm:$0xf]  ;;  %v7081_v17 = vld [vmem:[#allocation5 + $0xe0] sm:$0xf0]  ;;  %s12097_s5 = sld [smem:[#allocation81_spill]] }
  0x6f   : > { %1251 = vmatpush.bf16.msra.mxu2 %v6980_v36  ;;  %v9743_v14 = vpack.c.bf16 %v514_v11, %v512_v10  ;;  %v8718_v18 = vld [vmem:[#allocation5 + $0x24c] sm:$0xf]  ;;  %v7084_v19 = vor.u32 %v8670_v16, %v7081_v17  ;;  %v7273_v20 = vld [vmem:[#allocation5 + $0x260] sm:$0xf0]  ;;  %v7079_v21 = vld [vmem:[#allocation5 + $0xc8] sm:$0xf] }
  0x70   : > { %1300 = vmatpush.bf16.msra.mxu3 %v7172_v39  ;;  %1154 = vmatmul.bf16.vlgmr.msra.gmra.mxu0 %v9731_v44  ;;  %v8673_v22 = vld [vmem:[#allocation5 + $0xdc] sm:$0xf0]  ;;  %v7276_v23 = vor.u32 %v8718_v18, %v7273_v20  ;;  %v7271_v25 = vld [vmem:[#allocation5 + $0x248] sm:$0xf]  ;;  %v518_v29 = vld [vmem:[%s9709_s1 + $0x50] sm:$0xff]  ;;  %s6818_s12 = sshll.u32 %s11561_s14, 4  ;;  %s6819_s12 = int_to_ptr.vmem [resolvable:$true] %s6818_s12 }
  0x71   : > { %1203 = vmatmul.bf16.vlgmr.msra.gmra.mxu1 %v9733_v49  ;;  %1342 = vmatpush.bf16.msrb.mxu0 %v7152_v52  ;;  %v7080_v24 = vor.u32 %v8673_v22, %v7079_v21  ;;  %v8721_v26 = vld [vmem:[#allocation5 + $0x25c] sm:$0xf0]  ;;  %v517_v30 = vld [vmem:[%s9709_s1 + $0x48] sm:$0xff]  ;;  %v519_v31 = vld [vmem:[%s9709_s1 + $0x58] sm:$0xff]  ;;  %vm2508_vm4 = vsmask.f32 7424 }
  0x72   : > { %1252 = vmatmul.bf16.vlgmr.msra.gmra.mxu2 %v9731_v44  ;;  %1391 = vmatpush.bf16.msrb.mxu1 %v7344_v53  ;;  %v7272_v27 = vor.u32 %v8721_v26, %v7271_v25  ;;  %v516_v28 = vld [vmem:[%s9709_s1 + $0x40] sm:$0xff]  ;;  %v9757_v33 = vpack.c.bf16 %v519_v31, %v517_v30  ;;  %v8664_v34 = vld [vmem:[#allocation5 + $0x9c] sm:$0xf]  ;;  %v7057_v35 = vld [vmem:[#allocation5 + $0xb0] sm:$0xf0]  ;;  %s6805_s24 = scalar_lea.sflag [#allocation4], %s9703_s28 }
  0x73   : > { %1440 = vmatpush.bf16.msrb.mxu2 %v7156_v40  ;;  %1301 = vmatmul.bf16.vlgmr.msra.gmra.mxu3 %v9733_v49  ;;  %v9755_v32 = vpack.c.bf16 %v518_v29, %v516_v28  ;;  %v8712_v36 = vld [vmem:[#allocation5 + $0x21c] sm:$0xf]  ;;  %v7060_v37 = vor.u32 %v8664_v34, %v7057_v35  ;;  %v7249_v38 = vld [vmem:[#allocation5 + $0x230] sm:$0xf0]  ;;  %v7055_v39 = vld [vmem:[#allocation5 + $0x98] sm:$0xf] }
  0x74   : > { %1489 = vmatpush.bf16.msrb.mxu3 %v7348_v45  ;;  %v8667_v40 = vld [vmem:[#allocation5 + $0xac] sm:$0xf0]  ;;  %v7252_v41 = vor.u32 %v8712_v36, %v7249_v38  ;;  %v7247_v43 = vld [vmem:[#allocation5 + $0x218] sm:$0xf]  ;;  %v520_v47 = vld [vmem:[%s9709_s1 + $0x60] sm:$0xff]  ;;  %s6817_s25 = scalar_lea.hbm %s12097_s5, %s9062_s21  ;;  %s9441_s3 = scalar_lea.hbm %s12097_s5, 512 }
  0x75   : > { %1343 = vmatpush.bf16.msrb.mxu0 %v7128_v60  ;;  %v7056_v42 = vor.u32 %v8667_v40, %v7055_v39  ;;  %v8715_v45 = vld [vmem:[#allocation5 + $0x22c] sm:$0xf0]  ;;  %v521_v50 = vld [vmem:[%s9709_s1 + $0x68] sm:$0xff]  ;;  %v523_v51 = vld [vmem:[%s9709_s1 + $0x78] sm:$0xff]  ;;  %s6820_s10 = sshll.u32 %s6817_s25, 4  ;;  %s6821_s10 = int_to_ptr.hbm [resolvable:$true] %s6820_s10 }
  0x76   : > { %1392 = vmatpush.bf16.msrb.mxu1 %v7320_v0  ;;  %v7248_v46 = vor.u32 %v8715_v45, %v7247_v43  ;;  %v522_v48 = vld [vmem:[%s9709_s1 + $0x70] sm:$0xff]  ;;  %v9769_v53 = vpack.c.bf16 %v523_v51, %v521_v50  ;;  %v7033_v55 = vld [vmem:[#allocation5 + $0x80] sm:$0xf0]  ;;  %v8706_v56 = vld [vmem:[#allocation5 + $0x1ec] sm:$0xf]  ;;  %s9435_s23 = sshra.s32 %s6821_s10, 4  ;;  %s9436_s23 = int_to_ptr.hbm [resolvable:$true] %s9435_s23 }
  0x77   : > { %1441 = vmatpush.bf16.msrb.mxu2 %v7132_v54  ;;  %v9767_v52 = vpack.c.bf16 %v522_v48, %v520_v47  ;;  %v8658_v54 = vld [vmem:[#allocation5 + $0x6c] sm:$0xf]  ;;  %v7225_v58 = vld [vmem:[#allocation5 + $0x200] sm:$0xf0]  ;;  %v7031_v59 = vld [vmem:[#allocation5 + $0x68] sm:$0xf]  ;;  %p9442_p12 = scmp.lt.s32.totalorder %s9436_s23, %s12097_s5 }
  0x78   : > { %1490 = vmatpush.bf16.msrb.mxu3 %v7324_v57  ;;  %v7036_v57 = vor.u32 %v8658_v54, %v7033_v55  ;;  %v8661_v60 = vld [vmem:[#allocation5 + $0x7c] sm:$0xf0]  ;;  %v7228_v61 = vor.u32 %v8706_v56, %v7225_v58  ;;  %v7223_v63 = vld [vmem:[#allocation5 + $0x1e8] sm:$0xf]  ;;  %v526_v3 = vld [vmem:[%s9709_s1 + $0x90] sm:$0xff]  ;;  %s9437_s29 = scalar_lea.hbm %s9436_s23, 256 }
  0x79   : > { %1344 = vmatpush.bf16.msrb.mxu0 %v7104_v8  ;;  %v7032_v62 = vor.u32 %v8661_v60, %v7031_v59  ;;  %v8709_v0 = vld [vmem:[#allocation5 + $0x1fc] sm:$0xf0]  ;;  %v525_v4 = vld [vmem:[%s9709_s1 + $0x88] sm:$0xff]  ;;  %v8652_v8 = vld [vmem:[#allocation5 + $0x3c] sm:$0xf]  ;;  %p9438_p1 = scmp.ne.s32.totalorder %s9436_s23, %s9437_s29  ;;  %p9443_p7 = scmp.lt.s32.totalorder %s9441_s3, %s9437_s29 }
  0x7a   : > { %1393 = vmatpush.bf16.msrb.mxu1 %v7296_v9  ;;  %v524_v2 = vld [vmem:[%s9709_s1 + $0x80] sm:$0xff]  ;;  %v7009_v9 = vld [vmem:[#allocation5 + $0x50] sm:$0xf0]  ;;  %v8700_v10 = vld [vmem:[#allocation5 + $0x1bc] sm:$0xf] }
  0x7b   : > { %1442 = vmatpush.bf16.msrb.mxu2 %v7108_v1  ;;  %v7224_v1 = vor.u32 %v8709_v0, %v7223_v63  ;;  %v9779_v6 = vpack.c.bf16 %v526_v3, %v524_v2  ;;  %v7012_v11 = vor.u32 %v8652_v8, %v7009_v9  ;;  %v7201_v12 = vld [vmem:[#allocation5 + $0x1d0] sm:$0xf0]  ;;  %v7007_v13 = vld [vmem:[#allocation5 + $0x38] sm:$0xf]  ;;  %v8655_v16 = vld [vmem:[#allocation5 + $0x4c] sm:$0xf0]  ;;  %p9439_p3 = pnand %p9438_p1, %p9672_p4  ;;  %p9444_p8 = por %p9443_p7, %p9442_p12 }
  0x7c   : > { %1491 = vmatpush.bf16.msrb.mxu3 %v7300_v5  ;;  %v527_v5 = vld [vmem:[%s9709_s1 + $0x98] sm:$0xff]  ;;  %v7204_v17 = vor.u32 %v8700_v10, %v7201_v12  ;;  %v7008_v18 = vor.u32 %v8655_v16, %v7007_v13  ;;  %v8703_v20 = vld [vmem:[#allocation5 + $0x1cc] sm:$0xf0]  ;;  %v528_v22 = vld [vmem:[%s9709_s1 + $0xa0] sm:$0xff] }
  0x7d   : > { %1345 = vmatpush.bf16.msrb.mxu0 %v7080_v24  ;;  %v9781_v7 = vpack.c.bf16 %v527_v5, %v525_v4  ;;  %v529_v24 = vld [vmem:[%s9709_s1 + $0xa8] sm:$0xff]  ;;  %v531_v25 = vld [vmem:[%s9709_s1 + $0xb8] sm:$0xff]  ;;  %v6985_v29 = vld [vmem:[#allocation5 + $0x20] sm:$0xf0]  ;;  %p9440_p5 = pneg %p9439_p3 }
  0x7e   : > { %1394 = vmatpush.bf16.msrb.mxu1 %v7272_v27  ;;  %v9793_v27 = vpack.c.bf16 %v531_v25, %v529_v24  ;;  %v8646_v28 = vld [vmem:[#allocation5 + $0xc] sm:$0xf]  ;;  %v7177_v34 = vld [vmem:[#allocation5 + $0x1a0] sm:$0xf0]  ;;  %v6983_v35 = vld [vmem:[#allocation5 + $0x8] sm:$0xf] }
  0x7f   : > { %1443 = vmatpush.bf16.msrb.mxu2 %v7084_v19  ;;  %v7199_v19 = vld [vmem:[#allocation5 + $0x1b8] sm:$0xf]  ;;  %v8694_v30 = vld [vmem:[#allocation5 + $0x18c] sm:$0xf]  ;;  %v6988_v31 = vor.u32 %v8646_v28, %v6985_v29  ;;  %v8649_v36 = vld [vmem:[#allocation5 + $0x1c] sm:$0xf0]  ;;  %p9445_p9 = pnand %p9444_p8, %p9440_p5 }
  0x80   : > { %1159 = vmatmul.bf16.gmra.mxu0 %v9743_v14  ;;  %1492 = vmatpush.bf16.msrb.mxu3 %v7276_v23  ;;  %v7200_v21 = vor.u32 %v8703_v20, %v7199_v19  ;;  %v530_v23 = vld [vmem:[%s9709_s1 + $0xb0] sm:$0xff]  ;;  %v6984_v38 = vor.u32 %v8649_v36, %v6983_v35  ;;  %v7175_v39 = vld [vmem:[#allocation5 + $0x188] sm:$0xf]  ;;  %v8697_v40 = vld [vmem:[#allocation5 + $0x19c] sm:$0xf0] }
  0x81   : > { %1208 = vmatmul.bf16.gmra.mxu1 %v9745_v15  ;;  %1346 = vmatpush.bf16.msrb.mxu0 %v7056_v42  ;;  %v9791_v26 = vpack.c.bf16 %v530_v23, %v528_v22  ;;  %v532_v42 = vld [vmem:[%s9709_s1 + $0xc0] sm:$0xff]  ;;  %v534_v43 = vld [vmem:[%s9709_s1 + $0xd0] sm:$0xff]  ;;  %v533_v45 = vld [vmem:[%s9709_s1 + $0xc8] sm:$0xff] }
  0x82   : > { %1257 = vmatmul.bf16.gmra.mxu2 %v9743_v14  ;;  %1395 = vmatpush.bf16.msrb.mxu1 %v7248_v46  ;;  %v535_v46 = vld [vmem:[%s9709_s1 + $0xd8] sm:$0xff]  ;;  %v9803_v47 = vpack.c.bf16 %v534_v43, %v532_v42  ;;  %v8689_v50 = vld [vmem:[#allocation5 + $0x164] sm:$0xf]  ;;  %v538_v59 = vld [vmem:[%s9709_s1 + $0xf0] sm:$0xff] }
  0x83   : > { %1306 = vmatmul.bf16.gmra.mxu3 %v9745_v15  ;;  %1444 = vmatpush.bf16.msrb.mxu2 %v7060_v37  ;;  %v7180_v37 = vor.u32 %v8694_v30, %v7177_v34  ;;  %v9805_v48 = vpack.c.bf16 %v535_v46, %v533_v45  ;;  %v7161_v51 = vld [vmem:[#allocation5 + $0x178] sm:$0xf0]  ;;  %v8737_v54 = vld [vmem:[#allocation5 + $0x2e4] sm:$0xf]  ;;  %v537_v60 = vld [vmem:[%s9709_s1 + $0xe8] sm:$0xff] }
  0x84   : > { %1493 = vmatpush.bf16.msrb.mxu3 %v7252_v41  ;;  %v7176_v41 = vor.u32 %v8697_v40, %v7175_v39  ;;  %v7164_v55 = vor.u32 %v8689_v50, %v7161_v51  ;;  %v7353_v56 = vld [vmem:[#allocation5 + $0x2f8] sm:$0xf0]  ;;  %v536_v58 = vld [vmem:[%s9709_s1 + $0xe0] sm:$0xff]  ;;  %v8740_v4 = vld [vmem:[#allocation5 + $0x2f4] sm:$0xf0] }
  0x85   : > { %1347 = vmatpush.bf16.msrb.mxu0 %v7032_v62  ;;  %v9815_v62 = vpack.c.bf16 %v538_v59, %v536_v58  ;;  %v7159_v0 = vld [vmem:[#allocation5 + $0x160] sm:$0xf]  ;;  %v8683_v9 = vld [vmem:[#allocation5 + $0x134] sm:$0xf]  ;;  %v7137_v10 = vld [vmem:[#allocation5 + $0x148] sm:$0xf0] }
  0x86   : > { %1396 = vmatpush.bf16.msrb.mxu1 %v7224_v1  ;;  %v8692_v1 = vld [vmem:[#allocation5 + $0x174] sm:$0xf0]  ;;  %v7351_v2 = vld [vmem:[#allocation5 + $0x2e0] sm:$0xf]  ;;  %v7140_v12 = vor.u32 %v8683_v9, %v7137_v10  ;;  %v7329_v13 = vld [vmem:[#allocation5 + $0x2c8] sm:$0xf0] }
  0x87   : > { %1445 = vmatpush.bf16.msrb.mxu2 %v7036_v57  ;;  %v7356_v57 = vor.u32 %v8737_v54, %v7353_v56  ;;  %v7160_v3 = vor.u32 %v8692_v1, %v7159_v0  ;;  %v7352_v5 = vor.u32 %v8740_v4, %v7351_v2  ;;  %v9823_v8 = vld [vmem:[#allocation7] sm:$0x3f]  ;;  %v7135_v19 = vld [vmem:[#allocation5 + $0x130] sm:$0xf]  ;;  %v8686_v20 = vld [vmem:[#allocation5 + $0x144] sm:$0xf0] }
  0x88   : > { %1494 = vmatpush.bf16.msrb.mxu3 %v7228_v61  ;;  %v539_v61 = vld [vmem:[%s9709_s1 + $0xf8] sm:$0xff]  ;;  %v7136_v24 = vor.u32 %v8686_v20, %v7135_v19  ;;  %v8734_v25 = vld [vmem:[#allocation5 + $0x2c4] sm:$0xf0]  ;;  %v9833_v30 = vperm.slane %v9823_v8, 1  ;;  %v8725_v35 = vld [vmem:[#allocation5 + $0x284] sm:$0xf] }
  0x89   : > { %1348 = vmatpush.bf16.msrb.mxu0 %v7008_v18  ;;  %v9817_v63 = vpack.c.bf16 %v539_v61, %v537_v60  ;;  %v7113_v34 = vld [vmem:[#allocation5 + $0x118] sm:$0xf0]  ;;  %v7111_v60 = vld [vmem:[#allocation5 + $0x100] sm:$0xf]  ;;  %v8680_v61 = vld [vmem:[#allocation5 + $0x114] sm:$0xf0] }
  0x8a   : > { %1397 = vmatpush.bf16.msrb.mxu1 %v7200_v21  ;;  %v7327_v21 = vld [vmem:[#allocation5 + $0x2b0] sm:$0xf]  ;;  %v7303_v0 = vld [vmem:[#allocation5 + $0x280] sm:$0xf]  ;;  %v8728_v4 = vld [vmem:[#allocation5 + $0x294] sm:$0xf0] }
  0x8b   : > { %1446 = vmatpush.bf16.msrb.mxu2 %v7012_v11  ;;  %v8731_v11 = vld [vmem:[#allocation5 + $0x2b4] sm:$0xf]  ;;  %v7328_v28 = vor.u32 %v8734_v25, %v7327_v21  ;;  %v7304_v9 = vor.u32 %v8728_v4, %v7303_v0  ;;  %vm10288_vm2 = vmand %vm2430_vm0, %vm2431_vm1 }
  0x8c   : > { %1495 = vmatpush.bf16.msrb.mxu3 %v7204_v17  ;;  %v7332_v16 = vor.u32 %v8731_v11, %v7329_v13  ;;  %v9826_v17 = vperm.slane %v9823_v8, 0  ;;  %v8719_v19 = vld [vmem:[#allocation5 + $0x254] sm:$0xf]  ;;  %vm10531_vm5 = vmand %vm2507_vm3, %vm2508_vm4 }
  0x8d   : > { %1349 = vmatpush.bf16.msrb.mxu0 %v6984_v38  ;;  %v7305_v38 = vld [vmem:[#allocation5 + $0x298] sm:$0xf0] }
  0x8e   : > { %1398 = vmatpush.bf16.msrb.mxu1 %v7176_v41  ;;  %v7308_v42 = vor.u32 %v8725_v35, %v7305_v38 }
  0x8f   : > { %1447 = vmatpush.bf16.msrb.mxu2 %v6988_v31  ;;  %v8677_v31 = vld [vmem:[#allocation5 + $0x104] sm:$0xf] }
  0x90   : > { %1164 = vmatmul.bf16.gmra.mxu0 %v9755_v32  ;;  %1496 = vmatpush.bf16.msrb.mxu3 %v7180_v37  ;;  %v7116_v37 = vor.u32 %v8677_v31, %v7113_v34 }
  0x91   : > { %1213 = vmatmul.bf16.gmra.mxu1 %v9757_v33  ;;  %1538 = vmatpush.bf16.msra.mxu0 %v7160_v3  ;;  %v7112_v3 = vor.u32 %v8680_v61, %v7111_v60  ;;  %v8722_v61 = vld [vmem:[#allocation5 + $0x264] sm:$0xf0] }
  0x92   : > { %1262 = vmatmul.bf16.gmra.mxu2 %v9755_v32  ;;  %1587 = vmatpush.bf16.msra.mxu1 %v7352_v5 }
  0x93   : > { %1311 = vmatmul.bf16.gmra.mxu3 %v9757_v33  ;;  %1636 = vmatpush.bf16.msra.mxu2 %v7164_v55 }
  0x94   : > { %1685 = vmatpush.bf16.msra.mxu3 %v7356_v57 }
  0x95   : > { %1539 = vmatpush.bf16.msra.mxu0 %v7136_v24  ;;  %v7281_v24 = vld [vmem:[#allocation5 + $0x268] sm:$0xf0] }
  0x96   : > { %1588 = vmatpush.bf16.msra.mxu1 %v7328_v28  ;;  %v7284_v35 = vor.u32 %v8719_v19, %v7281_v24  ;;  %v7257_v19 = vld [vmem:[#allocation5 + $0x238] sm:$0xf0] }
  0x97   : > { %1637 = vmatpush.bf16.msra.mxu2 %v7140_v12 }
  0x98   : > { %1686 = vmatpush.bf16.msra.mxu3 %v7332_v16  ;;  %v8671_v16 = vld [vmem:[#allocation5 + $0xd4] sm:$0xf] }
  0x99   : > { %1540 = vmatpush.bf16.msra.mxu0 %v7112_v3 }
  0x9a   : > { %1589 = vmatpush.bf16.msra.mxu1 %v7304_v9  ;;  %v8665_v9 = vld [vmem:[#allocation5 + $0xa4] sm:$0xf] }
  0x9b   : > { %1638 = vmatpush.bf16.msra.mxu2 %v7116_v37 }
  0x9c   : > { %1687 = vmatpush.bf16.msra.mxu3 %v7308_v42 }
  0xa0   : > { %1169 = vmatmul.bf16.gmra.mxu0 %v9767_v52  ;;  %1688 = vmatpush.bf16.msra.mxu3 %v7284_v35 }
  0xa1   : > { %1218 = vmatmul.bf16.gmra.mxu1 %v9769_v53 }
  0xa2   : > { %1267 = vmatmul.bf16.gmra.mxu2 %v9767_v52 }
  0xa3   : > { %1316 = vmatmul.bf16.gmra.mxu3 %v9769_v53 }
  0xb0   : > { %1174 = vmatmul.bf16.gmra.mxu0 %v9779_v6 }
  0xb1   : > { %1223 = vmatmul.bf16.gmra.mxu1 %v9781_v7 }
  0xb2   : > { %1272 = vmatmul.bf16.gmra.mxu2 %v9779_v6 }
  0xb3   : > { %1321 = vmatmul.bf16.gmra.mxu3 %v9781_v7 }
  0xc0   : > { %1179 = vmatmul.bf16.gmra.mxu0 %v9791_v26 }
  0xc1   : > { %1228 = vmatmul.bf16.gmra.mxu1 %v9793_v27 }
  0xc2   : > { %1277 = vmatmul.bf16.gmra.mxu2 %v9791_v26 }
  0xc3   : > { %1326 = vmatmul.bf16.gmra.mxu3 %v9793_v27 }
  0xd0   : > { %1184 = vmatmul.bf16.gmra.mxu0 %v9803_v47 }
  0xd1   : > { %1233 = vmatmul.bf16.gmra.mxu1 %v9805_v48 }
  0xd2   : > { %1282 = vmatmul.bf16.gmra.mxu2 %v9803_v47 }
  0xd3   : > { %1331 = vmatmul.bf16.gmra.mxu3 %v9805_v48 }
  0xe0   : > { %1189 = vmatmul.bf16.gmra.mxu0 %v9815_v62 }
  0xe1   : > { %1238 = vmatmul.bf16.gmra.mxu1 %v9817_v63 }
  0xe2   : > { %1287 = vmatmul.bf16.gmra.mxu2 %v9815_v62 }
  0xe3   : > { %1336 = vmatmul.bf16.gmra.mxu3 %v9817_v63 }
  0xed   : > { %v1155_v18 = vpop.f32.mrf.mxu0 }
  0xee   : > { %v1156_v22 = vadd.f32 %v1155_v18, %v9826_v17  ;;  %v1204_v23 = vpop.f32.mrf.mxu1  ;;  %v7089_v18 = vld [vmem:[#allocation5 + $0xe8] sm:$0xf0] }
  0xf0   : > { %v1205_v29 = vadd.f32 %v1204_v23, %v1156_v22  ;;  %1350 = vmatmul.bf16.vlgmr.msrb.gmra.mxu0 %v9731_v44  ;;  %v7092_v23 = vor.u32 %v8671_v16, %v7089_v18 }
  0xf1   : > { %1399 = vmatmul.bf16.vlgmr.msrb.gmra.mxu1 %v9733_v49 }
  0xf2   : > { %1448 = vmatmul.bf16.vlgmr.msrb.gmra.mxu2 %v9731_v44  ;;  %v1734_v46 = vmax.f32 %v1205_v29, 0.0 }
  0xf3   : > { %1497 = vmatmul.bf16.vlgmr.msrb.gmra.mxu3 %v9733_v49  ;;  %1639 = vmatpush.bf16.msra.mxu2 %v7092_v23 }
  0xf5   : > { %v1253_v36 = vpop.f32.mrf.mxu2  ;;  %v1157_v41 = vpop.f32.mrf.mxu0 }
  0xf6   : > { %v1254_v39 = vadd.f32 %v1253_v36, %v9833_v30  ;;  %v1302_v40 = vpop.f32.mrf.mxu3  ;;  %v1158_v43 = vadd.f32 %v1157_v41, %v9826_v17  ;;  %v1206_v45 = vpop.f32.mrf.mxu1 }
  0xf8   : > { %v1303_v50 = vadd.f32 %v1302_v40, %v1254_v39  ;;  %v1207_v51 = vadd.f32 %v1206_v45, %v1158_v43 }
  0xfa   : > { %v1735_v54 = vmax.f32 %v1303_v50, 0.0  ;;  %v1736_v11 = vmax.f32 %v1207_v51, 0.0 }
  0xfc   : > { %v5250_v55 = vpack.c.bf16 %v1735_v54, %v1734_v46 }
  0xfd   : > { %v1255_v56 = vpop.f32.mrf.mxu2  ;;  %v1160_v59 = vpop.f32.mrf.mxu0 }
  0xfe   : > { %v1256_v57 = vadd.f32 %v1255_v56, %v9833_v30  ;;  %v1304_v58 = vpop.f32.mrf.mxu3  ;;  %v1161_v1 = vadd.f32 %v1160_v59, %v9826_v17  ;;  %v1209_v2 = vpop.f32.mrf.mxu1  ;;  %v5314_v20 = vunpack.c.l.b16 %v5250_v55  ;;  %v5315_v21 = vunpack.c.h.b16 %v5250_v55  ;;  %v7087_v55 = vld [vmem:[#allocation5 + $0xd0] sm:$0xf]  ;;  %v8674_v56 = vld [vmem:[#allocation5 + $0xe4] sm:$0xf0] }
  0xff   : > { %v7088_v60 = vor.u32 %v8674_v56, %v7087_v55 }
 0x100   : > { %v1305_v5 = vadd.f32 %v1304_v58, %v1256_v57  ;;  %v1210_v10 = vadd.f32 %v1209_v2, %v1161_v1  ;;  %1355 = vmatmul.bf16.gmra.mxu0 %v9743_v14  ;;  %v7279_v57 = vld [vmem:[#allocation5 + $0x250] sm:$0xf] }
 0x101   : > { %1404 = vmatmul.bf16.gmra.mxu1 %v9745_v15  ;;  %v7280_v1 = vor.u32 %v8722_v61, %v7279_v57  ;;  %1541 = vmatpush.bf16.msra.mxu0 %v7088_v60 }
 0x102   : > { %v1737_v12 = vmax.f32 %v1305_v5, 0.0  ;;  %1453 = vmatmul.bf16.gmra.mxu2 %v9743_v14  ;;  %v1738_v40 = vmax.f32 %v1210_v10, 0.0  ;;  %v7065_v10 = vld [vmem:[#allocation5 + $0xb8] sm:$0xf0] }
 0x103   : > { %1502 = vmatmul.bf16.gmra.mxu3 %v9745_v15  ;;  %1590 = vmatpush.bf16.msra.mxu1 %v7280_v1  ;;  %v7068_v18 = vor.u32 %v8665_v9, %v7065_v10 }
 0x104   : > { %v5251_v13 = vpack.c.bf16 %v1737_v12, %v1736_v11  ;;  %v8713_v11 = vld [vmem:[#allocation5 + $0x224] sm:$0xf] }
 0x105   : > { %v1258_v22 = vpop.f32.mrf.mxu2  ;;  %v1162_v34 = vpop.f32.mrf.mxu0  ;;  %v7260_v23 = vor.u32 %v8713_v11, %v7257_v19  ;;  %1640 = vmatpush.bf16.msra.mxu2 %v7068_v18 }
 0x106   : > { %v5316_v25 = vunpack.c.l.b16 %v5251_v13  ;;  %v5317_v28 = vunpack.c.h.b16 %v5251_v13  ;;  %v1259_v29 = vadd.f32 %v1258_v22, %v9833_v30  ;;  %v1307_v31 = vpop.f32.mrf.mxu3  ;;  %v1163_v36 = vadd.f32 %v1162_v34, %v9826_v17  ;;  %v1211_v37 = vpop.f32.mrf.mxu1 }
 0x107   : > { %1689 = vmatpush.bf16.msra.mxu3 %v7260_v23 }
 0x108   : > { %v9846_v38 = vpack.c.b16 %v5316_v25, %v5314_v20  ;;  %v9848_v39 = vpack.c.b16 %v5317_v28, %v5315_v21  ;;  %v1308_v41 = vadd.f32 %v1307_v31, %v1259_v29  ;;  %v1212_v42 = vadd.f32 %v1211_v37, %v1163_v36 }
 0x10a   : > { %11902 = vst [vmem:[#allocation20_spill] sm:$0xff] %v9846_v38  ;;  %v1739_v43 = vmax.f32 %v1308_v41, 0.0  ;;  %v1740_v3 = vmax.f32 %v1212_v42, 0.0 }
 0x10b   : > { %11903 = vst [vmem:[#allocation21_spill] sm:$0xff] %v9848_v39 }
 0x10c   : > { %v5252_v45 = vpack.c.bf16 %v1739_v43, %v1738_v40 }
 0x10d   : > { %v1260_v46 = vpop.f32.mrf.mxu2  ;;  %v1165_v54 = vpop.f32.mrf.mxu0 }
 0x10e   : > { %v1261_v50 = vadd.f32 %v1260_v46, %v9833_v30  ;;  %v1309_v51 = vpop.f32.mrf.mxu3  ;;  %v1166_v58 = vadd.f32 %v1165_v54, %v9826_v17  ;;  %v1214_v59 = vpop.f32.mrf.mxu1  ;;  %v5318_v12 = vunpack.c.l.b16 %v5252_v45  ;;  %v5319_v13 = vunpack.c.h.b16 %v5252_v45  ;;  %v7255_v54 = vld [vmem:[#allocation5 + $0x220] sm:$0xf] }
 0x110   : > { %v1310_v0 = vadd.f32 %v1309_v51, %v1261_v50  ;;  %v1215_v2 = vadd.f32 %v1214_v59, %v1166_v58  ;;  %1360 = vmatmul.bf16.gmra.mxu0 %v9755_v32  ;;  %v7063_v50 = vld [vmem:[#allocation5 + $0xa0] sm:$0xf]  ;;  %v8668_v51 = vld [vmem:[#allocation5 + $0xb4] sm:$0xf0] }
 0x111   : > { %1409 = vmatmul.bf16.gmra.mxu1 %v9757_v33  ;;  %v7064_v57 = vor.u32 %v8668_v51, %v7063_v50  ;;  %v8716_v58 = vld [vmem:[#allocation5 + $0x234] sm:$0xf0]  ;;  %v8662_v50 = vld [vmem:[#allocation5 + $0x84] sm:$0xf0]  ;;  %v7231_v51 = vld [vmem:[#allocation5 + $0x1f0] sm:$0xf] }
 0x112   : > { %v1741_v4 = vmax.f32 %v1310_v0, 0.0  ;;  %1458 = vmatmul.bf16.gmra.mxu2 %v9755_v32  ;;  %v1742_v31 = vmax.f32 %v1215_v2, 0.0  ;;  %v7256_v60 = vor.u32 %v8716_v58, %v7255_v54 }
 0x113   : > { %1507 = vmatmul.bf16.gmra.mxu3 %v9757_v33  ;;  %1542 = vmatpush.bf16.msra.mxu0 %v7064_v57  ;;  %v8710_v57 = vld [vmem:[#allocation5 + $0x204] sm:$0xf0] }
 0x114   : > { %v5253_v5 = vpack.c.bf16 %v1741_v4, %v1740_v3  ;;  %1591 = vmatpush.bf16.msra.mxu1 %v7256_v60  ;;  %v8659_v3 = vld [vmem:[#allocation5 + $0x74] sm:$0xf]  ;;  %v7041_v4 = vld [vmem:[#allocation5 + $0x88] sm:$0xf0] }
 0x115   : > { %v1263_v16 = vpop.f32.mrf.mxu2  ;;  %v1167_v22 = vpop.f32.mrf.mxu0 }
 0x116   : > { %v1264_v20 = vadd.f32 %v1263_v16, %v9833_v30  ;;  %v1312_v21 = vpop.f32.mrf.mxu3  ;;  %v5320_v24 = vunpack.c.l.b16 %v5253_v5  ;;  %v5321_v25 = vunpack.c.h.b16 %v5253_v5  ;;  %v1168_v28 = vadd.f32 %v1167_v22, %v9826_v17  ;;  %v1216_v29 = vpop.f32.mrf.mxu1  ;;  %v8707_v5 = vld [vmem:[#allocation5 + $0x1f4] sm:$0xf] }
 0x118   : > { %v1313_v34 = vadd.f32 %v1312_v21, %v1264_v20  ;;  %v9858_v35 = vpack.c.b16 %v5320_v24, %v5318_v12  ;;  %v9860_v36 = vpack.c.b16 %v5321_v25, %v5319_v13  ;;  %v1217_v37 = vadd.f32 %v1216_v29, %v1168_v28  ;;  %v7233_v13 = vld [vmem:[#allocation5 + $0x208] sm:$0xf0] }
 0x119   : > { %v7044_v12 = vor.u32 %v8659_v3, %v7041_v4  ;;  %v7236_v20 = vor.u32 %v8707_v5, %v7233_v13  ;;  %v7017_v3 = vld [vmem:[#allocation5 + $0x58] sm:$0xf0]  ;;  %v8701_v4 = vld [vmem:[#allocation5 + $0x1c4] sm:$0xf] }
 0x11a   : > { %11904 = vst [vmem:[#allocation22_spill] sm:$0xff] %v9858_v35  ;;  %v1743_v40 = vmax.f32 %v1313_v34, 0.0  ;;  %v1744_v0 = vmax.f32 %v1217_v37, 0.0 }
 0x11b   : > { %11905 = vst [vmem:[#allocation23_spill] sm:$0xff] %v9860_v36  ;;  %1641 = vmatpush.bf16.msra.mxu2 %v7044_v12  ;;  %1690 = vmatpush.bf16.msra.mxu3 %v7236_v20  ;;  %v7209_v12 = vld [vmem:[#allocation5 + $0x1d8] sm:$0xf0]  ;;  %v8785_v36 = vld [vmem:[#allocation10 + $0x64] sm:$0xf] }
 0x11c   : > { %v5254_v41 = vpack.c.bf16 %v1743_v40, %v1742_v31 }
 0x11d   : > { %v1265_v42 = vpop.f32.mrf.mxu2  ;;  %v1170_v46 = vpop.f32.mrf.mxu0 }
 0x11e   : > { %v1266_v43 = vadd.f32 %v1265_v42, %v9833_v30  ;;  %v1314_v45 = vpop.f32.mrf.mxu3  ;;  %v1171_v55 = vadd.f32 %v1170_v46, %v9826_v17  ;;  %v1219_v56 = vpop.f32.mrf.mxu1  ;;  %v5322_v9 = vunpack.c.l.b16 %v5254_v41  ;;  %v5323_v10 = vunpack.c.h.b16 %v5254_v41  ;;  %v7039_v46 = vld [vmem:[#allocation5 + $0x70] sm:$0xf] }
 0x120   : > { %v1315_v59 = vadd.f32 %v1314_v45, %v1266_v43  ;;  %v1220_v61 = vadd.f32 %v1219_v56, %v1171_v55  ;;  %1365 = vmatmul.bf16.gmra.mxu0 %v9767_v52  ;;  %v7040_v56 = vor.u32 %v8662_v50, %v7039_v46  ;;  %v7015_v50 = vld [vmem:[#allocation5 + $0x40] sm:$0xf] }
 0x121   : > { %1414 = vmatmul.bf16.gmra.mxu1 %v9769_v53 }
 0x122   : > { %v1745_v1 = vmax.f32 %v1315_v59, 0.0  ;;  %1463 = vmatmul.bf16.gmra.mxu2 %v9767_v52  ;;  %v1746_v25 = vmax.f32 %v1220_v61, 0.0  ;;  %v7232_v59 = vor.u32 %v8710_v57, %v7231_v51  ;;  %1543 = vmatpush.bf16.msra.mxu0 %v7040_v56  ;;  %v8656_v51 = vld [vmem:[#allocation5 + $0x54] sm:$0xf0] }
 0x123   : > { %1512 = vmatmul.bf16.gmra.mxu3 %v9769_v53  ;;  %v7016_v57 = vor.u32 %v8656_v51, %v7015_v50  ;;  %v6991_v50 = vld [vmem:[#allocation5 + $0x10] sm:$0xf]  ;;  %v8650_v51 = vld [vmem:[#allocation5 + $0x24] sm:$0xf0] }
 0x124   : > { %v5255_v2 = vpack.c.bf16 %v1745_v1, %v1744_v0  ;;  %1592 = vmatpush.bf16.msra.mxu1 %v7232_v59 }
 0x125   : > { %v1268_v11 = vpop.f32.mrf.mxu2  ;;  %v1172_v19 = vpop.f32.mrf.mxu0 }
 0x126   : > { %v1269_v16 = vadd.f32 %v1268_v11, %v9833_v30  ;;  %v1317_v18 = vpop.f32.mrf.mxu3  ;;  %v5324_v21 = vunpack.c.l.b16 %v5255_v2  ;;  %v5325_v22 = vunpack.c.h.b16 %v5255_v2  ;;  %v1173_v23 = vadd.f32 %v1172_v19, %v9826_v17  ;;  %v1221_v24 = vpop.f32.mrf.mxu1  ;;  %v8653_v2 = vld [vmem:[#allocation5 + $0x44] sm:$0xf]  ;;  %1544 = vmatpush.bf16.msra.mxu0 %v7016_v57 }
 0x127   : > { %v7020_v11 = vor.u32 %v8653_v2, %v7017_v3  ;;  %v7212_v19 = vor.u32 %v8701_v4, %v7209_v12  ;;  %v8647_v3 = vld [vmem:[#allocation5 + $0x14] sm:$0xf]  ;;  %v6993_v4 = vld [vmem:[#allocation5 + $0x28] sm:$0xf0] }
 0x128   : > { %v1318_v28 = vadd.f32 %v1317_v18, %v1269_v16  ;;  %v9870_v29 = vpack.c.b16 %v5324_v21, %v5322_v9  ;;  %v9872_v31 = vpack.c.b16 %v5325_v22, %v5323_v10  ;;  %v1222_v34 = vadd.f32 %v1221_v24, %v1173_v23 }
 0x129   : > { %1642 = vmatpush.bf16.msra.mxu2 %v7020_v11  ;;  %1691 = vmatpush.bf16.msra.mxu3 %v7212_v19  ;;  %v6996_v12 = vor.u32 %v8647_v3, %v6993_v4 }
 0x12a   : > { %11906 = vst [vmem:[#allocation24_spill] sm:$0xff] %v9870_v29  ;;  %v1747_v37 = vmax.f32 %v1318_v28, 0.0  ;;  %v1748_v61 = vmax.f32 %v1222_v34, 0.0 }
 0x12b   : > { %11907 = vst [vmem:[#allocation25_spill] sm:$0xff] %v9872_v31 }
 0x12c   : > { %v5256_v40 = vpack.c.bf16 %v1747_v37, %v1746_v25 }
 0x12d   : > { %v1270_v41 = vpop.f32.mrf.mxu2  ;;  %v1175_v45 = vpop.f32.mrf.mxu0  ;;  %1643 = vmatpush.bf16.msra.mxu2 %v6996_v12 }
 0x12e   : > { %v1271_v42 = vadd.f32 %v1270_v41, %v9833_v30  ;;  %v1319_v43 = vpop.f32.mrf.mxu3  ;;  %v1176_v54 = vadd.f32 %v1175_v45, %v9826_v17  ;;  %v1224_v55 = vpop.f32.mrf.mxu1  ;;  %v5326_v5 = vunpack.c.l.b16 %v5256_v40  ;;  %v5327_v9 = vunpack.c.h.b16 %v5256_v40 }
 0x130   : > { %v1320_v58 = vadd.f32 %v1319_v43, %v1271_v42  ;;  %v1225_v60 = vadd.f32 %v1224_v55, %v1176_v54  ;;  %1370 = vmatmul.bf16.gmra.mxu0 %v9779_v6  ;;  %v7207_v54 = vld [vmem:[#allocation5 + $0x1c0] sm:$0xf] }
 0x131   : > { %1419 = vmatmul.bf16.gmra.mxu1 %v9781_v7 }
 0x132   : > { %v1749_v0 = vmax.f32 %v1320_v58, 0.0  ;;  %1468 = vmatmul.bf16.gmra.mxu2 %v9779_v6  ;;  %v1750_v24 = vmax.f32 %v1225_v60, 0.0  ;;  %v8704_v58 = vld [vmem:[#allocation5 + $0x1d4] sm:$0xf0] }
 0x133   : > { %1517 = vmatmul.bf16.gmra.mxu3 %v9781_v7  ;;  %v7208_v60 = vor.u32 %v8704_v58, %v7207_v54  ;;  %v7183_v54 = vld [vmem:[#allocation5 + $0x190] sm:$0xf]  ;;  %v6992_v58 = vor.u32 %v8650_v51, %v6991_v50 }
 0x134   : > { %v5257_v1 = vpack.c.bf16 %v1749_v0, %v1748_v61 }
 0x135   : > { %v1273_v10 = vpop.f32.mrf.mxu2  ;;  %v1177_v18 = vpop.f32.mrf.mxu0  ;;  %1593 = vmatpush.bf16.msra.mxu1 %v7208_v60  ;;  %1545 = vmatpush.bf16.msra.mxu0 %v6992_v58 }
 0x136   : > { %v1274_v13 = vadd.f32 %v1273_v10, %v9833_v30  ;;  %v1322_v16 = vpop.f32.mrf.mxu3  ;;  %v5328_v20 = vunpack.c.l.b16 %v5257_v1  ;;  %v5329_v21 = vunpack.c.h.b16 %v5257_v1  ;;  %v1178_v22 = vadd.f32 %v1177_v18, %v9826_v17  ;;  %v1226_v23 = vpop.f32.mrf.mxu1 }
 0x138   : > { %v1323_v25 = vadd.f32 %v1322_v16, %v1274_v13  ;;  %v9882_v28 = vpack.c.b16 %v5328_v20, %v5326_v5  ;;  %v9884_v34 = vpack.c.b16 %v5329_v21, %v5327_v9  ;;  %v1227_v37 = vadd.f32 %v1226_v23, %v1178_v22  ;;  %v8695_v5 = vld [vmem:[#allocation5 + $0x194] sm:$0xf]  ;;  %v7185_v13 = vld [vmem:[#allocation5 + $0x1a8] sm:$0xf0] }
 0x139   : > { %v7188_v20 = vor.u32 %v8695_v5, %v7185_v13 }
 0x13a   : > { %11908 = vst [vmem:[#allocation26_spill] sm:$0xff] %v9882_v28  ;;  %v1751_v40 = vmax.f32 %v1323_v25, 0.0  ;;  %v1752_v0 = vmax.f32 %v1227_v37, 0.0 }
 0x13b   : > { %11909 = vst [vmem:[#allocation27_spill] sm:$0xff] %v9884_v34  ;;  %1692 = vmatpush.bf16.msra.mxu3 %v7188_v20 }
 0x13c   : > { %v5258_v41 = vpack.c.bf16 %v1751_v40, %v1750_v24 }
 0x13d   : > { %v1275_v42 = vpop.f32.mrf.mxu2  ;;  %v1180_v46 = vpop.f32.mrf.mxu0 }
 0x13e   : > { %v1276_v43 = vadd.f32 %v1275_v42, %v9833_v30  ;;  %v1324_v45 = vpop.f32.mrf.mxu3  ;;  %v1181_v55 = vadd.f32 %v1180_v46, %v9826_v17  ;;  %v1229_v56 = vpop.f32.mrf.mxu1  ;;  %v5330_v9 = vunpack.c.l.b16 %v5258_v41  ;;  %v5331_v10 = vunpack.c.h.b16 %v5258_v41 }
 0x140   : > { %v1325_v59 = vadd.f32 %v1324_v45, %v1276_v43  ;;  %v1230_v61 = vadd.f32 %v1229_v56, %v1181_v55  ;;  %1375 = vmatmul.bf16.gmra.mxu0 %v9791_v26 }
 0x141   : > { %1424 = vmatmul.bf16.gmra.mxu1 %v9793_v27 }
 0x142   : > { %v1753_v1 = vmax.f32 %v1325_v59, 0.0  ;;  %1473 = vmatmul.bf16.gmra.mxu2 %v9791_v26  ;;  %v1754_v25 = vmax.f32 %v1230_v61, 0.0  ;;  %v8698_v59 = vld [vmem:[#allocation5 + $0x1a4] sm:$0xf0] }
 0x143   : > { %1522 = vmatmul.bf16.gmra.mxu3 %v9793_v27 }
 0x144   : > { %v5259_v2 = vpack.c.bf16 %v1753_v1, %v1752_v0  ;;  %v7184_v0 = vor.u32 %v8698_v59, %v7183_v54  ;;  %v7479_v59 = vld [vmem:[#allocation8 + $0xf0] sm:$0xf] }
 0x145   : > { %v1278_v11 = vpop.f32.mrf.mxu2  ;;  %v1182_v19 = vpop.f32.mrf.mxu0 }
 0x146   : > { %v1279_v16 = vadd.f32 %v1278_v11, %v9833_v30  ;;  %v1327_v18 = vpop.f32.mrf.mxu3  ;;  %v5332_v21 = vunpack.c.l.b16 %v5259_v2  ;;  %v5333_v22 = vunpack.c.h.b16 %v5259_v2  ;;  %v1183_v23 = vadd.f32 %v1182_v19, %v9826_v17  ;;  %v1231_v24 = vpop.f32.mrf.mxu1  ;;  %1594 = vmatpush.bf16.msra.mxu1 %v7184_v0  ;;  %v7481_v19 = vld [vmem:[#allocation8 + $0xf8] sm:$0xf0] }
 0x148   : > { %v1328_v37 = vadd.f32 %v1327_v18, %v1279_v16  ;;  %v9894_v40 = vpack.c.b16 %v5332_v21, %v5330_v9  ;;  %v9896_v41 = vpack.c.b16 %v5333_v22, %v5331_v10  ;;  %v1232_v42 = vadd.f32 %v1231_v24, %v1183_v23  ;;  %v8755_v9 = vld [vmem:[#allocation8 + $0x74] sm:$0xf]  ;;  %v7417_v10 = vld [vmem:[#allocation8 + $0x78] sm:$0xf0] }
 0x149   : > { %v7420_v16 = vor.u32 %v8755_v9, %v7417_v10  ;;  %v8771_v18 = vld [vmem:[#allocation8 + $0xf4] sm:$0xf] }
 0x14a   : > { %11910 = vst [vmem:[#allocation28_spill] sm:$0xff] %v9894_v40  ;;  %v1755_v43 = vmax.f32 %v1328_v37, 0.0  ;;  %v1756_v3 = vmax.f32 %v1232_v42, 0.0  ;;  %v7484_v23 = vor.u32 %v8771_v18, %v7481_v19 }
 0x14b   : > { %11911 = vst [vmem:[#allocation29_spill] sm:$0xff] %v9896_v41  ;;  %2078 = vmatpush.bf16.msrb.mxu2 %v7420_v16  ;;  %v7409_v16 = vld [vmem:[#allocation8 + $0x68] sm:$0xf0]  ;;  %v7863_v41 = vld [vmem:[#allocation10 + $0x2f0] sm:$0xf] }
 0x14c   : > { %v5260_v45 = vpack.c.bf16 %v1755_v43, %v1754_v25  ;;  %2127 = vmatpush.bf16.msrb.mxu3 %v7484_v23 }
 0x14d   : > { %v1280_v46 = vpop.f32.mrf.mxu2  ;;  %v1185_v57 = vpop.f32.mrf.mxu0 }
 0x14e   : > { %v1281_v55 = vadd.f32 %v1280_v46, %v9833_v30  ;;  %v1329_v56 = vpop.f32.mrf.mxu3  ;;  %v1186_v60 = vadd.f32 %v1185_v57, %v9826_v17  ;;  %v1234_v61 = vpop.f32.mrf.mxu1  ;;  %v5334_v11 = vunpack.c.l.b16 %v5260_v45  ;;  %v5335_v12 = vunpack.c.h.b16 %v5260_v45 }
 0x150   : > { %v1330_v1 = vadd.f32 %v1329_v56, %v1281_v55  ;;  %v1235_v2 = vadd.f32 %v1234_v61, %v1186_v60  ;;  %1380 = vmatmul.bf16.gmra.mxu0 %v9803_v47  ;;  %v7415_v55 = vld [vmem:[#allocation8 + $0x70] sm:$0xf]  ;;  %v8756_v56 = vld [vmem:[#allocation8 + $0x74] sm:$0xf0] }
 0x151   : > { %1429 = vmatmul.bf16.gmra.mxu1 %v9805_v48  ;;  %v7416_v58 = vor.u32 %v8756_v56, %v7415_v55  ;;  %v8772_v60 = vld [vmem:[#allocation8 + $0xf4] sm:$0xf0] }
 0x152   : > { %v1757_v4 = vmax.f32 %v1330_v1, 0.0  ;;  %1478 = vmatmul.bf16.gmra.mxu2 %v9803_v47  ;;  %v1758_v43 = vmax.f32 %v1235_v2, 0.0  ;;  %v7480_v0 = vor.u32 %v8772_v60, %v7479_v59 }
 0x153   : > { %1527 = vmatmul.bf16.gmra.mxu3 %v9805_v48  ;;  %1980 = vmatpush.bf16.msrb.mxu0 %v7416_v58 }
 0x154   : > { %v5261_v5 = vpack.c.bf16 %v1757_v4, %v1756_v3  ;;  %2029 = vmatpush.bf16.msrb.mxu1 %v7480_v0 }
 0x155   : > { %v1283_v13 = vpop.f32.mrf.mxu2  ;;  %v1187_v22 = vpop.f32.mrf.mxu0 }
 0x156   : > { %v1284_v20 = vadd.f32 %v1283_v13, %v9833_v30  ;;  %v1332_v21 = vpop.f32.mrf.mxu3  ;;  %v5336_v24 = vunpack.c.l.b16 %v5261_v5  ;;  %v5337_v25 = vunpack.c.h.b16 %v5261_v5  ;;  %v1188_v37 = vadd.f32 %v1187_v22, %v9826_v17  ;;  %v1236_v42 = vpop.f32.mrf.mxu1  ;;  %v8753_v13 = vld [vmem:[#allocation8 + $0x64] sm:$0xf] }
 0x157   : > { %v7412_v19 = vor.u32 %v8753_v13, %v7409_v16 }
 0x158   : > { %v1333_v46 = vadd.f32 %v1332_v21, %v1284_v20  ;;  %v9906_v50 = vpack.c.b16 %v5336_v24, %v5334_v11  ;;  %v9908_v45 = vpack.c.b16 %v5337_v25, %v5335_v12  ;;  %v1237_v51 = vadd.f32 %v1236_v42, %v1188_v37  ;;  %v8769_v20 = vld [vmem:[#allocation8 + $0xe4] sm:$0xf]  ;;  %v7473_v21 = vld [vmem:[#allocation8 + $0xe8] sm:$0xf0] }
 0x159   : > { %v7476_v24 = vor.u32 %v8769_v20, %v7473_v21  ;;  %2079 = vmatpush.bf16.msrb.mxu2 %v7412_v19 }
 0x15a   : > { %11912 = vst [vmem:[#allocation30_spill] sm:$0xff] %v9906_v50  ;;  %v1759_v54 = vmax.f32 %v1333_v46, 0.0  ;;  %v1760_v11 = vmax.f32 %v1237_v51, 0.0 }
 0x15b   : > { %11913 = vst [vmem:[#allocation31_spill] sm:$0xff] %v9908_v45  ;;  %2128 = vmatpush.bf16.msrb.mxu3 %v7476_v24  ;;  %v7401_v24 = vld [vmem:[#allocation8 + $0x58] sm:$0xf0] }
 0x15c   : > { %v5262_v57 = vpack.c.bf16 %v1759_v54, %v1758_v43  ;;  %v7609_v45 = vld [vmem:[#allocation10 + $0xf8] sm:$0xf0] }
 0x15d   : > { %v1285_v61 = vpop.f32.mrf.mxu2  ;;  %v1190_v2 = vpop.f32.mrf.mxu0 }
 0x15e   : > { %v1286_v1 = vadd.f32 %v1285_v61, %v9833_v30  ;;  %v1334_v3 = vpop.f32.mrf.mxu3  ;;  %v1191_v4 = vadd.f32 %v1190_v2, %v9826_v17  ;;  %v1239_v5 = vpop.f32.mrf.mxu1  ;;  %v5338_v22 = vunpack.c.l.b16 %v5262_v57  ;;  %v5339_v25 = vunpack.c.h.b16 %v5262_v57 }
 0x15f   : > { %v9923_v57 = vperm.slane %v9823_v8, 2 }
 0x160   : > { %v1335_v9 = vadd.f32 %v1334_v3, %v1286_v1  ;;  %v1240_v10 = vadd.f32 %v1239_v5, %v1191_v4  ;;  %1385 = vmatmul.bf16.gmra.mxu0 %v9815_v62  ;;  %v7407_v1 = vld [vmem:[#allocation8 + $0x60] sm:$0xf]  ;;  %v8754_v3 = vld [vmem:[#allocation8 + $0x64] sm:$0xf0] }
 0x161   : > { %1434 = vmatmul.bf16.gmra.mxu1 %v9817_v63  ;;  %v7408_v4 = vor.u32 %v8754_v3, %v7407_v1  ;;  %v7471_v5 = vld [vmem:[#allocation8 + $0xe0] sm:$0xf] }
 0x162   : > { %v1761_v12 = vmax.f32 %v1335_v9, 0.0  ;;  %1483 = vmatmul.bf16.gmra.mxu2 %v9815_v62  ;;  %v1762_v56 = vmax.f32 %v1240_v10, 0.0  ;;  %v8770_v9 = vld [vmem:[#allocation8 + $0xe4] sm:$0xf0] }
 0x163   : > { %1532 = vmatmul.bf16.gmra.mxu3 %v9817_v63  ;;  %1981 = vmatpush.bf16.msrb.mxu0 %v7408_v4 }
 0x164   : > { %v5263_v18 = vpack.c.bf16 %v1761_v12, %v1760_v11  ;;  %v7472_v11 = vor.u32 %v8770_v9, %v7471_v5 }
 0x165   : > { %v1288_v23 = vpop.f32.mrf.mxu2  ;;  %v1192_v43 = vpop.f32.mrf.mxu0 }
 0x166   : > { %v1289_v37 = vadd.f32 %v1288_v23, %v9833_v30  ;;  %v1337_v42 = vpop.f32.mrf.mxu3  ;;  %v5340_v46 = vunpack.c.l.b16 %v5263_v18  ;;  %v5341_v51 = vunpack.c.h.b16 %v5263_v18  ;;  %v1193_v54 = vadd.f32 %v1192_v43, %v9826_v17  ;;  %v1241_v55 = vpop.f32.mrf.mxu1  ;;  %2030 = vmatpush.bf16.msrb.mxu1 %v7472_v11  ;;  %v7465_v43 = vld [vmem:[#allocation8 + $0xd8] sm:$0xf0]  ;;  %v7463_v11 = vld [vmem:[#allocation8 + $0xd0] sm:$0xf] }
 0x167   : > { %v9931_v23 = vperm.slane %v9823_v8, 3 }
 0x168   : > { %v1338_v58 = vadd.f32 %v1337_v42, %v1289_v37  ;;  %v9918_v59 = vpack.c.b16 %v5340_v46, %v5338_v22  ;;  %v9920_v60 = vpack.c.b16 %v5341_v51, %v5339_v25  ;;  %v1242_v61 = vadd.f32 %v1241_v55, %v1193_v54  ;;  %v8767_v25 = vld [vmem:[#allocation8 + $0xd4] sm:$0xf] }
 0x169   : > { %v7468_v54 = vor.u32 %v8767_v25, %v7465_v43  ;;  %v8765_v43 = vld [vmem:[#allocation8 + $0xc4] sm:$0xf] }
 0x16a   : > { %11914 = vst [vmem:[#allocation32_spill] sm:$0xff] %v9918_v59  ;;  %v1763_v0 = vmax.f32 %v1338_v58, 0.0  ;;  %v1764_v21 = vmax.f32 %v1242_v61, 0.0 }
 0x16b   : > { %11915 = vst [vmem:[#allocation33_spill] sm:$0xff] %v9920_v60  ;;  %2129 = vmatpush.bf16.msrb.mxu3 %v7468_v54 }
 0x16c   : > { %v5264_v2 = vpack.c.bf16 %v1763_v0, %v1762_v56 }
 0x16d   : > { %v1290_v17 = vpop.f32.mrf.mxu2  ;;  %v1351_v13 = vpop.f32.mrf.mxu0 }
 0x16e   : > { %v1291_v10 = vadd.f32 %v1290_v17, %v9833_v30  ;;  %v1339_v12 = vpop.f32.mrf.mxu3  ;;  %v1352_v16 = vadd.f32 %v1351_v13, %v9923_v57  ;;  %v1400_v18 = vpop.f32.mrf.mxu1  ;;  %v8751_v30 = vld [vmem:[#allocation8 + $0x54] sm:$0xf]  ;;  %v5342_v46 = vunpack.c.l.b16 %v5264_v2  ;;  %v5343_v55 = vunpack.c.h.b16 %v5264_v2  ;;  %v7399_v2 = vld [vmem:[#allocation8 + $0x50] sm:$0xf]  ;;  %v8752_v17 = vld [vmem:[#allocation8 + $0x54] sm:$0xf0] }
 0x16f   : > { %v7404_v42 = vor.u32 %v8751_v30, %v7401_v24 }
 0x170   : > { %v1340_v19 = vadd.f32 %v1339_v12, %v1291_v10  ;;  %v1401_v20 = vadd.f32 %v1400_v18, %v1352_v16  ;;  %1546 = vmatmul.bf16.vlgmr.msra.gmra.mxu0 %v9731_v44  ;;  %v7400_v10 = vor.u32 %v8752_v17, %v7399_v2  ;;  %v8768_v12 = vld [vmem:[#allocation8 + $0xd4] sm:$0xf0]  ;;  %v8766_v17 = vld [vmem:[#allocation8 + $0xc4] sm:$0xf0] }
 0x171   : > { %1595 = vmatmul.bf16.vlgmr.msra.gmra.mxu1 %v9733_v49  ;;  %2080 = vmatpush.bf16.msrb.mxu2 %v7404_v42  ;;  %v7464_v16 = vor.u32 %v8768_v12, %v7463_v11  ;;  %v7393_v42 = vld [vmem:[#allocation8 + $0x48] sm:$0xf0] }
 0x172   : > { %v1765_v22 = vmax.f32 %v1340_v19, 0.0  ;;  %1644 = vmatmul.bf16.vlgmr.msra.gmra.mxu2 %v9731_v44  ;;  %1982 = vmatpush.bf16.msrb.mxu0 %v7400_v10 }
 0x173   : > { %1693 = vmatmul.bf16.vlgmr.msra.gmra.mxu3 %v9733_v49  ;;  %2031 = vmatpush.bf16.msrb.mxu1 %v7464_v16 }
 0x174   : > { %v5265_v37 = vpack.c.bf16 %v1765_v22, %v1764_v21 }
 0x175   : > { %v1449_v51 = vpop.f32.mrf.mxu2  ;;  %v1353_v61 = vpop.f32.mrf.mxu0 }
 0x176   : > { %v1450_v56 = vadd.f32 %v1449_v51, %v9931_v23  ;;  %v1498_v58 = vpop.f32.mrf.mxu3  ;;  %v5344_v44 = vunpack.c.l.b16 %v5265_v37  ;;  %v5345_v8 = vunpack.c.h.b16 %v5265_v37  ;;  %v1354_v0 = vadd.f32 %v1353_v61, %v9923_v57  ;;  %v1402_v49 = vpop.f32.mrf.mxu1  ;;  %v8749_v37 = vld [vmem:[#allocation8 + $0x44] sm:$0xf]  ;;  %v7457_v51 = vld [vmem:[#allocation8 + $0xc8] sm:$0xf0] }
 0x178   : > { %v1499_v1 = vadd.f32 %v1498_v58, %v1450_v56  ;;  %v9936_v3 = vpack.c.b16 %v5344_v44, %v5342_v46  ;;  %v9938_v4 = vpack.c.b16 %v5345_v8, %v5343_v55  ;;  %v1403_v5 = vadd.f32 %v1402_v49, %v1354_v0 }
 0x179   : > { %v7396_v46 = vor.u32 %v8749_v37, %v7393_v42  ;;  %v7460_v55 = vor.u32 %v8765_v43, %v7457_v51  ;;  %v8763_v37 = vld [vmem:[#allocation8 + $0xb4] sm:$0xf]  ;;  %v7449_v43 = vld [vmem:[#allocation8 + $0xb8] sm:$0xf0] }
 0x17a   : > { %11916 = vst [vmem:[#allocation34_spill] sm:$0xff] %v9936_v3  ;;  %v9940_v9 = vpack.c.bf16 %v1403_v5, %v1401_v20  ;;  %v7455_v5 = vld [vmem:[#allocation8 + $0xc0] sm:$0xf]  ;;  %v7452_v51 = vor.u32 %v8763_v37, %v7449_v43  ;;  %v7441_v37 = vld [vmem:[#allocation8 + $0xa8] sm:$0xf0] }
 0x17b   : > { %11917 = vst [vmem:[#allocation35_spill] sm:$0xff] %v9938_v4  ;;  %2081 = vmatpush.bf16.msrb.mxu2 %v7396_v46  ;;  %2130 = vmatpush.bf16.msrb.mxu3 %v7460_v55  ;;  %v7456_v10 = vor.u32 %v8766_v17, %v7455_v5  ;;  %v8790_v3 = vld [vmem:[#allocation10 + $0x84] sm:$0xf0] }
 0x17d   : > { %v1451_v13 = vpop.f32.mrf.mxu2  ;;  %v1356_v21 = vpop.f32.mrf.mxu0  ;;  %2032 = vmatpush.bf16.msrb.mxu1 %v7456_v10 }
 0x17e   : > { %v1452_v18 = vadd.f32 %v1451_v13, %v9931_v23  ;;  %v1500_v19 = vpop.f32.mrf.mxu3  ;;  %v1357_v22 = vadd.f32 %v1356_v21, %v9923_v57  ;;  %v1405_v30 = vpop.f32.mrf.mxu1 }
 0x17f   : > { %2131 = vmatpush.bf16.msrb.mxu3 %v7452_v51 }
 0x180   : > { %v1501_v24 = vadd.f32 %v1500_v19, %v1452_v18  ;;  %v1406_v25 = vadd.f32 %v1405_v30, %v1357_v22  ;;  %1551 = vmatmul.bf16.gmra.mxu0 %v9743_v14 }
 0x181   : > { %1600 = vmatmul.bf16.gmra.mxu1 %v9745_v15 }
 0x182   : > { %v9945_v20 = vpack.c.bf16 %v1501_v24, %v1499_v1  ;;  %1649 = vmatmul.bf16.gmra.mxu2 %v9743_v14  ;;  %v8750_v1 = vld [vmem:[#allocation8 + $0x44] sm:$0xf0]  ;;  %v8747_v24 = vld [vmem:[#allocation8 + $0x34] sm:$0xf] }
 0x183   : > { %1698 = vmatmul.bf16.gmra.mxu3 %v9745_v15  ;;  %v7391_v15 = vld [vmem:[#allocation8 + $0x40] sm:$0xf] }
 0x184   : > { %v7392_v2 = vor.u32 %v8750_v1, %v7391_v15  ;;  %v8764_v1 = vld [vmem:[#allocation8 + $0xb4] sm:$0xf0] }
 0x185   : > { %v1454_v54 = vpop.f32.mrf.mxu2  ;;  %v1358_v61 = vpop.f32.mrf.mxu0 }
 0x186   : > { %v1455_v56 = vadd.f32 %v1454_v54, %v9931_v23  ;;  %v1503_v58 = vpop.f32.mrf.mxu3  ;;  %v1359_v44 = vadd.f32 %v1358_v61, %v9923_v57  ;;  %v1407_v8 = vpop.f32.mrf.mxu1  ;;  %1983 = vmatpush.bf16.msrb.mxu0 %v7392_v2 }
 0x188   : > { %v1504_v0 = vadd.f32 %v1503_v58, %v1455_v56  ;;  %v1408_v14 = vadd.f32 %v1407_v8, %v1359_v44 }
 0x18a   : > { %v9952_v49 = vpack.c.bf16 %v1408_v14, %v1406_v25  ;;  %v7385_v25 = vld [vmem:[#allocation8 + $0x38] sm:$0xf0]  ;;  %v7447_v14 = vld [vmem:[#allocation8 + $0xb0] sm:$0xf] }
 0x18b   : > { %v7388_v42 = vor.u32 %v8747_v24, %v7385_v25  ;;  %v7448_v2 = vor.u32 %v8764_v1, %v7447_v14  ;;  %v8761_v24 = vld [vmem:[#allocation8 + $0xa4] sm:$0xf] }
 0x18c   : > { %v7444_v43 = vor.u32 %v8761_v24, %v7441_v37  ;;  %v7433_v24 = vld [vmem:[#allocation8 + $0x98] sm:$0xf0] }
 0x18d   : > { %v1456_v11 = vpop.f32.mrf.mxu2  ;;  %v1361_v16 = vpop.f32.mrf.mxu0  ;;  %2082 = vmatpush.bf16.msrb.mxu2 %v7388_v42  ;;  %2033 = vmatpush.bf16.msrb.mxu1 %v7448_v2 }
 0x18e   : > { %v1457_v12 = vadd.f32 %v1456_v11, %v9931_v23  ;;  %v1505_v13 = vpop.f32.mrf.mxu3  ;;  %v1362_v18 = vadd.f32 %v1361_v16, %v9923_v57  ;;  %v1410_v19 = vpop.f32.mrf.mxu1  ;;  %2132 = vmatpush.bf16.msrb.mxu3 %v7444_v43 }
 0x190   : > { %v1506_v21 = vadd.f32 %v1505_v13, %v1457_v12  ;;  %v1411_v22 = vadd.f32 %v1410_v19, %v1362_v18  ;;  %1556 = vmatmul.bf16.gmra.mxu0 %v9755_v32 }
 0x191   : > { %1605 = vmatmul.bf16.gmra.mxu1 %v9757_v33 }
 0x192   : > { %v9957_v30 = vpack.c.bf16 %v1506_v21, %v1504_v0  ;;  %1654 = vmatmul.bf16.gmra.mxu2 %v9755_v32  ;;  %v8748_v0 = vld [vmem:[#allocation8 + $0x34] sm:$0xf0]  ;;  %v8745_v21 = vld [vmem:[#allocation8 + $0x24] sm:$0xf] }
 0x193   : > { %1703 = vmatmul.bf16.gmra.mxu3 %v9757_v33  ;;  %v7383_v33 = vld [vmem:[#allocation8 + $0x30] sm:$0xf] }
 0x194   : > { %v7384_v15 = vor.u32 %v8748_v0, %v7383_v33  ;;  %v8762_v0 = vld [vmem:[#allocation8 + $0xa4] sm:$0xf0] }
 0x195   : > { %v1459_v46 = vpop.f32.mrf.mxu2  ;;  %v1363_v56 = vpop.f32.mrf.mxu0 }
 0x196   : > { %v1460_v54 = vadd.f32 %v1459_v46, %v9931_v23  ;;  %v1508_v55 = vpop.f32.mrf.mxu3  ;;  %v1364_v58 = vadd.f32 %v1363_v56, %v9923_v57  ;;  %v1412_v61 = vpop.f32.mrf.mxu1  ;;  %1984 = vmatpush.bf16.msrb.mxu0 %v7384_v15 }
 0x198   : > { %v1509_v44 = vadd.f32 %v1508_v55, %v1460_v54  ;;  %v1413_v32 = vadd.f32 %v1412_v61, %v1364_v58 }
 0x19a   : > { %v9964_v8 = vpack.c.bf16 %v1413_v32, %v1411_v22  ;;  %v7377_v22 = vld [vmem:[#allocation8 + $0x28] sm:$0xf0]  ;;  %v7439_v32 = vld [vmem:[#allocation8 + $0xa0] sm:$0xf] }
 0x19b   : > { %v7380_v25 = vor.u32 %v8745_v21, %v7377_v22  ;;  %v7440_v15 = vor.u32 %v8762_v0, %v7439_v32  ;;  %v8759_v21 = vld [vmem:[#allocation8 + $0x94] sm:$0xf] }
 0x19c   : > { %v7436_v37 = vor.u32 %v8759_v21, %v7433_v24  ;;  %v7425_v21 = vld [vmem:[#allocation8 + $0x88] sm:$0xf0] }
 0x19d   : > { %v1461_v5 = vpop.f32.mrf.mxu2  ;;  %v1366_v10 = vpop.f32.mrf.mxu0  ;;  %2083 = vmatpush.bf16.msrb.mxu2 %v7380_v25  ;;  %2034 = vmatpush.bf16.msrb.mxu1 %v7440_v15 }
 0x19e   : > { %v1462_v17 = vadd.f32 %v1461_v5, %v9931_v23  ;;  %v1510_v11 = vpop.f32.mrf.mxu3  ;;  %v1367_v12 = vadd.f32 %v1366_v10, %v9923_v57  ;;  %v1415_v13 = vpop.f32.mrf.mxu1  ;;  %2133 = vmatpush.bf16.msrb.mxu3 %v7436_v37 }
 0x1a0   : > { %v1511_v16 = vadd.f32 %v1510_v11, %v1462_v17  ;;  %v1416_v18 = vadd.f32 %v1415_v13, %v1367_v12  ;;  %1561 = vmatmul.bf16.gmra.mxu0 %v9767_v52 }
 0x1a1   : > { %1610 = vmatmul.bf16.gmra.mxu1 %v9769_v53 }
 0x1a2   : > { %v9969_v19 = vpack.c.bf16 %v1511_v16, %v1509_v44  ;;  %1659 = vmatmul.bf16.gmra.mxu2 %v9767_v52  ;;  %v8746_v44 = vld [vmem:[#allocation8 + $0x24] sm:$0xf0]  ;;  %v8743_v16 = vld [vmem:[#allocation8 + $0x14] sm:$0xf] }
 0x1a3   : > { %1708 = vmatmul.bf16.gmra.mxu3 %v9769_v53  ;;  %v7375_v53 = vld [vmem:[#allocation8 + $0x20] sm:$0xf] }
 0x1a4   : > { %v7376_v33 = vor.u32 %v8746_v44, %v7375_v53  ;;  %v8760_v44 = vld [vmem:[#allocation8 + $0x94] sm:$0xf0] }
 0x1a5   : > { %v1464_v42 = vpop.f32.mrf.mxu2  ;;  %v1368_v54 = vpop.f32.mrf.mxu0 }
 0x1a6   : > { %v1465_v46 = vadd.f32 %v1464_v42, %v9931_v23  ;;  %v1513_v51 = vpop.f32.mrf.mxu3  ;;  %v1369_v55 = vadd.f32 %v1368_v54, %v9923_v57  ;;  %v1417_v56 = vpop.f32.mrf.mxu1  ;;  %1985 = vmatpush.bf16.msrb.mxu0 %v7376_v33 }
 0x1a8   : > { %v1514_v58 = vadd.f32 %v1513_v51, %v1465_v46  ;;  %v1418_v52 = vadd.f32 %v1417_v56, %v1369_v55 }
 0x1aa   : > { %v9976_v61 = vpack.c.bf16 %v1418_v52, %v1416_v18  ;;  %v7369_v18 = vld [vmem:[#allocation8 + $0x18] sm:$0xf0]  ;;  %v7431_v52 = vld [vmem:[#allocation8 + $0x90] sm:$0xf] }
 0x1ab   : > { %v7372_v22 = vor.u32 %v8743_v16, %v7369_v18  ;;  %v7432_v33 = vor.u32 %v8760_v44, %v7431_v52  ;;  %v8757_v16 = vld [vmem:[#allocation8 + $0x84] sm:$0xf] }
 0x1ac   : > { %v7428_v24 = vor.u32 %v8757_v16, %v7425_v21 }
 0x1ad   : > { %v1466_v14 = vpop.f32.mrf.mxu2  ;;  %v1371_v2 = vpop.f32.mrf.mxu0  ;;  %2084 = vmatpush.bf16.msrb.mxu2 %v7372_v22  ;;  %2035 = vmatpush.bf16.msrb.mxu1 %v7432_v33 }
 0x1ae   : > { %v1467_v1 = vadd.f32 %v1466_v14, %v9931_v23  ;;  %v1515_v5 = vpop.f32.mrf.mxu3  ;;  %v1372_v17 = vadd.f32 %v1371_v2, %v9923_v57  ;;  %v1420_v11 = vpop.f32.mrf.mxu1  ;;  %2134 = vmatpush.bf16.msrb.mxu3 %v7428_v24 }
 0x1b0   : > { %v1516_v10 = vadd.f32 %v1515_v5, %v1467_v1  ;;  %v1421_v12 = vadd.f32 %v1420_v11, %v1372_v17  ;;  %1566 = vmatmul.bf16.gmra.mxu0 %v9779_v6 }
 0x1b1   : > { %1615 = vmatmul.bf16.gmra.mxu1 %v9781_v7 }
 0x1b2   : > { %v9981_v13 = vpack.c.bf16 %v1516_v10, %v1514_v58  ;;  %1664 = vmatmul.bf16.gmra.mxu2 %v9779_v6  ;;  %v8744_v58 = vld [vmem:[#allocation8 + $0x14] sm:$0xf0]  ;;  %v8741_v10 = vld [vmem:[#allocation8 + $0x4] sm:$0xf] }
 0x1b3   : > { %1713 = vmatmul.bf16.gmra.mxu3 %v9781_v7  ;;  %v7367_v7 = vld [vmem:[#allocation8 + $0x10] sm:$0xf] }
 0x1b4   : > { %v7368_v53 = vor.u32 %v8744_v58, %v7367_v7  ;;  %v8758_v58 = vld [vmem:[#allocation8 + $0x84] sm:$0xf0] }
 0x1b5   : > { %v1469_v25 = vpop.f32.mrf.mxu2  ;;  %v1373_v46 = vpop.f32.mrf.mxu0 }
 0x1b6   : > { %v1470_v42 = vadd.f32 %v1469_v25, %v9931_v23  ;;  %v1518_v43 = vpop.f32.mrf.mxu3  ;;  %v1374_v51 = vadd.f32 %v1373_v46, %v9923_v57  ;;  %v1422_v54 = vpop.f32.mrf.mxu1  ;;  %1986 = vmatpush.bf16.msrb.mxu0 %v7368_v53 }
 0x1b8   : > { %v1519_v55 = vadd.f32 %v1518_v43, %v1470_v42  ;;  %v1423_v6 = vadd.f32 %v1422_v54, %v1374_v51 }
 0x1ba   : > { %v9988_v56 = vpack.c.bf16 %v1423_v6, %v1421_v12  ;;  %v7361_v12 = vld [vmem:[#allocation8 + $0x8] sm:$0xf0]  ;;  %v7423_v6 = vld [vmem:[#allocation8 + $0x80] sm:$0xf] }
 0x1bb   : > { %v7364_v18 = vor.u32 %v8741_v10, %v7361_v12  ;;  %v7424_v53 = vor.u32 %v8758_v58, %v7423_v6 }
 0x1bd   : > { %v1471_v32 = vpop.f32.mrf.mxu2  ;;  %v1376_v15 = vpop.f32.mrf.mxu0  ;;  %2085 = vmatpush.bf16.msrb.mxu2 %v7364_v18  ;;  %2036 = vmatpush.bf16.msrb.mxu1 %v7424_v53 }
 0x1be   : > { %v1472_v0 = vadd.f32 %v1471_v32, %v9931_v23  ;;  %v1520_v14 = vpop.f32.mrf.mxu3  ;;  %v1377_v1 = vadd.f32 %v1376_v15, %v9923_v57  ;;  %v1425_v5 = vpop.f32.mrf.mxu1 }
 0x1c0   : > { %v1521_v2 = vadd.f32 %v1520_v14, %v1472_v0  ;;  %v1426_v17 = vadd.f32 %v1425_v5, %v1377_v1  ;;  %1571 = vmatmul.bf16.gmra.mxu0 %v9791_v26 }
 0x1c1   : > { %1620 = vmatmul.bf16.gmra.mxu1 %v9793_v27 }
 0x1c2   : > { %v9993_v11 = vpack.c.bf16 %v1521_v2, %v1519_v55  ;;  %1669 = vmatmul.bf16.gmra.mxu2 %v9791_v26  ;;  %v8742_v55 = vld [vmem:[#allocation8 + $0x4] sm:$0xf0] }
 0x1c3   : > { %1718 = vmatmul.bf16.gmra.mxu3 %v9793_v27  ;;  %v7359_v27 = vld [vmem:[#allocation8] sm:$0xf] }
 0x1c4   : > { %v7360_v7 = vor.u32 %v8742_v55, %v7359_v27 }
 0x1c5   : > { %v1474_v22 = vpop.f32.mrf.mxu2  ;;  %v1378_v42 = vpop.f32.mrf.mxu0 }
 0x1c6   : > { %v1475_v25 = vadd.f32 %v1474_v22, %v9931_v23  ;;  %v1523_v37 = vpop.f32.mrf.mxu3  ;;  %v1379_v43 = vadd.f32 %v1378_v42, %v9923_v57  ;;  %v1427_v46 = vpop.f32.mrf.mxu1  ;;  %1987 = vmatpush.bf16.msrb.mxu0 %v7360_v7 }
 0x1c8   : > { %v1524_v51 = vadd.f32 %v1523_v37, %v1475_v25  ;;  %v1428_v26 = vadd.f32 %v1427_v46, %v1379_v43 }
 0x1ca   : > { %v10000_v54 = vpack.c.bf16 %v1428_v26, %v1426_v17 }
 0x1cd   : > { %v1476_v52 = vpop.f32.mrf.mxu2  ;;  %v1381_v33 = vpop.f32.mrf.mxu0 }
 0x1ce   : > { %v1477_v44 = vadd.f32 %v1476_v52, %v9931_v23  ;;  %v1525_v32 = vpop.f32.mrf.mxu3  ;;  %v1382_v0 = vadd.f32 %v1381_v33, %v9923_v57  ;;  %v1430_v14 = vpop.f32.mrf.mxu1  ;;  %v9178_v33 = vld [vmem:[#allocation7] sm:$0x3f] }
 0x1d0   : > { %v1526_v15 = vadd.f32 %v1525_v32, %v1477_v44  ;;  %v1431_v1 = vadd.f32 %v1430_v14, %v1382_v0  ;;  %1576 = vmatmul.bf16.gmra.mxu0 %v9803_v47  ;;  %v10026_v0 = vperm.slane %v9178_v33, 4 }
 0x1d1   : > { %1625 = vmatmul.bf16.gmra.mxu1 %v9805_v48 }
 0x1d2   : > { %v10005_v5 = vpack.c.bf16 %v1526_v15, %v1524_v51  ;;  %1674 = vmatmul.bf16.gmra.mxu2 %v9803_v47 }
 0x1d3   : > { %1723 = vmatmul.bf16.gmra.mxu3 %v9805_v48 }
 0x1d5   : > { %v1479_v2 = vpop.f32.mrf.mxu2  ;;  %v1383_v12 = vpop.f32.mrf.mxu0 }
 0x1d6   : > { %v1480_v17 = vadd.f32 %v1479_v2, %v9931_v23  ;;  %v1528_v10 = vpop.f32.mrf.mxu3  ;;  %v1384_v16 = vadd.f32 %v1383_v12, %v9923_v57  ;;  %v1432_v18 = vpop.f32.mrf.mxu1  ;;  %v10035_v12 = vperm.slane %v9178_v33, 5 }
 0x1d8   : > { %v1529_v21 = vadd.f32 %v1528_v10, %v1480_v17  ;;  %v1433_v22 = vadd.f32 %v1432_v18, %v1384_v16  ;;  %v8820_v16 = vld [vmem:[#allocation10 + $0x174] sm:$0xf0]  ;;  %v7543_v18 = vld [vmem:[#allocation10 + $0x70] sm:$0xf] }
 0x1da   : > { %v10012_v24 = vpack.c.bf16 %v1433_v22, %v1431_v1 }
 0x1dd   : > { %v1481_v25 = vpop.f32.mrf.mxu2  ;;  %v1386_v43 = vpop.f32.mrf.mxu0 }
 0x1de   : > { %v1482_v37 = vadd.f32 %v1481_v25, %v9931_v23  ;;  %v1530_v42 = vpop.f32.mrf.mxu3  ;;  %v1387_v47 = vadd.f32 %v1386_v43, %v9923_v57  ;;  %v1435_v48 = vpop.f32.mrf.mxu1  ;;  %v8788_v25 = vld [vmem:[#allocation10 + $0x74] sm:$0xf0] }
 0x1e0   : > { %v1531_v46 = vadd.f32 %v1530_v42, %v1482_v37  ;;  %v1436_v51 = vadd.f32 %v1435_v48, %v1387_v47  ;;  %1581 = vmatmul.bf16.gmra.mxu0 %v9815_v62  ;;  %v7735_v37 = vld [vmem:[#allocation10 + $0x1f0] sm:$0xf]  ;;  %v8836_v42 = vld [vmem:[#allocation10 + $0x1f4] sm:$0xf0] }
 0x1e1   : > { %1630 = vmatmul.bf16.gmra.mxu1 %v9817_v63 }
 0x1e2   : > { %v10017_v26 = vpack.c.bf16 %v1531_v46, %v1529_v21  ;;  %1679 = vmatmul.bf16.gmra.mxu2 %v9815_v62  ;;  %v7544_v46 = vor.u32 %v8788_v25, %v7543_v18  ;;  %v7663_v18 = vld [vmem:[#allocation10 + $0x160] sm:$0xf] }
 0x1e3   : > { %1728 = vmatmul.bf16.gmra.mxu3 %v9817_v63 }
 0x1e4   : > { %3124 = vmatpush.bf16.msra.mxu0 %v7544_v46 }
 0x1e5   : > { %v1484_v27 = vpop.f32.mrf.mxu2  ;;  %v1388_v7 = vpop.f32.mrf.mxu0 }
 0x1e6   : > { %v1485_v55 = vadd.f32 %v1484_v27, %v9931_v23  ;;  %v1533_v6 = vpop.f32.mrf.mxu3  ;;  %v1389_v58 = vadd.f32 %v1388_v7, %v9923_v57  ;;  %v1437_v52 = vpop.f32.mrf.mxu1  ;;  %v7607_v27 = vld [vmem:[#allocation10 + $0xf0] sm:$0xf] }
 0x1e8   : > { %v1534_v53 = vadd.f32 %v1533_v6, %v1485_v55  ;;  %v1438_v44 = vadd.f32 %v1437_v52, %v1389_v58 }
 0x1ea   : > { %v10024_v32 = vpack.c.bf16 %v1438_v44, %v1436_v51  ;;  %v7736_v51 = vor.u32 %v8836_v42, %v7735_v37  ;;  %v8786_v42 = vld [vmem:[#allocation10 + $0x64] sm:$0xf0] }
 0x1ec   : > { %3271 = vmatpush.bf16.msra.mxu3 %v7736_v51 }
 0x1ed   : > { %v1486_v14 = vpop.f32.mrf.mxu2  ;;  %v1547_v63 = vpop.f32.mrf.mxu0 }
 0x1ee   : > { %v1487_v62 = vadd.f32 %v1486_v14, %v9931_v23  ;;  %v1535_v15 = vpop.f32.mrf.mxu3  ;;  %v1548_v1 = vadd.f32 %v1547_v63, %v10026_v0  ;;  %v1596_v2 = vpop.f32.mrf.mxu1  ;;  %v7671_v23 = vld [vmem:[#allocation10 + $0x170] sm:$0xf] }
 0x1ef   : > { %v7672_v22 = vor.u32 %v8820_v16, %v7671_v23 }
 0x1f0   : > { %v1536_v17 = vadd.f32 %v1535_v15, %v1487_v62  ;;  %v1597_v10 = vadd.f32 %v1596_v2, %v1548_v1  ;;  %1988 = vmatmul.bf16.vlgmr.msrb.gmra.mxu0 %v9940_v9 }
 0x1f1   : > { %2037 = vmatmul.bf16.vlgmr.msrb.gmra.mxu1 %v9945_v20  ;;  %3222 = vmatpush.bf16.msra.mxu2 %v7672_v22  ;;  %v7535_v22 = vld [vmem:[#allocation10 + $0x60] sm:$0xf] }
 0x1f2   : > { %v10031_v57 = vpack.c.bf16 %v1536_v17, %v1534_v53  ;;  %2086 = vmatmul.bf16.vlgmr.msrb.gmra.mxu2 %v9940_v9  ;;  %v8804_v9 = vld [vmem:[#allocation10 + $0xf4] sm:$0xf0] }
 0x1f3   : > { %2135 = vmatmul.bf16.vlgmr.msrb.gmra.mxu3 %v9945_v20  ;;  %v7608_v20 = vor.u32 %v8804_v9, %v7607_v27  ;;  %v7536_v27 = vor.u32 %v8786_v42, %v7535_v22  ;;  %v7599_v9 = vld [vmem:[#allocation10 + $0xe0] sm:$0xf] }
 0x1f5   : > { %v1645_v21 = vpop.f32.mrf.mxu2  ;;  %v1549_v48 = vpop.f32.mrf.mxu0  ;;  %3173 = vmatpush.bf16.msra.mxu1 %v7608_v20  ;;  %3125 = vmatpush.bf16.msra.mxu0 %v7536_v27  ;;  %v7527_v27 = vld [vmem:[#allocation10 + $0x50] sm:$0xf] }
 0x1f6   : > { %v1646_v43 = vadd.f32 %v1645_v21, %v10035_v12  ;;  %v1694_v47 = vpop.f32.mrf.mxu3  ;;  %v1550_v55 = vadd.f32 %v1549_v48, %v10026_v0  ;;  %v1598_v6 = vpop.f32.mrf.mxu1  ;;  %v8818_v21 = vld [vmem:[#allocation10 + $0x164] sm:$0xf0] }
 0x1f7   : > { %v7664_v37 = vor.u32 %v8818_v21, %v7663_v18 }
 0x1f8   : > { %v1695_v7 = vadd.f32 %v1694_v47, %v1646_v43  ;;  %v1599_v58 = vadd.f32 %v1598_v6, %v1550_v55  ;;  %v7727_v43 = vld [vmem:[#allocation10 + $0x1e0] sm:$0xf]  ;;  %v8834_v47 = vld [vmem:[#allocation10 + $0x1e4] sm:$0xf0] }
 0x1f9   : > { %v8802_v55 = vld [vmem:[#allocation10 + $0xe4] sm:$0xf0]  ;;  %3223 = vmatpush.bf16.msra.mxu2 %v7664_v37 }
 0x1fa   : > { %v3744_v52 = vpack.c.bf16 %v1695_v7, %v1597_v10  ;;  %v7728_v7 = vor.u32 %v8834_v47, %v7727_v43 }
 0x1fc   : > { %v3776_v17 = vunpack.c.l.b16 %v3744_v52  ;;  %v3777_v10 = vunpack.c.h.b16 %v3744_v52  ;;  %3272 = vmatpush.bf16.msra.mxu3 %v7728_v7  ;;  %v7719_v7 = vld [vmem:[#allocation10 + $0x1d0] sm:$0xf] }
 0x1fd   : > { %v1647_v53 = vpop.f32.mrf.mxu2  ;;  %v1552_v14 = vpop.f32.mrf.mxu0 }
 0x1fe   : > { %v1648_v44 = vadd.f32 %v1647_v53, %v10035_v12  ;;  %v1696_v33 = vpop.f32.mrf.mxu3  ;;  %v1553_v62 = vadd.f32 %v1552_v14, %v10026_v0  ;;  %v1601_v15 = vpop.f32.mrf.mxu1 }
 0x200   : > { %v1697_v63 = vadd.f32 %v1696_v33, %v1648_v44  ;;  %v1602_v1 = vadd.f32 %v1601_v15, %v1553_v62  ;;  %1993 = vmatmul.bf16.gmra.mxu0 %v9952_v49 }
 0x201   : > { %2042 = vmatmul.bf16.gmra.mxu1 %v9957_v30 }
 0x202   : > { %v3745_v2 = vpack.c.bf16 %v1697_v63, %v1599_v58  ;;  %2091 = vmatmul.bf16.gmra.mxu2 %v9952_v49  ;;  %v7600_v58 = vor.u32 %v8802_v55, %v7599_v9 }
 0x203   : > { %2140 = vmatmul.bf16.gmra.mxu3 %v9957_v30 }
 0x204   : > { %v3778_v23 = vunpack.c.l.b16 %v3745_v2  ;;  %v3779_v16 = vunpack.c.h.b16 %v3745_v2  ;;  %3174 = vmatpush.bf16.msra.mxu1 %v7600_v58  ;;  %v8832_v58 = vld [vmem:[#allocation10 + $0x1d4] sm:$0xf0] }
 0x205   : > { %v1650_v25 = vpop.f32.mrf.mxu2  ;;  %v1554_v30 = vpop.f32.mrf.mxu0 }
 0x206   : > { %v10046_v48 = vpack.c.b16 %v3778_v23, %v3776_v17  ;;  %v10048_v46 = vpack.c.b16 %v3779_v16, %v3777_v10  ;;  %v1651_v49 = vadd.f32 %v1650_v25, %v10035_v12  ;;  %v1699_v51 = vpop.f32.mrf.mxu3  ;;  %v1555_v6 = vadd.f32 %v1554_v30, %v10026_v0  ;;  %v1603_v20 = vpop.f32.mrf.mxu1  ;;  %v8816_v30 = vld [vmem:[#allocation10 + $0x154] sm:$0xf0] }
 0x208   : > { %11918 = vst [vmem:[#allocation36_spill] sm:$0xff] %v10046_v48  ;;  %v1700_v52 = vadd.f32 %v1699_v51, %v1651_v49  ;;  %v11789_v53 = vshll.u32 %v10046_v48, 16  ;;  %v1604_v44 = vadd.f32 %v1603_v20, %v1555_v6  ;;  %v11784_v33 = vshll.u32 %v10048_v46, 16  ;;  %v7655_v51 = vld [vmem:[#allocation10 + $0x150] sm:$0xf] }
 0x209   : > { %11919 = vst [vmem:[#allocation37_spill] sm:$0xff] %v10048_v46  ;;  %v11795_v15 = vshrl.u32 %v10046_v48, 16  ;;  %v11790_v63 = vshrl.u32 %v10048_v46, 16  ;;  %v7656_v6 = vor.u32 %v8816_v30, %v7655_v51  ;;  %v8784_v20 = vld [vmem:[#allocation10 + $0x54] sm:$0xf0] }
 0x20a   : > { %v3746_v14 = vpack.c.bf16 %v1700_v52, %v1602_v1  ;;  %v3968_v62 = vrot.slane %v11789_v53, 1  ;;  %v3970_v2 = vrot.slane %v11784_v33, 1 }
 0x20b   : > { %3224 = vmatpush.bf16.msra.mxu2 %v7656_v6 }
 0x20c   : > { %v10062_v10 = vor.u32 %v3968_v62, %v11795_v15  ;;  %v10066_v23 = vor.u32 %v3970_v2, %v11790_v63  ;;  %v3780_v43 = vunpack.c.l.b16 %v3746_v14  ;;  %v3781_v9 = vunpack.c.h.b16 %v3746_v14 }
 0x20d   : > { %v1652_v17 = vpop.f32.mrf.mxu2  ;;  %v1557_v18 = vpop.f32.mrf.mxu0  ;;  %v7528_v2 = vor.u32 %v8784_v20, %v7527_v27 }
 0x20e   : > { %11920 = vst [vmem:[#allocation38_spill] sm:$0xff] %v10062_v10  ;;  %v1653_v1 = vadd.f32 %v1652_v17, %v10035_v12  ;;  %v1701_v16 = vpop.f32.mrf.mxu3  ;;  %v1558_v21 = vadd.f32 %v1557_v18, %v10026_v0  ;;  %v1606_v22 = vpop.f32.mrf.mxu1  ;;  %v7591_v17 = vld [vmem:[#allocation10 + $0xd0] sm:$0xf] }
 0x20f   : > { %11921 = vst [vmem:[#allocation39_spill] sm:$0xff] %v10066_v23  ;;  %3126 = vmatpush.bf16.msra.mxu0 %v7528_v2  ;;  %v8860_v23 = vld [vmem:[#allocation10 + $0x2b4] sm:$0xf0] }
 0x210   : > { %v1702_v25 = vadd.f32 %v1701_v16, %v1653_v1  ;;  %v1607_v37 = vadd.f32 %v1606_v22, %v1558_v21  ;;  %1998 = vmatmul.bf16.gmra.mxu0 %v9964_v8 }
 0x211   : > { %2047 = vmatmul.bf16.gmra.mxu1 %v9969_v19 }
 0x212   : > { %v3747_v42 = vpack.c.bf16 %v1702_v25, %v1604_v44  ;;  %2096 = vmatmul.bf16.gmra.mxu2 %v9964_v8  ;;  %v7720_v8 = vor.u32 %v8832_v58, %v7719_v7 }
 0x213   : > { %2145 = vmatmul.bf16.gmra.mxu3 %v9969_v19  ;;  %v8800_v19 = vld [vmem:[#allocation10 + $0xd4] sm:$0xf0] }
 0x214   : > { %v3782_v47 = vunpack.c.l.b16 %v3747_v42  ;;  %v3783_v49 = vunpack.c.h.b16 %v3747_v42  ;;  %v7592_v14 = vor.u32 %v8800_v19, %v7591_v17  ;;  %3273 = vmatpush.bf16.msra.mxu3 %v7720_v8 }
 0x215   : > { %v1655_v55 = vpop.f32.mrf.mxu2  ;;  %v1559_v62 = vpop.f32.mrf.mxu0 }
 0x216   : > { %v1656_v52 = vadd.f32 %v1655_v55, %v10035_v12  ;;  %v1704_v44 = vpop.f32.mrf.mxu3  ;;  %v10075_v1 = vpack.c.b16 %v3782_v47, %v3780_v43  ;;  %v1560_v16 = vadd.f32 %v1559_v62, %v10026_v0  ;;  %v1608_v18 = vpop.f32.mrf.mxu1  ;;  %v10078_v21 = vpack.c.b16 %v3783_v49, %v3781_v9  ;;  %3175 = vmatpush.bf16.msra.mxu1 %v7592_v14  ;;  %v7519_v14 = vld [vmem:[#allocation10 + $0x40] sm:$0xf] }
 0x218   : > { %11922 = vst [vmem:[#allocation40_spill] sm:$0xff] %v10075_v1  ;;  %v1705_v22 = vadd.f32 %v1704_v44, %v1656_v52  ;;  %v11777_v25 = vshll.u32 %v10075_v1, 16  ;;  %v1609_v42 = vadd.f32 %v1608_v18, %v1560_v16  ;;  %v11776_v51 = vshll.u32 %v10078_v21, 16  ;;  %v7647_v16 = vld [vmem:[#allocation10 + $0x140] sm:$0xf] }
 0x219   : > { %11923 = vst [vmem:[#allocation41_spill] sm:$0xff] %v10078_v21  ;;  %v11783_v43 = vshrl.u32 %v10075_v1, 16  ;;  %v11778_v27 = vshrl.u32 %v10078_v21, 16  ;;  %v8814_v18 = vld [vmem:[#allocation10 + $0x144] sm:$0xf0] }
 0x21a   : > { %v3748_v30 = vpack.c.bf16 %v1705_v22, %v1607_v37  ;;  %v3972_v47 = vrot.slane %v11777_v25, 1  ;;  %v3974_v49 = vrot.slane %v11776_v51, 1 }
 0x21c   : > { %v10090_v9 = vor.u32 %v3972_v47, %v11783_v43  ;;  %v10094_v6 = vor.u32 %v3974_v49, %v11778_v27  ;;  %v3784_v8 = vunpack.c.l.b16 %v3748_v30  ;;  %v3785_v22 = vunpack.c.h.b16 %v3748_v30 }
 0x21d   : > { %v1657_v55 = vpop.f32.mrf.mxu2  ;;  %v1562_v7 = vpop.f32.mrf.mxu0  ;;  %v7648_v49 = vor.u32 %v8814_v18, %v7647_v16 }
 0x21e   : > { %11924 = vst [vmem:[#allocation42_spill] sm:$0xff] %v10090_v9  ;;  %v1658_v37 = vadd.f32 %v1657_v55, %v10035_v12  ;;  %v1706_v20 = vpop.f32.mrf.mxu3  ;;  %v1563_v58 = vadd.f32 %v1562_v7, %v10026_v0  ;;  %v1611_v52 = vpop.f32.mrf.mxu1  ;;  %v8782_v55 = vld [vmem:[#allocation10 + $0x44] sm:$0xf0]  ;;  %v7577_v9 = vld [vmem:[#allocation10 + $0xb8] sm:$0xf0] }
 0x21f   : > { %11925 = vst [vmem:[#allocation43_spill] sm:$0xff] %v10094_v6  ;;  %3225 = vmatpush.bf16.msra.mxu2 %v7648_v49 }
 0x220   : > { %v1707_v44 = vadd.f32 %v1706_v20, %v1658_v37  ;;  %v1612_v62 = vadd.f32 %v1611_v52, %v1563_v58  ;;  %2003 = vmatmul.bf16.gmra.mxu0 %v9976_v61  ;;  %v7711_v37 = vld [vmem:[#allocation10 + $0x1c0] sm:$0xf]  ;;  %v8830_v20 = vld [vmem:[#allocation10 + $0x1c4] sm:$0xf0]  ;;  %v7520_v52 = vor.u32 %v8782_v55, %v7519_v14 }
 0x221   : > { %2052 = vmatmul.bf16.gmra.mxu1 %v9981_v13 }
 0x222   : > { %v3749_v2 = vpack.c.bf16 %v1707_v44, %v1609_v42  ;;  %2101 = vmatmul.bf16.gmra.mxu2 %v9976_v61  ;;  %v7712_v61 = vor.u32 %v8830_v20, %v7711_v37  ;;  %v7583_v44 = vld [vmem:[#allocation10 + $0xc0] sm:$0xf]  ;;  %3127 = vmatpush.bf16.msra.mxu0 %v7520_v52 }
 0x223   : > { %2150 = vmatmul.bf16.gmra.mxu3 %v9981_v13  ;;  %v8798_v13 = vld [vmem:[#allocation10 + $0xc4] sm:$0xf0] }
 0x224   : > { %v3786_v17 = vunpack.c.l.b16 %v3749_v2  ;;  %v3787_v19 = vunpack.c.h.b16 %v3749_v2  ;;  %v7584_v30 = vor.u32 %v8798_v13, %v7583_v44  ;;  %3274 = vmatpush.bf16.msra.mxu3 %v7712_v61 }
 0x225   : > { %v1660_v47 = vpop.f32.mrf.mxu2  ;;  %v1564_v58 = vpop.f32.mrf.mxu0 }
 0x226   : > { %v1661_v42 = vadd.f32 %v1660_v47, %v10035_v12  ;;  %v1709_v7 = vpop.f32.mrf.mxu3  ;;  %v10103_v51 = vpack.c.b16 %v3786_v17, %v3784_v8  ;;  %v1565_v2 = vadd.f32 %v1564_v58, %v10026_v0  ;;  %v1613_v25 = vpop.f32.mrf.mxu1  ;;  %v10106_v27 = vpack.c.b16 %v3787_v19, %v3785_v22  ;;  %3176 = vmatpush.bf16.msra.mxu1 %v7584_v30 }
 0x228   : > { %11926 = vst [vmem:[#allocation44_spill] sm:$0xff] %v10103_v51  ;;  %v1710_v16 = vadd.f32 %v1709_v7, %v1661_v42  ;;  %v11780_v18 = vshll.u32 %v10103_v51, 16  ;;  %v1614_v47 = vadd.f32 %v1613_v25, %v1565_v2  ;;  %v11779_v14 = vshll.u32 %v10106_v27, 16 }
 0x229   : > { %11927 = vst [vmem:[#allocation45_spill] sm:$0xff] %v10106_v27  ;;  %v11782_v8 = vshrl.u32 %v10103_v51, 16  ;;  %v11781_v49 = vshrl.u32 %v10106_v27, 16 }
 0x22a   : > { %v3750_v55 = vpack.c.bf16 %v1710_v16, %v1612_v62  ;;  %v3976_v17 = vrot.slane %v11780_v18, 1  ;;  %v3978_v19 = vrot.slane %v11779_v14, 1  ;;  %v7639_v16 = vld [vmem:[#allocation10 + $0x130] sm:$0xf] }
 0x22c   : > { %v10118_v22 = vor.u32 %v3976_v17, %v11782_v8  ;;  %v10122_v25 = vor.u32 %v3978_v19, %v11781_v49  ;;  %v3788_v13 = vunpack.c.l.b16 %v3750_v55  ;;  %v8812_v17 = vld [vmem:[#allocation10 + $0x134] sm:$0xf0]  ;;  %v7511_v19 = vld [vmem:[#allocation10 + $0x30] sm:$0xf] }
 0x22d   : > { %v1662_v37 = vpop.f32.mrf.mxu2  ;;  %v1567_v42 = vpop.f32.mrf.mxu0  ;;  %v7640_v14 = vor.u32 %v8812_v17, %v7639_v16  ;;  %v7575_v49 = vld [vmem:[#allocation10 + $0xb0] sm:$0xf] }
 0x22e   : > { %11928 = vst [vmem:[#allocation46_spill] sm:$0xff] %v10118_v22  ;;  %v1663_v62 = vadd.f32 %v1662_v37, %v10035_v12  ;;  %v1711_v20 = vpop.f32.mrf.mxu3  ;;  %v1568_v7 = vadd.f32 %v1567_v42, %v10026_v0  ;;  %v1616_v58 = vpop.f32.mrf.mxu1  ;;  %v3789_v37 = vunpack.c.h.b16 %v3750_v55 }
 0x22f   : > { %11929 = vst [vmem:[#allocation47_spill] sm:$0xff] %v10122_v25  ;;  %3226 = vmatpush.bf16.msra.mxu2 %v7640_v14 }
 0x230   : > { %v1712_v52 = vadd.f32 %v1711_v20, %v1663_v62  ;;  %v1617_v61 = vadd.f32 %v1616_v58, %v1568_v7  ;;  %2008 = vmatmul.bf16.gmra.mxu0 %v9988_v56  ;;  %v8780_v62 = vld [vmem:[#allocation10 + $0x34] sm:$0xf0]  ;;  %v7703_v20 = vld [vmem:[#allocation10 + $0x1b0] sm:$0xf] }
 0x231   : > { %2057 = vmatmul.bf16.gmra.mxu1 %v9993_v11  ;;  %v8828_v7 = vld [vmem:[#allocation10 + $0x1b4] sm:$0xf0]  ;;  %v7512_v18 = vor.u32 %v8780_v62, %v7511_v19 }
 0x232   : > { %v3751_v44 = vpack.c.bf16 %v1712_v52, %v1614_v47  ;;  %2106 = vmatmul.bf16.gmra.mxu2 %v9988_v56  ;;  %v7704_v56 = vor.u32 %v8828_v7, %v7703_v20 }
 0x233   : > { %2155 = vmatmul.bf16.gmra.mxu3 %v9993_v11  ;;  %v8796_v11 = vld [vmem:[#allocation10 + $0xb4] sm:$0xf0]  ;;  %3128 = vmatpush.bf16.msra.mxu0 %v7512_v18 }
 0x234   : > { %v3790_v2 = vunpack.c.l.b16 %v3751_v44  ;;  %v3791_v30 = vunpack.c.h.b16 %v3751_v44  ;;  %v7576_v43 = vor.u32 %v8796_v11, %v7575_v49  ;;  %3275 = vmatpush.bf16.msra.mxu3 %v7704_v56 }
 0x235   : > { %v1665_v42 = vpop.f32.mrf.mxu2  ;;  %v1569_v52 = vpop.f32.mrf.mxu0 }
 0x236   : > { %v1666_v47 = vadd.f32 %v1665_v42, %v10035_v12  ;;  %v1714_v58 = vpop.f32.mrf.mxu3  ;;  %v10131_v8 = vpack.c.b16 %v3790_v2, %v3788_v13  ;;  %v1618_v44 = vpop.f32.mrf.mxu1  ;;  %v10133_v33 = vpack.c.b16 %v3791_v30, %v3789_v37  ;;  %3177 = vmatpush.bf16.msra.mxu1 %v7576_v43  ;;  %v1570_v49 = vadd.f32 %v1569_v52, %v10026_v0 }
 0x238   : > { %11930 = vst [vmem:[#allocation48_spill] sm:$0xff] %v10131_v8  ;;  %v1715_v55 = vadd.f32 %v1714_v58, %v1666_v47  ;;  %v11786_v16 = vshll.u32 %v10131_v8, 16  ;;  %v11785_v17 = vshll.u32 %v10133_v33, 16  ;;  %v11788_v19 = vshrl.u32 %v10131_v8, 16 }
 0x239   : > { %11931 = vst [vmem:[#allocation49_spill] sm:$0xff] %v10133_v33  ;;  %v11787_v2 = vshrl.u32 %v10133_v33, 16  ;;  %v1619_v47 = vadd.f32 %v1618_v44, %v1570_v49  ;;  %v8778_v49 = vld [vmem:[#allocation10 + $0x24] sm:$0xf0] }
 0x23a   : > { %v3752_v42 = vpack.c.bf16 %v1715_v55, %v1617_v61  ;;  %v3980_v13 = vrot.slane %v11786_v16, 1  ;;  %v3982_v14 = vrot.slane %v11785_v17, 1  ;;  %v7503_v17 = vld [vmem:[#allocation10 + $0x20] sm:$0xf] }
 0x23c   : > { %v10146_v18 = vor.u32 %v3980_v13, %v11788_v19  ;;  %v10150_v61 = vor.u32 %v3982_v14, %v11787_v2  ;;  %v3792_v11 = vunpack.c.l.b16 %v3752_v42  ;;  %v7631_v14 = vld [vmem:[#allocation10 + $0x120] sm:$0xf] }
 0x23d   : > { %v1667_v43 = vpop.f32.mrf.mxu2  ;;  %v1572_v62 = vpop.f32.mrf.mxu0  ;;  %v7567_v2 = vld [vmem:[#allocation10 + $0xa0] sm:$0xf] }
 0x23e   : > { %11932 = vst [vmem:[#allocation50_spill] sm:$0xff] %v10146_v18  ;;  %v1668_v30 = vadd.f32 %v1667_v43, %v10035_v12  ;;  %v1716_v37 = vpop.f32.mrf.mxu3  ;;  %v1573_v20 = vadd.f32 %v1572_v62, %v10026_v0  ;;  %v1621_v7 = vpop.f32.mrf.mxu1  ;;  %v8810_v43 = vld [vmem:[#allocation10 + $0x124] sm:$0xf0]  ;;  %v3793_v62 = vunpack.c.h.b16 %v3752_v42 }
 0x23f   : > { %11933 = vst [vmem:[#allocation51_spill] sm:$0xff] %v10150_v61  ;;  %v7632_v44 = vor.u32 %v8810_v43, %v7631_v14  ;;  %v8862_v61 = vld [vmem:[#allocation10 + $0x2c4] sm:$0xf0] }
 0x240   : > { %v1717_v58 = vadd.f32 %v1716_v37, %v1668_v30  ;;  %v1622_v56 = vadd.f32 %v1621_v7, %v1573_v20  ;;  %2013 = vmatmul.bf16.gmra.mxu0 %v10000_v54  ;;  %v7695_v30 = vld [vmem:[#allocation10 + $0x1a0] sm:$0xf]  ;;  %v8826_v37 = vld [vmem:[#allocation10 + $0x1a4] sm:$0xf0] }
 0x241   : > { %2062 = vmatmul.bf16.gmra.mxu1 %v10005_v5  ;;  %3227 = vmatpush.bf16.msra.mxu2 %v7632_v44 }
 0x242   : > { %v3753_v52 = vpack.c.bf16 %v1717_v58, %v1619_v47  ;;  %2111 = vmatmul.bf16.gmra.mxu2 %v10000_v54  ;;  %v7504_v58 = vor.u32 %v8778_v49, %v7503_v17  ;;  %v7696_v54 = vor.u32 %v8826_v37, %v7695_v30 }
 0x243   : > { %2160 = vmatmul.bf16.gmra.mxu3 %v10005_v5  ;;  %v8794_v5 = vld [vmem:[#allocation10 + $0xa4] sm:$0xf0] }
 0x244   : > { %v3794_v55 = vunpack.c.l.b16 %v3753_v52  ;;  %v3795_v13 = vunpack.c.h.b16 %v3753_v52  ;;  %v7568_v53 = vor.u32 %v8794_v5, %v7567_v2  ;;  %3129 = vmatpush.bf16.msra.mxu0 %v7504_v58  ;;  %3276 = vmatpush.bf16.msra.mxu3 %v7696_v54 }
 0x245   : > { %v1670_v16 = vpop.f32.mrf.mxu2  ;;  %v1574_v47 = vpop.f32.mrf.mxu0 }
 0x246   : > { %v1671_v20 = vadd.f32 %v1670_v16, %v10035_v12  ;;  %v1719_v7 = vpop.f32.mrf.mxu3  ;;  %v10159_v19 = vpack.c.b16 %v3794_v55, %v3792_v11  ;;  %v1623_v52 = vpop.f32.mrf.mxu1  ;;  %v10161_v63 = vpack.c.b16 %v3795_v13, %v3793_v62  ;;  %3178 = vmatpush.bf16.msra.mxu1 %v7568_v53  ;;  %v1575_v13 = vadd.f32 %v1574_v47, %v10026_v0 }
 0x248   : > { %11934 = vst [vmem:[#allocation52_spill] sm:$0xff] %v10159_v19  ;;  %v1720_v42 = vadd.f32 %v1719_v7, %v1671_v20  ;;  %v11792_v14 = vshll.u32 %v10159_v19, 16  ;;  %v11791_v16 = vshll.u32 %v10161_v63, 16  ;;  %v11794_v17 = vshrl.u32 %v10159_v19, 16 }
 0x249   : > { %11935 = vst [vmem:[#allocation53_spill] sm:$0xff] %v10161_v63  ;;  %v11793_v55 = vshrl.u32 %v10161_v63, 16  ;;  %v1624_v7 = vadd.f32 %v1623_v52, %v1575_v13  ;;  %v8776_v13 = vld [vmem:[#allocation10 + $0x14] sm:$0xf0] }
 0x24a   : > { %v3754_v43 = vpack.c.bf16 %v1720_v42, %v1622_v56  ;;  %v3984_v11 = vrot.slane %v11792_v14, 1  ;;  %v3986_v2 = vrot.slane %v11791_v16, 1 }
 0x24c   : > { %v10174_v62 = vor.u32 %v3984_v11, %v11794_v17  ;;  %v10178_v56 = vor.u32 %v3986_v2, %v11793_v55  ;;  %v7623_v11 = vld [vmem:[#allocation10 + $0x110] sm:$0xf]  ;;  %v8808_v2 = vld [vmem:[#allocation10 + $0x114] sm:$0xf0]  ;;  %v3796_v16 = vunpack.c.l.b16 %v3754_v43 }
 0x24d   : > { %v1672_v53 = vpop.f32.mrf.mxu2  ;;  %v1577_v30 = vpop.f32.mrf.mxu0  ;;  %v7624_v52 = vor.u32 %v8808_v2, %v7623_v11  ;;  %v7559_v55 = vld [vmem:[#allocation10 + $0x90] sm:$0xf] }
 0x24e   : > { %11936 = vst [vmem:[#allocation54_spill] sm:$0xff] %v10174_v62  ;;  %v1673_v44 = vadd.f32 %v1672_v53, %v10035_v12  ;;  %v1721_v49 = vpop.f32.mrf.mxu3  ;;  %v1578_v37 = vadd.f32 %v1577_v30, %v10026_v0  ;;  %v1626_v20 = vpop.f32.mrf.mxu1  ;;  %v7495_v53 = vld [vmem:[#allocation10 + $0x10] sm:$0xf]  ;;  %v3797_v30 = vunpack.c.h.b16 %v3754_v43  ;;  %v7585_v62 = vld [vmem:[#allocation10 + $0xc8] sm:$0xf0] }
 0x24f   : > { %11937 = vst [vmem:[#allocation55_spill] sm:$0xff] %v10178_v56  ;;  %3228 = vmatpush.bf16.msra.mxu2 %v7624_v52 }
 0x250   : > { %v1722_v58 = vadd.f32 %v1721_v49, %v1673_v44  ;;  %v1627_v54 = vadd.f32 %v1626_v20, %v1578_v37  ;;  %2018 = vmatmul.bf16.gmra.mxu0 %v10012_v24  ;;  %v7687_v44 = vld [vmem:[#allocation10 + $0x190] sm:$0xf]  ;;  %v8824_v49 = vld [vmem:[#allocation10 + $0x194] sm:$0xf0] }
 0x251   : > { %2067 = vmatmul.bf16.gmra.mxu1 %v10017_v26 }
 0x252   : > { %v3755_v47 = vpack.c.bf16 %v1722_v58, %v1624_v7  ;;  %2116 = vmatmul.bf16.gmra.mxu2 %v10012_v24  ;;  %v7496_v58 = vor.u32 %v8776_v13, %v7495_v53  ;;  %v7688_v24 = vor.u32 %v8824_v49, %v7687_v44 }
 0x253   : > { %2165 = vmatmul.bf16.gmra.mxu3 %v10017_v26  ;;  %v8792_v26 = vld [vmem:[#allocation10 + $0x94] sm:$0xf0] }
 0x254   : > { %v3798_v5 = vunpack.c.l.b16 %v3755_v47  ;;  %v3799_v42 = vunpack.c.h.b16 %v3755_v47  ;;  %v7560_v47 = vor.u32 %v8792_v26, %v7559_v55  ;;  %3130 = vmatpush.bf16.msra.mxu0 %v7496_v58  ;;  %3277 = vmatpush.bf16.msra.mxu3 %v7688_v24 }
 0x255   : > { %v1675_v14 = vpop.f32.mrf.mxu2  ;;  %v1579_v7 = vpop.f32.mrf.mxu0 }
 0x256   : > { %v1676_v37 = vadd.f32 %v1675_v14, %v10035_v12  ;;  %v1724_v20 = vpop.f32.mrf.mxu3  ;;  %v1628_v17 = vpop.f32.mrf.mxu1  ;;  %v10187_v15 = vpack.c.b16 %v3798_v5, %v3796_v16  ;;  %v10189_v4 = vpack.c.b16 %v3799_v42, %v3797_v30  ;;  %3179 = vmatpush.bf16.msra.mxu1 %v7560_v47  ;;  %v1580_v55 = vadd.f32 %v1579_v7, %v10026_v0 }
 0x258   : > { %11938 = vst [vmem:[#allocation56_spill] sm:$0xff] %v10187_v15  ;;  %v1725_v43 = vadd.f32 %v1724_v20, %v1676_v37  ;;  %v11798_v11 = vshll.u32 %v10187_v15, 16  ;;  %v11797_v2 = vshll.u32 %v10189_v4, 16  ;;  %v11800_v53 = vshrl.u32 %v10187_v15, 16 }
 0x259   : > { %11939 = vst [vmem:[#allocation57_spill] sm:$0xff] %v10189_v4  ;;  %v11799_v16 = vshrl.u32 %v10189_v4, 16  ;;  %v1629_v7 = vadd.f32 %v1628_v17, %v1580_v55  ;;  %v8858_v4 = vld [vmem:[#allocation10 + $0x2a4] sm:$0xf0] }
 0x25a   : > { %v3756_v14 = vpack.c.bf16 %v1725_v43, %v1627_v54  ;;  %v3988_v13 = vrot.slane %v11798_v11, 1  ;;  %v3990_v5 = vrot.slane %v11797_v2, 1  ;;  %v7615_v2 = vld [vmem:[#allocation10 + $0x100] sm:$0xf] }
 0x25b   : > { %v7679_v11 = vld [vmem:[#allocation10 + $0x180] sm:$0xf] }
 0x25c   : > { %v10202_v30 = vor.u32 %v3988_v13, %v11800_v53  ;;  %v10207_v49 = vor.u32 %v3990_v5, %v11799_v16  ;;  %v3800_v13 = vunpack.c.l.b16 %v3756_v14  ;;  %v3801_v5 = vunpack.c.h.b16 %v3756_v14  ;;  %v8774_v14 = vld [vmem:[#allocation10 + $0x4] sm:$0xf0]  ;;  %v7551_v16 = vld [vmem:[#allocation10 + $0x80] sm:$0xf] }
 0x25d   : > { %v1677_v42 = vpop.f32.mrf.mxu2  ;;  %v1582_v44 = vpop.f32.mrf.mxu0  ;;  %v7552_v59 = vor.u32 %v8790_v3, %v7551_v16 }
 0x25e   : > { %11940 = vst [vmem:[#allocation58_spill] sm:$0xff] %v10202_v30  ;;  %v1678_v54 = vadd.f32 %v1677_v42, %v10035_v12  ;;  %v1726_v52 = vpop.f32.mrf.mxu3  ;;  %v1583_v37 = vadd.f32 %v1582_v44, %v10026_v0  ;;  %v1631_v20 = vpop.f32.mrf.mxu1  ;;  %v8806_v44 = vld [vmem:[#allocation10 + $0x104] sm:$0xf0] }
 0x25f   : > { %11941 = vst [vmem:[#allocation59_spill] sm:$0xff] %v10207_v49  ;;  %3180 = vmatpush.bf16.msra.mxu1 %v7552_v59  ;;  %v1814_v59 = vld [vmem:[%s11767_s4] sm:$0x3] }
 0x260   : > { %v1727_v58 = vadd.f32 %v1726_v52, %v1678_v54  ;;  %v1632_v24 = vadd.f32 %v1631_v20, %v1583_v37  ;;  %2023 = vmatmul.bf16.gmra.mxu0 %v10024_v32  ;;  %v7616_v52 = vor.u32 %v8806_v44, %v7615_v2  ;;  %v8822_v37 = vld [vmem:[#allocation10 + $0x184] sm:$0xf0] }
 0x261   : > { %2072 = vmatmul.bf16.gmra.mxu1 %v10031_v57 }
 0x262   : > { %v3757_v26 = vpack.c.bf16 %v1727_v58, %v1629_v7  ;;  %2121 = vmatmul.bf16.gmra.mxu2 %v10024_v32  ;;  %v7680_v7 = vor.u32 %v8822_v37, %v7679_v11  ;;  %v10240_v37 = vperm.slane %v1814_v59, 1 }
 0x263   : > { %2170 = vmatmul.bf16.gmra.mxu3 %v10031_v57  ;;  %3229 = vmatpush.bf16.msra.mxu2 %v7616_v52 }
 0x264   : > { %v3802_v47 = vunpack.c.l.b16 %v3757_v26  ;;  %v3803_v43 = vunpack.c.h.b16 %v3757_v26  ;;  %v7487_v26 = vld [vmem:[#allocation10] sm:$0xf]  ;;  %3278 = vmatpush.bf16.msra.mxu3 %v7680_v7  ;;  %v10242_v7 = vperm.slane %v1814_v59, 0 }
 0x265   : > { %v1680_v42 = vpop.f32.mrf.mxu2  ;;  %v1584_v54 = vpop.f32.mrf.mxu0  ;;  %v7488_v53 = vor.u32 %v8774_v14, %v7487_v26 }
 0x266   : > { %v1681_v17 = vadd.f32 %v1680_v42, %v10035_v12  ;;  %v1729_v55 = vpop.f32.mrf.mxu3  ;;  %v1633_v20 = vpop.f32.mrf.mxu1  ;;  %v10215_v58 = vpack.c.b16 %v3802_v47, %v3800_v13  ;;  %v10217_v32 = vpack.c.b16 %v3803_v43, %v3801_v5  ;;  %v1585_v43 = vadd.f32 %v1584_v54, %v10026_v0 }
 0x267   : > { %3131 = vmatpush.bf16.msra.mxu0 %v7488_v53 }
 0x268   : > { %11942 = vst [vmem:[#allocation60_spill] sm:$0xff] %v10215_v58  ;;  %v1730_v57 = vadd.f32 %v1729_v55, %v1681_v17  ;;  %v11805_v42 = vshll.u32 %v10215_v58, 16  ;;  %v11807_v2 = vshrl.u32 %v10215_v58, 16  ;;  %v11804_v11 = vshll.u32 %v10217_v32, 16  ;;  %v7569_v58 = vld [vmem:[#allocation10 + $0xa8] sm:$0xf0] }
 0x269   : > { %11943 = vst [vmem:[#allocation61_spill] sm:$0xff] %v10217_v32  ;;  %v11806_v44 = vshrl.u32 %v10217_v32, 16  ;;  %v1634_v55 = vadd.f32 %v1633_v20, %v1585_v43 }
 0x26a   : > { %v3758_v60 = vpack.c.bf16 %v1730_v57, %v1632_v24  ;;  %v3992_v47 = vrot.slane %v11805_v42, 1  ;;  %v3994_v24 = vrot.slane %v11804_v11, 1  ;;  %v7799_v11 = vld [vmem:[#allocation10 + $0x270] sm:$0xf] }
 0x26c   : > { %v10227_v5 = vor.u32 %v3992_v47, %v11807_v2  ;;  %v10238_v0 = vor.u32 %v3994_v24, %v11806_v44  ;;  %v3805_v57 = vunpack.c.h.b16 %v3758_v60  ;;  %v8852_v2 = vld [vmem:[#allocation10 + $0x274] sm:$0xf0] }
 0x26d   : > { %v1682_v13 = vpop.f32.mrf.mxu2  ;;  %v1989_v16 = vpop.f32.mrf.mxu0 }
 0x26e   : > { %11944 = vst [vmem:[#allocation62_spill] sm:$0xff] %v10227_v5  ;;  %v1683_v3 = vadd.f32 %v1682_v13, %v10035_v12  ;;  %v1731_v53 = vpop.f32.mrf.mxu3  ;;  %v2038_v17 = vpop.f32.mrf.mxu1  ;;  %v3804_v12 = vunpack.c.l.b16 %v3758_v60  ;;  %v8803_v60 = vld [vmem:[#allocation10 + $0xf4] sm:$0xf] }
 0x26f   : > { %11945 = vst [vmem:[#allocation63_spill] sm:$0xff] %v10238_v0  ;;  %v7612_v50 = vor.u32 %v8803_v60, %v7609_v45  ;;  %v8864_v0 = vld [vmem:[#allocation10 + $0x2d4] sm:$0xf0] }
 0x270   : > { %v1732_v52 = vadd.f32 %v1731_v53, %v1683_v3  ;;  %v8787_v3 = vld [vmem:[#allocation10 + $0x74] sm:$0xf]  ;;  %v7545_v53 = vld [vmem:[#allocation10 + $0x78] sm:$0xf0] }
 0x271   : > { %v7548_v44 = vor.u32 %v8787_v3, %v7545_v53  ;;  %3467 = vmatpush.bf16.msrb.mxu3 %v7612_v50 }
 0x272   : > { %v3759_v54 = vpack.c.bf16 %v1732_v52, %v1634_v55  ;;  %v1990_v55 = vadd.f32 %v1989_v16, %v10242_v7 }
 0x273   : > { %3418 = vmatpush.bf16.msrb.mxu2 %v7548_v44 }
 0x274   : > { %v3806_v26 = vunpack.c.l.b16 %v3759_v54  ;;  %v3807_v14 = vunpack.c.h.b16 %v3759_v54  ;;  %v7800_v54 = vor.u32 %v8852_v2, %v7799_v11  ;;  %v2224_v2 = vmax.f32 %v1814_v59, 0.0 }
 0x275   : > { %v2087_v47 = vpop.f32.mrf.mxu2  ;;  %v1991_v13 = vpop.f32.mrf.mxu0 }
 0x276   : > { %v2088_v20 = vadd.f32 %v2087_v47, %v10240_v37  ;;  %v2136_v43 = vpop.f32.mrf.mxu3  ;;  %v10245_v42 = vpack.c.b16 %v3806_v26, %v3804_v12  ;;  %v10247_v24 = vpack.c.b16 %v3807_v14, %v3805_v57  ;;  %v2040_v52 = vpop.f32.mrf.mxu1  ;;  %v8868_v47 = vld [vmem:[#allocation10 + $0x2f4] sm:$0xf0]  ;;  %v1992_v12 = vadd.f32 %v1991_v13, %v10242_v7  ;;  %3320 = vmatpush.bf16.msrb.mxu0 %v7800_v54 }
 0x277   : > { %v7864_v34 = vor.u32 %v8868_v47, %v7863_v41  ;;  %v2039_v57 = vadd.f32 %v2038_v17, %v1990_v55  ;;  %v2227_v55 = vperm.slane %v2224_v2, 1 }
 0x278   : > { %11946 = vst [vmem:[#allocation64_spill] sm:$0xff] %v10245_v42  ;;  %v2137_v40 = vadd.f32 %v2136_v43, %v2088_v20  ;;  %v11815_v28 = vshll.u32 %v10245_v42, 16  ;;  %v11814_v16 = vshll.u32 %v10247_v24, 16  ;;  %v11816_v26 = vshrl.u32 %v10245_v42, 16 }
 0x279   : > { %11947 = vst [vmem:[#allocation65_spill] sm:$0xff] %v10247_v24  ;;  %3369 = vmatpush.bf16.msrb.mxu1 %v7864_v34  ;;  %v11820_v14 = vshrl.u32 %v10247_v24, 16  ;;  %v2041_v20 = vadd.f32 %v2040_v52, %v1992_v12  ;;  %v2176_v13 = vmax.f32 %v2039_v57, 0.0 }
 0x27a   : > { %v3996_v45 = vrot.slane %v11815_v28, 1  ;;  %v3998_v11 = vrot.slane %v11814_v16, 1  ;;  %v2177_v41 = vmax.f32 %v2137_v40, 0.0  ;;  %v2226_v40 = vperm.slane %v2224_v2, 0 }
 0x27b   : > { %v2178_v54 = vmax.f32 %v2041_v20, 0.0  ;;  %v8850_v20 = vld [vmem:[#allocation10 + $0x264] sm:$0xf0] }
 0x27c   : > { %v10261_v50 = vor.u32 %v3996_v45, %v11816_v26  ;;  %v10266_v59 = vor.u32 %v3998_v11, %v11820_v14  ;;  %v2208_v60 = vpack.c.bf16 %v2177_v41, %v2176_v13  ;;  %v2230_v45 = vpack.c.bf16 %v2227_v55, %v2226_v40  ;;  %v7537_v11 = vld [vmem:[#allocation10 + $0x68] sm:$0xf0]  ;;  %v7791_v14 = vld [vmem:[#allocation10 + $0x260] sm:$0xf] }
 0x27d   : > { %v2089_v44 = vpop.f32.mrf.mxu2  ;;  %v1994_v43 = vpop.f32.mrf.mxu0  ;;  %v7540_v41 = vor.u32 %v8785_v36, %v7537_v11  ;;  %v7601_v13 = vld [vmem:[#allocation10 + $0xe8] sm:$0xf0] }
 0x27e   : > { %11948 = vst [vmem:[#allocation66_spill] sm:$0xff] %v10261_v50  ;;  %v2090_v34 = vadd.f32 %v2089_v44, %v10240_v37  ;;  %v2138_v17 = vpop.f32.mrf.mxu3  ;;  %v2043_v3 = vpop.f32.mrf.mxu1  ;;  %v2254_v28 = vunpack.c.l.b16 %v2208_v60  ;;  %v2255_v12 = vunpack.c.h.b16 %v2208_v60  ;;  %v2232_v55 = vunpack.c.l.b16 %v2230_v45  ;;  %v7855_v60 = vld [vmem:[#allocation10 + $0x2e0] sm:$0xf]  ;;  %v7593_v50 = vld [vmem:[#allocation10 + $0xd8] sm:$0xf0] }
 0x27f   : > { %11949 = vst [vmem:[#allocation67_spill] sm:$0xff] %v10266_v59  ;;  %3419 = vmatpush.bf16.msrb.mxu2 %v7540_v41  ;;  %v8799_v59 = vld [vmem:[#allocation10 + $0xd4] sm:$0xf] }
 0x280   : > { %v2139_v53 = vadd.f32 %v2138_v17, %v2090_v34  ;;  %v1995_v34 = vadd.f32 %v1994_v43, %v10242_v7  ;;  %v8801_v17 = vld [vmem:[#allocation10 + $0xe4] sm:$0xf]  ;;  %v10281_v11 = vpack.c.b16 %v2232_v55, %v2232_v55  ;;  %v7596_v5 = vor.u32 %v8799_v59, %v7593_v50 }
 0x281   : > { %v7604_v35 = vor.u32 %v8801_v17, %v7601_v13 }
 0x282   : > { %v2179_v47 = vmax.f32 %v2139_v53, 0.0 }
 0x283   : > { %3468 = vmatpush.bf16.msrb.mxu3 %v7604_v35 }
 0x284   : > { %v2209_v16 = vpack.c.bf16 %v2179_v47, %v2178_v54  ;;  %v8866_v54 = vld [vmem:[#allocation10 + $0x2e4] sm:$0xf0] }
 0x285   : > { %v2092_v52 = vpop.f32.mrf.mxu2  ;;  %v1996_v29 = vpop.f32.mrf.mxu0  ;;  %v7856_v39 = vor.u32 %v8866_v54, %v7855_v60 }
 0x286   : > { %v2256_v44 = vunpack.c.l.b16 %v2209_v16  ;;  %v2257_v26 = vunpack.c.h.b16 %v2209_v16  ;;  %v2093_v57 = vadd.f32 %v2092_v52, %v10240_v37  ;;  %v2141_v31 = vpop.f32.mrf.mxu3  ;;  %v2045_v2 = vpop.f32.mrf.mxu1  ;;  %v7792_v16 = vor.u32 %v8850_v20, %v7791_v14 }
 0x287   : > { %v2233_v52 = vunpack.c.h.b16 %v2230_v45  ;;  %v1997_v43 = vadd.f32 %v1996_v29, %v10242_v7  ;;  %v2044_v14 = vadd.f32 %v2043_v3, %v1995_v34  ;;  %3370 = vmatpush.bf16.msrb.mxu1 %v7856_v39  ;;  %v11950_v39 = vmov 0  ;;  %3469 = vmatpush.bf16.msrb.mxu3 %v7596_v5 }
 0x288   : > { %v10270_v53 = vpack.c.b16 %v2256_v44, %v2254_v28  ;;  %v10272_v40 = vpack.c.b16 %v2257_v26, %v2255_v12  ;;  %v2142_v47 = vadd.f32 %v2141_v31, %v2093_v57  ;;  %3321 = vmatpush.bf16.msrb.mxu0 %v7792_v16  ;;  %v11951_v39 = vsel %vm10288_vm2, 4294967295, %v11950_v39 }
 0x289   : > { %v2046_v20 = vadd.f32 %v2045_v2, %v1997_v43  ;;  %v10284_v60 = vpack.c.b16 %v2233_v52, %v2233_v52  ;;  %v2180_v16 = vmax.f32 %v2044_v14, 0.0  ;;  %11952 = vst [vmem:[#allocation68_spill] sm:$0xff] %v11951_v39 }
 0x28a   : > { %3230 = vmatmul.bf16.vlgmr.msra.gmra.mxu2 %v10270_v53  ;;  %3279 = vmatmul.bf16.vlgmr.msra.gmra.mxu3 %v10272_v40  ;;  %v2303_v36 = vshrl.u32 %v10270_v53, 16  ;;  %v2306_v28 = vshll.u32 %v10270_v53, 16  ;;  %v2310_v26 = vshrl.u32 %v10272_v40, 16  ;;  %v2313_v31 = vshll.u32 %v10272_v40, 16 }
 0x28b   : > { %v2181_v44 = vmax.f32 %v2142_v47, 0.0  ;;  %v2182_v14 = vmax.f32 %v2046_v20, 0.0 }
 0x28c   : > { %v2305_v45 = vrot.slane %v2303_v36, 7  ;;  %v2312_v12 = vrot.slane %v2310_v26, 7  ;;  %v2449_v29 = vrot.slane %v2306_v28, 1  ;;  %v2451_v41 = vrot.slane %v2313_v31, 1 }
 0x28d   : > { %v2094_v57 = vpop.f32.mrf.mxu2  ;;  %v1999_v3 = vpop.f32.mrf.mxu0  ;;  %v2210_v52 = vpack.c.bf16 %v2181_v44, %v2180_v16  ;;  %v7783_v16 = vld [vmem:[#allocation10 + $0x250] sm:$0xf] }
 0x28e   : > { %v2095_v17 = vadd.f32 %v2094_v57, %v10240_v37  ;;  %v2143_v13 = vpop.f32.mrf.mxu3  ;;  %v2308_v34 = vor.u32 %v2306_v28, %v2305_v45  ;;  %v2048_v35 = vpop.f32.mrf.mxu1  ;;  %v2315_v54 = vor.u32 %v2313_v31, %v2312_v12  ;;  %v10292_v55 = vor.u32 %v2449_v29, %v2303_v36 }
 0x28f   : > { %v10294_v47 = vor.u32 %v2451_v41, %v2310_v26  ;;  %v2258_v26 = vunpack.c.l.b16 %v2210_v52  ;;  %v2259_v12 = vunpack.c.h.b16 %v2210_v52 }
 0x290   : > { %v2144_v2 = vadd.f32 %v2143_v13, %v2095_v17  ;;  %v10299_v43 = vsel %vm10288_vm2, %v10281_v11, %v2308_v34  ;;  %v10305_v28 = vsel %vm10288_vm2, %v10284_v60, %v2315_v54  ;;  %v8783_v13 = vld [vmem:[#allocation10 + $0x54] sm:$0xf]  ;;  %v7529_v34 = vld [vmem:[#allocation10 + $0x58] sm:$0xf0]  ;;  %v2000_v54 = vadd.f32 %v1999_v3, %v10242_v7 }
 0x291   : > { %3132 = vmatmul.bf16.vlgmr.msra.gmra.mxu0 %v10299_v43  ;;  %3181 = vmatmul.bf16.vlgmr.msra.gmra.mxu1 %v10305_v28  ;;  %v7532_v20 = vor.u32 %v8783_v13, %v7529_v34 }
 0x292   : > { %v2183_v31 = vmax.f32 %v2144_v2, 0.0  ;;  %v8848_v2 = vld [vmem:[#allocation10 + $0x254] sm:$0xf0] }
 0x293   : > { %v7784_v52 = vor.u32 %v8848_v2, %v7783_v16  ;;  %3420 = vmatpush.bf16.msrb.mxu2 %v7532_v20 }
 0x294   : > { %v2211_v36 = vpack.c.bf16 %v2183_v31, %v2182_v14 }
 0x295   : > { %v2097_v45 = vpop.f32.mrf.mxu2  ;;  %v2001_v17 = vpop.f32.mrf.mxu0  ;;  %3322 = vmatpush.bf16.msrb.mxu0 %v7784_v52 }
 0x296   : > { %v2260_v29 = vunpack.c.l.b16 %v2211_v36  ;;  %v2261_v57 = vunpack.c.h.b16 %v2211_v36  ;;  %v2098_v41 = vadd.f32 %v2097_v45, %v10240_v37  ;;  %v2146_v44 = vpop.f32.mrf.mxu3  ;;  %v2050_v38 = vpop.f32.mrf.mxu1  ;;  %v7847_v36 = vld [vmem:[#allocation10 + $0x2d0] sm:$0xf]  ;;  %v2002_v30 = vadd.f32 %v2001_v17, %v10242_v7 }
 0x297   : > { %v7848_v49 = vor.u32 %v8864_v0, %v7847_v36 }
 0x298   : > { %v10310_v14 = vpack.c.b16 %v2260_v29, %v2258_v26  ;;  %v10312_v31 = vpack.c.b16 %v2261_v57, %v2259_v12  ;;  %v2147_v45 = vadd.f32 %v2146_v44, %v2098_v41  ;;  %v2049_v29 = vadd.f32 %v2048_v35, %v2000_v54 }
 0x299   : > { %3371 = vmatpush.bf16.msrb.mxu1 %v7848_v49  ;;  %v2051_v13 = vadd.f32 %v2050_v38, %v2002_v30 }
 0x29a   : > { %3235 = vmatmul.bf16.gmra.mxu2 %v10310_v14  ;;  %3284 = vmatmul.bf16.gmra.mxu3 %v10312_v31  ;;  %v2317_v3 = vshrl.u32 %v10310_v14, 16  ;;  %v2320_v26 = vshll.u32 %v10310_v14, 16  ;;  %v2324_v12 = vshrl.u32 %v10312_v31, 16  ;;  %v2327_v57 = vshll.u32 %v10312_v31, 16 }
 0x29b   : > { %v2185_v59 = vmax.f32 %v2147_v45, 0.0  ;;  %v2184_v36 = vmax.f32 %v2049_v29, 0.0  ;;  %v2186_v30 = vmax.f32 %v2051_v13, 0.0 }
 0x29c   : > { %v2319_v41 = vrot.slane %v2317_v3, 7  ;;  %v2326_v50 = vrot.slane %v2324_v12, 7  ;;  %v2453_v0 = vrot.slane %v2320_v26, 1  ;;  %v2455_v17 = vrot.slane %v2327_v57, 1 }
 0x29d   : > { %v2099_v44 = vpop.f32.mrf.mxu2  ;;  %v2004_v20 = vpop.f32.mrf.mxu0  ;;  %v2212_v45 = vpack.c.bf16 %v2185_v59, %v2184_v36 }
 0x29e   : > { %v2100_v34 = vadd.f32 %v2099_v44, %v10240_v37  ;;  %v2148_v16 = vpop.f32.mrf.mxu3  ;;  %v2322_v2 = vor.u32 %v2320_v26, %v2319_v41  ;;  %v2053_v56 = vpop.f32.mrf.mxu1  ;;  %v2329_v35 = vor.u32 %v2327_v57, %v2326_v50  ;;  %v10322_v54 = vor.u32 %v2453_v0, %v2317_v3 }
 0x29f   : > { %v10324_v52 = vor.u32 %v2455_v17, %v2324_v12  ;;  %v2262_v12 = vunpack.c.l.b16 %v2212_v45  ;;  %v2263_v57 = vunpack.c.h.b16 %v2212_v45  ;;  %v8781_v17 = vld [vmem:[#allocation10 + $0x44] sm:$0xf] }
 0x2a0   : > { %v2149_v5 = vadd.f32 %v2148_v16, %v2100_v34  ;;  %v10329_v49 = vsel %vm10288_vm2, %v10281_v11, %v2322_v2  ;;  %v10335_v38 = vsel %vm10288_vm2, %v10284_v60, %v2329_v35  ;;  %v7521_v34 = vld [vmem:[#allocation10 + $0x48] sm:$0xf0]  ;;  %v7775_v16 = vld [vmem:[#allocation10 + $0x240] sm:$0xf]  ;;  %v2005_v2 = vadd.f32 %v2004_v20, %v10242_v7  ;;  %v8846_v35 = vld [vmem:[#allocation10 + $0x244] sm:$0xf0] }
 0x2a1   : > { %3137 = vmatmul.bf16.gmra.mxu0 %v10329_v49  ;;  %3186 = vmatmul.bf16.gmra.mxu1 %v10335_v38  ;;  %v7524_v13 = vor.u32 %v8781_v17, %v7521_v34  ;;  %v7776_v45 = vor.u32 %v8846_v35, %v7775_v16 }
 0x2a2   : > { %v2187_v26 = vmax.f32 %v2149_v5, 0.0  ;;  %v8797_v5 = vld [vmem:[#allocation10 + $0xc4] sm:$0xf] }
 0x2a3   : > { %3421 = vmatpush.bf16.msrb.mxu2 %v7524_v13  ;;  %v7588_v18 = vor.u32 %v8797_v5, %v7585_v62  ;;  %3323 = vmatpush.bf16.msrb.mxu0 %v7776_v45 }
 0x2a4   : > { %v2213_v3 = vpack.c.bf16 %v2187_v26, %v2186_v30 }
 0x2a5   : > { %v2102_v29 = vpop.f32.mrf.mxu2  ;;  %v2006_v44 = vpop.f32.mrf.mxu0  ;;  %3470 = vmatpush.bf16.msrb.mxu3 %v7588_v18 }
 0x2a6   : > { %v2264_v41 = vunpack.c.l.b16 %v2213_v3  ;;  %v2265_v50 = vunpack.c.h.b16 %v2213_v3  ;;  %v2103_v0 = vadd.f32 %v2102_v29, %v10240_v37  ;;  %v2151_v59 = vpop.f32.mrf.mxu3  ;;  %v2055_v36 = vpop.f32.mrf.mxu1  ;;  %v7839_v3 = vld [vmem:[#allocation10 + $0x2c0] sm:$0xf]  ;;  %v2007_v22 = vadd.f32 %v2006_v44, %v10242_v7 }
 0x2a7   : > { %v7840_v25 = vor.u32 %v8862_v61, %v7839_v3 }
 0x2a8   : > { %v10340_v30 = vpack.c.b16 %v2264_v41, %v2262_v12  ;;  %v10342_v26 = vpack.c.b16 %v2265_v50, %v2263_v57  ;;  %v2152_v29 = vadd.f32 %v2151_v59, %v2103_v0  ;;  %v2054_v41 = vadd.f32 %v2053_v56, %v2005_v2 }
 0x2a9   : > { %3372 = vmatpush.bf16.msrb.mxu1 %v7840_v25  ;;  %v2056_v34 = vadd.f32 %v2055_v36, %v2007_v22 }
 0x2aa   : > { %3240 = vmatmul.bf16.gmra.mxu2 %v10340_v30  ;;  %3289 = vmatmul.bf16.gmra.mxu3 %v10342_v26  ;;  %v2331_v20 = vshrl.u32 %v10340_v30, 16  ;;  %v2334_v12 = vshll.u32 %v10340_v30, 16  ;;  %v2338_v57 = vshrl.u32 %v10342_v26, 16  ;;  %v2341_v50 = vshll.u32 %v10342_v26, 16 }
 0x2ab   : > { %v2189_v59 = vmax.f32 %v2152_v29, 0.0  ;;  %v2188_v3 = vmax.f32 %v2054_v41, 0.0  ;;  %v2190_v36 = vmax.f32 %v2056_v34, 0.0 }
 0x2ac   : > { %v2333_v0 = vrot.slane %v2331_v20, 7  ;;  %v2340_v62 = vrot.slane %v2338_v57, 7  ;;  %v2457_v61 = vrot.slane %v2334_v12, 1  ;;  %v2459_v17 = vrot.slane %v2341_v50, 1 }
 0x2ad   : > { %v2104_v44 = vpop.f32.mrf.mxu2  ;;  %v2009_v35 = vpop.f32.mrf.mxu0  ;;  %v2214_v29 = vpack.c.bf16 %v2189_v59, %v2188_v3 }
 0x2ae   : > { %v2105_v16 = vadd.f32 %v2104_v44, %v10240_v37  ;;  %v2153_v13 = vpop.f32.mrf.mxu3  ;;  %v2336_v5 = vor.u32 %v2334_v12, %v2333_v0  ;;  %v2058_v6 = vpop.f32.mrf.mxu1  ;;  %v2343_v56 = vor.u32 %v2341_v50, %v2340_v62  ;;  %v10352_v2 = vor.u32 %v2457_v61, %v2331_v20 }
 0x2af   : > { %v10354_v45 = vor.u32 %v2459_v17, %v2338_v57  ;;  %v2266_v57 = vunpack.c.l.b16 %v2214_v29  ;;  %v2267_v50 = vunpack.c.h.b16 %v2214_v29  ;;  %v8779_v17 = vld [vmem:[#allocation10 + $0x34] sm:$0xf] }
 0x2b0   : > { %v2154_v18 = vadd.f32 %v2153_v13, %v2105_v16  ;;  %v10359_v25 = vsel %vm10288_vm2, %v10281_v11, %v2336_v5  ;;  %v10365_v22 = vsel %vm10288_vm2, %v10284_v60, %v2343_v56  ;;  %v7513_v16 = vld [vmem:[#allocation10 + $0x38] sm:$0xf0]  ;;  %v7767_v13 = vld [vmem:[#allocation10 + $0x230] sm:$0xf]  ;;  %v2010_v5 = vadd.f32 %v2009_v35, %v10242_v7  ;;  %v8844_v56 = vld [vmem:[#allocation10 + $0x234] sm:$0xf0] }
 0x2b1   : > { %3142 = vmatmul.bf16.gmra.mxu0 %v10359_v25  ;;  %3191 = vmatmul.bf16.gmra.mxu1 %v10365_v22  ;;  %v7516_v34 = vor.u32 %v8779_v17, %v7513_v16  ;;  %v7768_v29 = vor.u32 %v8844_v56, %v7767_v13 }
 0x2b2   : > { %v2191_v12 = vmax.f32 %v2154_v18, 0.0  ;;  %v8795_v18 = vld [vmem:[#allocation10 + $0xb4] sm:$0xf] }
 0x2b3   : > { %3422 = vmatpush.bf16.msrb.mxu2 %v7516_v34  ;;  %v7580_v10 = vor.u32 %v8795_v18, %v7577_v9  ;;  %3324 = vmatpush.bf16.msrb.mxu0 %v7768_v29 }
 0x2b4   : > { %v2215_v20 = vpack.c.bf16 %v2191_v12, %v2190_v36 }
 0x2b5   : > { %v2107_v41 = vpop.f32.mrf.mxu2  ;;  %v2011_v44 = vpop.f32.mrf.mxu0  ;;  %3471 = vmatpush.bf16.msrb.mxu3 %v7580_v10 }
 0x2b6   : > { %v2268_v0 = vunpack.c.l.b16 %v2215_v20  ;;  %v2269_v62 = vunpack.c.h.b16 %v2215_v20  ;;  %v2108_v61 = vadd.f32 %v2107_v41, %v10240_v37  ;;  %v2156_v59 = vpop.f32.mrf.mxu3  ;;  %v2060_v3 = vpop.f32.mrf.mxu1  ;;  %v7831_v20 = vld [vmem:[#allocation10 + $0x2b0] sm:$0xf]  ;;  %v2012_v42 = vadd.f32 %v2011_v44, %v10242_v7 }
 0x2b7   : > { %v7832_v24 = vor.u32 %v8860_v23, %v7831_v20 }
 0x2b8   : > { %v10370_v36 = vpack.c.b16 %v2268_v0, %v2266_v57  ;;  %v10372_v12 = vpack.c.b16 %v2269_v62, %v2267_v50  ;;  %v2157_v41 = vadd.f32 %v2156_v59, %v2108_v61  ;;  %v2059_v0 = vadd.f32 %v2058_v6, %v2010_v5 }
 0x2b9   : > { %3373 = vmatpush.bf16.msrb.mxu1 %v7832_v24  ;;  %v2061_v16 = vadd.f32 %v2060_v3, %v2012_v42 }
 0x2ba   : > { %3245 = vmatmul.bf16.gmra.mxu2 %v10370_v36  ;;  %3294 = vmatmul.bf16.gmra.mxu3 %v10372_v12  ;;  %v2345_v35 = vshrl.u32 %v10370_v36, 16  ;;  %v2348_v57 = vshll.u32 %v10370_v36, 16  ;;  %v2352_v50 = vshrl.u32 %v10372_v12, 16  ;;  %v2355_v62 = vshll.u32 %v10372_v12, 16 }
 0x2bb   : > { %v2193_v59 = vmax.f32 %v2157_v41, 0.0  ;;  %v2192_v20 = vmax.f32 %v2059_v0, 0.0  ;;  %v2194_v3 = vmax.f32 %v2061_v16, 0.0 }
 0x2bc   : > { %v2347_v61 = vrot.slane %v2345_v35, 7  ;;  %v2354_v9 = vrot.slane %v2352_v50, 7  ;;  %v2461_v23 = vrot.slane %v2348_v57, 1  ;;  %v2463_v17 = vrot.slane %v2355_v62, 1 }
 0x2bd   : > { %v2109_v44 = vpop.f32.mrf.mxu2  ;;  %v2014_v56 = vpop.f32.mrf.mxu0  ;;  %v2216_v41 = vpack.c.bf16 %v2193_v59, %v2192_v20 }
 0x2be   : > { %v2110_v13 = vadd.f32 %v2109_v44, %v10240_v37  ;;  %v2158_v34 = vpop.f32.mrf.mxu3  ;;  %v2350_v18 = vor.u32 %v2348_v57, %v2347_v61  ;;  %v2063_v32 = vpop.f32.mrf.mxu1  ;;  %v2357_v6 = vor.u32 %v2355_v62, %v2354_v9  ;;  %v10382_v5 = vor.u32 %v2461_v23, %v2345_v35 }
 0x2bf   : > { %v10384_v29 = vor.u32 %v2463_v17, %v2352_v50  ;;  %v2270_v50 = vunpack.c.l.b16 %v2216_v41  ;;  %v2271_v62 = vunpack.c.h.b16 %v2216_v41  ;;  %v8777_v17 = vld [vmem:[#allocation10 + $0x24] sm:$0xf] }
 0x2c0   : > { %v2159_v10 = vadd.f32 %v2158_v34, %v2110_v13  ;;  %v10389_v24 = vsel %vm10288_vm2, %v10281_v11, %v2350_v18  ;;  %v10395_v42 = vsel %vm10288_vm2, %v10284_v60, %v2357_v6  ;;  %v7505_v13 = vld [vmem:[#allocation10 + $0x28] sm:$0xf0]  ;;  %v7759_v34 = vld [vmem:[#allocation10 + $0x220] sm:$0xf]  ;;  %v2015_v18 = vadd.f32 %v2014_v56, %v10242_v7  ;;  %v8842_v6 = vld [vmem:[#allocation10 + $0x224] sm:$0xf0] }
 0x2c1   : > { %3147 = vmatmul.bf16.gmra.mxu0 %v10389_v24  ;;  %3196 = vmatmul.bf16.gmra.mxu1 %v10395_v42  ;;  %v7508_v16 = vor.u32 %v8777_v17, %v7505_v13  ;;  %v7760_v41 = vor.u32 %v8842_v6, %v7759_v34 }
 0x2c2   : > { %v2195_v57 = vmax.f32 %v2159_v10, 0.0  ;;  %v8793_v10 = vld [vmem:[#allocation10 + $0xa4] sm:$0xf] }
 0x2c3   : > { %3423 = vmatpush.bf16.msrb.mxu2 %v7508_v16  ;;  %v7572_v15 = vor.u32 %v8793_v10, %v7569_v58  ;;  %3325 = vmatpush.bf16.msrb.mxu0 %v7760_v41 }
 0x2c4   : > { %v2217_v35 = vpack.c.bf16 %v2195_v57, %v2194_v3 }
 0x2c5   : > { %v2112_v0 = vpop.f32.mrf.mxu2  ;;  %v2016_v44 = vpop.f32.mrf.mxu0  ;;  %3472 = vmatpush.bf16.msrb.mxu3 %v7572_v15 }
 0x2c6   : > { %v2272_v61 = vunpack.c.l.b16 %v2217_v35  ;;  %v2273_v9 = vunpack.c.h.b16 %v2217_v35  ;;  %v2113_v23 = vadd.f32 %v2112_v0, %v10240_v37  ;;  %v2161_v59 = vpop.f32.mrf.mxu3  ;;  %v2065_v20 = vpop.f32.mrf.mxu1  ;;  %v7823_v35 = vld [vmem:[#allocation10 + $0x2a0] sm:$0xf]  ;;  %v2017_v19 = vadd.f32 %v2016_v44, %v10242_v7 }
 0x2c7   : > { %v7824_v63 = vor.u32 %v8858_v4, %v7823_v35 }
 0x2c8   : > { %v10400_v3 = vpack.c.b16 %v2272_v61, %v2270_v50  ;;  %v10402_v57 = vpack.c.b16 %v2273_v9, %v2271_v62  ;;  %v2162_v0 = vadd.f32 %v2161_v59, %v2113_v23  ;;  %v2064_v61 = vadd.f32 %v2063_v32, %v2015_v18 }
 0x2c9   : > { %3374 = vmatpush.bf16.msrb.mxu1 %v7824_v63  ;;  %v2066_v13 = vadd.f32 %v2065_v20, %v2017_v19 }
 0x2ca   : > { %11953 = vst [vmem:[#allocation69_spill] sm:$0xff] %v10402_v57  ;;  %3250 = vmatmul.bf16.gmra.mxu2 %v10400_v3  ;;  %3299 = vmatmul.bf16.gmra.mxu3 %v10402_v57  ;;  %v2359_v56 = vshrl.u32 %v10400_v3, 16  ;;  %v2362_v50 = vshll.u32 %v10400_v3, 16  ;;  %v2366_v62 = vshrl.u32 %v10402_v57, 16  ;;  %v2369_v9 = vshll.u32 %v10402_v57, 16 }
 0x2cb   : > { %v2197_v59 = vmax.f32 %v2162_v0, 0.0  ;;  %v2196_v35 = vmax.f32 %v2064_v61, 0.0  ;;  %v2198_v20 = vmax.f32 %v2066_v13, 0.0  ;;  %v8840_v13 = vld [vmem:[#allocation10 + $0x214] sm:$0xf0] }
 0x2cc   : > { %v2361_v23 = vrot.slane %v2359_v56, 7  ;;  %v2368_v58 = vrot.slane %v2366_v62, 7  ;;  %v2465_v4 = vrot.slane %v2362_v50, 1  ;;  %v2467_v17 = vrot.slane %v2369_v9, 1 }
 0x2cd   : > { %v2114_v44 = vpop.f32.mrf.mxu2  ;;  %v2019_v6 = vpop.f32.mrf.mxu0  ;;  %v2218_v0 = vpack.c.bf16 %v2197_v59, %v2196_v35 }
 0x2ce   : > { %v2115_v34 = vadd.f32 %v2114_v44, %v10240_v37  ;;  %v2163_v16 = vpop.f32.mrf.mxu3  ;;  %v2364_v10 = vor.u32 %v2362_v50, %v2361_v23  ;;  %v2068_v33 = vpop.f32.mrf.mxu1  ;;  %v2371_v32 = vor.u32 %v2369_v9, %v2368_v58  ;;  %v10412_v18 = vor.u32 %v2465_v4, %v2359_v56 }
 0x2cf   : > { %v10414_v41 = vor.u32 %v2467_v17, %v2366_v62  ;;  %v2274_v62 = vunpack.c.l.b16 %v2218_v0  ;;  %v2275_v9 = vunpack.c.h.b16 %v2218_v0  ;;  %v8775_v17 = vld [vmem:[#allocation10 + $0x14] sm:$0xf] }
 0x2d0   : > { %v2164_v15 = vadd.f32 %v2163_v16, %v2115_v34  ;;  %v10419_v63 = vsel %vm10288_vm2, %v10281_v11, %v2364_v10  ;;  %v10425_v19 = vsel %vm10288_vm2, %v10284_v60, %v2371_v32  ;;  %v7497_v34 = vld [vmem:[#allocation10 + $0x18] sm:$0xf0]  ;;  %v7751_v16 = vld [vmem:[#allocation10 + $0x210] sm:$0xf]  ;;  %v2020_v10 = vadd.f32 %v2019_v6, %v10242_v7  ;;  %v8791_v32 = vld [vmem:[#allocation10 + $0x94] sm:$0xf] }
 0x2d1   : > { %3152 = vmatmul.bf16.gmra.mxu0 %v10419_v63  ;;  %3201 = vmatmul.bf16.gmra.mxu1 %v10425_v19  ;;  %v7500_v35 = vor.u32 %v8775_v17, %v7497_v34  ;;  %v7752_v0 = vor.u32 %v8840_v13, %v7751_v16 }
 0x2d2   : > { %v2199_v50 = vmax.f32 %v2164_v15, 0.0  ;;  %v7561_v15 = vld [vmem:[#allocation10 + $0x98] sm:$0xf0] }
 0x2d3   : > { %3424 = vmatpush.bf16.msrb.mxu2 %v7500_v35  ;;  %v7564_v51 = vor.u32 %v8791_v32, %v7561_v15  ;;  %3326 = vmatpush.bf16.msrb.mxu0 %v7752_v0 }
 0x2d4   : > { %v2219_v56 = vpack.c.bf16 %v2199_v50, %v2198_v20  ;;  %v7815_v50 = vld [vmem:[#allocation10 + $0x290] sm:$0xf] }
 0x2d5   : > { %v2117_v61 = vpop.f32.mrf.mxu2  ;;  %v2021_v44 = vpop.f32.mrf.mxu0  ;;  %3473 = vmatpush.bf16.msrb.mxu3 %v7564_v51 }
 0x2d6   : > { %v2276_v23 = vunpack.c.l.b16 %v2219_v56  ;;  %v2277_v58 = vunpack.c.h.b16 %v2219_v56  ;;  %v2118_v4 = vadd.f32 %v2117_v61, %v10240_v37  ;;  %v2166_v59 = vpop.f32.mrf.mxu3  ;;  %v8856_v56 = vld [vmem:[#allocation10 + $0x294] sm:$0xf0]  ;;  %v2070_v61 = vpop.f32.mrf.mxu1  ;;  %v2022_v1 = vadd.f32 %v2021_v44, %v10242_v7 }
 0x2d7   : > { %v7816_v21 = vor.u32 %v8856_v56, %v7815_v50 }
 0x2d8   : > { %v10430_v8 = vpack.c.b16 %v2276_v23, %v2274_v62  ;;  %v10432_v20 = vpack.c.b16 %v2277_v58, %v2275_v9  ;;  %v2167_v27 = vadd.f32 %v2166_v59, %v2118_v4  ;;  %v8773_v23 = vld [vmem:[#allocation10 + $0x4] sm:$0xf]  ;;  %v2069_v58 = vadd.f32 %v2068_v33, %v2020_v10  ;;  %v7489_v59 = vld [vmem:[#allocation10 + $0x8] sm:$0xf0] }
 0x2d9   : > { %3375 = vmatpush.bf16.msrb.mxu1 %v7816_v21  ;;  %v7492_v44 = vor.u32 %v8773_v23, %v7489_v59  ;;  %v2071_v15 = vadd.f32 %v2070_v61, %v2022_v1  ;;  %v7553_v59 = vld [vmem:[#allocation10 + $0x88] sm:$0xf0] }
 0x2da   : > { %11954 = vst [vmem:[#allocation70_spill] sm:$0xff] %v10430_v8  ;;  %3255 = vmatmul.bf16.gmra.mxu2 %v10430_v8  ;;  %3304 = vmatmul.bf16.gmra.mxu3 %v10432_v20  ;;  %v2373_v6 = vshrl.u32 %v10430_v8, 16  ;;  %v2376_v62 = vshll.u32 %v10430_v8, 16  ;;  %v2380_v9 = vshrl.u32 %v10432_v20, 16  ;;  %v2383_v4 = vshll.u32 %v10432_v20, 16 }
 0x2db   : > { %11955 = vst [vmem:[#allocation71_spill] sm:$0xff] %v10432_v20  ;;  %v2201_v16 = vmax.f32 %v2167_v27, 0.0  ;;  %3425 = vmatpush.bf16.msrb.mxu2 %v7492_v44  ;;  %v2200_v33 = vmax.f32 %v2069_v58, 0.0  ;;  %v2202_v61 = vmax.f32 %v2071_v15, 0.0  ;;  %v8854_v44 = vld [vmem:[#allocation10 + $0x284] sm:$0xf0] }
 0x2dc   : > { %v2375_v17 = vrot.slane %v2373_v6, 7  ;;  %v2382_v34 = vrot.slane %v2380_v9, 7  ;;  %v2469_v13 = vrot.slane %v2376_v62, 1  ;;  %v2471_v32 = vrot.slane %v2383_v4, 1 }
 0x2dd   : > { %v2119_v35 = vpop.f32.mrf.mxu2  ;;  %v2024_v46 = vpop.f32.mrf.mxu0  ;;  %v2220_v27 = vpack.c.bf16 %v2201_v16, %v2200_v33 }
 0x2de   : > { %v2120_v50 = vadd.f32 %v2119_v35, %v10240_v37  ;;  %v2168_v56 = vpop.f32.mrf.mxu3  ;;  %v2378_v48 = vor.u32 %v2376_v62, %v2375_v17  ;;  %v2385_v10 = vor.u32 %v2383_v4, %v2382_v34  ;;  %v10442_v0 = vor.u32 %v2469_v13, %v2373_v6  ;;  %v7743_v6 = vld [vmem:[#allocation10 + $0x200] sm:$0xf]  ;;  %v2073_v23 = vpop.f32.mrf.mxu1  ;;  %v8789_v4 = vld [vmem:[#allocation10 + $0x84] sm:$0xf] }
 0x2df   : > { %v10444_v51 = vor.u32 %v2471_v32, %v2380_v9  ;;  %v8838_v9 = vld [vmem:[#allocation10 + $0x204] sm:$0xf0]  ;;  %v7556_v17 = vor.u32 %v8789_v4, %v7553_v59  ;;  %v7807_v34 = vld [vmem:[#allocation10 + $0x280] sm:$0xf]  ;;  %v2278_v16 = vunpack.c.l.b16 %v2220_v27  ;;  %v2279_v32 = vunpack.c.h.b16 %v2220_v27 }
 0x2e0   : > { %v2169_v20 = vadd.f32 %v2168_v56, %v2120_v50  ;;  %v10449_v21 = vsel %vm10288_vm2, %v10281_v11, %v2378_v48  ;;  %v10455_v1 = vsel %vm10288_vm2, %v10284_v60, %v2385_v10  ;;  %v7744_v58 = vor.u32 %v8838_v9, %v7743_v6 }
 0x2e1   : > { %3157 = vmatmul.bf16.gmra.mxu0 %v10449_v21  ;;  %3206 = vmatmul.bf16.gmra.mxu1 %v10455_v1  ;;  %v7808_v13 = vor.u32 %v8854_v44, %v7807_v34  ;;  %v2025_v33 = vadd.f32 %v2024_v46, %v10242_v7 }
 0x2e2   : > { %v2203_v62 = vmax.f32 %v2169_v20, 0.0  ;;  %3327 = vmatpush.bf16.msrb.mxu0 %v7744_v58  ;;  %3474 = vmatpush.bf16.msrb.mxu3 %v7556_v17 }
 0x2e3   : > { %3376 = vmatpush.bf16.msrb.mxu1 %v7808_v13  ;;  %v2074_v46 = vadd.f32 %v2073_v23, %v2025_v33 }
 0x2e4   : > { %v2221_v48 = vpack.c.bf16 %v2203_v62, %v2202_v61 }
 0x2e5   : > { %v2122_v35 = vpop.f32.mrf.mxu2  ;;  %v2026_v10 = vpop.f32.mrf.mxu0 }
 0x2e6   : > { %v2280_v50 = vunpack.c.l.b16 %v2221_v48  ;;  %v2281_v15 = vunpack.c.h.b16 %v2221_v48  ;;  %v2123_v20 = vadd.f32 %v2122_v35, %v10240_v37  ;;  %v2171_v56 = vpop.f32.mrf.mxu3  ;;  %v2027_v9 = vadd.f32 %v2026_v10, %v10242_v7 }
 0x2e8   : > { %v10460_v6 = vpack.c.b16 %v2280_v50, %v2278_v16  ;;  %v10462_v61 = vpack.c.b16 %v2281_v15, %v2279_v32  ;;  %v2172_v62 = vadd.f32 %v2171_v56, %v2123_v20  ;;  %v2075_v16 = vpop.f32.mrf.mxu1  ;;  %v2204_v15 = vmax.f32 %v2074_v46, 0.0  ;;  %v8819_v46 = vld [vmem:[#allocation10 + $0x174] sm:$0xf] }
 0x2e9   : > { %v2076_v13 = vadd.f32 %v2075_v16, %v2027_v9  ;;  %v7865_v16 = vld [vmem:[#allocation10 + $0x2f8] sm:$0xf0] }
 0x2ea   : > { %11956 = vst [vmem:[#allocation72_spill] sm:$0xff] %v10460_v6  ;;  %3260 = vmatmul.bf16.gmra.mxu2 %v10460_v6  ;;  %3309 = vmatmul.bf16.gmra.mxu3 %v10462_v61  ;;  %v2387_v27 = vshrl.u32 %v10460_v6, 16  ;;  %v2390_v58 = vshll.u32 %v10460_v6, 16  ;;  %v2394_v4 = vshrl.u32 %v10462_v61, 16  ;;  %v2397_v59 = vshll.u32 %v10462_v61, 16 }
 0x2eb   : > { %11957 = vst [vmem:[#allocation73_spill] sm:$0xff] %v10462_v61  ;;  %v2205_v44 = vmax.f32 %v2172_v62, 0.0  ;;  %v2206_v9 = vmax.f32 %v2076_v13, 0.0 }
 0x2ec   : > { %v2389_v48 = vrot.slane %v2387_v27, 7  ;;  %v2396_v17 = vrot.slane %v2394_v4, 7  ;;  %v2473_v34 = vrot.slane %v2390_v58, 1  ;;  %v2475_v7 = vrot.slane %v2397_v59, 1 }
 0x2ed   : > { %v2124_v35 = vpop.f32.mrf.mxu2  ;;  %v2222_v62 = vpack.c.bf16 %v2205_v44, %v2204_v15 }
 0x2ee   : > { %v2125_v32 = vadd.f32 %v2124_v35, %v10240_v37  ;;  %v2392_v50 = vor.u32 %v2390_v58, %v2389_v48  ;;  %v2173_v20 = vpop.f32.mrf.mxu3  ;;  %v2399_v56 = vor.u32 %v2397_v59, %v2396_v17  ;;  %v10472_v10 = vor.u32 %v2473_v34, %v2387_v27  ;;  %v8851_v27 = vld [vmem:[#allocation10 + $0x274] sm:$0xf]  ;;  %v7673_v17 = vld [vmem:[#allocation10 + $0x178] sm:$0xf0] }
 0x2ef   : > { %v10474_v6 = vor.u32 %v2475_v7, %v2394_v4  ;;  %v7801_v4 = vld [vmem:[#allocation10 + $0x278] sm:$0xf0]  ;;  %v8867_v34 = vld [vmem:[#allocation10 + $0x2f4] sm:$0xf]  ;;  %v2282_v44 = vunpack.c.l.b16 %v2222_v62  ;;  %v7676_v35 = vor.u32 %v8819_v46, %v7673_v17  ;;  %v2283_v15 = vunpack.c.h.b16 %v2222_v62 }
 0x2f0   : > { %v2174_v23 = vadd.f32 %v2173_v20, %v2125_v32  ;;  %v10479_v33 = vsel %vm10288_vm2, %v10281_v11, %v2392_v50  ;;  %v10485_v37 = vsel %vm10288_vm2, %v10284_v60, %v2399_v56  ;;  %v7804_v48 = vor.u32 %v8851_v27, %v7801_v4  ;;  %v8835_v32 = vld [vmem:[#allocation10 + $0x1f4] sm:$0xf]  ;;  %v7737_v50 = vld [vmem:[#allocation10 + $0x1f8] sm:$0xf0] }
 0x2f1   : > { %3162 = vmatmul.bf16.gmra.mxu0 %v10479_v33  ;;  %3211 = vmatmul.bf16.gmra.mxu1 %v10485_v37  ;;  %v7868_v7 = vor.u32 %v8867_v34, %v7865_v16  ;;  %v7740_v13 = vor.u32 %v8835_v32, %v7737_v50  ;;  %v8849_v32 = vld [vmem:[#allocation10 + $0x264] sm:$0xf]  ;;  %v7793_v50 = vld [vmem:[#allocation10 + $0x268] sm:$0xf0] }
 0x2f2   : > { %v2207_v58 = vmax.f32 %v2174_v23, 0.0  ;;  %3614 = vmatpush.bf16.msra.mxu2 %v7804_v48  ;;  %3516 = vmatpush.bf16.msra.mxu0 %v7676_v35 }
 0x2f3   : > { %3663 = vmatpush.bf16.msra.mxu3 %v7868_v7  ;;  %3565 = vmatpush.bf16.msra.mxu1 %v7740_v13  ;;  %v8865_v13 = vld [vmem:[#allocation10 + $0x2e4] sm:$0xf] }
 0x2f4   : > { %v2223_v59 = vpack.c.bf16 %v2207_v58, %v2206_v9 }
 0x2f6   : > { %v2284_v20 = vunpack.c.l.b16 %v2223_v59  ;;  %v2285_v56 = vunpack.c.h.b16 %v2223_v59 }
 0x2f8   : > { %v10488_v23 = vpack.c.b16 %v2284_v20, %v2282_v44  ;;  %v10490_v61 = vpack.c.b16 %v2285_v56, %v2283_v15  ;;  %v8817_v15 = vld [vmem:[#allocation10 + $0x164] sm:$0xf]  ;;  %v7796_v20 = vor.u32 %v8849_v32, %v7793_v50  ;;  %v7665_v56 = vld [vmem:[#allocation10 + $0x168] sm:$0xf0] }
 0x2fa   : > { %11958 = vst [vmem:[#allocation74_spill] sm:$0xff] %v10488_v23  ;;  %3265 = vmatmul.bf16.gmra.mxu2 %v10488_v23  ;;  %3314 = vmatmul.bf16.gmra.mxu3 %v10490_v61  ;;  %v2401_v9 = vshrl.u32 %v10488_v23, 16  ;;  %v2404_v58 = vshll.u32 %v10488_v23, 16  ;;  %v2408_v62 = vshrl.u32 %v10490_v61, 16  ;;  %v2411_v27 = vshll.u32 %v10490_v61, 16 }
 0x2fb   : > { %11959 = vst [vmem:[#allocation75_spill] sm:$0xff] %v10490_v61  ;;  %3615 = vmatpush.bf16.msra.mxu2 %v7796_v20  ;;  %v8831_v61 = vld [vmem:[#allocation10 + $0x1d4] sm:$0xf]  ;;  %v7721_v23 = vld [vmem:[#allocation10 + $0x1d8] sm:$0xf0] }
 0x2fc   : > { %v2403_v4 = vrot.slane %v2401_v9, 7  ;;  %v2410_v46 = vrot.slane %v2408_v62, 7  ;;  %v2477_v59 = vrot.slane %v2404_v58, 1  ;;  %v2479_v48 = vrot.slane %v2411_v27, 1 }
 0x2fd   : > { %v7724_v57 = vor.u32 %v8831_v61, %v7721_v23  ;;  %v8845_v23 = vld [vmem:[#allocation10 + $0x244] sm:$0xf] }
 0x2fe   : > { %v2406_v17 = vor.u32 %v2404_v58, %v2403_v4  ;;  %v2413_v34 = vor.u32 %v2411_v27, %v2410_v46  ;;  %v10498_v16 = vor.u32 %v2477_v59, %v2401_v9  ;;  %v10500_v44 = vor.u32 %v2479_v48, %v2408_v62  ;;  %v7857_v9 = vld [vmem:[#allocation10 + $0x2e8] sm:$0xf0]  ;;  %v8833_v27 = vld [vmem:[#allocation10 + $0x1e4] sm:$0xf]  ;;  %v10517_v59 = vld [vmem:[%s11769_s6] sm:$0x3] }
 0x2ff   : > { %v7668_v58 = vor.u32 %v8817_v15, %v7665_v56  ;;  %v7860_v62 = vor.u32 %v8865_v13, %v7857_v9  ;;  %v7729_v4 = vld [vmem:[#allocation10 + $0x1e8] sm:$0xf0]  ;;  %v2498_v48 = vshll.u32 %v10281_v11, 16 }
 0x300   : > { %v10505_v35 = vsel %vm10288_vm2, %v10281_v11, %v2406_v17  ;;  %v10510_v7 = vsel %vm10288_vm2, %v10284_v60, %v2413_v34  ;;  %v7732_v46 = vor.u32 %v8833_v27, %v7729_v4  ;;  %v2502_v17 = vshll.u32 %v10284_v60, 16  ;;  %v7785_v27 = vld [vmem:[#allocation10 + $0x258] sm:$0xf0]  ;;  %v8815_v4 = vld [vmem:[#allocation10 + $0x154] sm:$0xf] }
 0x301   : > { %3167 = vmatmul.bf16.gmra.mxu0 %v10505_v35  ;;  %3216 = vmatmul.bf16.gmra.mxu1 %v10510_v7  ;;  %v10524_v34 = vperm.slane %v10517_v59, 0  ;;  %v10526_v32 = vrot.slane %v2498_v48, 1  ;;  %v7657_v48 = vld [vmem:[#allocation10 + $0x158] sm:$0xf0] }
 0x302   : > { %3517 = vmatpush.bf16.msra.mxu0 %v7668_v58  ;;  %3664 = vmatpush.bf16.msra.mxu3 %v7860_v62  ;;  %v10528_v20 = vrot.slane %v2502_v17, 1  ;;  %v8847_v62 = vld [vmem:[#allocation10 + $0x254] sm:$0xf] }
 0x303   : > { %3566 = vmatpush.bf16.msra.mxu1 %v7732_v46  ;;  %v7788_v46 = vor.u32 %v8847_v62, %v7785_v27  ;;  %v8863_v17 = vld [vmem:[#allocation10 + $0x2d4] sm:$0xf] }
 0x304   : > { %v10546_v9 = vsel %vm10531_vm5, %v10294_v47, %v10528_v20 }
 0x305   : > { %3616 = vmatpush.bf16.msra.mxu2 %v7788_v46  ;;  %v7777_v46 = vld [vmem:[#allocation10 + $0x248] sm:$0xf0] }
 0x307   : > { %3567 = vmatpush.bf16.msra.mxu1 %v7724_v57 }
 0x30a   : > { %3426 = vmatmul.bf16.vlgmr.msrb.gmra.mxu2 %v10299_v43  ;;  %3475 = vmatmul.bf16.vlgmr.msrb.gmra.mxu3 %v10305_v28  ;;  %v10539_v43 = vsel %vm10531_vm5, %v10292_v55, %v10526_v32  ;;  %v7849_v55 = vld [vmem:[#allocation10 + $0x2d8] sm:$0xf0] }
 0x30b   : > { %v7852_v39 = vor.u32 %v8863_v17, %v7849_v55  ;;  %v8813_v55 = vld [vmem:[#allocation10 + $0x144] sm:$0xf] }
 0x30d   : > { %v3231_v50 = vpop.f32.mrf.mxu2  ;;  %v3280_v15 = vpop.f32.mrf.mxu3  ;;  %3665 = vmatpush.bf16.msra.mxu3 %v7852_v39  ;;  %v10561_v39 = vsel %vm10531_vm5, %v10322_v54, %v10526_v32  ;;  %v7841_v54 = vld [vmem:[#allocation10 + $0x2c8] sm:$0xf0] }
 0x30e   : > { %v3133_v56 = vpop.f32.mrf.mxu0  ;;  %v3182_v13 = vpop.f32.mrf.mxu1 }
 0x30f   : > { %v3134_v11 = vadd.f32 %v3133_v56, %v10524_v34 }
 0x311   : > { %v3183_v28 = vadd.f32 %v3182_v13, %v3134_v11  ;;  %3328 = vmatmul.bf16.vlgmr.msrb.gmra.mxu0 %v10539_v43  ;;  %3377 = vmatmul.bf16.vlgmr.msrb.gmra.mxu1 %v10546_v9  ;;  %v7660_v13 = vor.u32 %v8815_v4, %v7657_v48 }
 0x313   : > { %v3232_v58 = vadd.f32 %v3231_v50, %v3183_v28  ;;  %3518 = vmatpush.bf16.msra.mxu0 %v7660_v13  ;;  %v8861_v13 = vld [vmem:[#allocation10 + $0x2c4] sm:$0xf] }
 0x315   : > { %v3233_v56 = vpop.f32.mrf.mxu2  ;;  %v3282_v11 = vpop.f32.mrf.mxu3  ;;  %v10549_v8 = vadd.f32 %v3280_v15, %v3232_v58 }
 0x316   : > { %v3135_v47 = vpop.f32.mrf.mxu0  ;;  %v3184_v28 = vpop.f32.mrf.mxu1 }
 0x317   : > { %v3136_v50 = vadd.f32 %v3135_v47, %v10524_v34 }
 0x319   : > { %v3185_v62 = vadd.f32 %v3184_v28, %v3136_v50 }
 0x31a   : > { %3431 = vmatmul.bf16.gmra.mxu2 %v10329_v49  ;;  %3480 = vmatmul.bf16.gmra.mxu3 %v10335_v38  ;;  %v10568_v49 = vsel %vm10531_vm5, %v10324_v52, %v10528_v20 }
 0x31b   : > { %v3234_v27 = vadd.f32 %v3233_v56, %v3185_v62  ;;  %v7780_v56 = vor.u32 %v8845_v23, %v7777_v46  ;;  %v7844_v62 = vor.u32 %v8861_v13, %v7841_v54  ;;  %v10583_v54 = vsel %vm10531_vm5, %v10352_v2, %v10526_v32  ;;  %v7833_v2 = vld [vmem:[#allocation10 + $0x2b8] sm:$0xf0] }
 0x31d   : > { %v3236_v4 = vpop.f32.mrf.mxu2  ;;  %v3285_v48 = vpop.f32.mrf.mxu3  ;;  %v10554_v17 = vadd.f32 %v3282_v11, %v3234_v27  ;;  %v7649_v11 = vld [vmem:[#allocation10 + $0x148] sm:$0xf0]  ;;  %v8829_v27 = vld [vmem:[#allocation10 + $0x1c4] sm:$0xf]  ;;  %3617 = vmatpush.bf16.msra.mxu2 %v7780_v56  ;;  %3666 = vmatpush.bf16.msra.mxu3 %v7844_v62  ;;  %v8811_v62 = vld [vmem:[#allocation10 + $0x134] sm:$0xf] }
 0x31e   : > { %v3138_v15 = vpop.f32.mrf.mxu0  ;;  %v3187_v61 = vpop.f32.mrf.mxu1  ;;  %v7652_v28 = vor.u32 %v8813_v55, %v7649_v11 }
 0x31f   : > { %v3139_v58 = vadd.f32 %v3138_v15, %v10524_v34  ;;  %v7713_v15 = vld [vmem:[#allocation10 + $0x1c8] sm:$0xf0] }
 0x320   : > { %3519 = vmatpush.bf16.msra.mxu0 %v7652_v28 }
 0x321   : > { %v3188_v57 = vadd.f32 %v3187_v61, %v3139_v58  ;;  %3333 = vmatmul.bf16.gmra.mxu0 %v10561_v39  ;;  %3382 = vmatmul.bf16.gmra.mxu1 %v10568_v49  ;;  %v7716_v61 = vor.u32 %v8829_v27, %v7713_v15  ;;  %v7641_v15 = vld [vmem:[#allocation10 + $0x138] sm:$0xf0] }
 0x323   : > { %v3237_v38 = vadd.f32 %v3236_v4, %v3188_v57  ;;  %3568 = vmatpush.bf16.msra.mxu1 %v7716_v61 }
 0x325   : > { %v3238_v47 = vpop.f32.mrf.mxu2  ;;  %v3287_v50 = vpop.f32.mrf.mxu3  ;;  %v10571_v58 = vadd.f32 %v3285_v48, %v3237_v38 }
 0x326   : > { %v3140_v52 = vpop.f32.mrf.mxu0  ;;  %v3189_v57 = vpop.f32.mrf.mxu1 }
 0x327   : > { %v3141_v4 = vadd.f32 %v3140_v52, %v10524_v34  ;;  %v8859_v52 = vld [vmem:[#allocation10 + $0x2b4] sm:$0xf] }
 0x329   : > { %v3190_v23 = vadd.f32 %v3189_v57, %v3141_v4  ;;  %v7644_v57 = vor.u32 %v8811_v62, %v7641_v15 }
 0x32a   : > { %3436 = vmatmul.bf16.gmra.mxu2 %v10359_v25  ;;  %3485 = vmatmul.bf16.gmra.mxu3 %v10365_v22  ;;  %v10590_v25 = vsel %vm10531_vm5, %v10354_v45, %v10528_v20 }
 0x32b   : > { %v3239_v46 = vadd.f32 %v3238_v47, %v3190_v23  ;;  %v8843_v47 = vld [vmem:[#allocation10 + $0x234] sm:$0xf]  ;;  %v7836_v23 = vor.u32 %v8859_v52, %v7833_v2  ;;  %3520 = vmatpush.bf16.msra.mxu0 %v7644_v57  ;;  %v10605_v2 = vsel %vm10531_vm5, %v10382_v5, %v10526_v32  ;;  %v7825_v5 = vld [vmem:[#allocation10 + $0x2a8] sm:$0xf0] }
 0x32d   : > { %v3241_v55 = vpop.f32.mrf.mxu2  ;;  %v3290_v11 = vpop.f32.mrf.mxu3  ;;  %v10576_v13 = vadd.f32 %v3287_v50, %v3239_v46  ;;  %v7769_v50 = vld [vmem:[#allocation10 + $0x238] sm:$0xf0]  ;;  %v8827_v46 = vld [vmem:[#allocation10 + $0x1b4] sm:$0xf]  ;;  %3667 = vmatpush.bf16.msra.mxu3 %v7836_v23  ;;  %v8809_v23 = vld [vmem:[#allocation10 + $0x124] sm:$0xf] }
 0x32e   : > { %v3143_v48 = vpop.f32.mrf.mxu0  ;;  %v3192_v56 = vpop.f32.mrf.mxu1  ;;  %v7772_v27 = vor.u32 %v8843_v47, %v7769_v50 }
 0x32f   : > { %v3144_v38 = vadd.f32 %v3143_v48, %v10524_v34  ;;  %v7705_v48 = vld [vmem:[#allocation10 + $0x1b8] sm:$0xf0] }
 0x330   : > { %3618 = vmatpush.bf16.msra.mxu2 %v7772_v27 }
 0x331   : > { %v3193_v28 = vadd.f32 %v3192_v56, %v3144_v38  ;;  %3338 = vmatmul.bf16.gmra.mxu0 %v10583_v54  ;;  %3387 = vmatmul.bf16.gmra.mxu1 %v10590_v25  ;;  %v7708_v56 = vor.u32 %v8827_v46, %v7705_v48  ;;  %v7633_v48 = vld [vmem:[#allocation10 + $0x128] sm:$0xf0] }
 0x333   : > { %v3242_v22 = vadd.f32 %v3241_v55, %v3193_v28  ;;  %3569 = vmatpush.bf16.msra.mxu1 %v7708_v56 }
 0x335   : > { %v3243_v61 = vpop.f32.mrf.mxu2  ;;  %v3292_v4 = vpop.f32.mrf.mxu3  ;;  %v10593_v38 = vadd.f32 %v3290_v11, %v3242_v22 }
 0x336   : > { %v3145_v45 = vpop.f32.mrf.mxu0  ;;  %v3194_v28 = vpop.f32.mrf.mxu1 }
 0x337   : > { %v3146_v55 = vadd.f32 %v3145_v45, %v10524_v34  ;;  %v8857_v45 = vld [vmem:[#allocation10 + $0x2a4] sm:$0xf] }
 0x339   : > { %v3195_v47 = vadd.f32 %v3194_v28, %v3146_v55  ;;  %v7636_v28 = vor.u32 %v8809_v23, %v7633_v48 }
 0x33a   : > { %3441 = vmatmul.bf16.gmra.mxu2 %v10389_v24  ;;  %3490 = vmatmul.bf16.gmra.mxu3 %v10395_v42  ;;  %v10612_v24 = vsel %vm10531_vm5, %v10384_v29, %v10528_v20 }
 0x33b   : > { %v3244_v50 = vadd.f32 %v3243_v61, %v3195_v47  ;;  %v8841_v61 = vld [vmem:[#allocation10 + $0x224] sm:$0xf]  ;;  %v7828_v47 = vor.u32 %v8857_v45, %v7825_v5  ;;  %3521 = vmatpush.bf16.msra.mxu0 %v7636_v28  ;;  %v10627_v5 = vsel %vm10531_vm5, %v10412_v18, %v10526_v32  ;;  %v7817_v18 = vld [vmem:[#allocation10 + $0x298] sm:$0xf0] }
 0x33d   : > { %v3246_v62 = vpop.f32.mrf.mxu2  ;;  %v3295_v15 = vpop.f32.mrf.mxu3  ;;  %v10598_v52 = vadd.f32 %v3292_v4, %v3244_v50  ;;  %v7761_v4 = vld [vmem:[#allocation10 + $0x228] sm:$0xf0]  ;;  %v8825_v50 = vld [vmem:[#allocation10 + $0x1a4] sm:$0xf]  ;;  %3668 = vmatpush.bf16.msra.mxu3 %v7828_v47  ;;  %v8807_v47 = vld [vmem:[#allocation10 + $0x114] sm:$0xf] }
 0x33e   : > { %v3148_v11 = vpop.f32.mrf.mxu0  ;;  %v3197_v27 = vpop.f32.mrf.mxu1  ;;  %v7764_v46 = vor.u32 %v8841_v61, %v7761_v4 }
 0x33f   : > { %v3149_v22 = vadd.f32 %v3148_v11, %v10524_v34  ;;  %v7697_v11 = vld [vmem:[#allocation10 + $0x1a8] sm:$0xf0] }
 0x340   : > { %3619 = vmatpush.bf16.msra.mxu2 %v7764_v46 }
 0x341   : > { %v3198_v57 = vadd.f32 %v3197_v27, %v3149_v22  ;;  %3343 = vmatmul.bf16.gmra.mxu0 %v10605_v2  ;;  %3392 = vmatmul.bf16.gmra.mxu1 %v10612_v24  ;;  %v7700_v27 = vor.u32 %v8825_v50, %v7697_v11  ;;  %v7625_v11 = vld [vmem:[#allocation10 + $0x118] sm:$0xf0] }
 0x343   : > { %v3247_v42 = vadd.f32 %v3246_v62, %v3198_v57  ;;  %3570 = vmatpush.bf16.msra.mxu1 %v7700_v27 }
 0x345   : > { %v3248_v56 = vpop.f32.mrf.mxu2  ;;  %v3297_v55 = vpop.f32.mrf.mxu3  ;;  %v10615_v22 = vadd.f32 %v3295_v15, %v3247_v42 }
 0x346   : > { %v3150_v29 = vpop.f32.mrf.mxu0  ;;  %v3199_v57 = vpop.f32.mrf.mxu1 }
 0x347   : > { %v3151_v62 = vadd.f32 %v3150_v29, %v10524_v34  ;;  %v8855_v29 = vld [vmem:[#allocation10 + $0x294] sm:$0xf] }
 0x349   : > { %v3200_v61 = vadd.f32 %v3199_v57, %v3151_v62  ;;  %v7628_v57 = vor.u32 %v8807_v47, %v7625_v11 }
 0x34a   : > { %3446 = vmatmul.bf16.gmra.mxu2 %v10419_v63  ;;  %3495 = vmatmul.bf16.gmra.mxu3 %v10425_v19  ;;  %v10634_v63 = vsel %vm10531_vm5, %v10414_v41, %v10528_v20 }
 0x34b   : > { %v3249_v4 = vadd.f32 %v3248_v56, %v3200_v61  ;;  %v8839_v56 = vld [vmem:[#allocation10 + $0x214] sm:$0xf]  ;;  %v7820_v61 = vor.u32 %v8855_v29, %v7817_v18  ;;  %3522 = vmatpush.bf16.msra.mxu0 %v7628_v57  ;;  %v10649_v18 = vsel %vm10531_vm5, %v10442_v0, %v10526_v32  ;;  %v7809_v0 = vld [vmem:[#allocation10 + $0x288] sm:$0xf0] }
 0x34d   : > { %v3251_v23 = vpop.f32.mrf.mxu2  ;;  %v3300_v48 = vpop.f32.mrf.mxu3  ;;  %v10620_v45 = vadd.f32 %v3297_v55, %v3249_v4  ;;  %v7753_v55 = vld [vmem:[#allocation10 + $0x218] sm:$0xf0]  ;;  %v8823_v4 = vld [vmem:[#allocation10 + $0x194] sm:$0xf]  ;;  %3669 = vmatpush.bf16.msra.mxu3 %v7820_v61  ;;  %v8805_v61 = vld [vmem:[#allocation10 + $0x104] sm:$0xf] }
 0x34e   : > { %v3153_v15 = vpop.f32.mrf.mxu0  ;;  %v3202_v46 = vpop.f32.mrf.mxu1  ;;  %v7756_v50 = vor.u32 %v8839_v56, %v7753_v55 }
 0x34f   : > { %v3154_v42 = vadd.f32 %v3153_v15, %v10524_v34  ;;  %v7689_v15 = vld [vmem:[#allocation10 + $0x198] sm:$0xf0] }
 0x350   : > { %3620 = vmatpush.bf16.msra.mxu2 %v7756_v50 }
 0x351   : > { %v3203_v28 = vadd.f32 %v3202_v46, %v3154_v42  ;;  %3348 = vmatmul.bf16.gmra.mxu0 %v10627_v5  ;;  %3397 = vmatmul.bf16.gmra.mxu1 %v10634_v63  ;;  %v7692_v46 = vor.u32 %v8823_v4, %v7689_v15  ;;  %v7617_v15 = vld [vmem:[#allocation10 + $0x108] sm:$0xf0] }
 0x353   : > { %v3252_v19 = vadd.f32 %v3251_v23, %v3203_v28  ;;  %3571 = vmatpush.bf16.msra.mxu1 %v7692_v46 }
 0x355   : > { %v3253_v27 = vpop.f32.mrf.mxu2  ;;  %v3302_v62 = vpop.f32.mrf.mxu3  ;;  %v10637_v42 = vadd.f32 %v3300_v48, %v3252_v19 }
 0x356   : > { %v3155_v41 = vpop.f32.mrf.mxu0  ;;  %v3204_v28 = vpop.f32.mrf.mxu1 }
 0x357   : > { %v3156_v23 = vadd.f32 %v3155_v41, %v10524_v34  ;;  %v8853_v41 = vld [vmem:[#allocation10 + $0x284] sm:$0xf] }
 0x359   : > { %v3205_v56 = vadd.f32 %v3204_v28, %v3156_v23  ;;  %v7620_v28 = vor.u32 %v8805_v61, %v7617_v15 }
 0x35a   : > { %3451 = vmatmul.bf16.gmra.mxu2 %v10449_v21  ;;  %3500 = vmatmul.bf16.gmra.mxu3 %v10455_v1  ;;  %v10656_v21 = vsel %vm10531_vm5, %v10444_v51, %v10528_v20 }
 0x35b   : > { %v3254_v55 = vadd.f32 %v3253_v27, %v3205_v56  ;;  %v8837_v27 = vld [vmem:[#allocation10 + $0x204] sm:$0xf]  ;;  %v7812_v56 = vor.u32 %v8853_v41, %v7809_v0  ;;  %3523 = vmatpush.bf16.msra.mxu0 %v7620_v28  ;;  %v10671_v0 = vsel %vm10531_vm5, %v10472_v10, %v10526_v32  ;;  %v8932_v10 = vld [vmem:[#allocation11 + $0x1f4] sm:$0xf0] }
 0x35d   : > { %v3256_v47 = vpop.f32.mrf.mxu2  ;;  %v3305_v11 = vpop.f32.mrf.mxu3  ;;  %v10642_v29 = vadd.f32 %v3302_v62, %v3254_v55  ;;  %v7745_v62 = vld [vmem:[#allocation10 + $0x208] sm:$0xf0]  ;;  %v8821_v55 = vld [vmem:[#allocation10 + $0x184] sm:$0xf]  ;;  %3670 = vmatpush.bf16.msra.mxu3 %v7812_v56  ;;  %v7927_v56 = vld [vmem:[#allocation11 + $0x70] sm:$0xf] }
 0x35e   : > { %v3158_v48 = vpop.f32.mrf.mxu0  ;;  %v3207_v50 = vpop.f32.mrf.mxu1  ;;  %v7748_v4 = vor.u32 %v8837_v27, %v7745_v62 }
 0x35f   : > { %v3159_v19 = vadd.f32 %v3158_v48, %v10524_v34  ;;  %v7681_v48 = vld [vmem:[#allocation10 + $0x188] sm:$0xf0] }
 0x360   : > { %3621 = vmatpush.bf16.msra.mxu2 %v7748_v4 }
 0x361   : > { %v3208_v57 = vadd.f32 %v3207_v50, %v3159_v19  ;;  %3353 = vmatmul.bf16.gmra.mxu0 %v10649_v18  ;;  %3402 = vmatmul.bf16.gmra.mxu1 %v10656_v21  ;;  %v7684_v50 = vor.u32 %v8821_v55, %v7681_v48  ;;  %v8884_v48 = vld [vmem:[#allocation11 + $0x74] sm:$0xf0] }
 0x363   : > { %v3257_v1 = vadd.f32 %v3256_v47, %v3208_v57  ;;  %3572 = vmatpush.bf16.msra.mxu1 %v7684_v50 }
 0x365   : > { %v3258_v46 = vpop.f32.mrf.mxu2  ;;  %v3307_v23 = vpop.f32.mrf.mxu3  ;;  %v10659_v19 = vadd.f32 %v3305_v11, %v3257_v1 }
 0x366   : > { %v3160_v51 = vpop.f32.mrf.mxu0  ;;  %v3209_v57 = vpop.f32.mrf.mxu1 }
 0x367   : > { %v3161_v47 = vadd.f32 %v3160_v51, %v10524_v34  ;;  %v8119_v51 = vld [vmem:[#allocation11 + $0x1f0] sm:$0xf] }
 0x369   : > { %v3210_v27 = vadd.f32 %v3209_v57, %v3161_v47  ;;  %v7928_v57 = vor.u32 %v8884_v48, %v7927_v56 }
 0x36a   : > { %3456 = vmatmul.bf16.gmra.mxu2 %v10479_v33  ;;  %3505 = vmatmul.bf16.gmra.mxu3 %v10485_v37  ;;  %v10678_v33 = vsel %vm10531_vm5, %v10474_v6, %v10528_v20 }
 0x36b   : > { %v3259_v62 = vadd.f32 %v3258_v46, %v3210_v27  ;;  %v8055_v46 = vld [vmem:[#allocation11 + $0x170] sm:$0xf]  ;;  %v8120_v27 = vor.u32 %v8932_v10, %v8119_v51  ;;  %4630 = vmatpush.bf16.msrb.mxu0 %v7928_v57  ;;  %v10693_v10 = vsel %vm10531_vm5, %v10498_v16, %v10526_v32  ;;  %v8930_v16 = vld [vmem:[#allocation11 + $0x1e4] sm:$0xf0] }
 0x36d   : > { %v3261_v61 = vpop.f32.mrf.mxu2  ;;  %v3310_v15 = vpop.f32.mrf.mxu3  ;;  %v10664_v41 = vadd.f32 %v3307_v23, %v3259_v62  ;;  %v8916_v23 = vld [vmem:[#allocation11 + $0x174] sm:$0xf0]  ;;  %v7991_v62 = vld [vmem:[#allocation11 + $0xf0] sm:$0xf]  ;;  %4777 = vmatpush.bf16.msrb.mxu3 %v8120_v27  ;;  %v7919_v27 = vld [vmem:[#allocation11 + $0x60] sm:$0xf] }
 0x36e   : > { %v3163_v11 = vpop.f32.mrf.mxu0  ;;  %v3212_v4 = vpop.f32.mrf.mxu1  ;;  %v8056_v55 = vor.u32 %v8916_v23, %v8055_v46 }
 0x36f   : > { %v3164_v1 = vadd.f32 %v3163_v11, %v10524_v34  ;;  %v8900_v11 = vld [vmem:[#allocation11 + $0xf4] sm:$0xf0] }
 0x370   : > { %4728 = vmatpush.bf16.msrb.mxu2 %v8056_v55 }
 0x371   : > { %v3213_v28 = vadd.f32 %v3212_v4, %v3164_v1  ;;  %3358 = vmatmul.bf16.gmra.mxu0 %v10671_v0  ;;  %3407 = vmatmul.bf16.gmra.mxu1 %v10678_v33  ;;  %v7992_v4 = vor.u32 %v8900_v11, %v7991_v62  ;;  %v8882_v11 = vld [vmem:[#allocation11 + $0x64] sm:$0xf0] }
 0x373   : > { %v3262_v37 = vadd.f32 %v3261_v61, %v3213_v28  ;;  %4679 = vmatpush.bf16.msrb.mxu1 %v7992_v4 }
 0x375   : > { %v3263_v50 = vpop.f32.mrf.mxu2  ;;  %v3312_v47 = vpop.f32.mrf.mxu3  ;;  %v10681_v1 = vadd.f32 %v3310_v15, %v3262_v37 }
 0x376   : > { %v3165_v6 = vpop.f32.mrf.mxu0  ;;  %v3214_v28 = vpop.f32.mrf.mxu1 }
 0x377   : > { %v3166_v61 = vadd.f32 %v3165_v6, %v10524_v34  ;;  %v8111_v6 = vld [vmem:[#allocation11 + $0x1e0] sm:$0xf] }
 0x379   : > { %v3215_v46 = vadd.f32 %v3214_v28, %v3166_v61  ;;  %v7920_v61 = vor.u32 %v8882_v11, %v7919_v27  ;;  %v8112_v28 = vor.u32 %v8930_v16, %v8111_v6 }
 0x37a   : > { %3461 = vmatmul.bf16.gmra.mxu2 %v10505_v35  ;;  %3510 = vmatmul.bf16.gmra.mxu3 %v10510_v7  ;;  %v10700_v35 = vsel %vm10531_vm5, %v10500_v44, %v10528_v20 }
 0x37b   : > { %v3264_v23 = vadd.f32 %v3263_v50, %v3215_v46  ;;  %v8047_v50 = vld [vmem:[#allocation11 + $0x160] sm:$0xf]  ;;  %4631 = vmatpush.bf16.msrb.mxu0 %v7920_v61  ;;  %4778 = vmatpush.bf16.msrb.mxu3 %v8112_v28  ;;  %v8103_v61 = vld [vmem:[#allocation11 + $0x1d0] sm:$0xf] }
 0x37c   : > { %v7983_v46 = vld [vmem:[#allocation11 + $0xe0] sm:$0xf] }
 0x37d   : > { %v3266_v56 = vpop.f32.mrf.mxu2  ;;  %v3315_v48 = vpop.f32.mrf.mxu3  ;;  %v10686_v51 = vadd.f32 %v3312_v47, %v3264_v23  ;;  %v8914_v47 = vld [vmem:[#allocation11 + $0x164] sm:$0xf0] }
 0x37e   : > { %v3168_v15 = vpop.f32.mrf.mxu0  ;;  %v3217_v55 = vpop.f32.mrf.mxu1  ;;  %v8048_v62 = vor.u32 %v8914_v47, %v8047_v50  ;;  %v8898_v23 = vld [vmem:[#allocation11 + $0xe4] sm:$0xf0] }
 0x37f   : > { %v3169_v37 = vadd.f32 %v3168_v15, %v10524_v34  ;;  %v7984_v20 = vor.u32 %v8898_v23, %v7983_v46 }
 0x380   : > { %4729 = vmatpush.bf16.msrb.mxu2 %v8048_v62 }
 0x381   : > { %v3218_v57 = vadd.f32 %v3217_v55, %v3169_v37  ;;  %3363 = vmatmul.bf16.gmra.mxu0 %v10693_v10  ;;  %3412 = vmatmul.bf16.gmra.mxu1 %v10700_v35 }
 0x382   : > { %4680 = vmatpush.bf16.msrb.mxu1 %v7984_v20  ;;  %v8896_v20 = vld [vmem:[#allocation11 + $0xd4] sm:$0xf0] }
 0x383   : > { %v3267_v7 = vadd.f32 %v3266_v56, %v3218_v57  ;;  %v10709_v57 = vperm.slane %v10517_v59, 1  ;;  %v8039_v59 = vld [vmem:[#allocation11 + $0x150] sm:$0xf] }
 0x385   : > { %v3268_v32 = vpop.f32.mrf.mxu2  ;;  %v3317_v4 = vpop.f32.mrf.mxu3  ;;  %v10703_v15 = vadd.f32 %v3315_v48, %v3267_v7 }
 0x386   : > { %v3170_v44 = vpop.f32.mrf.mxu0  ;;  %v3219_v37 = vpop.f32.mrf.mxu1 }
 0x387   : > { %v3171_v56 = vadd.f32 %v3170_v44, %v10524_v34  ;;  %v8928_v44 = vld [vmem:[#allocation11 + $0x1d4] sm:$0xf0] }
 0x389   : > { %v3220_v55 = vadd.f32 %v3219_v37, %v3171_v56 }
 0x38a   : > { %3622 = vmatmul.bf16.vlgmr.msra.gmra.mxu2 %v10539_v43  ;;  %3671 = vmatmul.bf16.vlgmr.msra.gmra.mxu3 %v10546_v9  ;;  %v8912_v43 = vld [vmem:[#allocation11 + $0x154] sm:$0xf0] }
 0x38b   : > { %v3269_v50 = vadd.f32 %v3268_v32, %v3220_v55  ;;  %v8040_v9 = vor.u32 %v8912_v43, %v8039_v59  ;;  %v7911_v32 = vld [vmem:[#allocation11 + $0x50] sm:$0xf]  ;;  %v8104_v55 = vor.u32 %v8928_v44, %v8103_v61  ;;  %v8878_v61 = vld [vmem:[#allocation11 + $0x44] sm:$0xf0] }
 0x38d   : > { %v3427_v48 = vpop.f32.mrf.mxu2  ;;  %v3476_v7 = vpop.f32.mrf.mxu3  ;;  %v10711_v47 = vadd.f32 %v3317_v4, %v3269_v50  ;;  %v8880_v4 = vld [vmem:[#allocation11 + $0x54] sm:$0xf0]  ;;  %4730 = vmatpush.bf16.msrb.mxu2 %v8040_v9  ;;  %4779 = vmatpush.bf16.msrb.mxu3 %v8104_v55 }
 0x38e   : > { %v3428_v27 = vadd.f32 %v3427_v48, %v10709_v57  ;;  %v3329_v34 = vpop.f32.mrf.mxu0  ;;  %v3378_v11 = vpop.f32.mrf.mxu1  ;;  %v7912_v23 = vor.u32 %v8880_v4, %v7911_v32  ;;  %v8031_v32 = vld [vmem:[#allocation11 + $0x140] sm:$0xf] }
 0x38f   : > { %v3330_v62 = vadd.f32 %v3329_v34, %v10549_v8  ;;  %v7975_v8 = vld [vmem:[#allocation11 + $0xd0] sm:$0xf] }
 0x390   : > { %v10715_v6 = vadd.f32 %v3476_v7, %v3428_v27  ;;  %4632 = vmatpush.bf16.msrb.mxu0 %v7912_v23 }
 0x391   : > { %v10717_v16 = vadd.f32 %v3378_v11, %v3330_v62  ;;  %3524 = vmatmul.bf16.vlgmr.msra.gmra.mxu0 %v10270_v53  ;;  %3573 = vmatmul.bf16.vlgmr.msra.gmra.mxu1 %v10272_v40  ;;  %v7976_v53 = vor.u32 %v8896_v20, %v7975_v8  ;;  %v8926_v8 = vld [vmem:[#allocation11 + $0x1c4] sm:$0xf0] }
 0x392   : > { %v8894_v20 = vld [vmem:[#allocation11 + $0xc4] sm:$0xf0] }
 0x393   : > { %4681 = vmatpush.bf16.msrb.mxu1 %v7976_v53 }
 0x395   : > { %v3429_v28 = vpop.f32.mrf.mxu2  ;;  %v3478_v46 = vpop.f32.mrf.mxu3 }
 0x396   : > { %v3430_v56 = vadd.f32 %v3429_v28, %v10709_v57  ;;  %v3331_v37 = vpop.f32.mrf.mxu0  ;;  %v3380_v50 = vpop.f32.mrf.mxu1  ;;  %v8095_v28 = vld [vmem:[#allocation11 + $0x1c0] sm:$0xf] }
 0x397   : > { %v3332_v40 = vadd.f32 %v3331_v37, %v10554_v17  ;;  %v8096_v55 = vor.u32 %v8926_v8, %v8095_v28  ;;  %v8892_v8 = vld [vmem:[#allocation11 + $0xb4] sm:$0xf0] }
 0x398   : > { %v10723_v48 = vadd.f32 %v3478_v46, %v3430_v56 }
 0x399   : > { %v10725_v7 = vadd.f32 %v3380_v50, %v3332_v40  ;;  %4780 = vmatpush.bf16.msrb.mxu3 %v8096_v55 }
 0x39a   : > { %3627 = vmatmul.bf16.gmra.mxu2 %v10561_v39  ;;  %3676 = vmatmul.bf16.gmra.mxu3 %v10568_v49  ;;  %v8910_v39 = vld [vmem:[#allocation11 + $0x144] sm:$0xf0]  ;;  %v7903_v49 = vld [vmem:[#allocation11 + $0x40] sm:$0xf] }
 0x39b   : > { %v8032_v4 = vor.u32 %v8910_v39, %v8031_v32  ;;  %v7904_v44 = vor.u32 %v8878_v61, %v7903_v49  ;;  %v8023_v39 = vld [vmem:[#allocation11 + $0x130] sm:$0xf]  ;;  %v8876_v49 = vld [vmem:[#allocation11 + $0x34] sm:$0xf0] }
 0x39c   : > { %v8087_v61 = vld [vmem:[#allocation11 + $0x1b0] sm:$0xf] }
 0x39d   : > { %v3432_v27 = vpop.f32.mrf.mxu2  ;;  %v3481_v34 = vpop.f32.mrf.mxu3  ;;  %4731 = vmatpush.bf16.msrb.mxu2 %v8032_v4  ;;  %4633 = vmatpush.bf16.msrb.mxu0 %v7904_v44  ;;  %v8924_v44 = vld [vmem:[#allocation11 + $0x1b4] sm:$0xf0] }
 0x39e   : > { %v3433_v62 = vadd.f32 %v3432_v27, %v10709_v57  ;;  %v3334_v11 = vpop.f32.mrf.mxu0  ;;  %v3383_v17 = vpop.f32.mrf.mxu1 }
 0x39f   : > { %v3335_v59 = vadd.f32 %v3334_v11, %v10571_v58  ;;  %v7967_v58 = vld [vmem:[#allocation11 + $0xc0] sm:$0xf] }
 0x3a0   : > { %v10731_v43 = vadd.f32 %v3481_v34, %v3433_v62 }
 0x3a1   : > { %v10733_v9 = vadd.f32 %v3383_v17, %v3335_v59  ;;  %3529 = vmatmul.bf16.gmra.mxu0 %v10310_v14  ;;  %3578 = vmatmul.bf16.gmra.mxu1 %v10312_v31  ;;  %v7968_v14 = vor.u32 %v8894_v20, %v7967_v58 }
 0x3a3   : > { %4682 = vmatpush.bf16.msrb.mxu1 %v7968_v14 }
 0x3a5   : > { %v3434_v46 = vpop.f32.mrf.mxu2  ;;  %v3483_v23 = vpop.f32.mrf.mxu3 }
 0x3a6   : > { %v3435_v56 = vadd.f32 %v3434_v46, %v10709_v57  ;;  %v3336_v37 = vpop.f32.mrf.mxu0  ;;  %v3385_v53 = vpop.f32.mrf.mxu1 }
 0x3a7   : > { %v3337_v31 = vadd.f32 %v3336_v37, %v10576_v13 }
 0x3a8   : > { %v10739_v40 = vadd.f32 %v3483_v23, %v3435_v56  ;;  %v8088_v56 = vor.u32 %v8924_v44, %v8087_v61 }
 0x3a9   : > { %v10741_v50 = vadd.f32 %v3385_v53, %v3337_v31 }
 0x3aa   : > { %3632 = vmatmul.bf16.gmra.mxu2 %v10583_v54  ;;  %3681 = vmatmul.bf16.gmra.mxu3 %v10590_v25  ;;  %v8908_v54 = vld [vmem:[#allocation11 + $0x134] sm:$0xf0]  ;;  %v7895_v25 = vld [vmem:[#allocation11 + $0x30] sm:$0xf] }
 0x3ab   : > { %v8024_v4 = vor.u32 %v8908_v54, %v8023_v39  ;;  %v7896_v23 = vor.u32 %v8876_v49, %v7895_v25  ;;  %4781 = vmatpush.bf16.msrb.mxu3 %v8088_v56  ;;  %v8874_v54 = vld [vmem:[#allocation11 + $0x24] sm:$0xf0] }
 0x3ad   : > { %v3437_v27 = vpop.f32.mrf.mxu2  ;;  %v3486_v34 = vpop.f32.mrf.mxu3  ;;  %4732 = vmatpush.bf16.msrb.mxu2 %v8024_v4  ;;  %4634 = vmatpush.bf16.msrb.mxu0 %v7896_v23  ;;  %v8079_v4 = vld [vmem:[#allocation11 + $0x1a0] sm:$0xf] }
 0x3ae   : > { %v3438_v62 = vadd.f32 %v3437_v27, %v10709_v57  ;;  %v3339_v11 = vpop.f32.mrf.mxu0  ;;  %v3388_v13 = vpop.f32.mrf.mxu1 }
 0x3af   : > { %v3340_v59 = vadd.f32 %v3339_v11, %v10593_v38  ;;  %v7959_v38 = vld [vmem:[#allocation11 + $0xb0] sm:$0xf] }
 0x3b0   : > { %v10747_v17 = vadd.f32 %v3486_v34, %v3438_v62 }
 0x3b1   : > { %v10749_v32 = vadd.f32 %v3388_v13, %v3340_v59  ;;  %3534 = vmatmul.bf16.gmra.mxu0 %v10340_v30  ;;  %3583 = vmatmul.bf16.gmra.mxu1 %v10342_v26  ;;  %v7960_v30 = vor.u32 %v8892_v8, %v7959_v38  ;;  %v8015_v13 = vld [vmem:[#allocation11 + $0x120] sm:$0xf] }
 0x3b3   : > { %4683 = vmatpush.bf16.msrb.mxu1 %v7960_v30 }
 0x3b5   : > { %v3439_v28 = vpop.f32.mrf.mxu2  ;;  %v3488_v46 = vpop.f32.mrf.mxu3 }
 0x3b6   : > { %v3440_v58 = vadd.f32 %v3439_v28, %v10709_v57  ;;  %v3341_v20 = vpop.f32.mrf.mxu0  ;;  %v3390_v37 = vpop.f32.mrf.mxu1  ;;  %v8922_v28 = vld [vmem:[#allocation11 + $0x1a4] sm:$0xf0] }
 0x3b7   : > { %v3342_v26 = vadd.f32 %v3341_v20, %v10598_v52  ;;  %v8080_v38 = vor.u32 %v8922_v28, %v8079_v4  ;;  %v8920_v4 = vld [vmem:[#allocation11 + $0x194] sm:$0xf0] }
 0x3b8   : > { %v10755_v55 = vadd.f32 %v3488_v46, %v3440_v58  ;;  %v8890_v46 = vld [vmem:[#allocation11 + $0xa4] sm:$0xf0] }
 0x3b9   : > { %v10757_v14 = vadd.f32 %v3390_v37, %v3342_v26  ;;  %4782 = vmatpush.bf16.msrb.mxu3 %v8080_v38 }
 0x3ba   : > { %3637 = vmatmul.bf16.gmra.mxu2 %v10605_v2  ;;  %3686 = vmatmul.bf16.gmra.mxu3 %v10612_v24  ;;  %v8906_v2 = vld [vmem:[#allocation11 + $0x124] sm:$0xf0]  ;;  %v7887_v24 = vld [vmem:[#allocation11 + $0x20] sm:$0xf] }
 0x3bb   : > { %v8016_v39 = vor.u32 %v8906_v2, %v8015_v13  ;;  %v7888_v61 = vor.u32 %v8874_v54, %v7887_v24  ;;  %v8872_v13 = vld [vmem:[#allocation11 + $0x14] sm:$0xf0]  ;;  %v8071_v2 = vld [vmem:[#allocation11 + $0x190] sm:$0xf] }
 0x3bc   : > { %v8072_v28 = vor.u32 %v8920_v4, %v8071_v2  ;;  %v8918_v2 = vld [vmem:[#allocation11 + $0x184] sm:$0xf0] }
 0x3bd   : > { %v3442_v31 = vpop.f32.mrf.mxu2  ;;  %v3491_v53 = vpop.f32.mrf.mxu3  ;;  %4733 = vmatpush.bf16.msrb.mxu2 %v8016_v39  ;;  %4635 = vmatpush.bf16.msrb.mxu0 %v7888_v61 }
 0x3be   : > { %v3443_v27 = vadd.f32 %v3442_v31, %v10709_v57  ;;  %v3344_v34 = vpop.f32.mrf.mxu0  ;;  %v3393_v52 = vpop.f32.mrf.mxu1  ;;  %4783 = vmatpush.bf16.msrb.mxu3 %v8072_v28 }
 0x3bf   : > { %v3345_v62 = vadd.f32 %v3344_v34, %v10615_v22  ;;  %v7951_v22 = vld [vmem:[#allocation11 + $0xa0] sm:$0xf]  ;;  %v11962_v34 = vld [vmem:[#allocation69_spill] sm:$0xff] }
 0x3c0   : > { %v10763_v11 = vadd.f32 %v3491_v53, %v3443_v27 }
 0x3c1   : > { %v10765_v59 = vadd.f32 %v3393_v52, %v3345_v62  ;;  %3539 = vmatmul.bf16.gmra.mxu0 %v10370_v36  ;;  %3588 = vmatmul.bf16.gmra.mxu1 %v10372_v12  ;;  %v7952_v36 = vor.u32 %v8890_v46, %v7951_v22  ;;  %v8007_v62 = vld [vmem:[#allocation11 + $0x110] sm:$0xf] }
 0x3c3   : > { %4684 = vmatpush.bf16.msrb.mxu1 %v7952_v36 }
 0x3c5   : > { %v3444_v25 = vpop.f32.mrf.mxu2  ;;  %v3493_v49 = vpop.f32.mrf.mxu3 }
 0x3c6   : > { %v3445_v23 = vadd.f32 %v3444_v25, %v10709_v57  ;;  %v3346_v44 = vpop.f32.mrf.mxu0  ;;  %v3395_v8 = vpop.f32.mrf.mxu1  ;;  %v8888_v25 = vld [vmem:[#allocation11 + $0x94] sm:$0xf0] }
 0x3c7   : > { %v3347_v12 = vadd.f32 %v3346_v44, %v10620_v45 }
 0x3c8   : > { %v10771_v58 = vadd.f32 %v3493_v49, %v3445_v23 }
 0x3c9   : > { %v10773_v20 = vadd.f32 %v3395_v8, %v3347_v12 }
 0x3ca   : > { %3642 = vmatmul.bf16.gmra.mxu2 %v10627_v5  ;;  %3691 = vmatmul.bf16.gmra.mxu3 %v10634_v63  ;;  %v8904_v5 = vld [vmem:[#allocation11 + $0x114] sm:$0xf0]  ;;  %v7879_v63 = vld [vmem:[#allocation11 + $0x10] sm:$0xf] }
 0x3cb   : > { %v8008_v52 = vor.u32 %v8904_v5, %v8007_v62  ;;  %v7880_v54 = vor.u32 %v8872_v13, %v7879_v63  ;;  %v8870_v62 = vld [vmem:[#allocation11 + $0x4] sm:$0xf0]  ;;  %v8063_v5 = vld [vmem:[#allocation11 + $0x180] sm:$0xf] }
 0x3cc   : > { %v8064_v4 = vor.u32 %v8918_v2, %v8063_v5 }
 0x3cd   : > { %v3447_v56 = vpop.f32.mrf.mxu2  ;;  %v3496_v30 = vpop.f32.mrf.mxu3  ;;  %4734 = vmatpush.bf16.msrb.mxu2 %v8008_v52  ;;  %4636 = vmatpush.bf16.msrb.mxu0 %v7880_v54 }
 0x3ce   : > { %v3448_v26 = vadd.f32 %v3447_v56, %v10709_v57  ;;  %v3349_v37 = vpop.f32.mrf.mxu0  ;;  %v3398_v45 = vpop.f32.mrf.mxu1  ;;  %4784 = vmatpush.bf16.msrb.mxu3 %v8064_v4 }
 0x3cf   : > { %v3350_v31 = vadd.f32 %v3349_v37, %v10637_v42  ;;  %v7943_v42 = vld [vmem:[#allocation11 + $0x90] sm:$0xf] }
 0x3d0   : > { %v10779_v53 = vadd.f32 %v3496_v30, %v3448_v26  ;;  %v11963_v37 = vld [vmem:[#allocation70_spill] sm:$0xff] }
 0x3d1   : > { %v10781_v27 = vadd.f32 %v3398_v45, %v3350_v31  ;;  %3544 = vmatmul.bf16.gmra.mxu0 %v10400_v3  ;;  %3593 = vmatmul.bf16.gmra.mxu1 %v11962_v34  ;;  %v7944_v3 = vor.u32 %v8888_v25, %v7943_v42  ;;  %v11964_v31 = vld [vmem:[#allocation71_spill] sm:$0xff]  ;;  %v7999_v45 = vld [vmem:[#allocation11 + $0x100] sm:$0xf] }
 0x3d3   : > { %4685 = vmatpush.bf16.msrb.mxu1 %v7944_v3 }
 0x3d5   : > { %v3449_v39 = vpop.f32.mrf.mxu2  ;;  %v3498_v24 = vpop.f32.mrf.mxu3 }
 0x3d6   : > { %v3450_v49 = vadd.f32 %v3449_v39, %v10709_v57  ;;  %v3351_v61 = vpop.f32.mrf.mxu0  ;;  %v3400_v46 = vpop.f32.mrf.mxu1  ;;  %v8886_v39 = vld [vmem:[#allocation11 + $0x84] sm:$0xf0] }
 0x3d7   : > { %v3352_v22 = vadd.f32 %v3351_v61, %v10642_v29 }
 0x3d8   : > { %v10787_v23 = vadd.f32 %v3498_v24, %v3450_v49 }
 0x3d9   : > { %v10789_v44 = vadd.f32 %v3400_v46, %v3352_v22 }
 0x3da   : > { %3647 = vmatmul.bf16.gmra.mxu2 %v10649_v18  ;;  %3696 = vmatmul.bf16.gmra.mxu3 %v10656_v21  ;;  %v8902_v18 = vld [vmem:[#allocation11 + $0x104] sm:$0xf0]  ;;  %v7871_v21 = vld [vmem:[#allocation11] sm:$0xf] }
 0x3db   : > { %v8000_v34 = vor.u32 %v8902_v18, %v7999_v45  ;;  %v7872_v13 = vor.u32 %v8870_v62, %v7871_v21  ;;  %v8883_v21 = vld [vmem:[#allocation11 + $0x74] sm:$0xf]  ;;  %v7929_v62 = vld [vmem:[#allocation11 + $0x78] sm:$0xf0] }
 0x3dc   : > { %v7932_v5 = vor.u32 %v8883_v21, %v7929_v62 }
 0x3dd   : > { %v3452_v38 = vpop.f32.mrf.mxu2  ;;  %v3501_v36 = vpop.f32.mrf.mxu3  ;;  %4735 = vmatpush.bf16.msrb.mxu2 %v8000_v34  ;;  %4637 = vmatpush.bf16.msrb.mxu0 %v7872_v13  ;;  %v8899_v13 = vld [vmem:[#allocation11 + $0xf4] sm:$0xf] }
 0x3de   : > { %v3453_v12 = vadd.f32 %v3452_v38, %v10709_v57  ;;  %v3354_v8 = vpop.f32.mrf.mxu0  ;;  %v3403_v29 = vpop.f32.mrf.mxu1 }
 0x3df   : > { %v3355_v56 = vadd.f32 %v3354_v8, %v10659_v19  ;;  %v7935_v19 = vld [vmem:[#allocation11 + $0x80] sm:$0xf] }
 0x3e0   : > { %v10795_v30 = vadd.f32 %v3501_v36, %v3453_v12  ;;  %v7936_v42 = vor.u32 %v8886_v39, %v7935_v19 }
 0x3e1   : > { %v10797_v26 = vadd.f32 %v3403_v29, %v3355_v56  ;;  %3549 = vmatmul.bf16.gmra.mxu0 %v11963_v37  ;;  %3598 = vmatmul.bf16.gmra.mxu1 %v11964_v31  ;;  %v11965_v56 = vld [vmem:[#allocation72_spill] sm:$0xff]  ;;  %v11966_v29 = vld [vmem:[#allocation73_spill] sm:$0xff] }
 0x3e2   : > { %4686 = vmatpush.bf16.msrb.mxu1 %v7936_v42  ;;  %4924 = vmatpush.bf16.msra.mxu2 %v7932_v5 }
 0x3e5   : > { %v3454_v52 = vpop.f32.mrf.mxu2  ;;  %v3503_v63 = vpop.f32.mrf.mxu3 }
 0x3e6   : > { %v3455_v24 = vadd.f32 %v3454_v52, %v10709_v57  ;;  %v3356_v54 = vpop.f32.mrf.mxu0  ;;  %v3405_v49 = vpop.f32.mrf.mxu1  ;;  %v8183_v52 = vld [vmem:[#allocation11 + $0x270] sm:$0xf] }
 0x3e7   : > { %v3357_v25 = vadd.f32 %v3356_v54, %v10664_v41  ;;  %v8964_v54 = vld [vmem:[#allocation11 + $0x2f4] sm:$0xf0] }
 0x3e8   : > { %v10803_v61 = vadd.f32 %v3503_v63, %v3455_v24  ;;  %v8948_v63 = vld [vmem:[#allocation11 + $0x274] sm:$0xf0]  ;;  %v7993_v24 = vld [vmem:[#allocation11 + $0xf8] sm:$0xf0] }
 0x3e9   : > { %v10805_v28 = vadd.f32 %v3405_v49, %v3357_v25  ;;  %v8184_v39 = vor.u32 %v8948_v63, %v8183_v52  ;;  %v7996_v25 = vor.u32 %v8899_v13, %v7993_v24  ;;  %v8881_v52 = vld [vmem:[#allocation11 + $0x64] sm:$0xf]  ;;  %v7921_v63 = vld [vmem:[#allocation11 + $0x68] sm:$0xf0]  ;;  %v8175_v13 = vld [vmem:[#allocation11 + $0x260] sm:$0xf] }
 0x3ea   : > { %3652 = vmatmul.bf16.gmra.mxu2 %v10671_v0  ;;  %3701 = vmatmul.bf16.gmra.mxu3 %v10678_v33 }
 0x3eb   : > { %4826 = vmatpush.bf16.msra.mxu0 %v8184_v39  ;;  %4973 = vmatpush.bf16.msra.mxu3 %v7996_v25 }
 0x3ed   : > { %v3457_v3 = vpop.f32.mrf.mxu2  ;;  %v3506_v22 = vpop.f32.mrf.mxu3 }
 0x3ee   : > { %v3458_v46 = vadd.f32 %v3457_v3, %v10709_v57  ;;  %v3359_v38 = vpop.f32.mrf.mxu0  ;;  %v3408_v41 = vpop.f32.mrf.mxu1 }
 0x3ef   : > { %v3360_v36 = vadd.f32 %v3359_v38, %v10681_v1  ;;  %v11968_v38 = vld [vmem:[#allocation75_spill] sm:$0xff] }
 0x3f0   : > { %v10811_v12 = vadd.f32 %v3506_v22, %v3458_v46  ;;  %v11967_v46 = vld [vmem:[#allocation74_spill] sm:$0xff] }
 0x3f1   : > { %v10813_v8 = vadd.f32 %v3408_v41, %v3360_v36  ;;  %3554 = vmatmul.bf16.gmra.mxu0 %v11965_v56  ;;  %3603 = vmatmul.bf16.gmra.mxu1 %v11966_v29 }
 0x3f5   : > { %v3459_v37 = vpop.f32.mrf.mxu2  ;;  %v3508_v0 = vpop.f32.mrf.mxu3 }
 0x3f6   : > { %v3460_v33 = vadd.f32 %v3459_v37, %v10709_v57  ;;  %v3361_v31 = vpop.f32.mrf.mxu0  ;;  %v3410_v18 = vpop.f32.mrf.mxu1 }
 0x3f7   : > { %v3362_v45 = vadd.f32 %v3361_v31, %v10686_v51  ;;  %v8247_v51 = vld [vmem:[#allocation11 + $0x2f0] sm:$0xf] }
 0x3f8   : > { %v10819_v34 = vadd.f32 %v3508_v0, %v3460_v33  ;;  %v11969_v33 = vld [vmem:[#allocation36_spill] sm:$0xff] }
 0x3f9   : > { %v10821_v1 = vadd.f32 %v3410_v18, %v3362_v45  ;;  %v11970_v31 = vshrl.u32 %v11969_v33, 16  ;;  %v11971_v18 = vld [vmem:[#allocation37_spill] sm:$0xff] }
 0x3fa   : > { %3657 = vmatmul.bf16.gmra.mxu2 %v10693_v10  ;;  %3706 = vmatmul.bf16.gmra.mxu3 %v10700_v35  ;;  %v8248_v10 = vor.u32 %v8964_v54, %v8247_v51  ;;  %v11972_v21 = vshrl.u32 %v11971_v18, 16  ;;  %v8239_v51 = vld [vmem:[#allocation11 + $0x2e0] sm:$0xf]  ;;  %v8962_v54 = vld [vmem:[#allocation11 + $0x2e4] sm:$0xf0] }
 0x3fb   : > { %v3827_v45 = vrot.slane %v11970_v31, 7  ;;  %v8240_v25 = vor.u32 %v8962_v54, %v8239_v51 }
 0x3fc   : > { %4875 = vmatpush.bf16.msra.mxu1 %v8248_v10  ;;  %v3834_v62 = vrot.slane %v11972_v21, 7 }
 0x3fd   : > { %v3462_v2 = vpop.f32.mrf.mxu2  ;;  %v3511_v19 = vpop.f32.mrf.mxu3 }
 0x3fe   : > { %v3463_v4 = vadd.f32 %v3462_v2, %v10709_v57  ;;  %v3364_v42 = vpop.f32.mrf.mxu0  ;;  %v3413_v49 = vpop.f32.mrf.mxu1  ;;  %v8897_v2 = vld [vmem:[#allocation11 + $0xe4] sm:$0xf] }
 0x3ff   : > { %v3365_v35 = vadd.f32 %v3364_v42, %v10703_v15 }
 0x400   : > { %v10827_v3 = vadd.f32 %v3511_v19, %v3463_v4  ;;  %v7985_v19 = vld [vmem:[#allocation11 + $0xe8] sm:$0xf0]  ;;  %v11973_v4 = vshll.u32 %v11969_v33, 16  ;;  %4876 = vmatpush.bf16.msra.mxu1 %v8240_v25  ;;  %v7913_v25 = vld [vmem:[#allocation11 + $0x58] sm:$0xf0] }
 0x401   : > { %v10829_v22 = vadd.f32 %v3413_v49, %v3365_v35  ;;  %3559 = vmatmul.bf16.gmra.mxu0 %v11967_v46  ;;  %3608 = vmatmul.bf16.gmra.mxu1 %v11968_v38  ;;  %v7988_v24 = vor.u32 %v8897_v2, %v7985_v19  ;;  %v11974_v49 = vshll.u32 %v11971_v18, 16 }
 0x402   : > { %v3830_v42 = vor.u32 %v11973_v4, %v3827_v45 }
 0x403   : > { %v3837_v46 = vor.u32 %v11974_v49, %v3834_v62  ;;  %4974 = vmatpush.bf16.msra.mxu3 %v7988_v24  ;;  %v8895_v49 = vld [vmem:[#allocation11 + $0xd4] sm:$0xf] }
 0x405   : > { %v3464_v36 = vpop.f32.mrf.mxu2  ;;  %v3513_v41 = vpop.f32.mrf.mxu3 }
 0x406   : > { %v3465_v56 = vadd.f32 %v3464_v36, %v10709_v57  ;;  %v3366_v29 = vpop.f32.mrf.mxu0  ;;  %v3415_v15 = vpop.f32.mrf.mxu1  ;;  %v7924_v57 = vor.u32 %v8881_v52, %v7921_v63 }
 0x407   : > { %v3367_v37 = vadd.f32 %v3366_v29, %v10711_v47  ;;  %v8946_v47 = vld [vmem:[#allocation11 + $0x264] sm:$0xf0]  ;;  %v10852_v29 = vsel %vm10288_vm2, 0, %v3830_v42  ;;  %v8879_v42 = vld [vmem:[#allocation11 + $0x54] sm:$0xf] }
 0x408   : > { %v10835_v0 = vadd.f32 %v3513_v41, %v3465_v56  ;;  %v8176_v39 = vor.u32 %v8946_v47, %v8175_v13  ;;  %4925 = vmatpush.bf16.msra.mxu2 %v7924_v57  ;;  %v11976_v47 = vld [vmem:[#allocation40_spill] sm:$0xff] }
 0x409   : > { %v10841_v5 = vadd.f32 %v3415_v15, %v3367_v37  ;;  %v10857_v15 = vsel %vm10288_vm2, 0, %v3837_v46  ;;  %v11977_v2 = vshrl.u32 %v11976_v47, 16 }
 0x40a   : > { %4736 = vmatmul.bf16.vlgmr.msrb.gmra.mxu2 %v11969_v33  ;;  %4785 = vmatmul.bf16.vlgmr.msrb.gmra.mxu3 %v11971_v18 }
 0x40b   : > { %4827 = vmatpush.bf16.msra.mxu0 %v8176_v39  ;;  %v3841_v19 = vrot.slane %v11977_v2, 7  ;;  %v11978_v39 = vld [vmem:[#allocation41_spill] sm:$0xff] }
 0x40c   : > { %v11979_v24 = vshrl.u32 %v11978_v39, 16 }
 0x40d   : > { %v3623_v10 = vpop.f32.mrf.mxu2  ;;  %v3672_v35 = vpop.f32.mrf.mxu3 }
 0x40e   : > { %v3525_v38 = vpop.f32.mrf.mxu0  ;;  %v3574_v41 = vpop.f32.mrf.mxu1  ;;  %v3848_v51 = vrot.slane %v11979_v24, 7 }
 0x40f   : > { %v3526_v36 = vadd.f32 %v3525_v38, %v10715_v6  ;;  %v3712_v6 = vmax.f32 %v10717_v16, 0.0  ;;  %v7916_v16 = vor.u32 %v8879_v42, %v7913_v25 }
 0x411   : > { %v3575_v37 = vadd.f32 %v3574_v41, %v3526_v36  ;;  %4638 = vmatmul.bf16.vlgmr.msrb.gmra.mxu0 %v10852_v29  ;;  %4687 = vmatmul.bf16.vlgmr.msrb.gmra.mxu1 %v10857_v15  ;;  %v8231_v36 = vld [vmem:[#allocation11 + $0x2d0] sm:$0xf]  ;;  %v8960_v41 = vld [vmem:[#allocation11 + $0x2d4] sm:$0xf0] }
 0x412   : > { %4926 = vmatpush.bf16.msra.mxu2 %v7916_v16 }
 0x413   : > { %v3624_v31 = vadd.f32 %v3623_v10, %v3575_v37  ;;  %v8167_v10 = vld [vmem:[#allocation11 + $0x250] sm:$0xf]  ;;  %v11980_v37 = vshll.u32 %v11976_v47, 16 }
 0x415   : > { %v3673_v45 = vadd.f32 %v3672_v35, %v3624_v31  ;;  %v3625_v21 = vpop.f32.mrf.mxu2  ;;  %v3674_v62 = vpop.f32.mrf.mxu3  ;;  %v8944_v35 = vld [vmem:[#allocation11 + $0x254] sm:$0xf0]  ;;  %v3844_v31 = vor.u32 %v11980_v37, %v3841_v19 }
 0x416   : > { %v3527_v52 = vpop.f32.mrf.mxu0  ;;  %v3576_v57 = vpop.f32.mrf.mxu1  ;;  %v8168_v38 = vor.u32 %v8944_v35, %v8167_v10 }
 0x417   : > { %v3713_v63 = vmax.f32 %v3673_v45, 0.0  ;;  %v3528_v13 = vadd.f32 %v3527_v52, %v10723_v48  ;;  %v7977_v48 = vld [vmem:[#allocation11 + $0xd8] sm:$0xf0]  ;;  %v8232_v52 = vor.u32 %v8960_v41, %v8231_v36  ;;  %v10876_v19 = vsel %vm10288_vm2, 0, %v3844_v31 }
 0x418   : > { %v7980_v45 = vor.u32 %v8895_v49, %v7977_v48  ;;  %4828 = vmatpush.bf16.msra.mxu0 %v8168_v38  ;;  %v3716_v31 = vmax.f32 %v10733_v9, 0.0 }
 0x419   : > { %v5266_v54 = vpack.c.bf16 %v3713_v63, %v3712_v6  ;;  %v3577_v4 = vadd.f32 %v3576_v57, %v3528_v13  ;;  %v11981_v57 = vshll.u32 %v11978_v39, 16  ;;  %4877 = vmatpush.bf16.msra.mxu1 %v8232_v52 }
 0x41a   : > { %4741 = vmatmul.bf16.gmra.mxu2 %v11976_v47  ;;  %4790 = vmatmul.bf16.gmra.mxu3 %v11978_v39 }
 0x41b   : > { %v3626_v46 = vadd.f32 %v3625_v21, %v3577_v4  ;;  %v3851_v2 = vor.u32 %v11981_v57, %v3848_v51  ;;  %4975 = vmatpush.bf16.msra.mxu3 %v7980_v45  ;;  %v3714_v21 = vmax.f32 %v10725_v7, 0.0  ;;  %v5394_v16 = vunpack.c.l.b16 %v5266_v54  ;;  %v11984_v57 = vld [vmem:[#allocation44_spill] sm:$0xff] }
 0x41c   : > { %v5395_v7 = vunpack.c.h.b16 %v5266_v54 }
 0x41d   : > { %v3675_v6 = vadd.f32 %v3674_v62, %v3626_v46  ;;  %v3628_v63 = vpop.f32.mrf.mxu2  ;;  %v3677_v13 = vpop.f32.mrf.mxu3  ;;  %v10881_v51 = vsel %vm10288_vm2, 0, %v3851_v2  ;;  %v11985_v2 = vshrl.u32 %v11984_v57, 16 }
 0x41e   : > { %v3530_v24 = vpop.f32.mrf.mxu0  ;;  %v3579_v25 = vpop.f32.mrf.mxu1 }
 0x41f   : > { %v3715_v4 = vmax.f32 %v3675_v6, 0.0  ;;  %v3531_v42 = vadd.f32 %v3530_v24, %v10731_v43  ;;  %v3855_v54 = vrot.slane %v11985_v2, 7  ;;  %v11986_v24 = vld [vmem:[#allocation45_spill] sm:$0xff] }
 0x421   : > { %v5267_v62 = vpack.c.bf16 %v3715_v4, %v3714_v21  ;;  %v3580_v10 = vadd.f32 %v3579_v25, %v3531_v42  ;;  %4643 = vmatmul.bf16.gmra.mxu0 %v10876_v19  ;;  %4692 = vmatmul.bf16.gmra.mxu1 %v10881_v51  ;;  %v11987_v21 = vshrl.u32 %v11986_v24, 16  ;;  %v8877_v42 = vld [vmem:[#allocation11 + $0x44] sm:$0xf]  ;;  %v7905_v25 = vld [vmem:[#allocation11 + $0x48] sm:$0xf0] }
 0x422   : > { %v7908_v9 = vor.u32 %v8877_v42, %v7905_v25 }
 0x423   : > { %v5396_v35 = vunpack.c.l.b16 %v5267_v62  ;;  %v5397_v49 = vunpack.c.h.b16 %v5267_v62  ;;  %v3629_v43 = vadd.f32 %v3628_v63, %v3580_v10  ;;  %v3862_v63 = vrot.slane %v11987_v21, 7  ;;  %v8159_v62 = vld [vmem:[#allocation11 + $0x240] sm:$0xf]  ;;  %v8942_v10 = vld [vmem:[#allocation11 + $0x244] sm:$0xf0] }
 0x424   : > { %4927 = vmatpush.bf16.msra.mxu2 %v7908_v9  ;;  %v11989_v21 = vshll.u32 %v11986_v24, 16 }
 0x425   : > { %v3678_v48 = vadd.f32 %v3677_v13, %v3629_v43  ;;  %v3630_v46 = vpop.f32.mrf.mxu2  ;;  %v3679_v38 = vpop.f32.mrf.mxu3  ;;  %v10884_v36 = vpack.c.b16 %v5396_v35, %v5394_v16  ;;  %v10886_v41 = vpack.c.b16 %v5397_v49, %v5395_v7  ;;  %v8893_v16 = vld [vmem:[#allocation11 + $0xc4] sm:$0xf]  ;;  %v8160_v35 = vor.u32 %v8942_v10, %v8159_v62  ;;  %v8223_v43 = vld [vmem:[#allocation11 + $0x2c0] sm:$0xf] }
 0x426   : > { %v3532_v37 = vpop.f32.mrf.mxu0  ;;  %v3581_v6 = vpop.f32.mrf.mxu1 }
 0x427   : > { %11982 = vst [vmem:[#allocation69_spill] sm:$0xff] %v10884_v36  ;;  %v3717_v45 = vmax.f32 %v3678_v48, 0.0  ;;  %v3533_v52 = vadd.f32 %v3532_v37, %v10739_v40  ;;  %v7969_v40 = vld [vmem:[#allocation11 + $0xc8] sm:$0xf0]  ;;  %v8958_v48 = vld [vmem:[#allocation11 + $0x2c4] sm:$0xf0]  ;;  %4829 = vmatpush.bf16.msra.mxu0 %v8160_v35 }
 0x428   : > { %11983 = vst [vmem:[#allocation70_spill] sm:$0xff] %v10886_v41  ;;  %v7972_v49 = vor.u32 %v8893_v16, %v7969_v40  ;;  %v11988_v37 = vshll.u32 %v11984_v57, 16  ;;  %v3865_v41 = vor.u32 %v11989_v21, %v3862_v63  ;;  %v11992_v21 = vld [vmem:[#allocation48_spill] sm:$0xff] }
 0x429   : > { %v5268_v13 = vpack.c.bf16 %v3717_v45, %v3716_v31  ;;  %v3582_v4 = vadd.f32 %v3581_v6, %v3533_v52  ;;  %v8224_v45 = vor.u32 %v8958_v48, %v8223_v43 }
 0x42a   : > { %4746 = vmatmul.bf16.gmra.mxu2 %v11984_v57  ;;  %4795 = vmatmul.bf16.gmra.mxu3 %v11986_v24  ;;  %v3858_v31 = vor.u32 %v11988_v37, %v3855_v54  ;;  %v10909_v63 = vsel %vm10288_vm2, 0, %v3865_v41 }
 0x42b   : > { %v3631_v7 = vadd.f32 %v3630_v46, %v3582_v4  ;;  %4976 = vmatpush.bf16.msra.mxu3 %v7972_v49  ;;  %4878 = vmatpush.bf16.msra.mxu1 %v8224_v45  ;;  %v3718_v46 = vmax.f32 %v10741_v50, 0.0  ;;  %v5398_v10 = vunpack.c.l.b16 %v5268_v13  ;;  %v5399_v40 = vunpack.c.h.b16 %v5268_v13 }
 0x42c   : > { %v10904_v54 = vsel %vm10288_vm2, 0, %v3858_v31  ;;  %v3720_v31 = vmax.f32 %v10749_v32, 0.0 }
 0x42d   : > { %v3680_v52 = vadd.f32 %v3679_v38, %v3631_v7  ;;  %v3633_v6 = vpop.f32.mrf.mxu2  ;;  %v3682_v2 = vpop.f32.mrf.mxu3 }
 0x42e   : > { %v3535_v42 = vpop.f32.mrf.mxu0  ;;  %v3584_v62 = vpop.f32.mrf.mxu1 }
 0x42f   : > { %v3719_v4 = vmax.f32 %v3680_v52, 0.0  ;;  %v3536_v25 = vadd.f32 %v3535_v42, %v10747_v17  ;;  %v11993_v42 = vshrl.u32 %v11992_v21, 16 }
 0x431   : > { %v3585_v38 = vadd.f32 %v3584_v62, %v3536_v25  ;;  %4648 = vmatmul.bf16.gmra.mxu0 %v10904_v54  ;;  %v5269_v9 = vpack.c.bf16 %v3719_v4, %v3718_v46  ;;  %4697 = vmatmul.bf16.gmra.mxu1 %v10909_v63  ;;  %v11994_v46 = vld [vmem:[#allocation49_spill] sm:$0xff]  ;;  %v8875_v62 = vld [vmem:[#allocation11 + $0x34] sm:$0xf] }
 0x432   : > { %v11995_v13 = vshrl.u32 %v11994_v46, 16 }
 0x433   : > { %v3634_v50 = vadd.f32 %v3633_v6, %v3585_v38  ;;  %v5400_v16 = vunpack.c.l.b16 %v5269_v9  ;;  %v5401_v17 = vunpack.c.h.b16 %v5269_v9  ;;  %v3869_v6 = vrot.slane %v11993_v42, 7  ;;  %v7897_v38 = vld [vmem:[#allocation11 + $0x38] sm:$0xf0]  ;;  %v8151_v9 = vld [vmem:[#allocation11 + $0x230] sm:$0xf] }
 0x434   : > { %v3876_v4 = vrot.slane %v11995_v13, 7  ;;  %v7900_v32 = vor.u32 %v8875_v62, %v7897_v38  ;;  %v11996_v42 = vshll.u32 %v11992_v21, 16 }
 0x435   : > { %v3683_v7 = vadd.f32 %v3682_v2, %v3634_v50  ;;  %v3635_v35 = vpop.f32.mrf.mxu2  ;;  %v3684_v49 = vpop.f32.mrf.mxu3  ;;  %v10912_v43 = vpack.c.b16 %v5400_v16, %v5398_v10  ;;  %v10914_v48 = vpack.c.b16 %v5401_v17, %v5399_v40  ;;  %v8940_v10 = vld [vmem:[#allocation11 + $0x234] sm:$0xf0]  ;;  %v8891_v50 = vld [vmem:[#allocation11 + $0xb4] sm:$0xf] }
 0x436   : > { %v3537_v37 = vpop.f32.mrf.mxu0  ;;  %v3586_v52 = vpop.f32.mrf.mxu1  ;;  %v8152_v40 = vor.u32 %v8940_v10, %v8151_v9  ;;  %4928 = vmatpush.bf16.msra.mxu2 %v7900_v32 }
 0x437   : > { %11990 = vst [vmem:[#allocation71_spill] sm:$0xff] %v10912_v43  ;;  %v3721_v41 = vmax.f32 %v3683_v7, 0.0  ;;  %v3538_v45 = vadd.f32 %v3537_v37, %v10755_v55  ;;  %v7961_v55 = vld [vmem:[#allocation11 + $0xb8] sm:$0xf0]  ;;  %v8215_v7 = vld [vmem:[#allocation11 + $0x2b0] sm:$0xf] }
 0x438   : > { %11991 = vst [vmem:[#allocation72_spill] sm:$0xff] %v10914_v48  ;;  %v7964_v17 = vor.u32 %v8891_v50, %v7961_v55  ;;  %v8956_v37 = vld [vmem:[#allocation11 + $0x2b4] sm:$0xf0]  ;;  %v11997_v48 = vshll.u32 %v11994_v46, 16  ;;  %4830 = vmatpush.bf16.msra.mxu0 %v8152_v40 }
 0x439   : > { %v5270_v2 = vpack.c.bf16 %v3721_v41, %v3720_v31  ;;  %v3587_v25 = vadd.f32 %v3586_v52, %v3538_v45  ;;  %v3872_v31 = vor.u32 %v11996_v42, %v3869_v6  ;;  %v8216_v41 = vor.u32 %v8956_v37, %v8215_v7 }
 0x43a   : > { %4751 = vmatmul.bf16.gmra.mxu2 %v11992_v21  ;;  %4800 = vmatmul.bf16.gmra.mxu3 %v11994_v46  ;;  %v3879_v43 = vor.u32 %v11997_v48, %v3876_v4  ;;  %v3724_v42 = vmax.f32 %v10765_v59, 0.0 }
 0x43b   : > { %v3636_v16 = vadd.f32 %v3635_v35, %v3587_v25  ;;  %4977 = vmatpush.bf16.msra.mxu3 %v7964_v17  ;;  %4879 = vmatpush.bf16.msra.mxu1 %v8216_v41  ;;  %v3722_v35 = vmax.f32 %v10757_v14, 0.0  ;;  %v10932_v6 = vsel %vm10288_vm2, 0, %v3872_v31  ;;  %v5402_v32 = vunpack.c.l.b16 %v5270_v2 }
 0x43c   : > { %v10937_v48 = vsel %vm10288_vm2, 0, %v3879_v43  ;;  %v5403_v50 = vunpack.c.h.b16 %v5270_v2 }
 0x43d   : > { %v3685_v45 = vadd.f32 %v3684_v49, %v3636_v16  ;;  %v3638_v52 = vpop.f32.mrf.mxu2  ;;  %v3687_v13 = vpop.f32.mrf.mxu3 }
 0x43e   : > { %v3540_v62 = vpop.f32.mrf.mxu0  ;;  %v3589_v9 = vpop.f32.mrf.mxu1 }
 0x43f   : > { %v3723_v25 = vmax.f32 %v3685_v45, 0.0  ;;  %v3541_v38 = vadd.f32 %v3540_v62, %v10763_v11  ;;  %v12000_v45 = vld [vmem:[#allocation52_spill] sm:$0xff] }
 0x440   : > { %v12001_v62 = vshrl.u32 %v12000_v45, 16 }
 0x441   : > { %v3590_v49 = vadd.f32 %v3589_v9, %v3541_v38  ;;  %4653 = vmatmul.bf16.gmra.mxu0 %v10932_v6  ;;  %v5271_v4 = vpack.c.bf16 %v3723_v25, %v3722_v35  ;;  %4702 = vmatmul.bf16.gmra.mxu1 %v10937_v48  ;;  %v12002_v35 = vld [vmem:[#allocation53_spill] sm:$0xff]  ;;  %v8873_v9 = vld [vmem:[#allocation11 + $0x24] sm:$0xf] }
 0x442   : > { %v12003_v2 = vshrl.u32 %v12002_v35, 16 }
 0x443   : > { %v3639_v14 = vadd.f32 %v3638_v52, %v3590_v49  ;;  %v5404_v10 = vunpack.c.l.b16 %v5271_v4  ;;  %v5405_v11 = vunpack.c.h.b16 %v5271_v4  ;;  %v3883_v52 = vrot.slane %v12001_v62, 7  ;;  %v7889_v49 = vld [vmem:[#allocation11 + $0x28] sm:$0xf0]  ;;  %v8143_v4 = vld [vmem:[#allocation11 + $0x220] sm:$0xf] }
 0x444   : > { %v3890_v25 = vrot.slane %v12003_v2, 7  ;;  %v7892_v59 = vor.u32 %v8873_v9, %v7889_v49  ;;  %v12004_v62 = vshll.u32 %v12000_v45, 16 }
 0x445   : > { %v3688_v55 = vadd.f32 %v3687_v13, %v3639_v14  ;;  %v3640_v16 = vpop.f32.mrf.mxu2  ;;  %v3689_v40 = vpop.f32.mrf.mxu3  ;;  %v10940_v17 = vpack.c.b16 %v5404_v10, %v5402_v32  ;;  %v10942_v7 = vpack.c.b16 %v5405_v11, %v5403_v50  ;;  %v8938_v32 = vld [vmem:[#allocation11 + $0x224] sm:$0xf0]  ;;  %v8889_v14 = vld [vmem:[#allocation11 + $0xa4] sm:$0xf] }
 0x446   : > { %v3542_v37 = vpop.f32.mrf.mxu0  ;;  %v3591_v41 = vpop.f32.mrf.mxu1  ;;  %v8144_v50 = vor.u32 %v8938_v32, %v8143_v4  ;;  %4929 = vmatpush.bf16.msra.mxu2 %v7892_v59 }
 0x447   : > { %11998 = vst [vmem:[#allocation73_spill] sm:$0xff] %v10940_v17  ;;  %v3725_v43 = vmax.f32 %v3688_v55, 0.0  ;;  %v3543_v31 = vadd.f32 %v3542_v37, %v10771_v58  ;;  %v7953_v58 = vld [vmem:[#allocation11 + $0xa8] sm:$0xf0]  ;;  %v8207_v55 = vld [vmem:[#allocation11 + $0x2a0] sm:$0xf] }
 0x448   : > { %11999 = vst [vmem:[#allocation74_spill] sm:$0xff] %v10942_v7  ;;  %v7956_v11 = vor.u32 %v8889_v14, %v7953_v58  ;;  %v8954_v37 = vld [vmem:[#allocation11 + $0x2a4] sm:$0xf0]  ;;  %v12005_v7 = vshll.u32 %v12002_v35, 16  ;;  %4831 = vmatpush.bf16.msra.mxu0 %v8144_v50 }
 0x449   : > { %v5272_v13 = vpack.c.bf16 %v3725_v43, %v3724_v42  ;;  %v3592_v38 = vadd.f32 %v3591_v41, %v3543_v31  ;;  %v3886_v42 = vor.u32 %v12004_v62, %v3883_v52  ;;  %v8208_v43 = vor.u32 %v8954_v37, %v8207_v55 }
 0x44a   : > { %4756 = vmatmul.bf16.gmra.mxu2 %v12000_v45  ;;  %4805 = vmatmul.bf16.gmra.mxu3 %v12002_v35  ;;  %v3893_v17 = vor.u32 %v12005_v7, %v3890_v25  ;;  %v3728_v62 = vmax.f32 %v10781_v27, 0.0 }
 0x44b   : > { %v3641_v10 = vadd.f32 %v3640_v16, %v3592_v38  ;;  %4978 = vmatpush.bf16.msra.mxu3 %v7956_v11  ;;  %4880 = vmatpush.bf16.msra.mxu1 %v8208_v43  ;;  %v3726_v16 = vmax.f32 %v10773_v20, 0.0  ;;  %v10960_v52 = vsel %vm10288_vm2, 0, %v3886_v42  ;;  %v5406_v59 = vunpack.c.l.b16 %v5272_v13 }
 0x44c   : > { %v10965_v7 = vsel %vm10288_vm2, 0, %v3893_v17  ;;  %v5407_v14 = vunpack.c.h.b16 %v5272_v13 }
 0x44d   : > { %v3690_v31 = vadd.f32 %v3689_v40, %v3641_v10  ;;  %v3643_v41 = vpop.f32.mrf.mxu2  ;;  %v3692_v2 = vpop.f32.mrf.mxu3 }
 0x44e   : > { %v3545_v9 = vpop.f32.mrf.mxu0  ;;  %v3594_v4 = vpop.f32.mrf.mxu1 }
 0x44f   : > { %v3727_v38 = vmax.f32 %v3690_v31, 0.0  ;;  %v3546_v49 = vadd.f32 %v3545_v9, %v10779_v53  ;;  %v12008_v31 = vld [vmem:[#allocation56_spill] sm:$0xff] }
 0x450   : > { %v12009_v9 = vshrl.u32 %v12008_v31, 16 }
 0x451   : > { %v3595_v40 = vadd.f32 %v3594_v4, %v3546_v49  ;;  %4658 = vmatmul.bf16.gmra.mxu0 %v10960_v52  ;;  %v5273_v25 = vpack.c.bf16 %v3727_v38, %v3726_v16  ;;  %4707 = vmatmul.bf16.gmra.mxu1 %v10965_v7  ;;  %v12010_v16 = vld [vmem:[#allocation57_spill] sm:$0xff]  ;;  %v8871_v4 = vld [vmem:[#allocation11 + $0x14] sm:$0xf] }
 0x452   : > { %v12011_v13 = vshrl.u32 %v12010_v16, 16 }
 0x453   : > { %v3644_v20 = vadd.f32 %v3643_v41, %v3595_v40  ;;  %v5408_v32 = vunpack.c.l.b16 %v5273_v25  ;;  %v5409_v53 = vunpack.c.h.b16 %v5273_v25  ;;  %v3897_v41 = vrot.slane %v12009_v9, 7  ;;  %v7881_v40 = vld [vmem:[#allocation11 + $0x18] sm:$0xf0]  ;;  %v8135_v25 = vld [vmem:[#allocation11 + $0x210] sm:$0xf] }
 0x454   : > { %v3904_v38 = vrot.slane %v12011_v13, 7  ;;  %v7884_v27 = vor.u32 %v8871_v4, %v7881_v40  ;;  %v12012_v9 = vshll.u32 %v12008_v31, 16 }
 0x455   : > { %v3693_v58 = vadd.f32 %v3692_v2, %v3644_v20  ;;  %v3645_v10 = vpop.f32.mrf.mxu2  ;;  %v3694_v50 = vpop.f32.mrf.mxu3  ;;  %v10968_v11 = vpack.c.b16 %v5408_v32, %v5406_v59  ;;  %v10970_v55 = vpack.c.b16 %v5409_v53, %v5407_v14  ;;  %v8936_v59 = vld [vmem:[#allocation11 + $0x214] sm:$0xf0]  ;;  %v8887_v20 = vld [vmem:[#allocation11 + $0x94] sm:$0xf] }
 0x456   : > { %v3547_v37 = vpop.f32.mrf.mxu0  ;;  %v3596_v43 = vpop.f32.mrf.mxu1  ;;  %v8136_v14 = vor.u32 %v8936_v59, %v8135_v25  ;;  %4930 = vmatpush.bf16.msra.mxu2 %v7884_v27 }
 0x457   : > { %12006 = vst [vmem:[#allocation75_spill] sm:$0xff] %v10968_v11  ;;  %v3729_v17 = vmax.f32 %v3693_v58, 0.0  ;;  %v3548_v42 = vadd.f32 %v3547_v37, %v10787_v23  ;;  %v7945_v23 = vld [vmem:[#allocation11 + $0x98] sm:$0xf0]  ;;  %v8199_v58 = vld [vmem:[#allocation11 + $0x290] sm:$0xf] }
 0x458   : > { %12007 = vst [vmem:[#allocation36_spill] sm:$0xff] %v10970_v55  ;;  %v7948_v53 = vor.u32 %v8887_v20, %v7945_v23  ;;  %v8952_v37 = vld [vmem:[#allocation11 + $0x294] sm:$0xf0]  ;;  %v12013_v55 = vshll.u32 %v12010_v16, 16  ;;  %4832 = vmatpush.bf16.msra.mxu0 %v8136_v14 }
 0x459   : > { %v5274_v2 = vpack.c.bf16 %v3729_v17, %v3728_v62  ;;  %v3597_v49 = vadd.f32 %v3596_v43, %v3548_v42  ;;  %v3900_v62 = vor.u32 %v12012_v9, %v3897_v41  ;;  %v8200_v17 = vor.u32 %v8952_v37, %v8199_v58 }
 0x45a   : > { %4761 = vmatmul.bf16.gmra.mxu2 %v12008_v31  ;;  %4810 = vmatmul.bf16.gmra.mxu3 %v12010_v16  ;;  %v3907_v11 = vor.u32 %v12013_v55, %v3904_v38  ;;  %v3732_v9 = vmax.f32 %v10797_v26, 0.0 }
 0x45b   : > { %v3646_v32 = vadd.f32 %v3645_v10, %v3597_v49  ;;  %4979 = vmatpush.bf16.msra.mxu3 %v7948_v53  ;;  %4881 = vmatpush.bf16.msra.mxu1 %v8200_v17  ;;  %v3730_v10 = vmax.f32 %v10789_v44, 0.0  ;;  %v10988_v41 = vsel %vm10288_vm2, 0, %v3900_v62  ;;  %v5410_v27 = vunpack.c.l.b16 %v5274_v2 }
 0x45c   : > { %v10993_v55 = vsel %vm10288_vm2, 0, %v3907_v11  ;;  %v5411_v20 = vunpack.c.h.b16 %v5274_v2 }
 0x45d   : > { %v3695_v42 = vadd.f32 %v3694_v50, %v3646_v32  ;;  %v3648_v43 = vpop.f32.mrf.mxu2  ;;  %v3697_v13 = vpop.f32.mrf.mxu3 }
 0x45e   : > { %v3550_v4 = vpop.f32.mrf.mxu0  ;;  %v3599_v25 = vpop.f32.mrf.mxu1 }
 0x45f   : > { %v3731_v49 = vmax.f32 %v3695_v42, 0.0  ;;  %v3551_v40 = vadd.f32 %v3550_v4, %v10795_v30  ;;  %v8869_v42 = vld [vmem:[#allocation11 + $0x4] sm:$0xf]  ;;  %v7873_v4 = vld [vmem:[#allocation11 + $0x8] sm:$0xf0] }
 0x461   : > { %v3600_v50 = vadd.f32 %v3599_v25, %v3551_v40  ;;  %4663 = vmatmul.bf16.gmra.mxu0 %v10988_v41  ;;  %v5275_v38 = vpack.c.bf16 %v3731_v49, %v3730_v10  ;;  %4712 = vmatmul.bf16.gmra.mxu1 %v10993_v55  ;;  %v12018_v49 = vld [vmem:[#allocation61_spill] sm:$0xff]  ;;  %v7876_v25 = vor.u32 %v8869_v42, %v7873_v4 }
 0x463   : > { %v3649_v44 = vadd.f32 %v3648_v43, %v3600_v50  ;;  %v5412_v59 = vunpack.c.l.b16 %v5275_v38  ;;  %v5413_v30 = vunpack.c.h.b16 %v5275_v38  ;;  %v12016_v43 = vld [vmem:[#allocation60_spill] sm:$0xff]  ;;  %v7937_v38 = vld [vmem:[#allocation11 + $0x88] sm:$0xf0]  ;;  %4931 = vmatpush.bf16.msra.mxu2 %v7876_v25 }
 0x464   : > { %v12017_v10 = vshrl.u32 %v12016_v43, 16  ;;  %v8885_v50 = vld [vmem:[#allocation11 + $0x84] sm:$0xf]  ;;  %v12020_v42 = vshll.u32 %v12016_v43, 16 }
 0x465   : > { %v3698_v23 = vadd.f32 %v3697_v13, %v3649_v44  ;;  %v3650_v32 = vpop.f32.mrf.mxu2  ;;  %v3699_v14 = vpop.f32.mrf.mxu3  ;;  %v10996_v53 = vpack.c.b16 %v5412_v59, %v5410_v27  ;;  %v10998_v58 = vpack.c.b16 %v5413_v30, %v5411_v20  ;;  %v12019_v13 = vshrl.u32 %v12018_v49, 16  ;;  %v8127_v59 = vld [vmem:[#allocation11 + $0x200] sm:$0xf]  ;;  %v8934_v20 = vld [vmem:[#allocation11 + $0x204] sm:$0xf0] }
 0x466   : > { %v3552_v37 = vpop.f32.mrf.mxu0  ;;  %v3601_v17 = vpop.f32.mrf.mxu1  ;;  %v3911_v2 = vrot.slane %v12017_v10, 7  ;;  %v7940_v26 = vor.u32 %v8885_v50, %v7937_v38  ;;  %v8191_v30 = vld [vmem:[#allocation11 + $0x280] sm:$0xf]  ;;  %v3734_v38 = vmax.f32 %v10805_v28, 0.0  ;;  %v8947_v28 = vld [vmem:[#allocation11 + $0x274] sm:$0xf] }
 0x467   : > { %12014 = vst [vmem:[#allocation37_spill] sm:$0xff] %v10996_v53  ;;  %v3733_v11 = vmax.f32 %v3698_v23, 0.0  ;;  %v3553_v62 = vadd.f32 %v3552_v37, %v10803_v61  ;;  %v3918_v40 = vrot.slane %v12019_v13, 7  ;;  %v8128_v61 = vor.u32 %v8934_v20, %v8127_v59  ;;  %v8950_v23 = vld [vmem:[#allocation11 + $0x284] sm:$0xf0] }
 0x468   : > { %12015 = vst [vmem:[#allocation68_spill] sm:$0xff] %v10998_v58  ;;  %4980 = vmatpush.bf16.msra.mxu3 %v7940_v26  ;;  %v8192_v10 = vor.u32 %v8950_v23, %v8191_v30  ;;  %v3914_v4 = vor.u32 %v12020_v42, %v3911_v2  ;;  %v8185_v26 = vld [vmem:[#allocation11 + $0x278] sm:$0xf0]  ;;  %v8915_v30 = vld [vmem:[#allocation11 + $0x174] sm:$0xf] }
 0x469   : > { %v5276_v27 = vpack.c.bf16 %v3733_v11, %v3732_v9  ;;  %v3602_v44 = vadd.f32 %v3601_v17, %v3553_v62  ;;  %4833 = vmatpush.bf16.msra.mxu0 %v8128_v61  ;;  %v12021_v17 = vshll.u32 %v12018_v49, 16  ;;  %v8963_v42 = vld [vmem:[#allocation11 + $0x2f4] sm:$0xf] }
 0x46a   : > { %4766 = vmatmul.bf16.gmra.mxu2 %v12016_v43  ;;  %4815 = vmatmul.bf16.gmra.mxu3 %v12018_v49 }
 0x46b   : > { %v3651_v37 = vadd.f32 %v3650_v32, %v3602_v44  ;;  %v3921_v13 = vor.u32 %v12021_v17, %v3918_v40  ;;  %4882 = vmatpush.bf16.msra.mxu1 %v8192_v10  ;;  %v11016_v44 = vsel %vm10288_vm2, 0, %v3914_v4  ;;  %v8057_v10 = vld [vmem:[#allocation11 + $0x178] sm:$0xf0] }
 0x46c   : > { %v8249_v4 = vld [vmem:[#allocation11 + $0x2f8] sm:$0xf0] }
 0x46d   : > { %v3700_v9 = vadd.f32 %v3699_v14, %v3651_v37  ;;  %v3653_v11 = vpop.f32.mrf.mxu2  ;;  %v3702_v62 = vpop.f32.mrf.mxu3  ;;  %v11021_v14 = vsel %vm10288_vm2, 0, %v3921_v13  ;;  %v8188_v37 = vor.u32 %v8947_v28, %v8185_v26  ;;  %v8060_v13 = vor.u32 %v8915_v30, %v8057_v10 }
 0x46e   : > { %v3555_v50 = vpop.f32.mrf.mxu0  ;;  %v3604_v25 = vpop.f32.mrf.mxu1 }
 0x46f   : > { %v3735_v59 = vmax.f32 %v3700_v9, 0.0  ;;  %v3556_v32 = vadd.f32 %v3555_v50, %v10811_v12  ;;  %v5414_v12 = vunpack.c.l.b16 %v5276_v27  ;;  %v5415_v9 = vunpack.c.h.b16 %v5276_v27  ;;  %5120 = vmatpush.bf16.msrb.mxu2 %v8188_v37  ;;  %5022 = vmatpush.bf16.msrb.mxu0 %v8060_v13 }
 0x471   : > { %v3605_v2 = vadd.f32 %v3604_v25, %v3556_v32  ;;  %4668 = vmatmul.bf16.gmra.mxu0 %v11016_v44  ;;  %v5277_v40 = vpack.c.bf16 %v3735_v59, %v3734_v38  ;;  %4717 = vmatmul.bf16.gmra.mxu1 %v11021_v14  ;;  %v8252_v25 = vor.u32 %v8963_v42, %v8249_v4  ;;  %v8931_v38 = vld [vmem:[#allocation11 + $0x1f4] sm:$0xf]  ;;  %v8121_v59 = vld [vmem:[#allocation11 + $0x1f8] sm:$0xf0] }
 0x473   : > { %v3654_v20 = vadd.f32 %v3653_v11, %v3605_v2  ;;  %v5416_v61 = vunpack.c.l.b16 %v5277_v40  ;;  %v5417_v23 = vunpack.c.h.b16 %v5277_v40  ;;  %v8124_v2 = vor.u32 %v8931_v38, %v8121_v59  ;;  %5169 = vmatpush.bf16.msrb.mxu3 %v8252_v25 }
 0x474   : > { %v3736_v40 = vmax.f32 %v10813_v8, 0.0  ;;  %v3738_v59 = vmax.f32 %v10821_v1, 0.0  ;;  %v8945_v1 = vld [vmem:[#allocation11 + $0x264] sm:$0xf] }
 0x475   : > { %v3703_v17 = vadd.f32 %v3702_v62, %v3654_v20  ;;  %v3655_v50 = vpop.f32.mrf.mxu2  ;;  %v3704_v32 = vpop.f32.mrf.mxu3  ;;  %v11024_v58 = vpack.c.b16 %v5416_v61, %v5414_v12  ;;  %v11026_v53 = vpack.c.b16 %v5417_v23, %v5415_v9  ;;  %v12024_v62 = vld [vmem:[#allocation64_spill] sm:$0xff]  ;;  %5071 = vmatpush.bf16.msrb.mxu1 %v8124_v2  ;;  %v12026_v61 = vld [vmem:[#allocation65_spill] sm:$0xff] }
 0x476   : > { %v3557_v11 = vpop.f32.mrf.mxu0  ;;  %v3606_v27 = vpop.f32.mrf.mxu1  ;;  %v12025_v20 = vshrl.u32 %v12024_v62, 16  ;;  %v12027_v42 = vshrl.u32 %v12026_v61, 16  ;;  %v12028_v23 = vshll.u32 %v12024_v62, 16  ;;  %v12029_v13 = vshll.u32 %v12026_v61, 16 }
 0x477   : > { %12022 = vst [vmem:[#allocation40_spill] sm:$0xff] %v11024_v58  ;;  %v3737_v28 = vmax.f32 %v3703_v17, 0.0  ;;  %v3558_v26 = vadd.f32 %v3557_v11, %v10819_v34 }
 0x478   : > { %12023 = vst [vmem:[#allocation41_spill] sm:$0xff] %v11026_v53  ;;  %v3925_v30 = vrot.slane %v12025_v20, 7  ;;  %v3932_v37 = vrot.slane %v12027_v42, 7  ;;  %v8177_v20 = vld [vmem:[#allocation11 + $0x268] sm:$0xf0] }
 0x479   : > { %v5278_v10 = vpack.c.bf16 %v3737_v28, %v3736_v40  ;;  %v3607_v12 = vadd.f32 %v3606_v27, %v3558_v26 }
 0x47a   : > { %4771 = vmatmul.bf16.gmra.mxu2 %v12024_v62  ;;  %4820 = vmatmul.bf16.gmra.mxu3 %v12026_v61  ;;  %v3928_v34 = vor.u32 %v12028_v23, %v3925_v30  ;;  %v3935_v25 = vor.u32 %v12029_v13, %v3932_v37  ;;  %v8913_v30 = vld [vmem:[#allocation11 + $0x164] sm:$0xf]  ;;  %v8180_v37 = vor.u32 %v8945_v1, %v8177_v20 }
 0x47b   : > { %v3656_v8 = vadd.f32 %v3655_v50, %v3607_v12  ;;  %v8961_v23 = vld [vmem:[#allocation11 + $0x2e4] sm:$0xf] }
 0x47c   : > { %v11044_v28 = vsel %vm10288_vm2, 0, %v3928_v34  ;;  %v8241_v34 = vld [vmem:[#allocation11 + $0x2e8] sm:$0xf0]  ;;  %5121 = vmatpush.bf16.msrb.mxu2 %v8180_v37 }
 0x47d   : > { %v3705_v4 = vadd.f32 %v3704_v32, %v3656_v8  ;;  %v3658_v9 = vpop.f32.mrf.mxu2  ;;  %v3707_v17 = vpop.f32.mrf.mxu3  ;;  %v11049_v32 = vsel %vm10288_vm2, 0, %v3935_v25  ;;  %v8049_v8 = vld [vmem:[#allocation11 + $0x168] sm:$0xf0] }
 0x47e   : > { %v3560_v38 = vpop.f32.mrf.mxu0  ;;  %v3609_v40 = vpop.f32.mrf.mxu1  ;;  %v8052_v25 = vor.u32 %v8913_v30, %v8049_v8  ;;  %v3742_v8 = vmax.f32 %v10841_v5, 0.0 }
 0x47f   : > { %v3739_v11 = vmax.f32 %v3705_v4, 0.0  ;;  %v3561_v2 = vadd.f32 %v3560_v38, %v10827_v3  ;;  %v5418_v3 = vunpack.c.l.b16 %v5278_v10  ;;  %v5419_v4 = vunpack.c.h.b16 %v5278_v10 }
 0x480   : > { %5023 = vmatpush.bf16.msrb.mxu0 %v8052_v25 }
 0x481   : > { %v3610_v50 = vadd.f32 %v3609_v40, %v3561_v2  ;;  %4673 = vmatmul.bf16.gmra.mxu0 %v11044_v28  ;;  %v5279_v26 = vpack.c.bf16 %v3739_v11, %v3738_v59  ;;  %4722 = vmatmul.bf16.gmra.mxu1 %v11049_v32  ;;  %v8244_v2 = vor.u32 %v8961_v23, %v8241_v34  ;;  %v8929_v59 = vld [vmem:[#allocation11 + $0x1e4] sm:$0xf]  ;;  %v8113_v11 = vld [vmem:[#allocation11 + $0x1e8] sm:$0xf0] }
 0x483   : > { %v3659_v27 = vadd.f32 %v3658_v9, %v3610_v50  ;;  %v5420_v12 = vunpack.c.l.b16 %v5279_v26  ;;  %v5421_v42 = vunpack.c.h.b16 %v5279_v26  ;;  %v8116_v50 = vor.u32 %v8929_v59, %v8113_v11  ;;  %5170 = vmatpush.bf16.msrb.mxu3 %v8244_v2  ;;  %v8943_v2 = vld [vmem:[#allocation11 + $0x254] sm:$0xf]  ;;  %v8169_v59 = vld [vmem:[#allocation11 + $0x258] sm:$0xf0] }
 0x484   : > { %v3740_v26 = vmax.f32 %v10829_v22, 0.0  ;;  %v8911_v11 = vld [vmem:[#allocation11 + $0x154] sm:$0xf] }
 0x485   : > { %v3708_v13 = vadd.f32 %v3707_v17, %v3659_v27  ;;  %v3660_v38 = vpop.f32.mrf.mxu2  ;;  %v3709_v56 = vpop.f32.mrf.mxu3  ;;  %v11052_v40 = vpack.c.b16 %v5420_v12, %v5418_v3  ;;  %v11054_v53 = vpack.c.b16 %v5421_v42, %v5419_v4  ;;  %v11061_v17 = vld [vmem:[%s11771_s8] sm:$0x3]  ;;  %5072 = vmatpush.bf16.msrb.mxu1 %v8116_v50 }
 0x486   : > { %v3562_v9 = vpop.f32.mrf.mxu0  ;;  %v3611_v10 = vpop.f32.mrf.mxu1  ;;  %v11066_v22 = vperm.slane %v11061_v17, 0 }
 0x487   : > { %12030 = vst [vmem:[#allocation44_spill] sm:$0xff] %v11052_v40  ;;  %v3741_v1 = vmax.f32 %v3708_v13, 0.0  ;;  %v3563_v20 = vadd.f32 %v3562_v9, %v10835_v0  ;;  %v12032_v13 = vld [vmem:[#allocation38_spill] sm:$0xff] }
 0x488   : > { %12031 = vst [vmem:[#allocation45_spill] sm:$0xff] %v11054_v53 }
 0x489   : > { %v5280_v27 = vpack.c.bf16 %v3741_v1, %v3740_v26  ;;  %v3612_v30 = vadd.f32 %v3611_v10, %v3563_v20  ;;  %v8172_v1 = vor.u32 %v8943_v2, %v8169_v59  ;;  %v8041_v20 = vld [vmem:[#allocation11 + $0x158] sm:$0xf0]  ;;  %v8959_v10 = vld [vmem:[#allocation11 + $0x2d4] sm:$0xf] }
 0x48a   : > { %4932 = vmatmul.bf16.vlgmr.msra.gmra.mxu2 %v10852_v29  ;;  %4981 = vmatmul.bf16.vlgmr.msra.gmra.mxu3 %v10857_v15  ;;  %v11073_v29 = vsel %vm10531_vm5, %v12032_v13, 0  ;;  %v8927_v13 = vld [vmem:[#allocation11 + $0x1d4] sm:$0xf] }
 0x48b   : > { %v3661_v3 = vadd.f32 %v3660_v38, %v3612_v30  ;;  %v12033_v38 = vld [vmem:[#allocation39_spill] sm:$0xff]  ;;  %v5422_v9 = vunpack.c.l.b16 %v5280_v27  ;;  %5122 = vmatpush.bf16.msrb.mxu2 %v8172_v1  ;;  %v12036_v1 = vld [vmem:[#allocation42_spill] sm:$0xff] }
 0x48c   : > { %v8233_v30 = vld [vmem:[#allocation11 + $0x2d8] sm:$0xf0] }
 0x48d   : > { %v3710_v0 = vadd.f32 %v3709_v56, %v3661_v3  ;;  %v4737_v12 = vpop.f32.mrf.mxu2  ;;  %v4786_v42 = vpop.f32.mrf.mxu3  ;;  %v11079_v56 = vsel %vm10531_vm5, %v12033_v38, 0  ;;  %v5423_v3 = vunpack.c.h.b16 %v5280_v27 }
 0x48e   : > { %v4639_v37 = vpop.f32.mrf.mxu0  ;;  %v4688_v4 = vpop.f32.mrf.mxu1 }
 0x48f   : > { %v3743_v23 = vmax.f32 %v3710_v0, 0.0  ;;  %v4640_v34 = vadd.f32 %v4639_v37, %v11066_v22 }
 0x491   : > { %v4689_v15 = vadd.f32 %v4688_v4, %v4640_v34  ;;  %4834 = vmatmul.bf16.vlgmr.msra.gmra.mxu0 %v11073_v29  ;;  %v5281_v25 = vpack.c.bf16 %v3743_v23, %v3742_v8  ;;  %4883 = vmatmul.bf16.vlgmr.msra.gmra.mxu1 %v11079_v56  ;;  %v8044_v34 = vor.u32 %v8911_v11, %v8041_v20  ;;  %v8105_v8 = vld [vmem:[#allocation11 + $0x1d8] sm:$0xf0]  ;;  %v11097_v20 = vsel %vm10531_vm5, %v12036_v1, 0 }
 0x492   : > { %v8236_v4 = vor.u32 %v8959_v10, %v8233_v30  ;;  %v8108_v38 = vor.u32 %v8927_v13, %v8105_v8  ;;  %v8957_v13 = vld [vmem:[#allocation11 + $0x2c4] sm:$0xf]  ;;  %v8225_v8 = vld [vmem:[#allocation11 + $0x2c8] sm:$0xf0] }
 0x493   : > { %v4738_v5 = vadd.f32 %v4737_v12, %v4689_v15  ;;  %v5424_v50 = vunpack.c.l.b16 %v5281_v25  ;;  %v5425_v26 = vunpack.c.h.b16 %v5281_v25  ;;  %5024 = vmatpush.bf16.msrb.mxu0 %v8044_v34 }
 0x494   : > { %5171 = vmatpush.bf16.msrb.mxu3 %v8236_v4  ;;  %5073 = vmatpush.bf16.msrb.mxu1 %v8108_v38  ;;  %v8033_v4 = vld [vmem:[#allocation11 + $0x148] sm:$0xf0] }
 0x495   : > { %v4739_v0 = vpop.f32.mrf.mxu2  ;;  %v4788_v37 = vpop.f32.mrf.mxu3  ;;  %v11082_v23 = vadd.f32 %v4786_v42, %v4738_v5  ;;  %v11084_v12 = vpack.c.b16 %v5424_v50, %v5422_v9  ;;  %v11086_v53 = vpack.c.b16 %v5425_v26, %v5423_v3  ;;  %v8941_v3 = vld [vmem:[#allocation11 + $0x244] sm:$0xf] }
 0x496   : > { %v4641_v15 = vpop.f32.mrf.mxu0  ;;  %v4690_v2 = vpop.f32.mrf.mxu1 }
 0x497   : > { %12034 = vst [vmem:[#allocation48_spill] sm:$0xff] %v11084_v12  ;;  %v4642_v25 = vadd.f32 %v4641_v15, %v11066_v22 }
 0x498   : > { %12035 = vst [vmem:[#allocation49_spill] sm:$0xff] %v11086_v53 }
 0x499   : > { %v4691_v27 = vadd.f32 %v4690_v2, %v4642_v25  ;;  %v8228_v2 = vor.u32 %v8957_v13, %v8225_v8 }
 0x49a   : > { %4937 = vmatmul.bf16.gmra.mxu2 %v10876_v19  ;;  %4986 = vmatmul.bf16.gmra.mxu3 %v10881_v51  ;;  %v12037_v19 = vld [vmem:[#allocation43_spill] sm:$0xff] }
 0x49b   : > { %v4740_v42 = vadd.f32 %v4739_v0, %v4691_v27  ;;  %v11103_v51 = vsel %vm10531_vm5, %v12037_v19, 0  ;;  %v8161_v0 = vld [vmem:[#allocation11 + $0x248] sm:$0xf0]  ;;  %v8925_v27 = vld [vmem:[#allocation11 + $0x1c4] sm:$0xf]  ;;  %5172 = vmatpush.bf16.msrb.mxu3 %v8228_v2 }
 0x49c   : > { %v8164_v34 = vor.u32 %v8941_v3, %v8161_v0  ;;  %v8907_v2 = vld [vmem:[#allocation11 + $0x134] sm:$0xf] }
 0x49d   : > { %v4742_v5 = vpop.f32.mrf.mxu2  ;;  %v4791_v59 = vpop.f32.mrf.mxu3  ;;  %v11091_v11 = vadd.f32 %v4788_v37, %v4740_v42  ;;  %v8909_v37 = vld [vmem:[#allocation11 + $0x144] sm:$0xf]  ;;  %v8097_v42 = vld [vmem:[#allocation11 + $0x1c8] sm:$0xf0] }
 0x49e   : > { %v4644_v9 = vpop.f32.mrf.mxu0  ;;  %v4693_v26 = vpop.f32.mrf.mxu1  ;;  %v8036_v25 = vor.u32 %v8909_v37, %v8033_v4  ;;  %5123 = vmatpush.bf16.msrb.mxu2 %v8164_v34  ;;  %v12038_v4 = vld [vmem:[#allocation46_spill] sm:$0xff] }
 0x49f   : > { %v4645_v50 = vadd.f32 %v4644_v9, %v11066_v22  ;;  %v11117_v13 = vsel %vm10531_vm5, %v12038_v4, 0 }
 0x4a0   : > { %5025 = vmatpush.bf16.msrb.mxu0 %v8036_v25  ;;  %v8153_v25 = vld [vmem:[#allocation11 + $0x238] sm:$0xf0] }
 0x4a1   : > { %v4694_v10 = vadd.f32 %v4693_v26, %v4645_v50  ;;  %4839 = vmatmul.bf16.gmra.mxu0 %v11097_v20  ;;  %4888 = vmatmul.bf16.gmra.mxu1 %v11103_v51  ;;  %v8100_v26 = vor.u32 %v8925_v27, %v8097_v42  ;;  %v8025_v42 = vld [vmem:[#allocation11 + $0x138] sm:$0xf0] }
 0x4a3   : > { %v4743_v30 = vadd.f32 %v4742_v5, %v4694_v10  ;;  %5074 = vmatpush.bf16.msrb.mxu1 %v8100_v26  ;;  %v8217_v26 = vld [vmem:[#allocation11 + $0x2b8] sm:$0xf0] }
 0x4a5   : > { %v4744_v15 = vpop.f32.mrf.mxu2  ;;  %v4793_v38 = vpop.f32.mrf.mxu3  ;;  %v11106_v9 = vadd.f32 %v4791_v59, %v4743_v30 }
 0x4a6   : > { %v4646_v50 = vpop.f32.mrf.mxu0  ;;  %v4695_v1 = vpop.f32.mrf.mxu1 }
 0x4a7   : > { %v4647_v5 = vadd.f32 %v4646_v50, %v11066_v22  ;;  %v8955_v50 = vld [vmem:[#allocation11 + $0x2b4] sm:$0xf] }
 0x4a9   : > { %v4696_v10 = vadd.f32 %v4695_v1, %v4647_v5 }
 0x4aa   : > { %4942 = vmatmul.bf16.gmra.mxu2 %v10904_v54  ;;  %4991 = vmatmul.bf16.gmra.mxu3 %v10909_v63  ;;  %v12039_v54 = vld [vmem:[#allocation47_spill] sm:$0xff] }
 0x4ab   : > { %v4745_v19 = vadd.f32 %v4744_v15, %v4696_v10  ;;  %v11123_v63 = vsel %vm10531_vm5, %v12039_v54, 0  ;;  %v8028_v10 = vor.u32 %v8907_v2, %v8025_v42 }
 0x4ad   : > { %v4747_v3 = vpop.f32.mrf.mxu2  ;;  %v4796_v0 = vpop.f32.mrf.mxu3  ;;  %v11111_v37 = vadd.f32 %v4793_v38, %v4745_v19  ;;  %v8939_v38 = vld [vmem:[#allocation11 + $0x234] sm:$0xf]  ;;  %v8220_v19 = vor.u32 %v8955_v50, %v8217_v26  ;;  %5026 = vmatpush.bf16.msrb.mxu0 %v8028_v10 }
 0x4ae   : > { %v4649_v59 = vpop.f32.mrf.mxu0  ;;  %v4698_v34 = vpop.f32.mrf.mxu1  ;;  %v8156_v27 = vor.u32 %v8939_v38, %v8153_v25  ;;  %v12040_v26 = vld [vmem:[#allocation50_spill] sm:$0xff] }
 0x4af   : > { %v4650_v30 = vadd.f32 %v4649_v59, %v11066_v22  ;;  %v8923_v59 = vld [vmem:[#allocation11 + $0x1b4] sm:$0xf]  ;;  %5173 = vmatpush.bf16.msrb.mxu3 %v8220_v19  ;;  %v11137_v10 = vsel %vm10531_vm5, %v12040_v26, 0  ;;  %v8081_v26 = vld [vmem:[#allocation11 + $0x1a8] sm:$0xf0] }
 0x4b0   : > { %5124 = vmatpush.bf16.msrb.mxu2 %v8156_v27 }
 0x4b1   : > { %v4699_v8 = vadd.f32 %v4698_v34, %v4650_v30  ;;  %4844 = vmatmul.bf16.gmra.mxu0 %v11117_v13  ;;  %4893 = vmatmul.bf16.gmra.mxu1 %v11123_v63  ;;  %v8089_v30 = vld [vmem:[#allocation11 + $0x1b8] sm:$0xf0] }
 0x4b2   : > { %v8092_v54 = vor.u32 %v8923_v59, %v8089_v30  ;;  %v8145_v59 = vld [vmem:[#allocation11 + $0x228] sm:$0xf0]  ;;  %v8905_v30 = vld [vmem:[#allocation11 + $0x124] sm:$0xf] }
 0x4b3   : > { %v4748_v15 = vadd.f32 %v4747_v3, %v4699_v8 }
 0x4b4   : > { %5075 = vmatpush.bf16.msrb.mxu1 %v8092_v54  ;;  %v8017_v54 = vld [vmem:[#allocation11 + $0x128] sm:$0xf0] }
 0x4b5   : > { %v4749_v5 = vpop.f32.mrf.mxu2  ;;  %v4798_v1 = vpop.f32.mrf.mxu3  ;;  %v11126_v34 = vadd.f32 %v4796_v0, %v4748_v15 }
 0x4b6   : > { %v4651_v4 = vpop.f32.mrf.mxu0  ;;  %v4700_v8 = vpop.f32.mrf.mxu1 }
 0x4b7   : > { %v4652_v3 = vadd.f32 %v4651_v4, %v11066_v22 }
 0x4b9   : > { %v4701_v38 = vadd.f32 %v4700_v8, %v4652_v3  ;;  %v8953_v3 = vld [vmem:[#allocation11 + $0x2a4] sm:$0xf]  ;;  %v8209_v8 = vld [vmem:[#allocation11 + $0x2a8] sm:$0xf0] }
 0x4ba   : > { %4947 = vmatmul.bf16.gmra.mxu2 %v10932_v6  ;;  %4996 = vmatmul.bf16.gmra.mxu3 %v10937_v48  ;;  %v12041_v6 = vld [vmem:[#allocation51_spill] sm:$0xff] }
 0x4bb   : > { %v4750_v25 = vadd.f32 %v4749_v5, %v4701_v38  ;;  %v11143_v48 = vsel %vm10531_vm5, %v12041_v6, 0 }
 0x4bd   : > { %v4752_v2 = vpop.f32.mrf.mxu2  ;;  %v4801_v42 = vpop.f32.mrf.mxu3  ;;  %v11131_v50 = vadd.f32 %v4798_v1, %v4750_v25  ;;  %v8937_v1 = vld [vmem:[#allocation11 + $0x224] sm:$0xf] }
 0x4be   : > { %v4654_v0 = vpop.f32.mrf.mxu0  ;;  %v4703_v27 = vpop.f32.mrf.mxu1  ;;  %v8148_v4 = vor.u32 %v8937_v1, %v8145_v59 }
 0x4bf   : > { %v4655_v15 = vadd.f32 %v4654_v0, %v11066_v22  ;;  %v8020_v0 = vor.u32 %v8905_v30, %v8017_v54 }
 0x4c0   : > { %5125 = vmatpush.bf16.msrb.mxu2 %v8148_v4 }
 0x4c1   : > { %v4704_v19 = vadd.f32 %v4703_v27, %v4655_v15  ;;  %4849 = vmatmul.bf16.gmra.mxu0 %v11137_v10  ;;  %4898 = vmatmul.bf16.gmra.mxu1 %v11143_v48  ;;  %v8212_v15 = vor.u32 %v8953_v3, %v8209_v8  ;;  %v8921_v27 = vld [vmem:[#allocation11 + $0x1a4] sm:$0xf]  ;;  %v12042_v8 = vld [vmem:[#allocation54_spill] sm:$0xff] }
 0x4c2   : > { %v8084_v12 = vor.u32 %v8921_v27, %v8081_v26  ;;  %5027 = vmatpush.bf16.msrb.mxu0 %v8020_v0  ;;  %v11157_v0 = vsel %vm10531_vm5, %v12042_v8, 0  ;;  %v8903_v27 = vld [vmem:[#allocation11 + $0x114] sm:$0xf]  ;;  %v8073_v8 = vld [vmem:[#allocation11 + $0x198] sm:$0xf0] }
 0x4c3   : > { %v4753_v5 = vadd.f32 %v4752_v2, %v4704_v19  ;;  %5174 = vmatpush.bf16.msrb.mxu3 %v8212_v15  ;;  %v8137_v15 = vld [vmem:[#allocation11 + $0x218] sm:$0xf0] }
 0x4c4   : > { %5076 = vmatpush.bf16.msrb.mxu1 %v8084_v12 }
 0x4c5   : > { %v4754_v38 = vpop.f32.mrf.mxu2  ;;  %v4803_v25 = vpop.f32.mrf.mxu3  ;;  %v11146_v53 = vadd.f32 %v4801_v42, %v4753_v5 }
 0x4c6   : > { %v4656_v6 = vpop.f32.mrf.mxu0  ;;  %v4705_v19 = vpop.f32.mrf.mxu1 }
 0x4c7   : > { %v4657_v2 = vadd.f32 %v4656_v6, %v11066_v22  ;;  %v8009_v6 = vld [vmem:[#allocation11 + $0x118] sm:$0xf0] }
 0x4c9   : > { %v4706_v1 = vadd.f32 %v4705_v19, %v4657_v2  ;;  %v8951_v2 = vld [vmem:[#allocation11 + $0x294] sm:$0xf]  ;;  %v8201_v19 = vld [vmem:[#allocation11 + $0x298] sm:$0xf0] }
 0x4ca   : > { %4952 = vmatmul.bf16.gmra.mxu2 %v10960_v52  ;;  %5001 = vmatmul.bf16.gmra.mxu3 %v10965_v7  ;;  %v12043_v52 = vld [vmem:[#allocation55_spill] sm:$0xff] }
 0x4cb   : > { %v4755_v59 = vadd.f32 %v4754_v38, %v4706_v1  ;;  %v11163_v7 = vsel %vm10531_vm5, %v12043_v52, 0 }
 0x4cd   : > { %v4757_v30 = vpop.f32.mrf.mxu2  ;;  %v4806_v54 = vpop.f32.mrf.mxu3  ;;  %v11151_v3 = vadd.f32 %v4803_v25, %v4755_v59  ;;  %v8935_v25 = vld [vmem:[#allocation11 + $0x214] sm:$0xf] }
 0x4ce   : > { %v4659_v42 = vpop.f32.mrf.mxu0  ;;  %v4708_v4 = vpop.f32.mrf.mxu1  ;;  %v8140_v26 = vor.u32 %v8935_v25, %v8137_v15 }
 0x4cf   : > { %v4660_v5 = vadd.f32 %v4659_v42, %v11066_v22  ;;  %v8012_v42 = vor.u32 %v8903_v27, %v8009_v6 }
 0x4d0   : > { %5126 = vmatpush.bf16.msrb.mxu2 %v8140_v26 }
 0x4d1   : > { %v4709_v12 = vadd.f32 %v4708_v4, %v4660_v5  ;;  %4854 = vmatmul.bf16.gmra.mxu0 %v11157_v0  ;;  %4903 = vmatmul.bf16.gmra.mxu1 %v11163_v7  ;;  %v8204_v5 = vor.u32 %v8951_v2, %v8201_v19  ;;  %v8919_v4 = vld [vmem:[#allocation11 + $0x194] sm:$0xf] }
 0x4d2   : > { %v8076_v58 = vor.u32 %v8919_v4, %v8073_v8  ;;  %5028 = vmatpush.bf16.msrb.mxu0 %v8012_v42  ;;  %v12044_v19 = vld [vmem:[#allocation58_spill] sm:$0xff]  ;;  %v8901_v4 = vld [vmem:[#allocation11 + $0x104] sm:$0xf] }
 0x4d3   : > { %v4758_v38 = vadd.f32 %v4757_v30, %v4709_v12  ;;  %5175 = vmatpush.bf16.msrb.mxu3 %v8204_v5  ;;  %v11177_v42 = vsel %vm10531_vm5, %v12044_v19, 0  ;;  %v8129_v5 = vld [vmem:[#allocation11 + $0x208] sm:$0xf0] }
 0x4d4   : > { %5077 = vmatpush.bf16.msrb.mxu1 %v8076_v58  ;;  %v8065_v19 = vld [vmem:[#allocation11 + $0x188] sm:$0xf0] }
 0x4d5   : > { %v4759_v1 = vpop.f32.mrf.mxu2  ;;  %v4808_v59 = vpop.f32.mrf.mxu3  ;;  %v11166_v40 = vadd.f32 %v4806_v54, %v4758_v38 }
 0x4d6   : > { %v4661_v52 = vpop.f32.mrf.mxu0  ;;  %v4710_v12 = vpop.f32.mrf.mxu1 }
 0x4d7   : > { %v4662_v30 = vadd.f32 %v4661_v52, %v11066_v22  ;;  %v8001_v52 = vld [vmem:[#allocation11 + $0x108] sm:$0xf0] }
 0x4d9   : > { %v4711_v25 = vadd.f32 %v4710_v12, %v4662_v30  ;;  %v8949_v30 = vld [vmem:[#allocation11 + $0x284] sm:$0xf]  ;;  %v8193_v12 = vld [vmem:[#allocation11 + $0x288] sm:$0xf0] }
 0x4da   : > { %4957 = vmatmul.bf16.gmra.mxu2 %v10988_v41  ;;  %5006 = vmatmul.bf16.gmra.mxu3 %v10993_v55  ;;  %v12045_v41 = vld [vmem:[#allocation59_spill] sm:$0xff] }
 0x4db   : > { %v4760_v15 = vadd.f32 %v4759_v1, %v4711_v25  ;;  %v11183_v55 = vsel %vm10531_vm5, %v12045_v41, 0 }
 0x4dd   : > { %v4762_v27 = vpop.f32.mrf.mxu2  ;;  %v4811_v6 = vpop.f32.mrf.mxu3  ;;  %v11171_v2 = vadd.f32 %v4808_v59, %v4760_v15  ;;  %v8933_v59 = vld [vmem:[#allocation11 + $0x204] sm:$0xf] }
 0x4de   : > { %v4664_v54 = vpop.f32.mrf.mxu0  ;;  %v4713_v26 = vpop.f32.mrf.mxu1  ;;  %v8132_v8 = vor.u32 %v8933_v59, %v8129_v5 }
 0x4df   : > { %v4665_v38 = vadd.f32 %v4664_v54, %v11066_v22  ;;  %v8004_v54 = vor.u32 %v8901_v4, %v8001_v52 }
 0x4e0   : > { %5127 = vmatpush.bf16.msrb.mxu2 %v8132_v8 }
 0x4e1   : > { %v4714_v58 = vadd.f32 %v4713_v26, %v4665_v38  ;;  %4859 = vmatmul.bf16.gmra.mxu0 %v11177_v42  ;;  %4908 = vmatmul.bf16.gmra.mxu1 %v11183_v55  ;;  %v8196_v38 = vor.u32 %v8949_v30, %v8193_v12  ;;  %v8917_v26 = vld [vmem:[#allocation11 + $0x184] sm:$0xf]  ;;  %v12046_v12 = vld [vmem:[#allocation62_spill] sm:$0xff] }
 0x4e2   : > { %v8068_v61 = vor.u32 %v8917_v26, %v8065_v19  ;;  %5029 = vmatpush.bf16.msrb.mxu0 %v8004_v54  ;;  %v11197_v54 = vsel %vm10531_vm5, %v12046_v12, 0  ;;  %v8311_v26 = vld [vmem:[#allocation13 + $0x70] sm:$0xf]  ;;  %v8996_v12 = vld [vmem:[#allocation13 + $0xf4] sm:$0xf0] }
 0x4e3   : > { %v4763_v1 = vadd.f32 %v4762_v27, %v4714_v58  ;;  %5176 = vmatpush.bf16.msrb.mxu3 %v8196_v38  ;;  %v9012_v38 = vld [vmem:[#allocation13 + $0x174] sm:$0xf0] }
 0x4e4   : > { %5078 = vmatpush.bf16.msrb.mxu1 %v8068_v61 }
 0x4e5   : > { %v4764_v25 = vpop.f32.mrf.mxu2  ;;  %v4813_v15 = vpop.f32.mrf.mxu3  ;;  %v11186_v36 = vadd.f32 %v4811_v6, %v4763_v1 }
 0x4e6   : > { %v4666_v41 = vpop.f32.mrf.mxu0  ;;  %v4715_v58 = vpop.f32.mrf.mxu1 }
 0x4e7   : > { %v4667_v27 = vadd.f32 %v4666_v41, %v11066_v22  ;;  %v8980_v41 = vld [vmem:[#allocation13 + $0x74] sm:$0xf0] }
 0x4e9   : > { %v4716_v59 = vadd.f32 %v4715_v58, %v4667_v27  ;;  %v8503_v27 = vld [vmem:[#allocation13 + $0x1f0] sm:$0xf]  ;;  %v9028_v58 = vld [vmem:[#allocation13 + $0x1f4] sm:$0xf0] }
 0x4ea   : > { %4962 = vmatmul.bf16.gmra.mxu2 %v11016_v44  ;;  %5011 = vmatmul.bf16.gmra.mxu3 %v11021_v14  ;;  %v12047_v44 = vld [vmem:[#allocation63_spill] sm:$0xff] }
 0x4eb   : > { %v4765_v5 = vadd.f32 %v4764_v25, %v4716_v59  ;;  %v11203_v14 = vsel %vm10531_vm5, %v12047_v44, 0 }
 0x4ed   : > { %v4767_v4 = vpop.f32.mrf.mxu2  ;;  %v4816_v52 = vpop.f32.mrf.mxu3  ;;  %v11191_v30 = vadd.f32 %v4813_v15, %v4765_v5  ;;  %v8439_v15 = vld [vmem:[#allocation13 + $0x170] sm:$0xf] }
 0x4ee   : > { %v4669_v6 = vpop.f32.mrf.mxu0  ;;  %v4718_v8 = vpop.f32.mrf.mxu1  ;;  %v8440_v19 = vor.u32 %v9012_v38, %v8439_v15 }
 0x4ef   : > { %v4670_v1 = vadd.f32 %v4669_v6, %v11066_v22  ;;  %v8312_v6 = vor.u32 %v8980_v41, %v8311_v26 }
 0x4f0   : > { %6218 = vmatpush.bf16.msra.mxu2 %v8440_v19 }
 0x4f1   : > { %v4719_v61 = vadd.f32 %v4718_v8, %v4670_v1  ;;  %4864 = vmatmul.bf16.gmra.mxu0 %v11197_v54  ;;  %4913 = vmatmul.bf16.gmra.mxu1 %v11203_v14  ;;  %v8504_v1 = vor.u32 %v9028_v58, %v8503_v27  ;;  %v8375_v8 = vld [vmem:[#allocation13 + $0xf0] sm:$0xf] }
 0x4f2   : > { %v8376_v49 = vor.u32 %v8996_v12, %v8375_v8  ;;  %6120 = vmatpush.bf16.msra.mxu0 %v8312_v6  ;;  %v12048_v58 = vld [vmem:[#allocation66_spill] sm:$0xff]  ;;  %v8303_v8 = vld [vmem:[#allocation13 + $0x60] sm:$0xf] }
 0x4f3   : > { %v4768_v25 = vadd.f32 %v4767_v4, %v4719_v61  ;;  %6267 = vmatpush.bf16.msra.mxu3 %v8504_v1  ;;  %v11217_v6 = vsel %vm10531_vm5, %v12048_v58, 0  ;;  %v9010_v1 = vld [vmem:[#allocation13 + $0x164] sm:$0xf0] }
 0x4f4   : > { %6169 = vmatpush.bf16.msra.mxu1 %v8376_v49  ;;  %12049 = vst [vmem:[#allocation52_spill] sm:$0xff] %v11217_v6  ;;  %v8994_v58 = vld [vmem:[#allocation13 + $0xe4] sm:$0xf0] }
 0x4f5   : > { %v4769_v59 = vpop.f32.mrf.mxu2  ;;  %v4818_v5 = vpop.f32.mrf.mxu3  ;;  %v11206_v62 = vadd.f32 %v4816_v52, %v4768_v25 }
 0x4f6   : > { %v4671_v44 = vpop.f32.mrf.mxu0  ;;  %v4720_v61 = vpop.f32.mrf.mxu1 }
 0x4f7   : > { %v4672_v4 = vadd.f32 %v4671_v44, %v11066_v22  ;;  %v8978_v44 = vld [vmem:[#allocation13 + $0x64] sm:$0xf0] }
 0x4f9   : > { %v4721_v15 = vadd.f32 %v4720_v61, %v4672_v4  ;;  %v8495_v4 = vld [vmem:[#allocation13 + $0x1e0] sm:$0xf]  ;;  %v9026_v61 = vld [vmem:[#allocation13 + $0x1e4] sm:$0xf0] }
 0x4fa   : > { %4967 = vmatmul.bf16.gmra.mxu2 %v11044_v28  ;;  %5016 = vmatmul.bf16.gmra.mxu3 %v11049_v32  ;;  %v12050_v28 = vld [vmem:[#allocation67_spill] sm:$0xff] }
 0x4fb   : > { %v4770_v38 = vadd.f32 %v4769_v59, %v4721_v15  ;;  %v11223_v32 = vsel %vm10531_vm5, %v12050_v28, 0 }
 0x4fd   : > { %v4772_v26 = vpop.f32.mrf.mxu2  ;;  %v4821_v41 = vpop.f32.mrf.mxu3  ;;  %v11211_v27 = vadd.f32 %v4818_v5, %v4770_v38  ;;  %v8431_v5 = vld [vmem:[#allocation13 + $0x160] sm:$0xf] }
 0x4fe   : > { %v4674_v52 = vpop.f32.mrf.mxu0  ;;  %v4723_v19 = vpop.f32.mrf.mxu1  ;;  %v8432_v12 = vor.u32 %v9010_v1, %v8431_v5  ;;  %v11232_v1 = vperm.slane %v11061_v17, 1  ;;  %v8423_v17 = vld [vmem:[#allocation13 + $0x150] sm:$0xf] }
 0x4ff   : > { %v4675_v25 = vadd.f32 %v4674_v52, %v11066_v22  ;;  %v8304_v52 = vor.u32 %v8978_v44, %v8303_v8 }
 0x500   : > { %6219 = vmatpush.bf16.msra.mxu2 %v8432_v12 }
 0x501   : > { %v4724_v49 = vadd.f32 %v4723_v19, %v4675_v25  ;;  %4869 = vmatmul.bf16.gmra.mxu0 %v11217_v6  ;;  %4918 = vmatmul.bf16.gmra.mxu1 %v11223_v32  ;;  %v8496_v25 = vor.u32 %v9026_v61, %v8495_v4  ;;  %v8367_v19 = vld [vmem:[#allocation13 + $0xe0] sm:$0xf] }
 0x502   : > { %v8368_v28 = vor.u32 %v8994_v58, %v8367_v19  ;;  %6121 = vmatpush.bf16.msra.mxu0 %v8304_v52  ;;  %v8487_v19 = vld [vmem:[#allocation13 + $0x1d0] sm:$0xf] }
 0x503   : > { %v4773_v59 = vadd.f32 %v4772_v26, %v4724_v49  ;;  %6268 = vmatpush.bf16.msra.mxu3 %v8496_v25 }
 0x504   : > { %6170 = vmatpush.bf16.msra.mxu1 %v8368_v28 }
 0x505   : > { %v4774_v15 = vpop.f32.mrf.mxu2  ;;  %v4823_v38 = vpop.f32.mrf.mxu3  ;;  %v11226_v6 = vadd.f32 %v4821_v41, %v4773_v59 }
 0x506   : > { %v4676_v60 = vpop.f32.mrf.mxu0  ;;  %v4725_v49 = vpop.f32.mrf.mxu1 }
 0x507   : > { %v4677_v26 = vadd.f32 %v4676_v60, %v11066_v22 }
 0x509   : > { %v4726_v5 = vadd.f32 %v4725_v49, %v4677_v26  ;;  %v9024_v26 = vld [vmem:[#allocation13 + $0x1d4] sm:$0xf0] }
 0x50a   : > { %5128 = vmatmul.bf16.vlgmr.msrb.gmra.mxu2 %v11073_v29  ;;  %5177 = vmatmul.bf16.vlgmr.msrb.gmra.mxu3 %v11079_v56  ;;  %v9008_v29 = vld [vmem:[#allocation13 + $0x154] sm:$0xf0] }
 0x50b   : > { %v4775_v8 = vadd.f32 %v4774_v15, %v4726_v5  ;;  %v8424_v56 = vor.u32 %v9008_v29, %v8423_v17  ;;  %v8295_v15 = vld [vmem:[#allocation13 + $0x50] sm:$0xf]  ;;  %v8992_v49 = vld [vmem:[#allocation13 + $0xd4] sm:$0xf0] }
 0x50d   : > { %v4933_v41 = vpop.f32.mrf.mxu2  ;;  %v4982_v59 = vpop.f32.mrf.mxu3  ;;  %v11234_v44 = vadd.f32 %v4823_v38, %v4775_v8  ;;  %v8976_v38 = vld [vmem:[#allocation13 + $0x54] sm:$0xf0]  ;;  %6220 = vmatpush.bf16.msra.mxu2 %v8424_v56 }
 0x50e   : > { %v4934_v12 = vadd.f32 %v4933_v41, %v11232_v1  ;;  %v4835_v22 = vpop.f32.mrf.mxu0  ;;  %v4884_v61 = vpop.f32.mrf.mxu1  ;;  %v8296_v28 = vor.u32 %v8976_v38, %v8295_v15  ;;  %v8488_v41 = vor.u32 %v9024_v26, %v8487_v19  ;;  %v8415_v19 = vld [vmem:[#allocation13 + $0x140] sm:$0xf] }
 0x50f   : > { %v4836_v4 = vadd.f32 %v4835_v22, %v11082_v23  ;;  %v8359_v23 = vld [vmem:[#allocation13 + $0xd0] sm:$0xf] }
 0x510   : > { %v11238_v52 = vadd.f32 %v4982_v59, %v4934_v12  ;;  %6122 = vmatpush.bf16.msra.mxu0 %v8296_v28  ;;  %6269 = vmatpush.bf16.msra.mxu3 %v8488_v41  ;;  %v8479_v28 = vld [vmem:[#allocation13 + $0x1c0] sm:$0xf] }
 0x511   : > { %v11240_v25 = vadd.f32 %v4884_v61, %v4836_v4  ;;  %5030 = vmatmul.bf16.vlgmr.msrb.gmra.mxu0 %v11969_v33  ;;  %5079 = vmatmul.bf16.vlgmr.msrb.gmra.mxu1 %v11971_v18  ;;  %v8360_v33 = vor.u32 %v8992_v49, %v8359_v23 }
 0x513   : > { %6171 = vmatpush.bf16.msra.mxu1 %v8360_v33 }
 0x515   : > { %v4935_v58 = vpop.f32.mrf.mxu2  ;;  %v4984_v60 = vpop.f32.mrf.mxu3 }
 0x516   : > { %v4936_v5 = vadd.f32 %v4935_v58, %v11232_v1  ;;  %v4837_v8 = vpop.f32.mrf.mxu0  ;;  %v4886_v59 = vpop.f32.mrf.mxu1 }
 0x517   : > { %v4838_v18 = vadd.f32 %v4837_v8, %v11091_v11  ;;  %v8990_v8 = vld [vmem:[#allocation13 + $0xc4] sm:$0xf0] }
 0x518   : > { %v11246_v12 = vadd.f32 %v4984_v60, %v4936_v5  ;;  %v8974_v60 = vld [vmem:[#allocation13 + $0x44] sm:$0xf0] }
 0x519   : > { %v11248_v22 = vadd.f32 %v4886_v59, %v4838_v18  ;;  %v9022_v5 = vld [vmem:[#allocation13 + $0x1c4] sm:$0xf0] }
 0x51a   : > { %5133 = vmatmul.bf16.gmra.mxu2 %v11097_v20  ;;  %5182 = vmatmul.bf16.gmra.mxu3 %v11103_v51  ;;  %v9006_v20 = vld [vmem:[#allocation13 + $0x144] sm:$0xf0]  ;;  %v8287_v51 = vld [vmem:[#allocation13 + $0x40] sm:$0xf]  ;;  %v8480_v18 = vor.u32 %v9022_v5, %v8479_v28  ;;  %v8972_v28 = vld [vmem:[#allocation13 + $0x34] sm:$0xf0] }
 0x51b   : > { %v8416_v58 = vor.u32 %v9006_v20, %v8415_v19  ;;  %v8288_v49 = vor.u32 %v8974_v60, %v8287_v51  ;;  %v8407_v51 = vld [vmem:[#allocation13 + $0x130] sm:$0xf] }
 0x51c   : > { %6270 = vmatpush.bf16.msra.mxu3 %v8480_v18 }
 0x51d   : > { %v4938_v4 = vpop.f32.mrf.mxu2  ;;  %v4987_v61 = vpop.f32.mrf.mxu3  ;;  %6221 = vmatpush.bf16.msra.mxu2 %v8416_v58  ;;  %6123 = vmatpush.bf16.msra.mxu0 %v8288_v49 }
 0x51e   : > { %v4939_v17 = vadd.f32 %v4938_v4, %v11232_v1  ;;  %v4840_v29 = vpop.f32.mrf.mxu0  ;;  %v4889_v11 = vpop.f32.mrf.mxu1 }
 0x51f   : > { %v4841_v56 = vadd.f32 %v4840_v29, %v11106_v9  ;;  %v8351_v9 = vld [vmem:[#allocation13 + $0xc0] sm:$0xf] }
 0x520   : > { %v11254_v15 = vadd.f32 %v4987_v61, %v4939_v17 }
 0x521   : > { %v11256_v38 = vadd.f32 %v4889_v11, %v4841_v56  ;;  %5035 = vmatmul.bf16.gmra.mxu0 %v11976_v47  ;;  %5084 = vmatmul.bf16.gmra.mxu1 %v11978_v39  ;;  %v8352_v47 = vor.u32 %v8990_v8, %v8351_v9  ;;  %v9020_v9 = vld [vmem:[#allocation13 + $0x1b4] sm:$0xf0] }
 0x522   : > { %v8988_v8 = vld [vmem:[#allocation13 + $0xb4] sm:$0xf0] }
 0x523   : > { %6172 = vmatpush.bf16.msra.mxu1 %v8352_v47 }
 0x525   : > { %v4940_v26 = vpop.f32.mrf.mxu2  ;;  %v4989_v23 = vpop.f32.mrf.mxu3 }
 0x526   : > { %v4941_v41 = vadd.f32 %v4940_v26, %v11232_v1  ;;  %v4842_v33 = vpop.f32.mrf.mxu0  ;;  %v4891_v59 = vpop.f32.mrf.mxu1  ;;  %v8471_v26 = vld [vmem:[#allocation13 + $0x1b0] sm:$0xf] }
 0x527   : > { %v4843_v39 = vadd.f32 %v4842_v33, %v11111_v37  ;;  %v8472_v18 = vor.u32 %v9020_v9, %v8471_v26  ;;  %v8986_v9 = vld [vmem:[#allocation13 + $0xa4] sm:$0xf0] }
 0x528   : > { %v11262_v4 = vadd.f32 %v4989_v23, %v4941_v41 }
 0x529   : > { %v11264_v61 = vadd.f32 %v4891_v59, %v4843_v39  ;;  %6271 = vmatpush.bf16.msra.mxu3 %v8472_v18 }
 0x52a   : > { %5138 = vmatmul.bf16.gmra.mxu2 %v11117_v13  ;;  %5187 = vmatmul.bf16.gmra.mxu3 %v11123_v63  ;;  %v9004_v13 = vld [vmem:[#allocation13 + $0x134] sm:$0xf0]  ;;  %v8279_v63 = vld [vmem:[#allocation13 + $0x30] sm:$0xf] }
 0x52b   : > { %v8408_v60 = vor.u32 %v9004_v13, %v8407_v51  ;;  %v8280_v5 = vor.u32 %v8972_v28, %v8279_v63  ;;  %v8399_v13 = vld [vmem:[#allocation13 + $0x120] sm:$0xf]  ;;  %v8970_v63 = vld [vmem:[#allocation13 + $0x24] sm:$0xf0] }
 0x52c   : > { %v8463_v28 = vld [vmem:[#allocation13 + $0x1a0] sm:$0xf] }
 0x52d   : > { %v4943_v17 = vpop.f32.mrf.mxu2  ;;  %v4992_v29 = vpop.f32.mrf.mxu3  ;;  %6222 = vmatpush.bf16.msra.mxu2 %v8408_v60  ;;  %6124 = vmatpush.bf16.msra.mxu0 %v8280_v5  ;;  %v9018_v5 = vld [vmem:[#allocation13 + $0x1a4] sm:$0xf0] }
 0x52e   : > { %v4944_v56 = vadd.f32 %v4943_v17, %v11232_v1  ;;  %v4845_v11 = vpop.f32.mrf.mxu0  ;;  %v4894_v37 = vpop.f32.mrf.mxu1 }
 0x52f   : > { %v4846_v19 = vadd.f32 %v4845_v11, %v11126_v34  ;;  %v8343_v34 = vld [vmem:[#allocation13 + $0xb0] sm:$0xf] }
 0x530   : > { %v11270_v20 = vadd.f32 %v4992_v29, %v4944_v56 }
 0x531   : > { %v11272_v58 = vadd.f32 %v4894_v37, %v4846_v19  ;;  %5040 = vmatmul.bf16.gmra.mxu0 %v11984_v57  ;;  %5089 = vmatmul.bf16.gmra.mxu1 %v11986_v24  ;;  %v8344_v57 = vor.u32 %v8988_v8, %v8343_v34 }
 0x533   : > { %6173 = vmatpush.bf16.msra.mxu1 %v8344_v57 }
 0x535   : > { %v4945_v23 = vpop.f32.mrf.mxu2  ;;  %v4994_v49 = vpop.f32.mrf.mxu3 }
 0x536   : > { %v4946_v41 = vadd.f32 %v4945_v23, %v11232_v1  ;;  %v4847_v33 = vpop.f32.mrf.mxu0  ;;  %v4896_v47 = vpop.f32.mrf.mxu1 }
 0x537   : > { %v4848_v24 = vadd.f32 %v4847_v33, %v11131_v50 }
 0x538   : > { %v11278_v39 = vadd.f32 %v4994_v49, %v4946_v41  ;;  %v8464_v41 = vor.u32 %v9018_v5, %v8463_v28 }
 0x539   : > { %v11280_v59 = vadd.f32 %v4896_v47, %v4848_v24 }
 0x53a   : > { %5143 = vmatmul.bf16.gmra.mxu2 %v11137_v10  ;;  %5192 = vmatmul.bf16.gmra.mxu3 %v11143_v48  ;;  %v9002_v10 = vld [vmem:[#allocation13 + $0x124] sm:$0xf0]  ;;  %v8271_v48 = vld [vmem:[#allocation13 + $0x20] sm:$0xf] }
 0x53b   : > { %v8400_v60 = vor.u32 %v9002_v10, %v8399_v13  ;;  %v8272_v49 = vor.u32 %v8970_v63, %v8271_v48  ;;  %6272 = vmatpush.bf16.msra.mxu3 %v8464_v41  ;;  %v8968_v10 = vld [vmem:[#allocation13 + $0x14] sm:$0xf0] }
 0x53d   : > { %v4948_v17 = vpop.f32.mrf.mxu2  ;;  %v4997_v29 = vpop.f32.mrf.mxu3  ;;  %6223 = vmatpush.bf16.msra.mxu2 %v8400_v60  ;;  %6125 = vmatpush.bf16.msra.mxu0 %v8272_v49  ;;  %v8455_v60 = vld [vmem:[#allocation13 + $0x190] sm:$0xf] }
 0x53e   : > { %v4949_v56 = vadd.f32 %v4948_v17, %v11232_v1  ;;  %v4850_v11 = vpop.f32.mrf.mxu0  ;;  %v4899_v50 = vpop.f32.mrf.mxu1 }
 0x53f   : > { %v4851_v19 = vadd.f32 %v4850_v11, %v11146_v53  ;;  %v8335_v53 = vld [vmem:[#allocation13 + $0xa0] sm:$0xf] }
 0x540   : > { %v11286_v37 = vadd.f32 %v4997_v29, %v4949_v56 }
 0x541   : > { %v11288_v51 = vadd.f32 %v4899_v50, %v4851_v19  ;;  %5045 = vmatmul.bf16.gmra.mxu0 %v11992_v21  ;;  %5094 = vmatmul.bf16.gmra.mxu1 %v11994_v46  ;;  %v8336_v21 = vor.u32 %v8986_v9, %v8335_v53  ;;  %v8391_v50 = vld [vmem:[#allocation13 + $0x110] sm:$0xf] }
 0x543   : > { %6174 = vmatpush.bf16.msra.mxu1 %v8336_v21 }
 0x545   : > { %v4950_v26 = vpop.f32.mrf.mxu2  ;;  %v4999_v23 = vpop.f32.mrf.mxu3 }
 0x546   : > { %v4951_v34 = vadd.f32 %v4950_v26, %v11232_v1  ;;  %v4852_v8 = vpop.f32.mrf.mxu0  ;;  %v4901_v33 = vpop.f32.mrf.mxu1  ;;  %v9016_v26 = vld [vmem:[#allocation13 + $0x194] sm:$0xf0] }
 0x547   : > { %v4853_v46 = vadd.f32 %v4852_v8, %v11151_v3  ;;  %v8456_v53 = vor.u32 %v9016_v26, %v8455_v60  ;;  %v8982_v60 = vld [vmem:[#allocation13 + $0x84] sm:$0xf0] }
 0x548   : > { %v11294_v18 = vadd.f32 %v4999_v23, %v4951_v34  ;;  %v8984_v23 = vld [vmem:[#allocation13 + $0x94] sm:$0xf0] }
 0x549   : > { %v11296_v57 = vadd.f32 %v4901_v33, %v4853_v46  ;;  %6273 = vmatpush.bf16.msra.mxu3 %v8456_v53 }
 0x54a   : > { %5148 = vmatmul.bf16.gmra.mxu2 %v11157_v0  ;;  %5197 = vmatmul.bf16.gmra.mxu3 %v11163_v7  ;;  %v9000_v0 = vld [vmem:[#allocation13 + $0x114] sm:$0xf0]  ;;  %v8263_v7 = vld [vmem:[#allocation13 + $0x10] sm:$0xf] }
 0x54b   : > { %v8392_v13 = vor.u32 %v9000_v0, %v8391_v50  ;;  %v8264_v28 = vor.u32 %v8968_v10, %v8263_v7  ;;  %v8447_v50 = vld [vmem:[#allocation13 + $0x180] sm:$0xf]  ;;  %v9014_v10 = vld [vmem:[#allocation13 + $0x184] sm:$0xf0] }
 0x54d   : > { %v4953_v24 = vpop.f32.mrf.mxu2  ;;  %v5002_v47 = vpop.f32.mrf.mxu3  ;;  %6224 = vmatpush.bf16.msra.mxu2 %v8392_v13  ;;  %6126 = vmatpush.bf16.msra.mxu0 %v8264_v28  ;;  %v8448_v28 = vor.u32 %v9014_v10, %v8447_v50  ;;  %v9044_v50 = vld [vmem:[#allocation13 + $0x274] sm:$0xf0] }
 0x54e   : > { %v4954_v17 = vadd.f32 %v4953_v24, %v11232_v1  ;;  %v4855_v29 = vpop.f32.mrf.mxu0  ;;  %v4904_v3 = vpop.f32.mrf.mxu1 }
 0x54f   : > { %v4856_v56 = vadd.f32 %v4855_v29, %v11166_v40  ;;  %v8327_v40 = vld [vmem:[#allocation13 + $0x90] sm:$0xf]  ;;  %v8383_v29 = vld [vmem:[#allocation13 + $0x100] sm:$0xf]  ;;  %6274 = vmatpush.bf16.msra.mxu3 %v8448_v28 }
 0x550   : > { %v11302_v11 = vadd.f32 %v5002_v47, %v4954_v17 }
 0x551   : > { %v11304_v19 = vadd.f32 %v4904_v3, %v4856_v56  ;;  %5050 = vmatmul.bf16.gmra.mxu0 %v12000_v45  ;;  %5099 = vmatmul.bf16.gmra.mxu1 %v12002_v35  ;;  %v8328_v45 = vor.u32 %v8984_v23, %v8327_v40  ;;  %v8966_v3 = vld [vmem:[#allocation13 + $0x4] sm:$0xf0] }
 0x553   : > { %6175 = vmatpush.bf16.msra.mxu1 %v8328_v45 }
 0x555   : > { %v4955_v48 = vpop.f32.mrf.mxu2  ;;  %v5004_v63 = vpop.f32.mrf.mxu3 }
 0x556   : > { %v4956_v49 = vadd.f32 %v4955_v48, %v11232_v1  ;;  %v4857_v5 = vpop.f32.mrf.mxu0  ;;  %v4906_v9 = vpop.f32.mrf.mxu1 }
 0x557   : > { %v4858_v35 = vadd.f32 %v4857_v5, %v11171_v2 }
 0x558   : > { %v11310_v34 = vadd.f32 %v5004_v63, %v4956_v49 }
 0x559   : > { %v11312_v8 = vadd.f32 %v4906_v9, %v4858_v35 }
 0x55a   : > { %5153 = vmatmul.bf16.gmra.mxu2 %v11177_v42  ;;  %5202 = vmatmul.bf16.gmra.mxu3 %v11183_v55  ;;  %v8998_v42 = vld [vmem:[#allocation13 + $0x104] sm:$0xf0]  ;;  %v8255_v55 = vld [vmem:[#allocation13] sm:$0xf] }
 0x55b   : > { %v8384_v56 = vor.u32 %v8998_v42, %v8383_v29  ;;  %v8256_v7 = vor.u32 %v8966_v3, %v8255_v55  ;;  %v12052_v42 = vld [vmem:[#allocation52_spill] sm:$0xff]  ;;  %v8567_v3 = vld [vmem:[#allocation13 + $0x270] sm:$0xf] }
 0x55c   : > { %v8568_v10 = vor.u32 %v9044_v50, %v8567_v3  ;;  %v8993_v3 = vld [vmem:[#allocation13 + $0xe4] sm:$0xf]  ;;  %v8369_v50 = vld [vmem:[#allocation13 + $0xe8] sm:$0xf0] }
 0x55d   : > { %v4958_v41 = vpop.f32.mrf.mxu2  ;;  %v5007_v21 = vpop.f32.mrf.mxu3  ;;  %6225 = vmatpush.bf16.msra.mxu2 %v8384_v56  ;;  %6127 = vmatpush.bf16.msra.mxu0 %v8256_v7  ;;  %v8979_v56 = vld [vmem:[#allocation13 + $0x74] sm:$0xf] }
 0x55e   : > { %v4959_v46 = vadd.f32 %v4958_v41, %v11232_v1  ;;  %v4860_v33 = vpop.f32.mrf.mxu0  ;;  %v4909_v2 = vpop.f32.mrf.mxu1 }
 0x55f   : > { %v4861_v24 = vadd.f32 %v4860_v33, %v11186_v36  ;;  %v8319_v36 = vld [vmem:[#allocation13 + $0x80] sm:$0xf] }
 0x560   : > { %v11318_v47 = vadd.f32 %v5007_v21, %v4959_v46  ;;  %v12051_v21 = vld [vmem:[#allocation61_spill] sm:$0xff] }
 0x561   : > { %v11320_v17 = vadd.f32 %v4909_v2, %v4861_v24  ;;  %5055 = vmatmul.bf16.gmra.mxu0 %v12008_v31  ;;  %5104 = vmatmul.bf16.gmra.mxu1 %v12010_v16  ;;  %v8320_v31 = vor.u32 %v8982_v60, %v8319_v36  ;;  %v8377_v36 = vld [vmem:[#allocation13 + $0xf8] sm:$0xf0]  ;;  %v9060_v60 = vld [vmem:[#allocation13 + $0x2f4] sm:$0xf0] }
 0x562   : > { %6316 = vmatpush.bf16.msrb.mxu0 %v8568_v10 }
 0x563   : > { %6176 = vmatpush.bf16.msra.mxu1 %v8320_v31 }
 0x565   : > { %v4960_v0 = vpop.f32.mrf.mxu2  ;;  %v5009_v13 = vpop.f32.mrf.mxu3 }
 0x566   : > { %v4961_v48 = vadd.f32 %v4960_v0, %v11232_v1  ;;  %v4862_v63 = vpop.f32.mrf.mxu0  ;;  %v4911_v26 = vpop.f32.mrf.mxu1  ;;  %v8995_v0 = vld [vmem:[#allocation13 + $0xf4] sm:$0xf] }
 0x567   : > { %v4863_v16 = vadd.f32 %v4862_v63, %v11191_v30  ;;  %v8380_v28 = vor.u32 %v8995_v0, %v8377_v36  ;;  %v8372_v0 = vor.u32 %v8993_v3, %v8369_v50  ;;  %v9040_v50 = vld [vmem:[#allocation13 + $0x254] sm:$0xf0] }
 0x568   : > { %v11326_v40 = vadd.f32 %v5009_v13, %v4961_v48 }
 0x569   : > { %v11328_v23 = vadd.f32 %v4911_v26, %v4863_v16  ;;  %6463 = vmatpush.bf16.msrb.mxu3 %v8380_v28  ;;  %v12057_v28 = vld [vmem:[#allocation20_spill] sm:$0xff] }
 0x56a   : > { %5158 = vmatmul.bf16.gmra.mxu2 %v11197_v54  ;;  %5207 = vmatmul.bf16.gmra.mxu3 %v11203_v14 }
 0x56d   : > { %v4963_v49 = vpop.f32.mrf.mxu2  ;;  %v5012_v5 = vpop.f32.mrf.mxu3  ;;  %6464 = vmatpush.bf16.msrb.mxu3 %v8372_v0  ;;  %v8361_v0 = vld [vmem:[#allocation13 + $0xd8] sm:$0xf0] }
 0x56e   : > { %v4964_v53 = vadd.f32 %v4963_v49, %v11232_v1  ;;  %v4865_v45 = vpop.f32.mrf.mxu0  ;;  %v4914_v30 = vpop.f32.mrf.mxu1 }
 0x56f   : > { %v4866_v35 = vadd.f32 %v4865_v45, %v11206_v62 }
 0x570   : > { %v11334_v9 = vadd.f32 %v5012_v5, %v4964_v53  ;;  %v12053_v5 = vld [vmem:[#allocation64_spill] sm:$0xff]  ;;  %v12054_v53 = vld [vmem:[#allocation65_spill] sm:$0xff] }
 0x571   : > { %v11336_v41 = vadd.f32 %v4914_v30, %v4866_v35  ;;  %5060 = vmatmul.bf16.gmra.mxu0 %v12016_v43  ;;  %5109 = vmatmul.bf16.gmra.mxu1 %v12051_v21  ;;  %v8313_v43 = vld [vmem:[#allocation13 + $0x78] sm:$0xf0] }
 0x572   : > { %v8316_v55 = vor.u32 %v8979_v56, %v8313_v43  ;;  %v12056_v56 = vld [vmem:[#allocation70_spill] sm:$0xff] }
 0x574   : > { %6414 = vmatpush.bf16.msrb.mxu2 %v8316_v55  ;;  %v9042_v55 = vld [vmem:[#allocation13 + $0x264] sm:$0xf0] }
 0x575   : > { %v4965_v46 = vpop.f32.mrf.mxu2  ;;  %v5014_v54 = vpop.f32.mrf.mxu3 }
 0x576   : > { %v4966_v14 = vadd.f32 %v4965_v46, %v11232_v1  ;;  %v4867_v33 = vpop.f32.mrf.mxu0  ;;  %v4916_v2 = vpop.f32.mrf.mxu1 }
 0x577   : > { %v4868_v24 = vadd.f32 %v4867_v33, %v11211_v27  ;;  %v8631_v27 = vld [vmem:[#allocation13 + $0x2f0] sm:$0xf]  ;;  %v8977_v33 = vld [vmem:[#allocation13 + $0x64] sm:$0xf] }
 0x578   : > { %v11342_v29 = vadd.f32 %v5014_v54, %v4966_v14  ;;  %v8632_v31 = vor.u32 %v9060_v60, %v8631_v27 }
 0x579   : > { %v11344_v62 = vadd.f32 %v4916_v2, %v4868_v24  ;;  %v8305_v24 = vld [vmem:[#allocation13 + $0x68] sm:$0xf0]  ;;  %v8559_v2 = vld [vmem:[#allocation13 + $0x260] sm:$0xf] }
 0x57a   : > { %5163 = vmatmul.bf16.gmra.mxu2 %v12052_v42  ;;  %5212 = vmatmul.bf16.gmra.mxu3 %v11223_v32  ;;  %v12055_v42 = vld [vmem:[#allocation69_spill] sm:$0xff]  ;;  %v8308_v43 = vor.u32 %v8977_v33, %v8305_v24  ;;  %v8297_v24 = vld [vmem:[#allocation13 + $0x58] sm:$0xf0] }
 0x57b   : > { %6365 = vmatpush.bf16.msrb.mxu1 %v8632_v31  ;;  %v12058_v31 = vld [vmem:[#allocation21_spill] sm:$0xff] }
 0x57c   : > { %6415 = vmatpush.bf16.msrb.mxu2 %v8308_v43  ;;  %v12059_v43 = vld [vmem:[#allocation71_spill] sm:$0xff] }
 0x57d   : > { %v4968_v13 = vpop.f32.mrf.mxu2  ;;  %v5017_v7 = vpop.f32.mrf.mxu3 }
 0x57e   : > { %v4969_v48 = vadd.f32 %v4968_v13, %v11232_v1  ;;  %v4870_v63 = vpop.f32.mrf.mxu0  ;;  %v4919_v16 = vpop.f32.mrf.mxu1  ;;  %v8623_v13 = vld [vmem:[#allocation13 + $0x2e0] sm:$0xf] }
 0x57f   : > { %v4871_v32 = vadd.f32 %v4870_v63, %v11226_v6 }
 0x580   : > { %v11350_v26 = vadd.f32 %v5017_v7, %v4969_v48 }
 0x581   : > { %v11352_v49 = vadd.f32 %v4919_v16, %v4871_v32  ;;  %5065 = vmatmul.bf16.gmra.mxu0 %v12053_v5  ;;  %5114 = vmatmul.bf16.gmra.mxu1 %v12054_v53 }
 0x585   : > { %v4970_v45 = vpop.f32.mrf.mxu2  ;;  %v5019_v35 = vpop.f32.mrf.mxu3 }
 0x586   : > { %v4971_v30 = vadd.f32 %v4970_v45, %v11232_v1  ;;  %v4872_v21 = vpop.f32.mrf.mxu0  ;;  %v4921_v6 = vpop.f32.mrf.mxu1  ;;  %v8560_v1 = vor.u32 %v9042_v55, %v8559_v2  ;;  %v8551_v2 = vld [vmem:[#allocation13 + $0x250] sm:$0xf]  ;;  %v12060_v55 = vld [vmem:[#allocation72_spill] sm:$0xff] }
 0x587   : > { %v4873_v46 = vadd.f32 %v4872_v21, %v11234_v44  ;;  %v9058_v44 = vld [vmem:[#allocation13 + $0x2e4] sm:$0xf0] }
 0x588   : > { %v11358_v54 = vadd.f32 %v5019_v35, %v4971_v30  ;;  %v8624_v7 = vor.u32 %v9058_v44, %v8623_v13  ;;  %6317 = vmatpush.bf16.msrb.mxu0 %v8560_v1  ;;  %v5218_v35 = vmax.f32 %v11240_v25, 0.0  ;;  %v8991_v1 = vld [vmem:[#allocation13 + $0xd4] sm:$0xf]  ;;  %v8552_v44 = vor.u32 %v9040_v50, %v8551_v2  ;;  %v8615_v25 = vld [vmem:[#allocation13 + $0x2d0] sm:$0xf] }
 0x589   : > { %v11360_v14 = vadd.f32 %v4921_v6, %v4873_v46 }
 0x58a   : > { %6226 = vmatmul.bf16.vlgmr.msra.gmra.mxu2 %v12055_v42  ;;  %6275 = vmatmul.bf16.vlgmr.msra.gmra.mxu3 %v12056_v56 }
 0x58b   : > { %6366 = vmatpush.bf16.msrb.mxu1 %v8624_v7  ;;  %v9056_v7 = vld [vmem:[#allocation13 + $0x2d4] sm:$0xf0] }
 0x58c   : > { %6318 = vmatpush.bf16.msrb.mxu0 %v8552_v44 }
 0x58d   : > { %v5129_v10 = vpop.f32.mrf.mxu2  ;;  %v5178_v36 = vpop.f32.mrf.mxu3 }
 0x58e   : > { %v5031_v27 = vpop.f32.mrf.mxu0  ;;  %v5080_v48 = vpop.f32.mrf.mxu1 }
 0x58f   : > { %v5032_v60 = vadd.f32 %v5031_v27, %v11238_v52  ;;  %v8975_v52 = vld [vmem:[#allocation13 + $0x54] sm:$0xf] }
 0x590   : > { %v8300_v3 = vor.u32 %v8975_v52, %v8297_v24 }
 0x591   : > { %v5081_v63 = vadd.f32 %v5080_v48, %v5032_v60  ;;  %6128 = vmatmul.bf16.vlgmr.msra.gmra.mxu0 %v12057_v28  ;;  %6177 = vmatmul.bf16.vlgmr.msra.gmra.mxu1 %v12058_v31 }
 0x592   : > { %6416 = vmatpush.bf16.msrb.mxu2 %v8300_v3 }
 0x593   : > { %v5130_v32 = vadd.f32 %v5129_v10, %v5081_v63  ;;  %v8616_v10 = vor.u32 %v9056_v7, %v8615_v25  ;;  %v5220_v63 = vmax.f32 %v11248_v22, 0.0 }
 0x595   : > { %v5179_v16 = vadd.f32 %v5178_v36, %v5130_v32  ;;  %v5131_v5 = vpop.f32.mrf.mxu2  ;;  %v5180_v53 = vpop.f32.mrf.mxu3  ;;  %6367 = vmatpush.bf16.msrb.mxu1 %v8616_v10  ;;  %v8289_v10 = vld [vmem:[#allocation13 + $0x48] sm:$0xf0] }
 0x596   : > { %v5033_v45 = vpop.f32.mrf.mxu0  ;;  %v5082_v46 = vpop.f32.mrf.mxu1 }
 0x597   : > { %v5219_v30 = vmax.f32 %v5179_v16, 0.0  ;;  %v5034_v21 = vadd.f32 %v5033_v45, %v11246_v12  ;;  %v8364_v12 = vor.u32 %v8991_v1, %v8361_v0  ;;  %v5222_v0 = vmax.f32 %v11256_v38, 0.0 }
 0x599   : > { %v5282_v6 = vpack.c.bf16 %v5219_v30, %v5218_v35  ;;  %v5083_v33 = vadd.f32 %v5082_v46, %v5034_v21  ;;  %6465 = vmatpush.bf16.msrb.mxu3 %v8364_v12  ;;  %v12061_v30 = vld [vmem:[#allocation22_spill] sm:$0xff]  ;;  %v12062_v46 = vld [vmem:[#allocation23_spill] sm:$0xff] }
 0x59a   : > { %6231 = vmatmul.bf16.gmra.mxu2 %v12059_v43  ;;  %6280 = vmatmul.bf16.gmra.mxu3 %v12060_v55 }
 0x59b   : > { %v5132_v13 = vadd.f32 %v5131_v5, %v5083_v33  ;;  %v5474_v21 = vunpack.c.l.b16 %v5282_v6 }
 0x59d   : > { %v5181_v36 = vadd.f32 %v5180_v53, %v5132_v13  ;;  %v5134_v27 = vpop.f32.mrf.mxu2  ;;  %v5183_v60 = vpop.f32.mrf.mxu3  ;;  %v5475_v53 = vunpack.c.h.b16 %v5282_v6  ;;  %v8973_v6 = vld [vmem:[#allocation13 + $0x44] sm:$0xf] }
 0x59e   : > { %v5036_v48 = vpop.f32.mrf.mxu0  ;;  %v5085_v45 = vpop.f32.mrf.mxu1 }
 0x59f   : > { %v5221_v32 = vmax.f32 %v5181_v36, 0.0  ;;  %v5037_v16 = vadd.f32 %v5036_v48, %v11254_v15  ;;  %v8543_v36 = vld [vmem:[#allocation13 + $0x240] sm:$0xf]  ;;  %v8292_v48 = vor.u32 %v8973_v6, %v8289_v10 }
 0x5a1   : > { %v5283_v5 = vpack.c.bf16 %v5221_v32, %v5220_v63  ;;  %v5086_v35 = vadd.f32 %v5085_v45, %v5037_v16  ;;  %6133 = vmatmul.bf16.gmra.mxu0 %v12061_v30  ;;  %6182 = vmatmul.bf16.gmra.mxu1 %v12062_v46  ;;  %v9038_v63 = vld [vmem:[#allocation13 + $0x244] sm:$0xf0]  ;;  %v8989_v32 = vld [vmem:[#allocation13 + $0xc4] sm:$0xf]  ;;  %v8353_v16 = vld [vmem:[#allocation13 + $0xc8] sm:$0xf0] }
 0x5a2   : > { %v8356_v38 = vor.u32 %v8989_v32, %v8353_v16  ;;  %6417 = vmatpush.bf16.msrb.mxu2 %v8292_v48 }
 0x5a3   : > { %v5476_v33 = vunpack.c.l.b16 %v5283_v5  ;;  %v5477_v52 = vunpack.c.h.b16 %v5283_v5  ;;  %v5135_v24 = vadd.f32 %v5134_v27, %v5086_v35  ;;  %v12063_v27 = vld [vmem:[#allocation73_spill] sm:$0xff]  ;;  %v8544_v5 = vor.u32 %v9038_v63, %v8543_v36  ;;  %v8607_v35 = vld [vmem:[#allocation13 + $0x2c0] sm:$0xf] }
 0x5a4   : > { %6466 = vmatpush.bf16.msrb.mxu3 %v8356_v38 }
 0x5a5   : > { %v5184_v2 = vadd.f32 %v5183_v60, %v5135_v24  ;;  %v5136_v3 = vpop.f32.mrf.mxu2  ;;  %v5185_v50 = vpop.f32.mrf.mxu3  ;;  %v11375_v1 = vpack.c.b16 %v5476_v33, %v5474_v21  ;;  %v11377_v22 = vpack.c.b16 %v5477_v52, %v5475_v53  ;;  %v12064_v60 = vld [vmem:[#allocation74_spill] sm:$0xff]  ;;  %v9054_v21 = vld [vmem:[#allocation13 + $0x2c4] sm:$0xf0]  ;;  %6319 = vmatpush.bf16.msrb.mxu0 %v8544_v5  ;;  %v5226_v5 = vmax.f32 %v11272_v58, 0.0 }
 0x5a6   : > { %v5038_v15 = vpop.f32.mrf.mxu0  ;;  %v5087_v25 = vpop.f32.mrf.mxu1 }
 0x5a7   : > { %v5223_v13 = vmax.f32 %v5184_v2, 0.0  ;;  %v5039_v44 = vadd.f32 %v5038_v15, %v11262_v4  ;;  %v8608_v4 = vor.u32 %v9054_v21, %v8607_v35  ;;  %v5224_v2 = vmax.f32 %v11264_v61, 0.0 }
 0x5a9   : > { %v5284_v7 = vpack.c.bf16 %v5223_v13, %v5222_v0  ;;  %v5088_v12 = vadd.f32 %v5087_v25, %v5039_v44  ;;  %6368 = vmatpush.bf16.msrb.mxu1 %v8608_v4  ;;  %v12065_v44 = vld [vmem:[#allocation24_spill] sm:$0xff] }
 0x5aa   : > { %6236 = vmatmul.bf16.gmra.mxu2 %v12063_v27  ;;  %6285 = vmatmul.bf16.gmra.mxu3 %v12064_v60 }
 0x5ab   : > { %v5137_v45 = vadd.f32 %v5136_v3, %v5088_v12  ;;  %v12066_v12 = vld [vmem:[#allocation25_spill] sm:$0xff]  ;;  %v5478_v6 = vunpack.c.l.b16 %v5284_v7  ;;  %v5479_v36 = vunpack.c.h.b16 %v5284_v7  ;;  %v8535_v7 = vld [vmem:[#allocation13 + $0x230] sm:$0xf] }
 0x5ad   : > { %v5186_v53 = vadd.f32 %v5185_v50, %v5137_v45  ;;  %v5139_v33 = vpop.f32.mrf.mxu2  ;;  %v5188_v52 = vpop.f32.mrf.mxu3 }
 0x5ae   : > { %v5041_v24 = vpop.f32.mrf.mxu0  ;;  %v5090_v13 = vpop.f32.mrf.mxu1 }
 0x5af   : > { %v5225_v15 = vmax.f32 %v5186_v53, 0.0  ;;  %v5042_v0 = vadd.f32 %v5041_v24, %v11270_v20  ;;  %v8281_v24 = vld [vmem:[#allocation13 + $0x38] sm:$0xf0] }
 0x5b1   : > { %v5091_v3 = vadd.f32 %v5090_v13, %v5042_v0  ;;  %6138 = vmatmul.bf16.gmra.mxu0 %v12065_v44  ;;  %v5285_v25 = vpack.c.bf16 %v5225_v15, %v5224_v2  ;;  %6187 = vmatmul.bf16.gmra.mxu1 %v12066_v12  ;;  %v12067_v2 = vld [vmem:[#allocation75_spill] sm:$0xff]  ;;  %v8987_v13 = vld [vmem:[#allocation13 + $0xb4] sm:$0xf] }
 0x5b2   : > { %v9036_v0 = vld [vmem:[#allocation13 + $0x234] sm:$0xf0] }
 0x5b3   : > { %v5140_v50 = vadd.f32 %v5139_v33, %v5091_v3  ;;  %v5480_v10 = vunpack.c.l.b16 %v5285_v25  ;;  %v5481_v48 = vunpack.c.h.b16 %v5285_v25  ;;  %v8971_v33 = vld [vmem:[#allocation13 + $0x34] sm:$0xf]  ;;  %v8345_v3 = vld [vmem:[#allocation13 + $0xb8] sm:$0xf0] }
 0x5b4   : > { %v8284_v15 = vor.u32 %v8971_v33, %v8281_v24  ;;  %v8348_v58 = vor.u32 %v8987_v13, %v8345_v3  ;;  %v12070_v24 = vld [vmem:[#allocation27_spill] sm:$0xff] }
 0x5b5   : > { %v5189_v63 = vadd.f32 %v5188_v52, %v5140_v50  ;;  %v5141_v32 = vpop.f32.mrf.mxu2  ;;  %v5190_v16 = vpop.f32.mrf.mxu3  ;;  %v11387_v45 = vpack.c.b16 %v5480_v10, %v5478_v6  ;;  %v11389_v61 = vpack.c.b16 %v5481_v48, %v5479_v36  ;;  %v12068_v52 = vld [vmem:[#allocation36_spill] sm:$0xff]  ;;  %v8536_v6 = vor.u32 %v9036_v0, %v8535_v7  ;;  %v8599_v50 = vld [vmem:[#allocation13 + $0x2b0] sm:$0xf]  ;;  %v9052_v10 = vld [vmem:[#allocation13 + $0x2b4] sm:$0xf0] }
 0x5b6   : > { %v5043_v20 = vpop.f32.mrf.mxu0  ;;  %v5092_v21 = vpop.f32.mrf.mxu1  ;;  %6418 = vmatpush.bf16.msrb.mxu2 %v8284_v15  ;;  %6467 = vmatpush.bf16.msrb.mxu3 %v8348_v58 }
 0x5b7   : > { %v5227_v38 = vmax.f32 %v5189_v63, 0.0  ;;  %v5044_v35 = vadd.f32 %v5043_v20, %v11278_v39  ;;  %v8600_v39 = vor.u32 %v9052_v10, %v8599_v50  ;;  %6320 = vmatpush.bf16.msrb.mxu0 %v8536_v6  ;;  %v5230_v50 = vmax.f32 %v11288_v51, 0.0 }
 0x5b9   : > { %v5286_v4 = vpack.c.bf16 %v5227_v38, %v5226_v5  ;;  %v5093_v53 = vadd.f32 %v5092_v21, %v5044_v35  ;;  %6369 = vmatpush.bf16.msrb.mxu1 %v8600_v39  ;;  %v5228_v5 = vmax.f32 %v11280_v59, 0.0 }
 0x5ba   : > { %6241 = vmatmul.bf16.gmra.mxu2 %v12067_v2  ;;  %6290 = vmatmul.bf16.gmra.mxu3 %v12068_v52 }
 0x5bb   : > { %v5142_v25 = vadd.f32 %v5141_v32, %v5093_v53  ;;  %v12069_v53 = vld [vmem:[#allocation26_spill] sm:$0xff]  ;;  %v5482_v7 = vunpack.c.l.b16 %v5286_v4  ;;  %v5483_v0 = vunpack.c.h.b16 %v5286_v4  ;;  %v8527_v4 = vld [vmem:[#allocation13 + $0x220] sm:$0xf] }
 0x5bd   : > { %v5191_v36 = vadd.f32 %v5190_v16, %v5142_v25  ;;  %v5144_v48 = vpop.f32.mrf.mxu2  ;;  %v5193_v63 = vpop.f32.mrf.mxu3 }
 0x5be   : > { %v5046_v20 = vpop.f32.mrf.mxu0  ;;  %v5095_v21 = vpop.f32.mrf.mxu1 }
 0x5bf   : > { %v5229_v38 = vmax.f32 %v5191_v36, 0.0  ;;  %v5047_v35 = vadd.f32 %v5046_v20, %v11286_v37 }
 0x5c1   : > { %v5096_v32 = vadd.f32 %v5095_v21, %v5047_v35  ;;  %6143 = vmatmul.bf16.gmra.mxu0 %v12069_v53  ;;  %v5287_v33 = vpack.c.bf16 %v5229_v38, %v5228_v5  ;;  %6192 = vmatmul.bf16.gmra.mxu1 %v12070_v24  ;;  %v8273_v38 = vld [vmem:[#allocation13 + $0x28] sm:$0xf0] }
 0x5c2   : > { %v12071_v35 = vld [vmem:[#allocation37_spill] sm:$0xff] }
 0x5c3   : > { %v5145_v16 = vadd.f32 %v5144_v48, %v5096_v32  ;;  %v5484_v15 = vunpack.c.l.b16 %v5287_v33  ;;  %v5485_v13 = vunpack.c.h.b16 %v5287_v33  ;;  %v8969_v48 = vld [vmem:[#allocation13 + $0x24] sm:$0xf]  ;;  %v9034_v32 = vld [vmem:[#allocation13 + $0x224] sm:$0xf0] }
 0x5c4   : > { %v8276_v21 = vor.u32 %v8969_v48, %v8273_v38  ;;  %v8985_v33 = vld [vmem:[#allocation13 + $0xa4] sm:$0xf] }
 0x5c5   : > { %v5194_v3 = vadd.f32 %v5193_v63, %v5145_v16  ;;  %v5146_v25 = vpop.f32.mrf.mxu2  ;;  %v5195_v6 = vpop.f32.mrf.mxu3  ;;  %v11399_v58 = vpack.c.b16 %v5484_v15, %v5482_v7  ;;  %v11401_v59 = vpack.c.b16 %v5485_v13, %v5483_v0  ;;  %v12072_v63 = vld [vmem:[#allocation68_spill] sm:$0xff]  ;;  %v8337_v7 = vld [vmem:[#allocation13 + $0xa8] sm:$0xf0]  ;;  %v8528_v15 = vor.u32 %v9034_v32, %v8527_v4  ;;  %v9050_v13 = vld [vmem:[#allocation13 + $0x2a4] sm:$0xf0] }
 0x5c6   : > { %v5048_v37 = vpop.f32.mrf.mxu0  ;;  %v5097_v36 = vpop.f32.mrf.mxu1  ;;  %v8340_v51 = vor.u32 %v8985_v33, %v8337_v7  ;;  %v8591_v0 = vld [vmem:[#allocation13 + $0x2a0] sm:$0xf]  ;;  %6419 = vmatpush.bf16.msrb.mxu2 %v8276_v21  ;;  %v12074_v32 = vld [vmem:[#allocation29_spill] sm:$0xff] }
 0x5c7   : > { %v5231_v10 = vmax.f32 %v5194_v3, 0.0  ;;  %v5049_v39 = vadd.f32 %v5048_v37, %v11294_v18  ;;  %v8592_v18 = vor.u32 %v9050_v13, %v8591_v0  ;;  %6321 = vmatpush.bf16.msrb.mxu0 %v8528_v15 }
 0x5c8   : > { %6468 = vmatpush.bf16.msrb.mxu3 %v8340_v51 }
 0x5c9   : > { %v5288_v20 = vpack.c.bf16 %v5231_v10, %v5230_v50  ;;  %v5098_v5 = vadd.f32 %v5097_v36, %v5049_v39  ;;  %6370 = vmatpush.bf16.msrb.mxu1 %v8592_v18  ;;  %v5232_v39 = vmax.f32 %v11296_v57, 0.0  ;;  %v5234_v18 = vmax.f32 %v11304_v19, 0.0 }
 0x5ca   : > { %6246 = vmatmul.bf16.gmra.mxu2 %v12071_v35  ;;  %6295 = vmatmul.bf16.gmra.mxu3 %v12072_v63  ;;  %v9048_v63 = vld [vmem:[#allocation13 + $0x294] sm:$0xf0] }
 0x5cb   : > { %v5147_v16 = vadd.f32 %v5146_v25, %v5098_v5  ;;  %v12073_v5 = vld [vmem:[#allocation28_spill] sm:$0xff]  ;;  %v5486_v21 = vunpack.c.l.b16 %v5288_v20  ;;  %v5487_v7 = vunpack.c.h.b16 %v5288_v20  ;;  %v8519_v20 = vld [vmem:[#allocation13 + $0x210] sm:$0xf] }
 0x5cd   : > { %v5196_v3 = vadd.f32 %v5195_v6, %v5147_v16  ;;  %v5149_v37 = vpop.f32.mrf.mxu2  ;;  %v5198_v50 = vpop.f32.mrf.mxu3 }
 0x5ce   : > { %v5051_v10 = vpop.f32.mrf.mxu0  ;;  %v5100_v38 = vpop.f32.mrf.mxu1 }
 0x5cf   : > { %v5233_v36 = vmax.f32 %v5196_v3, 0.0  ;;  %v5052_v48 = vadd.f32 %v5051_v10, %v11302_v11 }
 0x5d1   : > { %v5101_v25 = vadd.f32 %v5100_v38, %v5052_v48  ;;  %6148 = vmatmul.bf16.gmra.mxu0 %v12073_v5  ;;  %v5289_v4 = vpack.c.bf16 %v5233_v36, %v5232_v39  ;;  %6197 = vmatmul.bf16.gmra.mxu1 %v12074_v32  ;;  %v8265_v38 = vld [vmem:[#allocation13 + $0x18] sm:$0xf0] }
 0x5d3   : > { %v5150_v6 = vadd.f32 %v5149_v37, %v5101_v25  ;;  %v5488_v33 = vunpack.c.l.b16 %v5289_v4  ;;  %v5489_v16 = vunpack.c.h.b16 %v5289_v4  ;;  %v8967_v37 = vld [vmem:[#allocation13 + $0x14] sm:$0xf]  ;;  %v12075_v25 = vld [vmem:[#allocation40_spill] sm:$0xff] }
 0x5d4   : > { %v8268_v4 = vor.u32 %v8967_v37, %v8265_v38 }
 0x5d5   : > { %v5199_v15 = vadd.f32 %v5198_v50, %v5150_v6  ;;  %v5151_v51 = vpop.f32.mrf.mxu2  ;;  %v5200_v0 = vpop.f32.mrf.mxu3  ;;  %v11411_v13 = vpack.c.b16 %v5488_v33, %v5486_v21  ;;  %v11413_v57 = vpack.c.b16 %v5489_v16, %v5487_v7  ;;  %v12076_v50 = vld [vmem:[#allocation41_spill] sm:$0xff]  ;;  %v9032_v21 = vld [vmem:[#allocation13 + $0x214] sm:$0xf0]  ;;  %v8983_v6 = vld [vmem:[#allocation13 + $0x94] sm:$0xf] }
 0x5d6   : > { %v5053_v11 = vpop.f32.mrf.mxu0  ;;  %v5102_v39 = vpop.f32.mrf.mxu1  ;;  %v8329_v33 = vld [vmem:[#allocation13 + $0x98] sm:$0xf0]  ;;  %v8520_v16 = vor.u32 %v9032_v21, %v8519_v20  ;;  %6420 = vmatpush.bf16.msrb.mxu2 %v8268_v4 }
 0x5d7   : > { %v5235_v3 = vmax.f32 %v5199_v15, 0.0  ;;  %v5054_v10 = vadd.f32 %v5053_v11, %v11310_v34  ;;  %v8332_v19 = vor.u32 %v8983_v6, %v8329_v33  ;;  %v8583_v15 = vld [vmem:[#allocation13 + $0x290] sm:$0xf]  ;;  %v12078_v21 = vld [vmem:[#allocation31_spill] sm:$0xff] }
 0x5d8   : > { %v8584_v34 = vor.u32 %v9048_v63, %v8583_v15  ;;  %6322 = vmatpush.bf16.msrb.mxu0 %v8520_v16 }
 0x5d9   : > { %v5290_v36 = vpack.c.bf16 %v5235_v3, %v5234_v18  ;;  %v5103_v48 = vadd.f32 %v5102_v39, %v5054_v10  ;;  %6469 = vmatpush.bf16.msrb.mxu3 %v8332_v19  ;;  %v5236_v39 = vmax.f32 %v11312_v8, 0.0 }
 0x5da   : > { %6251 = vmatmul.bf16.gmra.mxu2 %v12075_v25  ;;  %6300 = vmatmul.bf16.gmra.mxu3 %v12076_v50 }
 0x5db   : > { %v5152_v7 = vadd.f32 %v5151_v51, %v5103_v48  ;;  %6371 = vmatpush.bf16.msrb.mxu1 %v8584_v34  ;;  %v12077_v48 = vld [vmem:[#allocation30_spill] sm:$0xff]  ;;  %v5490_v63 = vunpack.c.l.b16 %v5290_v36  ;;  %v5491_v6 = vunpack.c.h.b16 %v5290_v36 }
 0x5dd   : > { %v5201_v11 = vadd.f32 %v5200_v0, %v5152_v7  ;;  %v5154_v18 = vpop.f32.mrf.mxu2  ;;  %v5203_v3 = vpop.f32.mrf.mxu3 }
 0x5de   : > { %v5056_v10 = vpop.f32.mrf.mxu0  ;;  %v5105_v50 = vpop.f32.mrf.mxu1 }
 0x5df   : > { %v5237_v37 = vmax.f32 %v5201_v11, 0.0  ;;  %v5057_v38 = vadd.f32 %v5056_v10, %v11318_v47 }
 0x5e1   : > { %v5106_v51 = vadd.f32 %v5105_v50, %v5057_v38  ;;  %6153 = vmatmul.bf16.gmra.mxu0 %v12077_v48  ;;  %v5291_v20 = vpack.c.bf16 %v5237_v37, %v5236_v39  ;;  %6202 = vmatmul.bf16.gmra.mxu1 %v12078_v21  ;;  %v5238_v50 = vmax.f32 %v11320_v17, 0.0  ;;  %v8965_v39 = vld [vmem:[#allocation13 + $0x4] sm:$0xf]  ;;  %v8257_v37 = vld [vmem:[#allocation13 + $0x8] sm:$0xf0] }
 0x5e2   : > { %v8575_v17 = vld [vmem:[#allocation13 + $0x280] sm:$0xf] }
 0x5e3   : > { %v5155_v0 = vadd.f32 %v5154_v18, %v5106_v51  ;;  %v5492_v4 = vunpack.c.l.b16 %v5291_v20  ;;  %v5493_v33 = vunpack.c.h.b16 %v5291_v20  ;;  %v8981_v18 = vld [vmem:[#allocation13 + $0x84] sm:$0xf]  ;;  %v8260_v51 = vor.u32 %v8965_v39, %v8257_v37  ;;  %v9030_v20 = vld [vmem:[#allocation13 + $0x204] sm:$0xf0] }
 0x5e5   : > { %v5204_v7 = vadd.f32 %v5203_v3, %v5155_v0  ;;  %v5156_v16 = vpop.f32.mrf.mxu2  ;;  %v5205_v19 = vpop.f32.mrf.mxu3  ;;  %v11423_v15 = vpack.c.b16 %v5492_v4, %v5490_v63  ;;  %v11425_v8 = vpack.c.b16 %v5493_v33, %v5491_v6  ;;  %v8511_v3 = vld [vmem:[#allocation13 + $0x200] sm:$0xf]  ;;  %v8321_v0 = vld [vmem:[#allocation13 + $0x88] sm:$0xf0]  ;;  %6421 = vmatpush.bf16.msrb.mxu2 %v8260_v51  ;;  %v9043_v51 = vld [vmem:[#allocation13 + $0x274] sm:$0xf] }
 0x5e6   : > { %v5058_v47 = vpop.f32.mrf.mxu0  ;;  %v5107_v10 = vpop.f32.mrf.mxu1  ;;  %v12079_v63 = vld [vmem:[#allocation44_spill] sm:$0xff]  ;;  %v12080_v4 = vld [vmem:[#allocation45_spill] sm:$0xff]  ;;  %v8512_v6 = vor.u32 %v9030_v20, %v8511_v3  ;;  %v8324_v33 = vor.u32 %v8981_v18, %v8321_v0  ;;  %v8569_v0 = vld [vmem:[#allocation13 + $0x278] sm:$0xf0] }
 0x5e7   : > { %v5239_v34 = vmax.f32 %v5204_v7, 0.0  ;;  %v5059_v11 = vadd.f32 %v5058_v47, %v11326_v40  ;;  %v9046_v7 = vld [vmem:[#allocation13 + $0x284] sm:$0xf0]  ;;  %v12081_v18 = vld [vmem:[#allocation32_spill] sm:$0xff] }
 0x5e8   : > { %v8576_v40 = vor.u32 %v9046_v7, %v8575_v17  ;;  %6323 = vmatpush.bf16.msrb.mxu0 %v8512_v6  ;;  %6470 = vmatpush.bf16.msrb.mxu3 %v8324_v33  ;;  %v8572_v17 = vor.u32 %v9043_v51, %v8569_v0  ;;  %v8441_v7 = vld [vmem:[#allocation13 + $0x178] sm:$0xf0] }
 0x5e9   : > { %v5292_v38 = vpack.c.bf16 %v5239_v34, %v5238_v50  ;;  %v5108_v36 = vadd.f32 %v5107_v10, %v5059_v11  ;;  %v5240_v10 = vmax.f32 %v11328_v23, 0.0  ;;  %v9059_v23 = vld [vmem:[#allocation13 + $0x2f4] sm:$0xf] }
 0x5ea   : > { %6256 = vmatmul.bf16.gmra.mxu2 %v12079_v63  ;;  %6305 = vmatmul.bf16.gmra.mxu3 %v12080_v4 }
 0x5eb   : > { %v5157_v25 = vadd.f32 %v5156_v16, %v5108_v36  ;;  %6372 = vmatpush.bf16.msrb.mxu1 %v8576_v40  ;;  %v12082_v16 = vld [vmem:[#allocation33_spill] sm:$0xff]  ;;  %v8633_v40 = vld [vmem:[#allocation13 + $0x2f8] sm:$0xf0]  ;;  %6610 = vmatpush.bf16.msra.mxu2 %v8572_v17 }
 0x5ec   : > { %v8636_v63 = vor.u32 %v9059_v23, %v8633_v40 }
 0x5ed   : > { %v5206_v47 = vadd.f32 %v5205_v19, %v5157_v25  ;;  %v5159_v50 = vpop.f32.mrf.mxu2  ;;  %v5208_v34 = vpop.f32.mrf.mxu3  ;;  %v9011_v25 = vld [vmem:[#allocation13 + $0x174] sm:$0xf]  ;;  %v5494_v19 = vunpack.c.l.b16 %v5292_v38 }
 0x5ee   : > { %v5061_v11 = vpop.f32.mrf.mxu0  ;;  %v5110_v4 = vpop.f32.mrf.mxu1  ;;  %6659 = vmatpush.bf16.msra.mxu3 %v8636_v63  ;;  %v12085_v63 = vld [vmem:[#allocation34_spill] sm:$0xff] }
 0x5ef   : > { %v5241_v39 = vmax.f32 %v5206_v47, 0.0  ;;  %v5062_v37 = vadd.f32 %v5061_v11, %v11334_v9  ;;  %v5495_v47 = vunpack.c.h.b16 %v5292_v38 }
 0x5f1   : > { %v5111_v3 = vadd.f32 %v5110_v4, %v5062_v37  ;;  %6158 = vmatmul.bf16.gmra.mxu0 %v12081_v18  ;;  %v5293_v20 = vpack.c.bf16 %v5241_v39, %v5240_v10  ;;  %6207 = vmatmul.bf16.gmra.mxu1 %v12082_v16  ;;  %v8444_v37 = vor.u32 %v9011_v25, %v8441_v7  ;;  %v9027_v10 = vld [vmem:[#allocation13 + $0x1f4] sm:$0xf]  ;;  %v8505_v39 = vld [vmem:[#allocation13 + $0x1f8] sm:$0xf0]  ;;  %v12083_v25 = vld [vmem:[#allocation48_spill] sm:$0xff] }
 0x5f3   : > { %v5160_v36 = vadd.f32 %v5159_v50, %v5111_v3  ;;  %v5496_v6 = vunpack.c.l.b16 %v5293_v20  ;;  %v5497_v33 = vunpack.c.h.b16 %v5293_v20  ;;  %v8508_v3 = vor.u32 %v9027_v10, %v8505_v39  ;;  %6512 = vmatpush.bf16.msra.mxu0 %v8444_v37  ;;  %v12086_v10 = vld [vmem:[#allocation35_spill] sm:$0xff] }
 0x5f4   : > { %v5242_v20 = vmax.f32 %v11336_v41, 0.0  ;;  %v5244_v41 = vmax.f32 %v11344_v62, 0.0  ;;  %v9057_v62 = vld [vmem:[#allocation13 + $0x2e4] sm:$0xf] }
 0x5f5   : > { %v5209_v9 = vadd.f32 %v5208_v34, %v5160_v36  ;;  %v5161_v11 = vpop.f32.mrf.mxu2  ;;  %v5210_v4 = vpop.f32.mrf.mxu3  ;;  %v11435_v35 = vpack.c.b16 %v5496_v6, %v5494_v19  ;;  %v11437_v52 = vpack.c.b16 %v5497_v33, %v5495_v47  ;;  %6561 = vmatpush.bf16.msra.mxu1 %v8508_v3  ;;  %v12084_v19 = vld [vmem:[#allocation49_spill] sm:$0xff] }
 0x5f6   : > { %v5063_v50 = vpop.f32.mrf.mxu0  ;;  %v5112_v38 = vpop.f32.mrf.mxu1  ;;  %v8561_v3 = vld [vmem:[#allocation13 + $0x268] sm:$0xf0] }
 0x5f7   : > { %v5243_v51 = vmax.f32 %v5209_v9, 0.0  ;;  %v5064_v0 = vadd.f32 %v5063_v50, %v11342_v29  ;;  %v9041_v50 = vld [vmem:[#allocation13 + $0x264] sm:$0xf] }
 0x5f9   : > { %v5294_v34 = vpack.c.bf16 %v5243_v51, %v5242_v20  ;;  %v5113_v36 = vadd.f32 %v5112_v38, %v5064_v0  ;;  %v8564_v0 = vor.u32 %v9041_v50, %v8561_v3  ;;  %v8433_v38 = vld [vmem:[#allocation13 + $0x168] sm:$0xf0] }
 0x5fa   : > { %6261 = vmatmul.bf16.gmra.mxu2 %v12083_v25  ;;  %6310 = vmatmul.bf16.gmra.mxu3 %v12084_v19 }
 0x5fb   : > { %v5162_v6 = vadd.f32 %v5161_v11, %v5113_v36  ;;  %v9009_v11 = vld [vmem:[#allocation13 + $0x164] sm:$0xf]  ;;  %v8625_v36 = vld [vmem:[#allocation13 + $0x2e8] sm:$0xf0]  ;;  %6611 = vmatpush.bf16.msra.mxu2 %v8564_v0 }
 0x5fd   : > { %v5211_v17 = vadd.f32 %v5210_v4, %v5162_v6  ;;  %v5164_v7 = vpop.f32.mrf.mxu2  ;;  %v5213_v33 = vpop.f32.mrf.mxu3  ;;  %v5498_v4 = vunpack.c.l.b16 %v5294_v34  ;;  %v5499_v6 = vunpack.c.h.b16 %v5294_v34 }
 0x5fe   : > { %v5066_v23 = vpop.f32.mrf.mxu0  ;;  %v5115_v47 = vpop.f32.mrf.mxu1 }
 0x5ff   : > { %v5245_v40 = vmax.f32 %v5211_v17, 0.0  ;;  %v5067_v29 = vadd.f32 %v5066_v23, %v11350_v26 }
 0x601   : > { %v5116_v9 = vadd.f32 %v5115_v47, %v5067_v29  ;;  %6163 = vmatmul.bf16.gmra.mxu0 %v12085_v63  ;;  %v5295_v37 = vpack.c.bf16 %v5245_v40, %v5244_v41  ;;  %6212 = vmatmul.bf16.gmra.mxu1 %v12086_v10  ;;  %v8436_v29 = vor.u32 %v9009_v11, %v8433_v38  ;;  %v9025_v41 = vld [vmem:[#allocation13 + $0x1e4] sm:$0xf]  ;;  %v8497_v40 = vld [vmem:[#allocation13 + $0x1e8] sm:$0xf0]  ;;  %v5248_v38 = vmax.f32 %v11360_v14, 0.0 }
 0x602   : > { %v8628_v47 = vor.u32 %v9057_v62, %v8625_v36  ;;  %v8425_v14 = vld [vmem:[#allocation13 + $0x158] sm:$0xf0] }
 0x603   : > { %v5165_v39 = vadd.f32 %v5164_v7, %v5116_v9  ;;  %v5500_v20 = vunpack.c.l.b16 %v5295_v37  ;;  %v5501_v51 = vunpack.c.h.b16 %v5295_v37  ;;  %v8500_v9 = vor.u32 %v9025_v41, %v8497_v40  ;;  %6513 = vmatpush.bf16.msra.mxu0 %v8436_v29  ;;  %v9039_v29 = vld [vmem:[#allocation13 + $0x254] sm:$0xf] }
 0x604   : > { %v5246_v37 = vmax.f32 %v11352_v49, 0.0  ;;  %6660 = vmatpush.bf16.msra.mxu3 %v8628_v47  ;;  %v8553_v47 = vld [vmem:[#allocation13 + $0x258] sm:$0xf0] }
 0x605   : > { %v5214_v26 = vadd.f32 %v5213_v33, %v5165_v39  ;;  %v5166_v17 = vpop.f32.mrf.mxu2  ;;  %v5215_v23 = vpop.f32.mrf.mxu3  ;;  %v11447_v19 = vpack.c.b16 %v5500_v20, %v5498_v4  ;;  %v11449_v25 = vpack.c.b16 %v5501_v51, %v5499_v6  ;;  %v11456_v33 = vld [vmem:[%s12087_s16] sm:$0x3]  ;;  %6562 = vmatpush.bf16.msra.mxu1 %v8500_v9  ;;  %v8556_v9 = vor.u32 %v9039_v29, %v8553_v47 }
 0x606   : > { %v5068_v7 = vpop.f32.mrf.mxu0  ;;  %v5117_v34 = vpop.f32.mrf.mxu1  ;;  %v11461_v49 = vperm.slane %v11456_v33, 0 }
 0x607   : > { %v5247_v50 = vmax.f32 %v5214_v26, 0.0  ;;  %v5069_v3 = vadd.f32 %v5068_v7, %v11358_v54  ;;  %6612 = vmatpush.bf16.msra.mxu2 %v8556_v9  ;;  %v9037_v9 = vld [vmem:[#allocation13 + $0x244] sm:$0xf] }
 0x609   : > { %v5296_v39 = vpack.c.bf16 %v5247_v50, %v5246_v37  ;;  %v5118_v11 = vadd.f32 %v5117_v34, %v5069_v3  ;;  %v9055_v37 = vld [vmem:[#allocation13 + $0x2d4] sm:$0xf]  ;;  %v8617_v50 = vld [vmem:[#allocation13 + $0x2d8] sm:$0xf0] }
 0x60a   : > { %6422 = vmatmul.bf16.vlgmr.msrb.gmra.mxu2 %v12057_v28  ;;  %6471 = vmatmul.bf16.vlgmr.msrb.gmra.mxu3 %v12058_v31 }
 0x60b   : > { %v5167_v4 = vadd.f32 %v5166_v17, %v5118_v11  ;;  %v5502_v31 = vunpack.c.l.b16 %v5296_v39  ;;  %v5503_v40 = vunpack.c.h.b16 %v5296_v39 }
 0x60d   : > { %v5216_v54 = vadd.f32 %v5215_v23, %v5167_v4  ;;  %v6227_v20 = vpop.f32.mrf.mxu2  ;;  %v6276_v51 = vpop.f32.mrf.mxu3  ;;  %v9007_v23 = vld [vmem:[#allocation13 + $0x154] sm:$0xf]  ;;  %v8620_v4 = vor.u32 %v9055_v37, %v8617_v50  ;;  %v9053_v50 = vld [vmem:[#allocation13 + $0x2c4] sm:$0xf] }
 0x60e   : > { %v6129_v0 = vpop.f32.mrf.mxu0  ;;  %v6178_v6 = vpop.f32.mrf.mxu1  ;;  %v8428_v11 = vor.u32 %v9007_v23, %v8425_v14  ;;  %v8545_v14 = vld [vmem:[#allocation13 + $0x248] sm:$0xf0] }
 0x60f   : > { %v5249_v62 = vmax.f32 %v5216_v54, 0.0  ;;  %v6130_v36 = vadd.f32 %v6129_v0, %v11461_v49  ;;  %v9023_v54 = vld [vmem:[#allocation13 + $0x1d4] sm:$0xf]  ;;  %v8489_v0 = vld [vmem:[#allocation13 + $0x1d8] sm:$0xf0]  ;;  %6661 = vmatpush.bf16.msra.mxu3 %v8620_v4  ;;  %v8548_v37 = vor.u32 %v9037_v9, %v8545_v14 }
 0x610   : > { %6514 = vmatpush.bf16.msra.mxu0 %v8428_v11 }
 0x611   : > { %v6179_v26 = vadd.f32 %v6178_v6, %v6130_v36  ;;  %6324 = vmatmul.bf16.vlgmr.msrb.gmra.mxu0 %v11375_v1  ;;  %v5297_v28 = vpack.c.bf16 %v5249_v62, %v5248_v38  ;;  %6373 = vmatmul.bf16.vlgmr.msrb.gmra.mxu1 %v11377_v22  ;;  %v8492_v36 = vor.u32 %v9023_v54, %v8489_v0  ;;  %v9021_v0 = vld [vmem:[#allocation13 + $0x1c4] sm:$0xf] }
 0x612   : > { %6613 = vmatpush.bf16.msra.mxu2 %v8548_v37  ;;  %v9035_v37 = vld [vmem:[#allocation13 + $0x234] sm:$0xf] }
 0x613   : > { %v6228_v17 = vadd.f32 %v6227_v20, %v6179_v26  ;;  %v5504_v41 = vunpack.c.l.b16 %v5297_v28  ;;  %v5505_v7 = vunpack.c.h.b16 %v5297_v28  ;;  %6563 = vmatpush.bf16.msra.mxu1 %v8492_v36 }
 0x615   : > { %v6229_v3 = vpop.f32.mrf.mxu2  ;;  %v6278_v34 = vpop.f32.mrf.mxu3  ;;  %v11467_v38 = vpack.c.b16 %v5504_v41, %v5502_v31  ;;  %v11469_v62 = vpack.c.b16 %v5505_v7, %v5503_v40  ;;  %v11471_v6 = vadd.f32 %v6276_v51, %v6228_v17 }
 0x616   : > { %v6131_v20 = vpop.f32.mrf.mxu0  ;;  %v6180_v26 = vpop.f32.mrf.mxu1 }
 0x617   : > { %v6132_v39 = vadd.f32 %v6131_v20, %v11461_v49  ;;  %v8481_v20 = vld [vmem:[#allocation13 + $0x1c8] sm:$0xf0] }
 0x619   : > { %v6181_v28 = vadd.f32 %v6180_v26, %v6132_v39  ;;  %v8484_v26 = vor.u32 %v9021_v0, %v8481_v20  ;;  %v9019_v20 = vld [vmem:[#allocation13 + $0x1b4] sm:$0xf] }
 0x61a   : > { %6427 = vmatmul.bf16.gmra.mxu2 %v12061_v30  ;;  %6476 = vmatmul.bf16.gmra.mxu3 %v12062_v46  ;;  %v9005_v30 = vld [vmem:[#allocation13 + $0x144] sm:$0xf]  ;;  %v8417_v46 = vld [vmem:[#allocation13 + $0x148] sm:$0xf0] }
 0x61b   : > { %v6230_v31 = vadd.f32 %v6229_v3, %v6181_v28  ;;  %v8609_v3 = vld [vmem:[#allocation13 + $0x2c8] sm:$0xf0]  ;;  %v8420_v4 = vor.u32 %v9005_v30, %v8417_v46  ;;  %6564 = vmatpush.bf16.msra.mxu1 %v8484_v26  ;;  %v8537_v46 = vld [vmem:[#allocation13 + $0x238] sm:$0xf0] }
 0x61c   : > { %v8612_v54 = vor.u32 %v9053_v50, %v8609_v3  ;;  %v8540_v50 = vor.u32 %v9035_v37, %v8537_v46  ;;  %v9051_v3 = vld [vmem:[#allocation13 + $0x2b4] sm:$0xf] }
 0x61d   : > { %v6232_v29 = vpop.f32.mrf.mxu2  ;;  %v6281_v47 = vpop.f32.mrf.mxu3  ;;  %v11476_v23 = vadd.f32 %v6278_v34, %v6230_v31  ;;  %6515 = vmatpush.bf16.msra.mxu0 %v8420_v4 }
 0x61e   : > { %v6134_v41 = vpop.f32.mrf.mxu0  ;;  %v6183_v17 = vpop.f32.mrf.mxu1  ;;  %6662 = vmatpush.bf16.msra.mxu3 %v8612_v54  ;;  %6614 = vmatpush.bf16.msra.mxu2 %v8540_v50  ;;  %v9033_v50 = vld [vmem:[#allocation13 + $0x224] sm:$0xf] }
 0x61f   : > { %v6135_v51 = vadd.f32 %v6134_v41, %v11461_v49 }
 0x621   : > { %v6184_v40 = vadd.f32 %v6183_v17, %v6135_v51  ;;  %6329 = vmatmul.bf16.gmra.mxu0 %v11387_v45  ;;  %6378 = vmatmul.bf16.gmra.mxu1 %v11389_v61 }
 0x623   : > { %v6233_v7 = vadd.f32 %v6232_v29, %v6184_v40 }
 0x625   : > { %v6234_v11 = vpop.f32.mrf.mxu2  ;;  %v6283_v34 = vpop.f32.mrf.mxu3  ;;  %v11481_v36 = vadd.f32 %v6281_v47, %v6233_v7 }
 0x626   : > { %v6136_v39 = vpop.f32.mrf.mxu0  ;;  %v6185_v31 = vpop.f32.mrf.mxu1 }
 0x627   : > { %v6137_v28 = vadd.f32 %v6136_v39, %v11461_v49  ;;  %v8473_v39 = vld [vmem:[#allocation13 + $0x1b8] sm:$0xf0] }
 0x629   : > { %v6186_v29 = vadd.f32 %v6185_v31, %v6137_v28  ;;  %v8476_v31 = vor.u32 %v9019_v20, %v8473_v39  ;;  %v9017_v39 = vld [vmem:[#allocation13 + $0x1a4] sm:$0xf] }
 0x62a   : > { %6432 = vmatmul.bf16.gmra.mxu2 %v12065_v44  ;;  %6481 = vmatmul.bf16.gmra.mxu3 %v12066_v12  ;;  %v9003_v44 = vld [vmem:[#allocation13 + $0x134] sm:$0xf]  ;;  %v8409_v12 = vld [vmem:[#allocation13 + $0x138] sm:$0xf0] }
 0x62b   : > { %v6235_v41 = vadd.f32 %v6234_v11, %v6186_v29  ;;  %v8601_v11 = vld [vmem:[#allocation13 + $0x2b8] sm:$0xf0]  ;;  %v8412_v54 = vor.u32 %v9003_v44, %v8409_v12  ;;  %6565 = vmatpush.bf16.msra.mxu1 %v8476_v31  ;;  %v8529_v12 = vld [vmem:[#allocation13 + $0x228] sm:$0xf0] }
 0x62c   : > { %v8604_v0 = vor.u32 %v9051_v3, %v8601_v11  ;;  %v8532_v3 = vor.u32 %v9033_v50, %v8529_v12  ;;  %v9049_v11 = vld [vmem:[#allocation13 + $0x2a4] sm:$0xf] }
 0x62d   : > { %v6237_v51 = vpop.f32.mrf.mxu2  ;;  %v6286_v17 = vpop.f32.mrf.mxu3  ;;  %v11486_v40 = vadd.f32 %v6283_v34, %v6235_v41  ;;  %6516 = vmatpush.bf16.msra.mxu0 %v8412_v54 }
 0x62e   : > { %v6139_v47 = vpop.f32.mrf.mxu0  ;;  %v6188_v9 = vpop.f32.mrf.mxu1  ;;  %6663 = vmatpush.bf16.msra.mxu3 %v8604_v0  ;;  %6615 = vmatpush.bf16.msra.mxu2 %v8532_v3  ;;  %v9031_v3 = vld [vmem:[#allocation13 + $0x214] sm:$0xf] }
 0x62f   : > { %v6140_v7 = vadd.f32 %v6139_v47, %v11461_v49 }
 0x631   : > { %v6189_v14 = vadd.f32 %v6188_v9, %v6140_v7  ;;  %6334 = vmatmul.bf16.gmra.mxu0 %v11399_v58  ;;  %6383 = vmatmul.bf16.gmra.mxu1 %v11401_v59 }
 0x633   : > { %v6238_v30 = vadd.f32 %v6237_v51, %v6189_v14 }
 0x635   : > { %v6239_v4 = vpop.f32.mrf.mxu2  ;;  %v6288_v34 = vpop.f32.mrf.mxu3  ;;  %v11491_v26 = vadd.f32 %v6286_v17, %v6238_v30 }
 0x636   : > { %v6141_v28 = vpop.f32.mrf.mxu0  ;;  %v6190_v41 = vpop.f32.mrf.mxu1 }
 0x637   : > { %v6142_v29 = vadd.f32 %v6141_v28, %v11461_v49  ;;  %v8465_v28 = vld [vmem:[#allocation13 + $0x1a8] sm:$0xf0] }
 0x639   : > { %v6191_v51 = vadd.f32 %v6190_v41, %v6142_v29  ;;  %v8468_v41 = vor.u32 %v9017_v39, %v8465_v28  ;;  %v9015_v28 = vld [vmem:[#allocation13 + $0x194] sm:$0xf] }
 0x63a   : > { %6437 = vmatmul.bf16.gmra.mxu2 %v12069_v53  ;;  %6486 = vmatmul.bf16.gmra.mxu3 %v12070_v24  ;;  %v9001_v53 = vld [vmem:[#allocation13 + $0x124] sm:$0xf]  ;;  %v8401_v24 = vld [vmem:[#allocation13 + $0x128] sm:$0xf0] }
 0x63b   : > { %v6240_v47 = vadd.f32 %v6239_v4, %v6191_v51  ;;  %v8593_v4 = vld [vmem:[#allocation13 + $0x2a8] sm:$0xf0]  ;;  %v8404_v0 = vor.u32 %v9001_v53, %v8401_v24  ;;  %6566 = vmatpush.bf16.msra.mxu1 %v8468_v41  ;;  %v8521_v24 = vld [vmem:[#allocation13 + $0x218] sm:$0xf0] }
 0x63c   : > { %v8596_v20 = vor.u32 %v9049_v11, %v8593_v4  ;;  %v8524_v11 = vor.u32 %v9031_v3, %v8521_v24  ;;  %v9047_v4 = vld [vmem:[#allocation13 + $0x294] sm:$0xf] }
 0x63d   : > { %v6242_v7 = vpop.f32.mrf.mxu2  ;;  %v6291_v9 = vpop.f32.mrf.mxu3  ;;  %v11496_v14 = vadd.f32 %v6288_v34, %v6240_v47  ;;  %6517 = vmatpush.bf16.msra.mxu0 %v8404_v0 }
 0x63e   : > { %v6144_v17 = vpop.f32.mrf.mxu0  ;;  %v6193_v37 = vpop.f32.mrf.mxu1  ;;  %6664 = vmatpush.bf16.msra.mxu3 %v8596_v20  ;;  %6616 = vmatpush.bf16.msra.mxu2 %v8524_v11  ;;  %v9029_v11 = vld [vmem:[#allocation13 + $0x204] sm:$0xf] }
 0x63f   : > { %v6145_v30 = vadd.f32 %v6144_v17, %v11461_v49 }
 0x641   : > { %v6194_v46 = vadd.f32 %v6193_v37, %v6145_v30  ;;  %6339 = vmatmul.bf16.gmra.mxu0 %v11411_v13  ;;  %6388 = vmatmul.bf16.gmra.mxu1 %v11413_v57 }
 0x643   : > { %v6243_v44 = vadd.f32 %v6242_v7, %v6194_v46 }
 0x645   : > { %v6244_v54 = vpop.f32.mrf.mxu2  ;;  %v6293_v34 = vpop.f32.mrf.mxu3  ;;  %v11501_v31 = vadd.f32 %v6291_v9, %v6243_v44 }
 0x646   : > { %v6146_v29 = vpop.f32.mrf.mxu0  ;;  %v6195_v47 = vpop.f32.mrf.mxu1 }
 0x647   : > { %v6147_v51 = vadd.f32 %v6146_v29, %v11461_v49  ;;  %v8457_v29 = vld [vmem:[#allocation13 + $0x198] sm:$0xf0] }
 0x649   : > { %v6196_v7 = vadd.f32 %v6195_v47, %v6147_v51  ;;  %v8460_v47 = vor.u32 %v9015_v28, %v8457_v29  ;;  %v9013_v29 = vld [vmem:[#allocation13 + $0x184] sm:$0xf] }
 0x64a   : > { %6442 = vmatmul.bf16.gmra.mxu2 %v12073_v5  ;;  %6491 = vmatmul.bf16.gmra.mxu3 %v12074_v32  ;;  %v8999_v5 = vld [vmem:[#allocation13 + $0x114] sm:$0xf]  ;;  %v8393_v32 = vld [vmem:[#allocation13 + $0x118] sm:$0xf0] }
 0x64b   : > { %v6245_v17 = vadd.f32 %v6244_v54, %v6196_v7  ;;  %v8585_v54 = vld [vmem:[#allocation13 + $0x298] sm:$0xf0]  ;;  %v8396_v20 = vor.u32 %v8999_v5, %v8393_v32  ;;  %6567 = vmatpush.bf16.msra.mxu1 %v8460_v47  ;;  %v8513_v32 = vld [vmem:[#allocation13 + $0x208] sm:$0xf0] }
 0x64c   : > { %v8588_v39 = vor.u32 %v9047_v4, %v8585_v54  ;;  %v8516_v4 = vor.u32 %v9029_v11, %v8513_v32  ;;  %v9045_v54 = vld [vmem:[#allocation13 + $0x284] sm:$0xf] }
 0x64d   : > { %v6247_v30 = vpop.f32.mrf.mxu2  ;;  %v6296_v37 = vpop.f32.mrf.mxu3  ;;  %v11506_v46 = vadd.f32 %v6293_v34, %v6245_v17  ;;  %6518 = vmatpush.bf16.msra.mxu0 %v8396_v20 }
 0x64e   : > { %v6149_v9 = vpop.f32.mrf.mxu0  ;;  %v6198_v50 = vpop.f32.mrf.mxu1  ;;  %6665 = vmatpush.bf16.msra.mxu3 %v8588_v39  ;;  %6617 = vmatpush.bf16.msra.mxu2 %v8516_v4 }
 0x64f   : > { %v6150_v44 = vadd.f32 %v6149_v9, %v11461_v49 }
 0x651   : > { %v6199_v12 = vadd.f32 %v6198_v50, %v6150_v44  ;;  %6344 = vmatmul.bf16.gmra.mxu0 %v11423_v15  ;;  %6393 = vmatmul.bf16.gmra.mxu1 %v11425_v8 }
 0x653   : > { %v6248_v53 = vadd.f32 %v6247_v30, %v6199_v12 }
 0x655   : > { %v6249_v0 = vpop.f32.mrf.mxu2  ;;  %v6298_v34 = vpop.f32.mrf.mxu3  ;;  %v11511_v41 = vadd.f32 %v6296_v37, %v6248_v53 }
 0x656   : > { %v6151_v51 = vpop.f32.mrf.mxu0  ;;  %v6200_v17 = vpop.f32.mrf.mxu1 }
 0x657   : > { %v6152_v7 = vadd.f32 %v6151_v51, %v11461_v49  ;;  %v8449_v51 = vld [vmem:[#allocation13 + $0x188] sm:$0xf0] }
 0x659   : > { %v6201_v30 = vadd.f32 %v6200_v17, %v6152_v7  ;;  %v8452_v17 = vor.u32 %v9013_v29, %v8449_v51 }
 0x65a   : > { %6447 = vmatmul.bf16.gmra.mxu2 %v12077_v48  ;;  %6496 = vmatmul.bf16.gmra.mxu3 %v12078_v21  ;;  %v8997_v48 = vld [vmem:[#allocation13 + $0x104] sm:$0xf]  ;;  %v8385_v21 = vld [vmem:[#allocation13 + $0x108] sm:$0xf0] }
 0x65b   : > { %v6250_v9 = vadd.f32 %v6249_v0, %v6201_v30  ;;  %v8577_v0 = vld [vmem:[#allocation13 + $0x288] sm:$0xf0]  ;;  %v8388_v39 = vor.u32 %v8997_v48, %v8385_v21  ;;  %6568 = vmatpush.bf16.msra.mxu1 %v8452_v17 }
 0x65c   : > { %v8580_v28 = vor.u32 %v9045_v54, %v8577_v0 }
 0x65d   : > { %v6252_v44 = vpop.f32.mrf.mxu2  ;;  %v6301_v50 = vpop.f32.mrf.mxu3  ;;  %v11516_v12 = vadd.f32 %v6298_v34, %v6250_v9  ;;  %6519 = vmatpush.bf16.msra.mxu0 %v8388_v39 }
 0x65e   : > { %v6154_v37 = vpop.f32.mrf.mxu0  ;;  %v6203_v3 = vpop.f32.mrf.mxu1  ;;  %6666 = vmatpush.bf16.msra.mxu3 %v8580_v28 }
 0x65f   : > { %v6155_v53 = vadd.f32 %v6154_v37, %v11461_v49 }
 0x661   : > { %v6204_v24 = vadd.f32 %v6203_v3, %v6155_v53  ;;  %6349 = vmatmul.bf16.gmra.mxu0 %v11435_v35  ;;  %6398 = vmatmul.bf16.gmra.mxu1 %v11437_v52 }
 0x663   : > { %v6253_v5 = vadd.f32 %v6252_v44, %v6204_v24 }
 0x665   : > { %v6254_v20 = vpop.f32.mrf.mxu2  ;;  %v6303_v34 = vpop.f32.mrf.mxu3  ;;  %v11521_v47 = vadd.f32 %v6301_v50, %v6253_v5 }
 0x666   : > { %v6156_v7 = vpop.f32.mrf.mxu0  ;;  %v6205_v9 = vpop.f32.mrf.mxu1 }
 0x667   : > { %v6157_v30 = vadd.f32 %v6156_v7, %v11461_v49 }
 0x669   : > { %v6206_v44 = vadd.f32 %v6205_v9, %v6157_v30 }
 0x66a   : > { %6452 = vmatmul.bf16.gmra.mxu2 %v12081_v18  ;;  %6501 = vmatmul.bf16.gmra.mxu3 %v12082_v16 }
 0x66b   : > { %v6255_v37 = vadd.f32 %v6254_v20, %v6206_v44 }
 0x66d   : > { %v6257_v53 = vpop.f32.mrf.mxu2  ;;  %v6306_v3 = vpop.f32.mrf.mxu3  ;;  %v11526_v24 = vadd.f32 %v6303_v34, %v6255_v37 }
 0x66e   : > { %v6159_v50 = vpop.f32.mrf.mxu0  ;;  %v6208_v11 = vpop.f32.mrf.mxu1 }
 0x66f   : > { %v6160_v5 = vadd.f32 %v6159_v50, %v11461_v49 }
 0x671   : > { %v6209_v32 = vadd.f32 %v6208_v11, %v6160_v5  ;;  %6354 = vmatmul.bf16.gmra.mxu0 %v11447_v19  ;;  %6403 = vmatmul.bf16.gmra.mxu1 %v11449_v25  ;;  %v11547_v5 = vperm.slane %v11456_v33, 1  ;;  %v9179_v33 = vld [vmem:[%s9709_s1] sm:$0xff] }
 0x673   : > { %v6258_v48 = vadd.f32 %v6257_v53, %v6209_v32 }
 0x675   : > { %v6259_v4 = vpop.f32.mrf.mxu2  ;;  %v6308_v21 = vpop.f32.mrf.mxu3  ;;  %v11531_v18 = vadd.f32 %v6306_v3, %v6258_v48 }
 0x676   : > { %v6161_v16 = vpop.f32.mrf.mxu0  ;;  %v6210_v0 = vpop.f32.mrf.mxu1 }
 0x677   : > { %v6162_v54 = vadd.f32 %v6161_v16, %v11461_v49 }
 0x679   : > { %v6211_v20 = vadd.f32 %v6210_v0, %v6162_v54 }
 0x67a   : > { %6457 = vmatmul.bf16.gmra.mxu2 %v12085_v63  ;;  %6506 = vmatmul.bf16.gmra.mxu3 %v12086_v10 }
 0x67b   : > { %v6260_v34 = vadd.f32 %v6259_v4, %v6211_v20 }
 0x67d   : > { %v6262_v39 = vpop.f32.mrf.mxu2  ;;  %v6311_v28 = vpop.f32.mrf.mxu3  ;;  %v11536_v29 = vadd.f32 %v6308_v21, %v6260_v34 }
 0x67e   : > { %v6164_v51 = vpop.f32.mrf.mxu0  ;;  %v6213_v17 = vpop.f32.mrf.mxu1 }
 0x67f   : > { %v6165_v7 = vadd.f32 %v6164_v51, %v11461_v49 }
 0x681   : > { %v6214_v30 = vadd.f32 %v6213_v17, %v6165_v7  ;;  %6359 = vmatmul.bf16.gmra.mxu0 %v11467_v38  ;;  %6408 = vmatmul.bf16.gmra.mxu1 %v11469_v62 }
 0x683   : > { %v6263_v9 = vadd.f32 %v6262_v39, %v6214_v30  ;;  %v9180_v30 = vld [vmem:[%s9709_s1 + $0x10] sm:$0xff] }
 0x685   : > { %v6264_v44 = vpop.f32.mrf.mxu2  ;;  %v6313_v37 = vpop.f32.mrf.mxu3  ;;  %v11541_v63 = vadd.f32 %v6311_v28, %v6263_v9 }
 0x686   : > { %v6166_v10 = vpop.f32.mrf.mxu0  ;;  %v6215_v3 = vpop.f32.mrf.mxu1 }
 0x687   : > { %v6167_v53 = vadd.f32 %v6166_v10, %v11461_v49 }
 0x689   : > { %v6216_v50 = vadd.f32 %v6215_v3, %v6167_v53 }
 0x68a   : > { %6618 = vmatmul.bf16.vlgmr.msra.gmra.mxu2 %v11375_v1  ;;  %6667 = vmatmul.bf16.vlgmr.msra.gmra.mxu3 %v11377_v22 }
 0x68b   : > { %v6265_v11 = vadd.f32 %v6264_v44, %v6216_v50 }
 0x68d   : > { %v6423_v32 = vpop.f32.mrf.mxu2  ;;  %v6472_v48 = vpop.f32.mrf.mxu3  ;;  %v11549_v4 = vadd.f32 %v6313_v37, %v6265_v11 }
 0x68e   : > { %v6424_v21 = vadd.f32 %v6423_v32, %v11547_v5  ;;  %v6325_v16 = vpop.f32.mrf.mxu0  ;;  %v6374_v54 = vpop.f32.mrf.mxu1 }
 0x68f   : > { %v6326_v49 = vadd.f32 %v6325_v16, %v11471_v6 }
 0x690   : > { %v11553_v0 = vadd.f32 %v6472_v48, %v6424_v21 }
 0x691   : > { %v6375_v1 = vadd.f32 %v6374_v54, %v6326_v49  ;;  %6520 = vmatmul.bf16.vlgmr.msra.gmra.mxu0 %v12055_v42  ;;  %6569 = vmatmul.bf16.vlgmr.msra.gmra.mxu1 %v12056_v56 }
 0x693   : > { %v6708_v22 = vmax.f32 %v6375_v1, 0.0 }
 0x695   : > { %v6740_v20 = vadd.f32 %v9179_v33, %v6708_v22  ;;  %v6425_v34 = vpop.f32.mrf.mxu2  ;;  %v6474_v39 = vpop.f32.mrf.mxu3 }
 0x696   : > { %v6426_v28 = vadd.f32 %v6425_v34, %v11547_v5  ;;  %v6327_v51 = vpop.f32.mrf.mxu0  ;;  %v6376_v42 = vpop.f32.mrf.mxu1 }
 0x697   : > { %6772 = vst [vmem:[%s11561_s14] sm:$0xff] %v6740_v20  ;;  %v6328_v6 = vadd.f32 %v6327_v51, %v11476_v23 }
 0x698   : > { %v11565_v7 = vadd.f32 %v6474_v39, %v6426_v28 }
 0x699   : > { %v6377_v56 = vadd.f32 %v6376_v42, %v6328_v6 }
 0x69a   : > { %6623 = vmatmul.bf16.gmra.mxu2 %v11387_v45  ;;  %6672 = vmatmul.bf16.gmra.mxu3 %v11389_v61  ;;  %v9181_v61 = vld [vmem:[%s9709_s1 + $0x20] sm:$0xff] }
 0x69b   : > { %v6710_v17 = vmax.f32 %v6377_v56, 0.0 }
 0x69d   : > { %v6742_v9 = vadd.f32 %v9180_v30, %v6710_v17  ;;  %v6428_v44 = vpop.f32.mrf.mxu2  ;;  %v6477_v37 = vpop.f32.mrf.mxu3 }
 0x69e   : > { %v6429_v10 = vadd.f32 %v6428_v44, %v11547_v5  ;;  %v6330_v53 = vpop.f32.mrf.mxu0  ;;  %v6379_v3 = vpop.f32.mrf.mxu1 }
 0x69f   : > { %6774 = vst [vmem:[%s11561_s14 + $0x10] sm:$0xff] %v6742_v9  ;;  %v6331_v23 = vadd.f32 %v6330_v53, %v11481_v36 }
 0x6a0   : > { %v11573_v50 = vadd.f32 %v6477_v37, %v6429_v10 }
 0x6a1   : > { %v6380_v11 = vadd.f32 %v6379_v3, %v6331_v23  ;;  %6525 = vmatmul.bf16.gmra.mxu0 %v12059_v43  ;;  %6574 = vmatmul.bf16.gmra.mxu1 %v12060_v55  ;;  %v9182_v55 = vld [vmem:[%s9709_s1 + $0x30] sm:$0xff] }
 0x6a3   : > { %v6712_v45 = vmax.f32 %v6380_v11, 0.0 }
 0x6a5   : > { %v6744_v32 = vadd.f32 %v9181_v61, %v6712_v45  ;;  %v6430_v48 = vpop.f32.mrf.mxu2  ;;  %v6479_v21 = vpop.f32.mrf.mxu3 }
 0x6a6   : > { %v6431_v16 = vadd.f32 %v6430_v48, %v11547_v5  ;;  %v6332_v49 = vpop.f32.mrf.mxu0  ;;  %v6381_v54 = vpop.f32.mrf.mxu1 }
 0x6a7   : > { %6776 = vst [vmem:[%s11561_s14 + $0x20] sm:$0xff] %v6744_v32  ;;  %v6333_v36 = vadd.f32 %v6332_v49, %v11486_v40 }
 0x6a8   : > { %v11581_v1 = vadd.f32 %v6479_v21, %v6431_v16  ;;  %v9185_v16 = vld [vmem:[%s9709_s1 + $0x60] sm:$0xff] }
 0x6a9   : > { %v6382_v22 = vadd.f32 %v6381_v54, %v6333_v36 }
 0x6aa   : > { %6628 = vmatmul.bf16.gmra.mxu2 %v11399_v58  ;;  %6677 = vmatmul.bf16.gmra.mxu3 %v11401_v59  ;;  %v9183_v59 = vld [vmem:[%s9709_s1 + $0x40] sm:$0xff] }
 0x6ab   : > { %v6714_v43 = vmax.f32 %v6382_v22, 0.0 }
 0x6ad   : > { %v6746_v33 = vadd.f32 %v9182_v55, %v6714_v43  ;;  %v6433_v20 = vpop.f32.mrf.mxu2  ;;  %v6482_v34 = vpop.f32.mrf.mxu3 }
 0x6ae   : > { %v6434_v39 = vadd.f32 %v6433_v20, %v11547_v5  ;;  %v6335_v28 = vpop.f32.mrf.mxu0  ;;  %v6384_v51 = vpop.f32.mrf.mxu1 }
 0x6af   : > { %6778 = vst [vmem:[%s11561_s14 + $0x30] sm:$0xff] %v6746_v33  ;;  %v6336_v40 = vadd.f32 %v6335_v28, %v11491_v26 }
 0x6b0   : > { %v11589_v6 = vadd.f32 %v6482_v34, %v6434_v39  ;;  %v9186_v34 = vld [vmem:[%s9709_s1 + $0x70] sm:$0xff] }
 0x6b1   : > { %v6385_v42 = vadd.f32 %v6384_v51, %v6336_v40  ;;  %6530 = vmatmul.bf16.gmra.mxu0 %v12063_v27  ;;  %6579 = vmatmul.bf16.gmra.mxu1 %v12064_v60  ;;  %v9184_v60 = vld [vmem:[%s9709_s1 + $0x50] sm:$0xff] }
 0x6b3   : > { %v6716_v58 = vmax.f32 %v6385_v42, 0.0 }
 0x6b5   : > { %v6748_v56 = vadd.f32 %v9183_v59, %v6716_v58  ;;  %v6435_v17 = vpop.f32.mrf.mxu2  ;;  %v6484_v30 = vpop.f32.mrf.mxu3 }
 0x6b6   : > { %v6436_v9 = vadd.f32 %v6435_v17, %v11547_v5  ;;  %v6337_v44 = vpop.f32.mrf.mxu0  ;;  %v6386_v37 = vpop.f32.mrf.mxu1 }
 0x6b7   : > { %6780 = vst [vmem:[%s11561_s14 + $0x40] sm:$0xff] %v6748_v56  ;;  %v6338_v26 = vadd.f32 %v6337_v44, %v11496_v14 }
 0x6b8   : > { %v11597_v10 = vadd.f32 %v6484_v30, %v6436_v9  ;;  %v9187_v30 = vld [vmem:[%s9709_s1 + $0x80] sm:$0xff] }
 0x6b9   : > { %v6387_v53 = vadd.f32 %v6386_v37, %v6338_v26 }
 0x6ba   : > { %6633 = vmatmul.bf16.gmra.mxu2 %v11411_v13  ;;  %6682 = vmatmul.bf16.gmra.mxu3 %v11413_v57  ;;  %v12088_v13 = vld [vmem:[#allocation36_spill] sm:$0xff] }
 0x6bb   : > { %v6718_v27 = vmax.f32 %v6387_v53, 0.0 }
 0x6bd   : > { %v6750_v23 = vadd.f32 %v9184_v60, %v6718_v27  ;;  %v6438_v3 = vpop.f32.mrf.mxu2  ;;  %v6487_v11 = vpop.f32.mrf.mxu3 }
 0x6be   : > { %v6439_v45 = vadd.f32 %v6438_v3, %v11547_v5  ;;  %v6340_v61 = vpop.f32.mrf.mxu0  ;;  %v6389_v32 = vpop.f32.mrf.mxu1 }
 0x6bf   : > { %6782 = vst [vmem:[%s11561_s14 + $0x50] sm:$0xff] %v6750_v23  ;;  %v6341_v14 = vadd.f32 %v6340_v61, %v11501_v31 }
 0x6c0   : > { %v11605_v48 = vadd.f32 %v6487_v11, %v6439_v45  ;;  %v9188_v11 = vld [vmem:[%s9709_s1 + $0x90] sm:$0xff] }
 0x6c1   : > { %v6390_v21 = vadd.f32 %v6389_v32, %v6341_v14  ;;  %6535 = vmatmul.bf16.gmra.mxu0 %v12067_v2  ;;  %6584 = vmatmul.bf16.gmra.mxu1 %v12088_v13 }
 0x6c3   : > { %v6720_v57 = vmax.f32 %v6390_v21, 0.0 }
 0x6c5   : > { %v6752_v49 = vadd.f32 %v9185_v16, %v6720_v57  ;;  %v6440_v36 = vpop.f32.mrf.mxu2  ;;  %v6489_v54 = vpop.f32.mrf.mxu3 }
 0x6c6   : > { %v6441_v22 = vadd.f32 %v6440_v36, %v11547_v5  ;;  %v6342_v43 = vpop.f32.mrf.mxu0  ;;  %v6391_v55 = vpop.f32.mrf.mxu1  ;;  %v9189_v36 = vld [vmem:[%s9709_s1 + $0xa0] sm:$0xff] }
 0x6c7   : > { %6784 = vst [vmem:[%s11561_s14 + $0x60] sm:$0xff] %v6752_v49  ;;  %v6343_v31 = vadd.f32 %v6342_v43, %v11506_v46 }
 0x6c8   : > { %v11613_v33 = vadd.f32 %v6489_v54, %v6441_v22 }
 0x6c9   : > { %v6392_v20 = vadd.f32 %v6391_v55, %v6343_v31 }
 0x6ca   : > { %6638 = vmatmul.bf16.gmra.mxu2 %v11423_v15  ;;  %6687 = vmatmul.bf16.gmra.mxu3 %v11425_v8  ;;  %v12089_v15 = vld [vmem:[#allocation37_spill] sm:$0xff]  ;;  %v12090_v8 = vld [vmem:[#allocation68_spill] sm:$0xff] }
 0x6cb   : > { %v6722_v2 = vmax.f32 %v6392_v20, 0.0 }
 0x6cd   : > { %v6754_v39 = vadd.f32 %v9186_v34, %v6722_v2  ;;  %v6443_v28 = vpop.f32.mrf.mxu2  ;;  %v6492_v40 = vpop.f32.mrf.mxu3 }
 0x6ce   : > { %v6444_v51 = vadd.f32 %v6443_v28, %v11547_v5  ;;  %v6345_v42 = vpop.f32.mrf.mxu0  ;;  %v6394_v58 = vpop.f32.mrf.mxu1  ;;  %v9190_v28 = vld [vmem:[%s9709_s1 + $0xb0] sm:$0xff] }
 0x6cf   : > { %6786 = vst [vmem:[%s11561_s14 + $0x70] sm:$0xff] %v6754_v39  ;;  %v6346_v46 = vadd.f32 %v6345_v42, %v11511_v41 }
 0x6d0   : > { %v11621_v59 = vadd.f32 %v6492_v40, %v6444_v51 }
 0x6d1   : > { %v6395_v56 = vadd.f32 %v6394_v58, %v6346_v46  ;;  %6540 = vmatmul.bf16.gmra.mxu0 %v12089_v15  ;;  %6589 = vmatmul.bf16.gmra.mxu1 %v12090_v8 }
 0x6d3   : > { %v6724_v17 = vmax.f32 %v6395_v56, 0.0 }
 0x6d5   : > { %v6756_v9 = vadd.f32 %v9187_v30, %v6724_v17  ;;  %v6445_v44 = vpop.f32.mrf.mxu2  ;;  %v6494_v26 = vpop.f32.mrf.mxu3  ;;  %v9191_v30 = vld [vmem:[%s9709_s1 + $0xc0] sm:$0xff] }
 0x6d6   : > { %v6446_v37 = vadd.f32 %v6445_v44, %v11547_v5  ;;  %v6347_v53 = vpop.f32.mrf.mxu0  ;;  %v6396_v27 = vpop.f32.mrf.mxu1 }
 0x6d7   : > { %6788 = vst [vmem:[%s11561_s14 + $0x80] sm:$0xff] %v6756_v9  ;;  %v6348_v41 = vadd.f32 %v6347_v53, %v11516_v12 }
 0x6d8   : > { %v11629_v60 = vadd.f32 %v6494_v26, %v6446_v37 }
 0x6d9   : > { %v6397_v23 = vadd.f32 %v6396_v27, %v6348_v41 }
 0x6da   : > { %6643 = vmatmul.bf16.gmra.mxu2 %v11435_v35  ;;  %6692 = vmatmul.bf16.gmra.mxu3 %v11437_v52  ;;  %v12091_v35 = vld [vmem:[#allocation40_spill] sm:$0xff]  ;;  %v12092_v52 = vld [vmem:[#allocation41_spill] sm:$0xff] }
 0x6db   : > { %v6726_v3 = vmax.f32 %v6397_v23, 0.0 }
 0x6dd   : > { %v6758_v45 = vadd.f32 %v9188_v11, %v6726_v3  ;;  %v6448_v61 = vpop.f32.mrf.mxu2  ;;  %v6497_v14 = vpop.f32.mrf.mxu3  ;;  %v9192_v11 = vld [vmem:[%s9709_s1 + $0xd0] sm:$0xff] }
 0x6de   : > { %v6449_v32 = vadd.f32 %v6448_v61, %v11547_v5  ;;  %v6350_v21 = vpop.f32.mrf.mxu0  ;;  %v6399_v13 = vpop.f32.mrf.mxu1 }
 0x6df   : > { %6790 = vst [vmem:[%s11561_s14 + $0x90] sm:$0xff] %v6758_v45  ;;  %v6351_v12 = vadd.f32 %v6350_v21, %v11521_v47 }
 0x6e0   : > { %v11637_v57 = vadd.f32 %v6497_v14, %v6449_v32 }
 0x6e1   : > { %v6400_v16 = vadd.f32 %v6399_v13, %v6351_v12  ;;  %6545 = vmatmul.bf16.gmra.mxu0 %v12091_v35  ;;  %6594 = vmatmul.bf16.gmra.mxu1 %v12092_v52  ;;  %v9193_v52 = vld [vmem:[%s9709_s1 + $0xe0] sm:$0xff] }
 0x6e3   : > { %v6728_v49 = vmax.f32 %v6400_v16, 0.0 }
 0x6e5   : > { %v6760_v54 = vadd.f32 %v9189_v36, %v6728_v49  ;;  %v6450_v22 = vpop.f32.mrf.mxu2  ;;  %v6499_v43 = vpop.f32.mrf.mxu3 }
 0x6e6   : > { %v6451_v31 = vadd.f32 %v6450_v22, %v11547_v5  ;;  %v6352_v55 = vpop.f32.mrf.mxu0  ;;  %v6401_v20 = vpop.f32.mrf.mxu1 }
 0x6e7   : > { %6792 = vst [vmem:[%s11561_s14 + $0xa0] sm:$0xff] %v6760_v54  ;;  %v6353_v47 = vadd.f32 %v6352_v55, %v11526_v24 }
 0x6e8   : > { %v11645_v2 = vadd.f32 %v6499_v43, %v6451_v31 }
 0x6e9   : > { %v6402_v34 = vadd.f32 %v6401_v20, %v6353_v47 }
 0x6ea   : > { %6648 = vmatmul.bf16.gmra.mxu2 %v11447_v19  ;;  %6697 = vmatmul.bf16.gmra.mxu3 %v11449_v25  ;;  %v12093_v19 = vld [vmem:[#allocation44_spill] sm:$0xff]  ;;  %v12094_v25 = vld [vmem:[#allocation45_spill] sm:$0xff] }
 0x6eb   : > { %v6730_v39 = vmax.f32 %v6402_v34, 0.0  ;;  %v9194_v34 = vld [vmem:[%s9709_s1 + $0xf0] sm:$0xff] }
 0x6ed   : > { %v6762_v40 = vadd.f32 %v9190_v28, %v6730_v39  ;;  %v6453_v51 = vpop.f32.mrf.mxu2  ;;  %v6502_v42 = vpop.f32.mrf.mxu3 }
 0x6ee   : > { %v6454_v46 = vadd.f32 %v6453_v51, %v11547_v5  ;;  %v6355_v58 = vpop.f32.mrf.mxu0  ;;  %v6404_v56 = vpop.f32.mrf.mxu1 }
 0x6ef   : > { %6794 = vst [vmem:[%s11561_s14 + $0xb0] sm:$0xff] %v6762_v40  ;;  %v6356_v24 = vadd.f32 %v6355_v58, %v11531_v18 }
 0x6f0   : > { %v11653_v15 = vadd.f32 %v6502_v42, %v6454_v46 }
 0x6f1   : > { %v6405_v8 = vadd.f32 %v6404_v56, %v6356_v24  ;;  %6550 = vmatmul.bf16.gmra.mxu0 %v12093_v19  ;;  %6599 = vmatmul.bf16.gmra.mxu1 %v12094_v25 }
 0x6f3   : > { %v6732_v17 = vmax.f32 %v6405_v8, 0.0 }
 0x6f5   : > { %v6764_v9 = vadd.f32 %v9191_v30, %v6732_v17  ;;  %v6455_v44 = vpop.f32.mrf.mxu2  ;;  %v6504_v26 = vpop.f32.mrf.mxu3  ;;  %v9195_v30 = vld [vmem:[%s9709_s1 + $0x8] sm:$0xff] }
 0x6f6   : > { %v6456_v37 = vadd.f32 %v6455_v44, %v11547_v5  ;;  %v6357_v53 = vpop.f32.mrf.mxu0  ;;  %v6406_v41 = vpop.f32.mrf.mxu1 }
 0x6f7   : > { %6796 = vst [vmem:[%s11561_s14 + $0xc0] sm:$0xff] %v6764_v9  ;;  %v6358_v18 = vadd.f32 %v6357_v53, %v11536_v29 }
 0x6f8   : > { %v11661_v27 = vadd.f32 %v6504_v26, %v6456_v37 }
 0x6f9   : > { %v6407_v23 = vadd.f32 %v6406_v41, %v6358_v18 }
 0x6fa   : > { %6653 = vmatmul.bf16.gmra.mxu2 %v11467_v38  ;;  %6702 = vmatmul.bf16.gmra.mxu3 %v11469_v62  ;;  %v12095_v38 = vld [vmem:[#allocation48_spill] sm:$0xff]  ;;  %v12096_v62 = vld [vmem:[#allocation49_spill] sm:$0xff] }
 0x6fb   : > { %v6734_v3 = vmax.f32 %v6407_v23, 0.0 }
 0x6fd   : > { %v6766_v45 = vadd.f32 %v9192_v11, %v6734_v3  ;;  %v6458_v61 = vpop.f32.mrf.mxu2  ;;  %v6507_v14 = vpop.f32.mrf.mxu3  ;;  %v9196_v11 = vld [vmem:[%s9709_s1 + $0x18] sm:$0xff] }
 0x6fe   : > { %v6459_v32 = vadd.f32 %v6458_v61, %v11547_v5  ;;  %v6360_v21 = vpop.f32.mrf.mxu0  ;;  %v6409_v12 = vpop.f32.mrf.mxu1 }
 0x6ff   : > { %6798 = vst [vmem:[%s11561_s14 + $0xd0] sm:$0xff] %v6766_v45  ;;  %v6361_v29 = vadd.f32 %v6360_v21, %v11541_v63 }
 0x700   : > { %v11669_v13 = vadd.f32 %v6507_v14, %v6459_v32 }
 0x701   : > { %v6410_v16 = vadd.f32 %v6409_v12, %v6361_v29  ;;  %6555 = vmatmul.bf16.gmra.mxu0 %v12095_v38  ;;  %6604 = vmatmul.bf16.gmra.mxu1 %v12096_v62  ;;  %v9197_v62 = vld [vmem:[%s9709_s1 + $0x28] sm:$0xff] }
 0x703   : > { %v6736_v35 = vmax.f32 %v6410_v16, 0.0 }
 0x705   : > { %v6768_v49 = vadd.f32 %v9193_v52, %v6736_v35  ;;  %v6460_v36 = vpop.f32.mrf.mxu2  ;;  %v6509_v54 = vpop.f32.mrf.mxu3 }
 0x706   : > { %v6461_v22 = vadd.f32 %v6460_v36, %v11547_v5  ;;  %v6362_v43 = vpop.f32.mrf.mxu0  ;;  %v6411_v31 = vpop.f32.mrf.mxu1 }
 0x707   : > { %6800 = vst [vmem:[%s11561_s14 + $0xe0] sm:$0xff] %v6768_v49  ;;  %v6363_v63 = vadd.f32 %v6362_v43, %v11549_v4 }
 0x708   : > { %v11677_v55 = vadd.f32 %v6509_v54, %v6461_v22 }
 0x709   : > { %v6412_v47 = vadd.f32 %v6411_v31, %v6363_v63 }
 0x70b   : > { %v6738_v20 = vmax.f32 %v6412_v47, 0.0  ;;  %v9198_v47 = vld [vmem:[%s9709_s1 + $0x38] sm:$0xff] }
 0x70d   : > { %v6770_v39 = vadd.f32 %v9194_v34, %v6738_v20  ;;  %v6619_v28 = vpop.f32.mrf.mxu2  ;;  %v6668_v40 = vpop.f32.mrf.mxu3 }
 0x70e   : > { %v6521_v51 = vpop.f32.mrf.mxu0  ;;  %v6570_v5 = vpop.f32.mrf.mxu1 }
 0x70f   : > { %6802 = vst [vmem:[%s11561_s14 + $0xf0] sm:$0xff] %v6770_v39  ;;  %v6522_v42 = vadd.f32 %v6521_v51, %v11553_v0 }
 0x711   : > { %v6571_v46 = vadd.f32 %v6570_v5, %v6522_v42 }
 0x713   : > { %v6620_v58 = vadd.f32 %v6619_v28, %v6571_v46 }
 0x715   : > { %v6669_v24 = vadd.f32 %v6668_v40, %v6620_v58  ;;  %v6621_v4 = vpop.f32.mrf.mxu2  ;;  %v6670_v56 = vpop.f32.mrf.mxu3  ;;  %v9199_v58 = vld [vmem:[%s9709_s1 + $0x48] sm:$0xff] }
 0x716   : > { %v6523_v8 = vpop.f32.mrf.mxu0  ;;  %v6572_v17 = vpop.f32.mrf.mxu1 }
 0x717   : > { %v6709_v19 = vmax.f32 %v6669_v24, 0.0  ;;  %v6524_v25 = vadd.f32 %v6523_v8, %v11565_v7 }
 0x719   : > { %v6741_v9 = vadd.f32 %v9195_v30, %v6709_v19  ;;  %v6573_v44 = vadd.f32 %v6572_v17, %v6524_v25 }
 0x71b   : > { %6773 = vst [vmem:[%s11561_s14 + $0x8] sm:$0xff] %v6741_v9  ;;  %v6622_v26 = vadd.f32 %v6621_v4, %v6573_v44  ;;  %v9200_v44 = vld [vmem:[%s9709_s1 + $0x58] sm:$0xff] }
 0x71d   : > { %v6671_v37 = vadd.f32 %v6670_v56, %v6622_v26  ;;  %v6624_v0 = vpop.f32.mrf.mxu2  ;;  %v6673_v53 = vpop.f32.mrf.mxu3 }
 0x71e   : > { %v6526_v18 = vpop.f32.mrf.mxu0  ;;  %v6575_v3 = vpop.f32.mrf.mxu1 }
 0x71f   : > { %v6711_v41 = vmax.f32 %v6671_v37, 0.0  ;;  %v6527_v23 = vadd.f32 %v6526_v18, %v11573_v50 }
 0x721   : > { %v6743_v45 = vadd.f32 %v9196_v11, %v6711_v41  ;;  %v6576_v7 = vadd.f32 %v6575_v3, %v6527_v23 }
 0x723   : > { %6775 = vst [vmem:[%s11561_s14 + $0x18] sm:$0xff] %v6743_v45  ;;  %v6625_v61 = vadd.f32 %v6624_v0, %v6576_v7  ;;  %v9201_v45 = vld [vmem:[%s9709_s1 + $0x68] sm:$0xff] }
 0x725   : > { %v6674_v14 = vadd.f32 %v6673_v53, %v6625_v61  ;;  %v6626_v32 = vpop.f32.mrf.mxu2  ;;  %v6675_v21 = vpop.f32.mrf.mxu3 }
 0x726   : > { %v6528_v29 = vpop.f32.mrf.mxu0  ;;  %v6577_v38 = vpop.f32.mrf.mxu1 }
 0x727   : > { %v6713_v12 = vmax.f32 %v6674_v14, 0.0  ;;  %v6529_v16 = vadd.f32 %v6528_v29, %v11581_v1 }
 0x729   : > { %v6745_v35 = vadd.f32 %v9197_v62, %v6713_v12  ;;  %v6578_v50 = vadd.f32 %v6577_v38, %v6529_v16  ;;  %v9202_v62 = vld [vmem:[%s9709_s1 + $0x78] sm:$0xff] }
 0x72b   : > { %6777 = vst [vmem:[%s11561_s14 + $0x28] sm:$0xff] %v6745_v35  ;;  %v6627_v52 = vadd.f32 %v6626_v32, %v6578_v50 }
 0x72d   : > { %v6676_v49 = vadd.f32 %v6675_v21, %v6627_v52  ;;  %v6629_v36 = vpop.f32.mrf.mxu2  ;;  %v6678_v54 = vpop.f32.mrf.mxu3 }
 0x72e   : > { %v6531_v22 = vpop.f32.mrf.mxu0  ;;  %v6580_v31 = vpop.f32.mrf.mxu1 }
 0x72f   : > { %v6715_v43 = vmax.f32 %v6676_v49, 0.0  ;;  %v6532_v63 = vadd.f32 %v6531_v22, %v11589_v6 }
 0x731   : > { %v6747_v20 = vadd.f32 %v9198_v47, %v6715_v43  ;;  %v6581_v1 = vadd.f32 %v6580_v31, %v6532_v63  ;;  %v9203_v31 = vld [vmem:[%s9709_s1 + $0x88] sm:$0xff] }
 0x733   : > { %6779 = vst [vmem:[%s11561_s14 + $0x38] sm:$0xff] %v6747_v20  ;;  %v6630_v34 = vadd.f32 %v6629_v36, %v6581_v1 }
 0x735   : > { %v6679_v39 = vadd.f32 %v6678_v54, %v6630_v34  ;;  %v6631_v28 = vpop.f32.mrf.mxu2  ;;  %v6680_v40 = vpop.f32.mrf.mxu3 }
 0x736   : > { %v6533_v51 = vpop.f32.mrf.mxu0  ;;  %v6582_v46 = vpop.f32.mrf.mxu1 }
 0x737   : > { %v6717_v42 = vmax.f32 %v6679_v39, 0.0  ;;  %v6534_v5 = vadd.f32 %v6533_v51, %v11597_v10 }
 0x739   : > { %v6749_v24 = vadd.f32 %v9199_v58, %v6717_v42  ;;  %v6583_v6 = vadd.f32 %v6582_v46, %v6534_v5  ;;  %v9204_v5 = vld [vmem:[%s9709_s1 + $0x98] sm:$0xff] }
 0x73b   : > { %6781 = vst [vmem:[%s11561_s14 + $0x48] sm:$0xff] %v6749_v24  ;;  %v6632_v4 = vadd.f32 %v6631_v28, %v6583_v6 }
 0x73d   : > { %v6681_v56 = vadd.f32 %v6680_v40, %v6632_v4  ;;  %v6634_v8 = vpop.f32.mrf.mxu2  ;;  %v6683_v19 = vpop.f32.mrf.mxu3 }
 0x73e   : > { %v6536_v25 = vpop.f32.mrf.mxu0  ;;  %v6585_v9 = vpop.f32.mrf.mxu1 }
 0x73f   : > { %v6719_v17 = vmax.f32 %v6681_v56, 0.0  ;;  %v6537_v30 = vadd.f32 %v6536_v25, %v11605_v48 }
 0x741   : > { %v6751_v26 = vadd.f32 %v9200_v44, %v6719_v17  ;;  %v6586_v10 = vadd.f32 %v6585_v9, %v6537_v30  ;;  %v9205_v17 = vld [vmem:[%s9709_s1 + $0xa8] sm:$0xff] }
 0x743   : > { %6783 = vst [vmem:[%s11561_s14 + $0x58] sm:$0xff] %v6751_v26  ;;  %v6635_v37 = vadd.f32 %v6634_v8, %v6586_v10 }
 0x745   : > { %v6684_v0 = vadd.f32 %v6683_v19, %v6635_v37  ;;  %v6636_v53 = vpop.f32.mrf.mxu2  ;;  %v6685_v18 = vpop.f32.mrf.mxu3 }
 0x746   : > { %v6538_v41 = vpop.f32.mrf.mxu0  ;;  %v6587_v11 = vpop.f32.mrf.mxu1 }
 0x747   : > { %v6721_v23 = vmax.f32 %v6684_v0, 0.0  ;;  %v6539_v3 = vadd.f32 %v6538_v41, %v11613_v33  ;;  %v9206_v41 = vld [vmem:[%s9709_s1 + $0xb8] sm:$0xff] }
 0x749   : > { %v6753_v7 = vadd.f32 %v9201_v45, %v6721_v23  ;;  %v6588_v48 = vadd.f32 %v6587_v11, %v6539_v3 }
 0x74b   : > { %6785 = vst [vmem:[%s11561_s14 + $0x68] sm:$0xff] %v6753_v7  ;;  %v6637_v61 = vadd.f32 %v6636_v53, %v6588_v48 }
 0x74d   : > { %v6686_v14 = vadd.f32 %v6685_v18, %v6637_v61  ;;  %v6639_v32 = vpop.f32.mrf.mxu2  ;;  %v6688_v21 = vpop.f32.mrf.mxu3 }
 0x74e   : > { %v6541_v29 = vpop.f32.mrf.mxu0  ;;  %v6590_v38 = vpop.f32.mrf.mxu1 }
 0x74f   : > { %v6723_v12 = vmax.f32 %v6686_v14, 0.0  ;;  %v6542_v16 = vadd.f32 %v6541_v29, %v11621_v59 }
 0x751   : > { %v6755_v35 = vadd.f32 %v9202_v62, %v6723_v12  ;;  %v6591_v33 = vadd.f32 %v6590_v38, %v6542_v16 }
 0x753   : > { %6787 = vst [vmem:[%s11561_s14 + $0x78] sm:$0xff] %v6755_v35  ;;  %v6640_v50 = vadd.f32 %v6639_v32, %v6591_v33 }
 0x755   : > { %v6689_v52 = vadd.f32 %v6688_v21, %v6640_v50  ;;  %v6641_v49 = vpop.f32.mrf.mxu2  ;;  %v6690_v36 = vpop.f32.mrf.mxu3  ;;  %v9207_v21 = vld [vmem:[%s9709_s1 + $0xc8] sm:$0xff] }
 0x756   : > { %v6543_v54 = vpop.f32.mrf.mxu0  ;;  %v6592_v63 = vpop.f32.mrf.mxu1 }
 0x757   : > { %v6725_v22 = vmax.f32 %v6689_v52, 0.0  ;;  %v6544_v43 = vadd.f32 %v6543_v54, %v11629_v60  ;;  %v9208_v52 = vld [vmem:[%s9709_s1 + $0xd8] sm:$0xff] }
 0x759   : > { %v6757_v47 = vadd.f32 %v9203_v31, %v6725_v22  ;;  %v6593_v59 = vadd.f32 %v6592_v63, %v6544_v43 }
 0x75b   : > { %6789 = vst [vmem:[%s11561_s14 + $0x88] sm:$0xff] %v6757_v47  ;;  %v6642_v20 = vadd.f32 %v6641_v49, %v6593_v59  ;;  %v9209_v59 = vld [vmem:[%s9709_s1 + $0xe8] sm:$0xff] }
 0x75d   : > { %v6691_v1 = vadd.f32 %v6690_v36, %v6642_v20  ;;  %v6644_v34 = vpop.f32.mrf.mxu2  ;;  %v6693_v39 = vpop.f32.mrf.mxu3 }
 0x75e   : > { %v6546_v28 = vpop.f32.mrf.mxu0  ;;  %v6595_v42 = vpop.f32.mrf.mxu1 }
 0x75f   : > { %v6727_v40 = vmax.f32 %v6691_v1, 0.0  ;;  %v6547_v51 = vadd.f32 %v6546_v28, %v11637_v57 }
 0x761   : > { %v6759_v46 = vadd.f32 %v9204_v5, %v6727_v40  ;;  %v6596_v60 = vadd.f32 %v6595_v42, %v6547_v51  ;;  %v9210_v40 = vld [vmem:[%s9709_s1 + $0xf8] sm:$0xff] }
 0x763   : > { %6791 = vst [vmem:[%s11561_s14 + $0x98] sm:$0xff] %v6759_v46  ;;  %v6645_v58 = vadd.f32 %v6644_v34, %v6596_v60 }
 0x765   : > { %v6694_v24 = vadd.f32 %v6693_v39, %v6645_v58  ;;  %v6646_v6 = vpop.f32.mrf.mxu2  ;;  %v6695_v4 = vpop.f32.mrf.mxu3 }
 0x766   : > { %v6548_v56 = vpop.f32.mrf.mxu0  ;;  %v6597_v25 = vpop.f32.mrf.mxu1 }
 0x767   : > { %v6729_v8 = vmax.f32 %v6694_v24, 0.0  ;;  %v6549_v19 = vadd.f32 %v6548_v56, %v11645_v2 }
 0x769   : > { %v6761_v30 = vadd.f32 %v9205_v17, %v6729_v8  ;;  %v6598_v57 = vadd.f32 %v6597_v25, %v6549_v19 }
 0x76b   : > { %6793 = vst [vmem:[%s11561_s14 + $0xa8] sm:$0xff] %v6761_v30  ;;  %v6647_v9 = vadd.f32 %v6646_v6, %v6598_v57 }
 0x76d   : > { %v6696_v44 = vadd.f32 %v6695_v4, %v6647_v9  ;;  %v6649_v26 = vpop.f32.mrf.mxu2  ;;  %v6698_v10 = vpop.f32.mrf.mxu3 }
 0x76e   : > { %v6551_v37 = vpop.f32.mrf.mxu0  ;;  %v6600_v18 = vpop.f32.mrf.mxu1 }
 0x76f   : > { %v6731_v0 = vmax.f32 %v6696_v44, 0.0  ;;  %v6552_v53 = vadd.f32 %v6551_v37, %v11653_v15 }
 0x771   : > { %v6763_v23 = vadd.f32 %v9206_v41, %v6731_v0  ;;  %v6601_v2 = vadd.f32 %v6600_v18, %v6552_v53 }
 0x773   : > { %6795 = vst [vmem:[%s11561_s14 + $0xb8] sm:$0xff] %v6763_v23  ;;  %v6650_v3 = vadd.f32 %v6649_v26, %v6601_v2 }
 0x775   : > { %v6699_v11 = vadd.f32 %v6698_v10, %v6650_v3  ;;  %v6651_v45 = vpop.f32.mrf.mxu2  ;;  %v6700_v32 = vpop.f32.mrf.mxu3 }
 0x776   : > { %v6553_v7 = vpop.f32.mrf.mxu0  ;;  %v6602_v14 = vpop.f32.mrf.mxu1 }
 0x777   : > { %v6733_v48 = vmax.f32 %v6699_v11, 0.0  ;;  %v6554_v61 = vadd.f32 %v6553_v7, %v11661_v27 }
 0x779   : > { %v6765_v29 = vadd.f32 %v9207_v21, %v6733_v48  ;;  %v6603_v15 = vadd.f32 %v6602_v14, %v6554_v61 }
 0x77b   : > { %6797 = vst [vmem:[%s11561_s14 + $0xc8] sm:$0xff] %v6765_v29  ;;  %v6652_v12 = vadd.f32 %v6651_v45, %v6603_v15 }
 0x77d   : > { %v6701_v16 = vadd.f32 %v6700_v32, %v6652_v12  ;;  %v6654_v50 = vpop.f32.mrf.mxu2  ;;  %v6703_v36 = vpop.f32.mrf.mxu3 }
 0x77e   : > { %v6556_v38 = vpop.f32.mrf.mxu0  ;;  %v6605_v33 = vpop.f32.mrf.mxu1 }
 0x77f   : > { %v6735_v62 = vmax.f32 %v6701_v16, 0.0  ;;  %v6557_v35 = vadd.f32 %v6556_v38, %v11669_v13 }
 0x781   : > { %v6767_v49 = vadd.f32 %v9208_v52, %v6735_v62  ;;  %v6606_v27 = vadd.f32 %v6605_v33, %v6557_v35 }
 0x783   : > { %6799 = vst [vmem:[%s11561_s14 + $0xd8] sm:$0xff] %v6767_v49  ;;  %v6655_v54 = vadd.f32 %v6654_v50, %v6606_v27 }
 0x785   : > { %v6704_v22 = vadd.f32 %v6703_v36, %v6655_v54  ;;  %v6656_v1 = vpop.f32.mrf.mxu2  ;;  %v6705_v39 = vpop.f32.mrf.mxu3 }
 0x786   : > { %v6558_v43 = vpop.f32.mrf.mxu0  ;;  %v6607_v47 = vpop.f32.mrf.mxu1 }
 0x787   : > { %v6737_v63 = vmax.f32 %v6704_v22, 0.0  ;;  %v6559_v31 = vadd.f32 %v6558_v43, %v11677_v55 }
 0x789   : > { %v6769_v13 = vadd.f32 %v9209_v59, %v6737_v63  ;;  %v6608_v20 = vadd.f32 %v6607_v47, %v6559_v31 }
 0x78b   : > { %6801 = vst [vmem:[%s11561_s14 + $0xe8] sm:$0xff] %v6769_v13  ;;  %v6657_v34 = vadd.f32 %v6656_v1, %v6608_v20 }
 0x78d   : > { %v6706_v28 = vadd.f32 %v6705_v39, %v6657_v34 }
 0x78f   : > { %v6739_v55 = vmax.f32 %v6706_v28, 0.0 }
 0x791   : > { %v6771_v51 = vadd.f32 %v9210_v40, %v6739_v55 }
 0x793   : > { %6803 = vst [vmem:[%s11561_s14 + $0xf8] sm:$0xff] %v6771_v51 }
 0x794   : > { %9448 = shalt.err (!%p9445_p9)
}
 0x795   : > { %s9513_s28 = smov 256   ;;  %s9514_s1 = smov 16  }
 0x796   : > { %9089 = dma.vmem_to_hbm [thread:$0]  (%p9672_p4), %s6819_s12, 4096, %s6821_s10, %s6805_s24, %s9513_s28, %s9513_s28, %s9514_s1  }
 0x797 PF: > { %s6835_s14 = sand.u32 1, %s9487_s17   ;;  %p12098_p10 = scmp.ge.s32.totalorder %s9499_s20, 2 }
 0x798   : > { %s6836_s26 = scalar_lea.sflag [#allocation4], %s6835_s14 }
 0x799   : > { %p9115_p13 = pnand %p12098_p10, %p9676_p6 }
 0x79b   : > { %p9116_p11 = pneg %p9115_p13 }
 0x79d   : > { %9482 = dma.done.wait (%p9116_p11), %s6836_s26, 4096  }
 0x79e   : > { %9484 = vsyncadd (%p9116_p11), %s6836_s26, 4294963200  ;;  %p27_p0 = scmp.ge.s32.totalorder %s9646_s13, 4   ;;  %s12099_s17 = smov %s9491_s18 }
 0x79f   : > { %s12100_s18 = smov %s9495_s19  ;;  %s12101_s19 = smov %s9657_s30 }
 0x7a0   : > { %s12102_s20 = smov %s9646_s13  ;;  %29 = sbr.rel (!%p27_p0) target bundleno = 15 (0xf), region = 133 }
 0x7a5   :  { %6842 = vsyncpa [#allocation3], 1 }
 0x7a6   :  { %6844 = vsyncpa [#allocation3 + $0x1], 1 }
 0x7a7   :  { %6845 = vsyncpa [#allocation6], 1 }
 0x7a8   :  { %6846 = vsyncpa [#allocation9], 1 }
 0x7a9   :  { %6847 = vsyncpa [#allocation12], 1 }
 0x7aa   :  { %6848 = vsyncpa [#allocation4], 1 }
 0x7ab   :  { %6850 = vsyncpa [#allocation4 + $0x1], 1 }

</bundles_post_ra>
